<compile_context>
chip_gen: v6e
topology: v6e:2x2x1
jax: 0.10.0
libtpu: 0.0.40
codegen_flags: <defaults>
</compile_context>

<pallas_src>
import math
import functools

import jax
import jax.numpy as jnp
from jax.experimental import pallas as pl
from jax.experimental.pallas import tpu as pltpu

HIDDEN = 768
NUM_HEADS = 12
HEAD_DIM = HIDDEN // NUM_HEADS          # 64
HEADS_PER_BLOCK = 2                     # 2 * 64 = 128 lanes per attention block
INTERMEDIATE = 3072
NUM_LAYERS = 2      # TODO(synk): bert-base-cased has 12 encoder layers; 2 keeps the demo fast.
VOCAB = 512         # synthetic vocab (real bert-base-cased vocab is 28996; weights are synthetic anyway)
MAX_POS = 64
LN_EPS = 1e-12
HEAD_PAD = 128      # lane-dense head output width (cols 0/1 real, 2..127 zero)


def _pick_tile(dim, preferred):
    """Largest tile <= preferred that divides dim (multiple of 8 when possible)."""
    for t in (preferred, 512, 256, 128, 64, 32, 16, 8):
        if t <= dim and dim % t == 0:
            return t
    return dim


# ----------------------------- Pallas kernels ------------------------------

def _dense_kernel(x_ref, w_ref, b_ref, o_ref, *, activation):
    # bf16 x bf16 -> f32 accumulation on the MXU.
    acc = jnp.dot(x_ref[...], w_ref[...], preferred_element_type=jnp.float32)
    acc = acc + b_ref[...]
    if activation == "gelu":
        # tanh-approx GELU (BERT uses erf-GELU; tanh approximation is numerically close)
        c = math.sqrt(2.0 / math.pi)
        acc = 0.5 * acc * (1.0 + jnp.tanh(c * (acc + 0.044715 * acc * acc * acc)))
    o_ref[...] = acc.astype(o_ref.dtype)


def dense(x, w, b, activation=None, tm=256, tn=768):
    """x[M,K] @ w[K,N] + b (optional GELU). (N, M) grid, M inner so weight tiles
    stay resident while rows stream; both axes parallel."""
    M, K = x.shape
    N = w.shape[1]
    tm = _pick_tile(M, tm)
    tn = _pick_tile(N, tn)
    return pl.pallas_call(
        functools.partial(_dense_kernel, activation=activation),
        out_shape=jax.ShapeDtypeStruct((M, N), jnp.bfloat16),
        grid=(N // tn, M // tm),
        in_specs=[pl.BlockSpec((tm, K), lambda j, i: (i, 0)),
                  pl.BlockSpec((K, tn), lambda j, i: (0, j)),   # invariant along M axis
                  pl.BlockSpec((1, tn), lambda j, i: (0, j))],
        out_specs=pl.BlockSpec((tm, tn), lambda j, i: (i, j)),
        compiler_params=pltpu.CompilerParams(
            dimension_semantics=("parallel", "parallel")),
        # TODO(synk): on v7x consider pipeline_mode=pl.Buffered(3) on the weight spec
        # once per-step compute shrinks enough to expose weight DMA.
    )(x.astype(jnp.bfloat16), w.astype(jnp.bfloat16), b.reshape(1, N))


def _res_ln_epilogue(acc, b, r, g, beta):
    """bias + residual + layernorm, all in f32."""
    y = acc + b + r.astype(jnp.float32)
    mu = jnp.mean(y, axis=-1, keepdims=True)
    var = jnp.mean((y - mu) ** 2, axis=-1, keepdims=True)
    yn = (y - mu) * jax.lax.rsqrt(var + LN_EPS)
    return yn * g + beta


def _dense_res_ln_single_kernel(x_ref, w_ref, b_ref, r_ref, g_ref, beta_ref, o_ref):
    """K fits in one block: no scratch accumulator, compute and store once."""
    acc = jnp.dot(x_ref[...], w_ref[...], preferred_element_type=jnp.float32)
    y = _res_ln_epilogue(acc, b_ref[...], r_ref[...], g_ref[...], beta_ref[...])
    o_ref[...] = y.astype(o_ref.dtype)


def _dense_res_ln_reduce_kernel(x_ref, w_ref, b_ref, r_ref, g_ref, beta_ref,
                                o_ref, acc_ref):
    """K-reduction grid (axis 1, 'arbitrary'); f32 scratch; epilogue on last step."""
    @pl.when(pl.program_id(1) == 0)
    def _():
        acc_ref[...] = jnp.zeros_like(acc_ref)

    acc_ref[...] += jnp.dot(x_ref[...], w_ref[...], preferred_element_type=jnp.float32)

    @pl.when(pl.program_id(1) == pl.num_programs(1) - 1)
    def _():
        y = _res_ln_epilogue(acc_ref[...], b_ref[...], r_ref[...],
                             g_ref[...], beta_ref[...])
        o_ref[...] = y.astype(o_ref.dtype)


def _dense_res_ln_heads_kernel(x_ref, w_ref, b_ref, r_ref, g_ref, beta_ref,
                               hw_ref, hb_ref, o_ref, acc_ref):
    """Same as the reduce kernel, but the epilogue also applies the fused
    metaphor/novelty projection heads and writes only the (tm, 128) head block."""
    @pl.when(pl.program_id(1) == 0)
    def _():
        acc_ref[...] = jnp.zeros_like(acc_ref)

    acc_ref[...] += jnp.dot(x_ref[...], w_ref[...], preferred_element_type=jnp.float32)

    @pl.when(pl.program_id(1) == pl.num_programs(1) - 1)
    def _():
        y = _res_ln_epilogue(acc_ref[...], b_ref[...], r_ref[...],
                             g_ref[...], beta_ref[...])
        logits = jnp.dot(y.astype(jnp.bfloat16), hw_ref[...],
                         preferred_element_type=jnp.float32) + hb_ref[...]
        col = jax.lax.broadcasted_iota(jnp.int32, logits.shape, 1)
        # col 0 = metaphor (sigmoid), col 1 = novelty (tanh), padding cols = 0.
        o_ref[...] = jnp.where(col == 0, jax.nn.sigmoid(logits),
                               jnp.where(col == 1, jnp.tanh(logits), 0.0))


def dense_residual_layernorm(x, w, b, residual, g, beta, heads=None, tm=256, tk=768):
    """LayerNorm(x @ w + b + residual); optionally fused with the output heads."""
    M, K = x.shape
    N = w.shape[1]
    tm = _pick_tile(M, tm)
    tk = _pick_tile(K, tk)
    nk = K // tk

    x16 = x.astype(jnp.bfloat16)
    w16 = w.astype(jnp.bfloat16)
    r16 = residual.astype(jnp.bfloat16)
    b2, g2, beta2 = b.reshape(1, N), g.reshape(1, N), beta.reshape(1, N)

    if nk == 1 and heads is None:
        # Attention-output projection path: single K step, no scratch accumulator.
        return pl.pallas_call(
            _dense_res_ln_single_kernel,
            out_shape=jax.ShapeDtypeStruct((M, N), jnp.bfloat16),
            grid=(M // tm,),
            in_specs=[pl.BlockSpec((tm, K), lambda i: (i, 0)),
                      pl.BlockSpec((K, N), lambda i: (0, 0)),
                      pl.BlockSpec((1, N), lambda i: (0, 0)),
                      pl.BlockSpec((tm, N), lambda i: (i, 0)),
                      pl.BlockSpec((1, N), lambda i: (0, 0)),
                      pl.BlockSpec((1, N), lambda i: (0, 0))],
            out_specs=pl.BlockSpec((tm, N), lambda i: (i, 0)),
            compiler_params=pltpu.CompilerParams(
                dimension_semantics=("parallel",)),
        )(x16, w16, b2, r16, g2, beta2)

    in_specs = [pl.BlockSpec((tm, tk), lambda i, k: (i, k)),
                pl.BlockSpec((tk, N), lambda i, k: (k, 0)),
                pl.BlockSpec((1, N), lambda i, k: (0, 0)),
                pl.BlockSpec((tm, N), lambda i, k: (i, 0)),
                pl.BlockSpec((1, N), lambda i, k: (0, 0)),
                pl.BlockSpec((1, N), lambda i, k: (0, 0))]
    scratch = [pltpu.VMEM((tm, N), jnp.float32)]
    cparams = pltpu.CompilerParams(dimension_semantics=("parallel", "arbitrary"))

    if heads is None:
        return pl.pallas_call(
            _dense_res_ln_reduce_kernel,
            out_shape=jax.ShapeDtypeStruct((M, N), jnp.bfloat16),
            grid=(M // tm, nk),
            in_specs=in_specs,
            out_specs=pl.BlockSpec((tm, N), lambda i, k: (i, 0)),
            scratch_shapes=scratch,
            compiler_params=cparams,
        )(x16, w16, b2, r16, g2, beta2)

    hw, hb = heads                      # (768, 128) / (128,) zero-padded
    NH = hw.shape[1]
    return pl.pallas_call(
        _dense_res_ln_heads_kernel,
        out_shape=jax.ShapeDtypeStruct((M, NH), jnp.float32),
        grid=(M // tm, nk),
        in_specs=in_specs + [pl.BlockSpec((N, NH), lambda i, k: (0, 0)),
                             pl.BlockSpec((1, NH), lambda i, k: (0, 0))],
        out_specs=pl.BlockSpec((tm, NH), lambda i, k: (i, 0)),
        scratch_shapes=scratch,
        compiler_params=cparams,
    )(x16, w16, b2, r16, g2, beta2, hw.astype(jnp.bfloat16), hb.reshape(1, NH))


def _layernorm_kernel(x_ref, g_ref, b_ref, o_ref):
    x = x_ref[...]
    mu = jnp.mean(x, axis=-1, keepdims=True)
    var = jnp.mean((x - mu) ** 2, axis=-1, keepdims=True)
    y = (x - mu) * jax.lax.rsqrt(var + LN_EPS)
    o_ref[...] = (y * g_ref[...] + b_ref[...]).astype(o_ref.dtype)


def layernorm(x, g, b, tm=256):
    """Standalone layernorm (embedding LN). M-tiled parallel grid. f32 in, bf16 out."""
    M, N = x.shape
    tm = _pick_tile(M, tm)
    return pl.pallas_call(
        _layernorm_kernel,
        out_shape=jax.ShapeDtypeStruct((M, N), jnp.bfloat16),
        grid=(M // tm,),
        in_specs=[pl.BlockSpec((tm, N), lambda i: (i, 0)),
                  pl.BlockSpec((1, N), lambda i: (0, 0)),
                  pl.BlockSpec((1, N), lambda i: (0, 0))],
        out_specs=pl.BlockSpec((tm, N), lambda i: (i, 0)),
        compiler_params=pltpu.CompilerParams(dimension_semantics=("parallel",)),
    )(x, g.reshape(1, N), b.reshape(1, N))


def _attention_kernel(q_ref, k_ref, v_ref, m_ref, o_ref, *, scale):
    """One (batch, head-pair) step: 128-lane Q/K/V/ctx blocks, 2 heads per step."""
    qb = q_ref[0]                      # (S, 128) bf16 (2 heads)
    kb = k_ref[0]
    vb = v_ref[0]
    mask_add = m_ref[0]                # (1, S) additive mask: 0 keep, -1e9 pad
    outs = []
    for hh in range(HEADS_PER_BLOCK):
        lo = hh * HEAD_DIM
        q = qb[:, lo:lo + HEAD_DIM] * scale        # exact: 1/sqrt(64) = 1/8 in bf16
        k = kb[:, lo:lo + HEAD_DIM]
        v = vb[:, lo:lo + HEAD_DIM]
        s = jnp.einsum("qd,kd->qk", q, k, preferred_element_type=jnp.float32)
        s = s + mask_add
        m = jnp.max(s, axis=-1, keepdims=True)
        p = jnp.exp(s - m)
        p = p * pl.reciprocal(jnp.sum(p, axis=-1, keepdims=True), approx=True)
        # TODO(synk): BERT applies dropout(p=0.1) to attention probs in train mode; eval semantics here.
        outs.append(jnp.dot(p.astype(v.dtype), v, preferred_element_type=jnp.float32))
    o_ref[0] = jnp.concatenate(outs, axis=-1).astype(o_ref.dtype)   # lane-dense (S, 128) store


def attention(qkv, mask_add):
    """qkv: (B, S, 3*HIDDEN) bf16 from the fused QKV projection (cols [Q|K|V],
    each head h at h*64:(h+1)*64 within its section).  Returns ctx (B, S, HIDDEN)
    with heads concatenated along hidden -- no JAX-level head transposes needed."""
    B, S, _ = qkv.shape
    HP = NUM_HEADS // HEADS_PER_BLOCK          # 6 head-pairs
    blk = HEADS_PER_BLOCK * HEAD_DIM           # 128 lanes
    scale = 1.0 / math.sqrt(HEAD_DIM)
    return pl.pallas_call(
        functools.partial(_attention_kernel, scale=scale),
        out_shape=jax.ShapeDtypeStruct((B, S, HIDDEN), jnp.bfloat16),
        grid=(B, HP),
        in_specs=[pl.BlockSpec((1, S, blk), lambda b, hp: (b, 0, hp)),           # Q pair
                  pl.BlockSpec((1, S, blk), lambda b, hp: (b, 0, HP + hp)),      # K pair
                  pl.BlockSpec((1, S, blk), lambda b, hp: (b, 0, 2 * HP + hp)),  # V pair
                  pl.BlockSpec((1, 1, S), lambda b, hp: (b, 0, 0))],
        out_specs=pl.BlockSpec((1, S, blk), lambda b, hp: (b, 0, hp)),
        compiler_params=pltpu.CompilerParams(
            dimension_semantics=("parallel", "parallel")),
        # TODO(synk): for S >= 1024, switch to a kv-tiled online-softmax (flash) grid
        # (B, head_pair, q_tile, kv_tile) to bound the (S,S) f32 score live set.
    )(qkv, qkv, qkv, mask_add)


# ----------------------------- parameters ----------------------------------

def init_params(key):
    def normal(k, shape):
        return 0.02 * jax.random.normal(k, shape, dtype=jnp.float32)

    keys = iter(jax.random.split(key, 4 + NUM_LAYERS * 4))
    head_w = normal(next(keys), (HIDDEN, 2))     # [metaphor | novelty], each 768->1
    params = {
        "word_emb": normal(next(keys), (VOCAB, HIDDEN)),
        "pos_emb": normal(next(keys), (MAX_POS, HIDDEN)),
        "type_emb": normal(next(keys), (2, HIDDEN)),
        "emb_ln_g": jnp.ones((HIDDEN,), jnp.float32),
        "emb_ln_b": jnp.zeros((HIDDEN,), jnp.float32),
        # lane-dense zero-padded head weights, built once at init (not per forward)
        "head_w_pad": jnp.zeros((HIDDEN, HEAD_PAD), jnp.float32).at[:, :2].set(head_w),
        "head_b_pad": jnp.zeros((HEAD_PAD,), jnp.float32),
        "layers": [],
    }
    for _ in range(NUM_LAYERS):
        params["layers"].append({
            # fused [Q | K | V] projection weight/bias
            "w_qkv": normal(next(keys), (HIDDEN, 3 * HIDDEN)),
            "b_qkv": jnp.zeros((3 * HIDDEN,), jnp.float32),
            "wo": normal(next(keys), (HIDDEN, HIDDEN)), "bo": jnp.zeros((HIDDEN,), jnp.float32),
            "ln1_g": jnp.ones((HIDDEN,), jnp.float32), "ln1_b": jnp.zeros((HIDDEN,), jnp.float32),
            "wi": normal(next(keys), (HIDDEN, INTERMEDIATE)), "bi": jnp.zeros((INTERMEDIATE,), jnp.float32),
            "wf": normal(next(keys), (INTERMEDIATE, HIDDEN)), "bf": jnp.zeros((HIDDEN,), jnp.float32),
            "ln2_g": jnp.ones((HIDDEN,), jnp.float32), "ln2_b": jnp.zeros((HIDDEN,), jnp.float32),
        })
    return params


# ----------------------------- forward pass --------------------------------

def metaphor_forward(params, input_ids, mask):
    B, S = input_ids.shape

    # BERT embeddings (gather is glue); token_type_ids default to 0.
    h = (params["word_emb"][input_ids]
         + params["pos_emb"][:S][None, :, :]
         + params["type_emb"][0][None, None, :])
    h = h.reshape(B * S, HIDDEN)
    h = layernorm(h, params["emb_ln_g"], params["emb_ln_b"])     # bf16 [B*S, 768]
    # TODO(synk): embedding/hidden/output dropout(p=0.1) of train() mode omitted (eval semantics).

    mask_add = ((1.0 - mask.astype(jnp.float32)) * -1e9).reshape(B, 1, S)

    n_layers = len(params["layers"])
    head_out = None
    for li, lp in enumerate(params["layers"]):
        # fused QKV projection: one matmul, x read from HBM once.
        qkv = dense(h, lp["w_qkv"], lp["b_qkv"])                 # bf16 [B*S, 2304]
        # attention consumes qkv directly (head split happens in-kernel via BlockSpecs);
        # context comes back already in (B, S, 768) heads-concatenated layout.
        ctx = attention(qkv.reshape(B, S, 3 * HIDDEN), mask_add)
        ctx = ctx.reshape(B * S, HIDDEN)

        # attention output projection fused with residual-add + layernorm (single-K path).
        h = dense_residual_layernorm(ctx, lp["wo"], lp["bo"], h, lp["ln1_g"], lp["ln1_b"])

        # FFN up-projection + GELU (N/M-tiled), then down-projection fused with
        # residual-add + layernorm (K-reduction grid).  The last layer additionally
        # fuses the metaphor/novelty heads into the epilogue.
        ffn = dense(h, lp["wi"], lp["bi"], activation="gelu")
        if li == n_layers - 1:
            head_out = dense_residual_layernorm(
                ffn, lp["wf"], lp["bf"], h, lp["ln2_g"], lp["ln2_b"],
                heads=(params["head_w_pad"], params["head_b_pad"]))   # f32 [B*S, 128]
        else:
            h = dense_residual_layernorm(ffn, lp["wf"], lp["bf"], h,
                                         lp["ln2_g"], lp["ln2_b"])

    out = head_out.reshape(B, S, HEAD_PAD)
    metaphoricity = out[:, 1:-1, 0]   # sigmoid head, drop [CLS]/[SEP]
    novelty = out[:, 1:-1, 1]         # tanh head,    drop [CLS]/[SEP]
    return metaphoricity, novelty


# --------------------------------- main -------------------------------------

if __name__ == "__main__":
    B, S = 2, 8
    # TODO(synk): at these demo shapes (B*S = 16 rows) every matmul underfills the
    # MXU; production use should batch to B*S >= 256 tokens per call (the tiling
    # above then picks tm=256 automatically).
    key = jax.random.PRNGKey(0)
    k_param, k_ids = jax.random.split(key)

    params = init_params(k_param)
    input_ids = jax.random.randint(k_ids, (B, S), 0, VOCAB, dtype=jnp.int32)
    mask = jnp.ones((B, S), dtype=jnp.int32).at[1, -2:].set(0)  # pad last 2 tokens of sample 1

    fwd = jax.jit(metaphor_forward)
    metaphoricity, novelty = fwd(params, input_ids, mask)
    jax.block_until_ready((metaphoricity, novelty))

    assert metaphoricity.shape == (B, S - 2) and novelty.shape == (B, S - 2)
    assert bool(jnp.all(jnp.isfinite(metaphoricity))) and bool(jnp.all(jnp.isfinite(novelty)))
    assert bool(jnp.all((metaphoricity >= 0) & (metaphoricity <= 1)))
    assert bool(jnp.all((novelty >= -1) & (novelty <= 1)))
    print("KERNEL_OK")
</pallas_src>

<mosaic_0001>
module attributes {stable_mosaic.version = 11 : i64} {
  func.func @_layernorm_kernel(%arg0: i32, %arg1: memref<16x768xf32, #tpu.memory_space<vmem>>, %arg2: memref<1x768xf32, #tpu.memory_space<vmem>>, %arg3: memref<1x768xf32, #tpu.memory_space<vmem>>, %arg4: memref<16x768xbf16, #tpu.memory_space<vmem>>) attributes {dimension_semantics = [#tpu.dimension_semantics<parallel>], iteration_bounds = array<i64: 1>, scalar_prefetch = 0 : i64, scratch_operands = 0 : i64, tpu.core_type = #tpu.core_type<tc>, window_params = [{transform_indices = @transform_0, window_bounds = array<i64: 16, 768>}, {pipeline_mode = #tpu.pipeline_mode<synchronous>, transform_indices = @transform_1, window_bounds = array<i64: 1, 768>}, {pipeline_mode = #tpu.pipeline_mode<synchronous>, transform_indices = @transform_2, window_bounds = array<i64: 1, 768>}, {transform_indices = @transform_3, window_bounds = array<i64: 16, 768>}]} {
    %c0 = arith.constant 0 : index
    %c0_0 = arith.constant 0 : index
    %0 = vector.load %arg1[%c0, %c0_0] : memref<16x768xf32, #tpu.memory_space<vmem>>, vector<16x768xf32>
    %cst = arith.constant dense<0.000000e+00> : vector<16xf32>
    %1 = vector.multi_reduction <add>, %0, %cst [1] : vector<16x768xf32> to vector<16xf32>
    %2 = vector.shape_cast %1 : vector<16xf32> to vector<16x1xf32>
    %cst_1 = arith.constant 7.680000e+02 : f32
    %3 = vector.broadcast %cst_1 : f32 to vector<16x1xf32>
    %4 = arith.divf %2, %3 : vector<16x1xf32>
    %5 = vector.broadcast %4 : vector<16x1xf32> to vector<16x768xf32>
    %6 = arith.subf %0, %5 : vector<16x768xf32>
    %7 = arith.mulf %6, %6 : vector<16x768xf32>
    %cst_2 = arith.constant dense<0.000000e+00> : vector<16xf32>
    %8 = vector.multi_reduction <add>, %7, %cst_2 [1] : vector<16x768xf32> to vector<16xf32>
    %9 = vector.shape_cast %8 : vector<16xf32> to vector<16x1xf32>
    %cst_3 = arith.constant 7.680000e+02 : f32
    %10 = vector.broadcast %cst_3 : f32 to vector<16x1xf32>
    %11 = arith.divf %9, %10 : vector<16x1xf32>
    %12 = vector.broadcast %4 : vector<16x1xf32> to vector<16x768xf32>
    %13 = arith.subf %0, %12 : vector<16x768xf32>
    %cst_4 = arith.constant 9.99999996E-13 : f32
    %14 = vector.broadcast %cst_4 : f32 to vector<16x1xf32>
    %15 = arith.addf %11, %14 : vector<16x1xf32>
    %16 = math.rsqrt %15 : vector<16x1xf32>
    %17 = vector.broadcast %16 : vector<16x1xf32> to vector<16x768xf32>
    %18 = arith.mulf %13, %17 : vector<16x768xf32>
    %c0_5 = arith.constant 0 : index
    %c0_6 = arith.constant 0 : index
    %19 = vector.load %arg2[%c0_5, %c0_6] : memref<1x768xf32, #tpu.memory_space<vmem>>, vector<1x768xf32>
    %20 = vector.broadcast %19 : vector<1x768xf32> to vector<16x768xf32>
    %21 = arith.mulf %18, %20 : vector<16x768xf32>
    %c0_7 = arith.constant 0 : index
    %c0_8 = arith.constant 0 : index
    %22 = vector.load %arg3[%c0_7, %c0_8] : memref<1x768xf32, #tpu.memory_space<vmem>>, vector<1x768xf32>
    %23 = vector.broadcast %22 : vector<1x768xf32> to vector<16x768xf32>
    %24 = arith.addf %21, %23 : vector<16x768xf32>
    %25 = arith.truncf %24 : vector<16x768xf32> to vector<16x768xbf16>
    %c0_9 = arith.constant 0 : index
    %c0_10 = arith.constant 0 : index
    %26 = vector.load %arg4[%c0_9, %c0_10] : memref<16x768xbf16, #tpu.memory_space<vmem>>, vector<16x768xbf16>
    tpu.vector_store %arg4[%c0_9, %c0_10], %25 {strides = array<i32>} : memref<16x768xbf16, #tpu.memory_space<vmem>>, vector<16x768xbf16>,
    return
  }
  func.func @transform_0(%arg0: i32) -> (i32, i32) {
    %c0_i32 = arith.constant 0 : i32
    %c0_i32_0 = arith.constant 0 : i32
    return %arg0, %c0_i32 : i32, i32
  }
  func.func @transform_1(%arg0: i32) -> (i32, i32) {
    %c0_i32 = arith.constant 0 : i32
    %c0_i32_0 = arith.constant 0 : i32
    %c0_i32_1 = arith.constant 0 : i32
    return %c0_i32, %c0_i32_0 : i32, i32
  }
  func.func @transform_2(%arg0: i32) -> (i32, i32) {
    %c0_i32 = arith.constant 0 : i32
    %c0_i32_0 = arith.constant 0 : i32
    %c0_i32_1 = arith.constant 0 : i32
    return %c0_i32, %c0_i32_0 : i32, i32
  }
  func.func @transform_3(%arg0: i32) -> (i32, i32) {
    %c0_i32 = arith.constant 0 : i32
    %c0_i32_0 = arith.constant 0 : i32
    return %arg0, %c0_i32 : i32, i32
  }
}

module attributes {stable_mosaic.version = 11 : i64} {
  func.func @_dense_kernel(%arg0: i32, %arg1: i32, %arg2: memref<16x768xbf16, #tpu.memory_space<vmem>>, %arg3: memref<768x768xbf16, #tpu.memory_space<vmem>>, %arg4: memref<1x768xf32, #tpu.memory_space<vmem>>, %arg5: memref<16x768xbf16, #tpu.memory_space<vmem>>) attributes {dimension_semantics = [#tpu.dimension_semantics<parallel>, #tpu.dimension_semantics<parallel>], iteration_bounds = array<i64: 3, 1>, scalar_prefetch = 0 : i64, scratch_operands = 0 : i64, tpu.core_type = #tpu.core_type<tc>, window_params = [{transform_indices = @transform_0, window_bounds = array<i64: 16, 768>}, {transform_indices = @transform_1, window_bounds = array<i64: 768, 768>}, {transform_indices = @transform_2, window_bounds = array<i64: 1, 768>}, {transform_indices = @transform_3, window_bounds = array<i64: 16, 768>}]} {
    %c0 = arith.constant 0 : index
    %c0_0 = arith.constant 0 : index
    %0 = vector.load %arg2[%c0, %c0_0] : memref<16x768xbf16, #tpu.memory_space<vmem>>, vector<16x768xbf16>
    %c0_1 = arith.constant 0 : index
    %c0_2 = arith.constant 0 : index
    %1 = vector.load %arg3[%c0_1, %c0_2] : memref<768x768xbf16, #tpu.memory_space<vmem>>, vector<768x768xbf16>
    %cst = arith.constant dense<0.000000e+00> : vector<16x768xf32>
    %2 = tpu.matmul %0, %1, %cst {dimension_numbers = #tpu.dot_dimension_numbers<[1], [0], [0], [1], [0, 0, 1, 1], [], []>} : vector<16x768xbf16>, vector<768x768xbf16>, vector<16x768xf32> -> vector<16x768xf32>
    %c0_3 = arith.constant 0 : index
    %c0_4 = arith.constant 0 : index
    %3 = vector.load %arg4[%c0_3, %c0_4] : memref<1x768xf32, #tpu.memory_space<vmem>>, vector<1x768xf32>
    %4 = vector.broadcast %3 : vector<1x768xf32> to vector<16x768xf32>
    %5 = arith.addf %2, %4 : vector<16x768xf32>
    %6 = arith.truncf %5 : vector<16x768xf32> to vector<16x768xbf16>
    %c0_5 = arith.constant 0 : index
    %c0_6 = arith.constant 0 : index
    %7 = vector.load %arg5[%c0_5, %c0_6] : memref<16x768xbf16, #tpu.memory_space<vmem>>, vector<16x768xbf16>
    tpu.vector_store %arg5[%c0_5, %c0_6], %6 {strides = array<i32>} : memref<16x768xbf16, #tpu.memory_space<vmem>>, vector<16x768xbf16>,
    return
  }
  func.func @transform_0(%arg0: i32, %arg1: i32) -> (i32, i32) {
    %c0_i32 = arith.constant 0 : i32
    %c0_i32_0 = arith.constant 0 : i32
    return %arg1, %c0_i32 : i32, i32
  }
  func.func @transform_1(%arg0: i32, %arg1: i32) -> (i32, i32) {
    %c0_i32 = arith.constant 0 : i32
    %c0_i32_0 = arith.constant 0 : i32
    return %c0_i32, %arg0 : i32, i32
  }
  func.func @transform_2(%arg0: i32, %arg1: i32) -> (i32, i32) {
    %c0_i32 = arith.constant 0 : i32
    %c0_i32_0 = arith.constant 0 : i32
    return %c0_i32, %arg0 : i32, i32
  }
  func.func @transform_3(%arg0: i32, %arg1: i32) -> (i32, i32) {
    %c0_i32 = arith.constant 0 : i32
    return %arg1, %arg0 : i32, i32
  }
}

module attributes {stable_mosaic.version = 11 : i64} {
  func.func @_attention_kernel(%arg0: i32, %arg1: i32, %arg2: memref<1x8x128xbf16, #tpu.memory_space<vmem>>, %arg3: memref<1x8x128xbf16, #tpu.memory_space<vmem>>, %arg4: memref<1x8x128xbf16, #tpu.memory_space<vmem>>, %arg5: memref<1x1x8xf32, #tpu.memory_space<vmem>>, %arg6: memref<1x8x128xbf16, #tpu.memory_space<vmem>>) attributes {dimension_semantics = [#tpu.dimension_semantics<parallel>, #tpu.dimension_semantics<parallel>], iteration_bounds = array<i64: 2, 6>, scalar_prefetch = 0 : i64, scratch_operands = 0 : i64, tpu.core_type = #tpu.core_type<tc>, window_params = [{transform_indices = @transform_0, window_bounds = array<i64: 1, 8, 128>}, {transform_indices = @transform_1, window_bounds = array<i64: 1, 8, 128>}, {transform_indices = @transform_2, window_bounds = array<i64: 1, 8, 128>}, {transform_indices = @transform_3, window_bounds = array<i64: 1, 1, 8>}, {transform_indices = @transform_4, window_bounds = array<i64: 1, 8, 128>}]} {
    %c0 = arith.constant 0 : index
    %c0_0 = arith.constant 0 : index
    %c0_1 = arith.constant 0 : index
    %0 = vector.load %arg2[%c0, %c0_0, %c0_1] : memref<1x8x128xbf16, #tpu.memory_space<vmem>>, vector<1x8x128xbf16>
    %1 = vector.shape_cast %0 : vector<1x8x128xbf16> to vector<8x128xbf16>
    %c0_2 = arith.constant 0 : index
    %c0_3 = arith.constant 0 : index
    %c0_4 = arith.constant 0 : index
    %2 = vector.load %arg3[%c0_2, %c0_3, %c0_4] : memref<1x8x128xbf16, #tpu.memory_space<vmem>>, vector<1x8x128xbf16>
    %3 = vector.shape_cast %2 : vector<1x8x128xbf16> to vector<8x128xbf16>
    %c0_5 = arith.constant 0 : index
    %c0_6 = arith.constant 0 : index
    %c0_7 = arith.constant 0 : index
    %4 = vector.load %arg4[%c0_5, %c0_6, %c0_7] : memref<1x8x128xbf16, #tpu.memory_space<vmem>>, vector<1x8x128xbf16>
    %5 = vector.shape_cast %4 : vector<1x8x128xbf16> to vector<8x128xbf16>
    %c0_8 = arith.constant 0 : index
    %c0_9 = arith.constant 0 : index
    %c0_10 = arith.constant 0 : index
    %6 = vector.load %arg5[%c0_8, %c0_9, %c0_10] : memref<1x1x8xf32, #tpu.memory_space<vmem>>, vector<1x1x8xf32>
    %7 = vector.shape_cast %6 : vector<1x1x8xf32> to vector<1x8xf32>
    %8 = vector.extract_strided_slice %1 {offsets = [0, 0], sizes = [8, 64], strides = [1, 1]} : vector<8x128xbf16> to vector<8x64xbf16>
    %cst = arith.constant 1.250000e-01 : bf16
    %9 = vector.broadcast %cst : bf16 to vector<8x64xbf16>
    %10 = arith.mulf %8, %9 : vector<8x64xbf16>
    %11 = vector.extract_strided_slice %3 {offsets = [0, 0], sizes = [8, 64], strides = [1, 1]} : vector<8x128xbf16> to vector<8x64xbf16>
    %12 = vector.extract_strided_slice %5 {offsets = [0, 0], sizes = [8, 64], strides = [1, 1]} : vector<8x128xbf16> to vector<8x64xbf16>
    "tpu.trace_start"() <{level = 10 : i32, message = "qd,kd->qk"}> : () -> ()
    %cst_11 = arith.constant dense<0.000000e+00> : vector<8x8xf32>
    %13 = tpu.matmul %10, %11, %cst_11 {dimension_numbers = #tpu.dot_dimension_numbers<[1], [1], [0], [0], [0, 0, 1, 0], [], []>} : vector<8x64xbf16>, vector<8x64xbf16>, vector<8x8xf32> -> vector<8x8xf32>
    "tpu.trace_stop"() : () -> ()
    %14 = vector.broadcast %7 : vector<1x8xf32> to vector<8x8xf32>
    %15 = arith.addf %13, %14 : vector<8x8xf32>
    %cst_12 = arith.constant dense<0xFF800000> : vector<8xf32>
    %16 = vector.multi_reduction <maximumf>, %15, %cst_12 [1] : vector<8x8xf32> to vector<8xf32>
    %17 = vector.shape_cast %16 : vector<8xf32> to vector<8x1xf32>
    %18 = vector.broadcast %17 : vector<8x1xf32> to vector<8x8xf32>
    %19 = arith.subf %15, %18 : vector<8x8xf32>
    %20 = math.exp %19 : vector<8x8xf32>
    %cst_13 = arith.constant dense<0.000000e+00> : vector<8xf32>
    %21 = vector.multi_reduction <add>, %20, %cst_13 [1] : vector<8x8xf32> to vector<8xf32>
    %22 = vector.shape_cast %21 : vector<8xf32> to vector<8x1xf32>
    %23 = tpu.reciprocal %22 {approx = true} : vector<8x1xf32> -> vector<8x1xf32>
    %24 = vector.broadcast %23 : vector<8x1xf32> to vector<8x8xf32>
    %25 = arith.mulf %20, %24 : vector<8x8xf32>
    %26 = arith.truncf %25 : vector<8x8xf32> to vector<8x8xbf16>
    %cst_14 = arith.constant dense<0.000000e+00> : vector<8x64xf32>
    %27 = tpu.matmul %26, %12, %cst_14 {dimension_numbers = #tpu.dot_dimension_numbers<[1], [0], [0], [1], [0, 0, 1, 1], [], []>} : vector<8x8xbf16>, vector<8x64xbf16>, vector<8x64xf32> -> vector<8x64xf32>
    %28 = vector.extract_strided_slice %1 {offsets = [0, 64], sizes = [8, 64], strides = [1, 1]} : vector<8x128xbf16> to vector<8x64xbf16>
    %cst_15 = arith.constant 1.250000e-01 : bf16
    %29 = vector.broadcast %cst_15 : bf16 to vector<8x64xbf16>
    %30 = arith.mulf %28, %29 : vector<8x64xbf16>
    %31 = vector.extract_strided_slice %3 {offsets = [0, 64], sizes = [8, 64], strides = [1, 1]} : vector<8x128xbf16> to vector<8x64xbf16>
    %32 = vector.extract_strided_slice %5 {offsets = [0, 64], sizes = [8, 64], strides = [1, 1]} : vector<8x128xbf16> to vector<8x64xbf16>
    "tpu.trace_start"() <{level = 10 : i32, message = "qd,kd->qk"}> : () -> ()
    %cst_16 = arith.constant dense<0.000000e+00> : vector<8x8xf32>
    %33 = tpu.matmul %30, %31, %cst_16 {dimension_numbers = #tpu.dot_dimension_numbers<[1], [1], [0], [0], [0, 0, 1, 0], [], []>} : vector<8x64xbf16>, vector<8x64xbf16>, vector<8x8xf32> -> vector<8x8xf32>
    "tpu.trace_stop"() : () -> ()
    %34 = vector.broadcast %7 : vector<1x8xf32> to vector<8x8xf32>
    %35 = arith.addf %33, %34 : vector<8x8xf32>
    %cst_17 = arith.constant dense<0xFF800000> : vector<8xf32>
    %36 = vector.multi_reduction <maximumf>, %35, %cst_17 [1] : vector<8x8xf32> to vector<8xf32>
    %37 = vector.shape_cast %36 : vector<8xf32> to vector<8x1xf32>
    %38 = vector.broadcast %37 : vector<8x1xf32> to vector<8x8xf32>
    %39 = arith.subf %35, %38 : vector<8x8xf32>
    %40 = math.exp %39 : vector<8x8xf32>
    %cst_18 = arith.constant dense<0.000000e+00> : vector<8xf32>
    %41 = vector.multi_reduction <add>, %40, %cst_18 [1] : vector<8x8xf32> to vector<8xf32>
    %42 = vector.shape_cast %41 : vector<8xf32> to vector<8x1xf32>
    %43 = tpu.reciprocal %42 {approx = true} : vector<8x1xf32> -> vector<8x1xf32>
    %44 = vector.broadcast %43 : vector<8x1xf32> to vector<8x8xf32>
    %45 = arith.mulf %40, %44 : vector<8x8xf32>
    %46 = arith.truncf %45 : vector<8x8xf32> to vector<8x8xbf16>
    %cst_19 = arith.constant dense<0.000000e+00> : vector<8x64xf32>
    %47 = tpu.matmul %46, %32, %cst_19 {dimension_numbers = #tpu.dot_dimension_numbers<[1], [0], [0], [1], [0, 0, 1, 1], [], []>} : vector<8x8xbf16>, vector<8x64xbf16>, vector<8x64xf32> -> vector<8x64xf32>
    %48 = tpu.concatenate %27, %47 in 1 : vector<8x64xf32>, vector<8x64xf32> -> vector<8x128xf32>
    %49 = arith.truncf %48 : vector<8x128xf32> to vector<8x128xbf16>
    %c0_20 = arith.constant 0 : index
    %c0_21 = arith.constant 0 : index
    %c0_22 = arith.constant 0 : index
    %50 = vector.load %arg6[%c0_20, %c0_21, %c0_22] : memref<1x8x128xbf16, #tpu.memory_space<vmem>>, vector<1x8x128xbf16>
    %51 = vector.shape_cast %50 : vector<1x8x128xbf16> to vector<8x128xbf16>
    %52 = vector.shape_cast %49 : vector<8x128xbf16> to vector<1x8x128xbf16>
    tpu.vector_store %arg6[%c0_20, %c0_21, %c0_22], %52 {strides = array<i32>} : memref<1x8x128xbf16, #tpu.memory_space<vmem>>, vector<1x8x128xbf16>,
    return
  }
  func.func @transform_0(%arg0: i32, %arg1: i32) -> (i32, i32, i32) {
    %c0_i32 = arith.constant 0 : i32
    %c0_i32_0 = arith.constant 0 : i32
    return %arg0, %c0_i32, %arg1 : i32, i32, i32
  }
  func.func @transform_1(%arg0: i32, %arg1: i32) -> (i32, i32, i32) {
    %c6_i32 = arith.constant 6 : i32
    %0 = arith.addi %c6_i32, %arg1 : i32
    %c0_i32 = arith.constant 0 : i32
    %c0_i32_0 = arith.constant 0 : i32
    return %arg0, %c0_i32, %0 : i32, i32, i32
  }
  func.func @transform_2(%arg0: i32, %arg1: i32) -> (i32, i32, i32) {
    %c12_i32 = arith.constant 12 : i32
    %0 = arith.addi %c12_i32, %arg1 : i32
    %c0_i32 = arith.constant 0 : i32
    %c0_i32_0 = arith.constant 0 : i32
    return %arg0, %c0_i32, %0 : i32, i32, i32
  }
  func.func @transform_3(%arg0: i32, %arg1: i32) -> (i32, i32, i32) {
    %c0_i32 = arith.constant 0 : i32
    %c0_i32_0 = arith.constant 0 : i32
    %c0_i32_1 = arith.constant 0 : i32
    return %arg0, %c0_i32, %c0_i32_0 : i32, i32, i32
  }
  func.func @transform_4(%arg0: i32, %arg1: i32) -> (i32, i32, i32) {
    %c0_i32 = arith.constant 0 : i32
    %c0_i32_0 = arith.constant 0 : i32
    return %arg0, %c0_i32, %arg1 : i32, i32, i32
  }
}

module attributes {stable_mosaic.version = 11 : i64} {
  func.func @_dense_res_ln_single_kernel(%arg0: i32, %arg1: memref<16x768xbf16, #tpu.memory_space<vmem>>, %arg2: memref<768x768xbf16, #tpu.memory_space<vmem>>, %arg3: memref<1x768xf32, #tpu.memory_space<vmem>>, %arg4: memref<16x768xbf16, #tpu.memory_space<vmem>>, %arg5: memref<1x768xf32, #tpu.memory_space<vmem>>, %arg6: memref<1x768xf32, #tpu.memory_space<vmem>>, %arg7: memref<16x768xbf16, #tpu.memory_space<vmem>>) attributes {dimension_semantics = [#tpu.dimension_semantics<parallel>], iteration_bounds = array<i64: 1>, scalar_prefetch = 0 : i64, scratch_operands = 0 : i64, tpu.core_type = #tpu.core_type<tc>, window_params = [{transform_indices = @transform_0, window_bounds = array<i64: 16, 768>}, {pipeline_mode = #tpu.pipeline_mode<synchronous>, transform_indices = @transform_1, window_bounds = array<i64: 768, 768>}, {pipeline_mode = #tpu.pipeline_mode<synchronous>, transform_indices = @transform_2, window_bounds = array<i64: 1, 768>}, {transform_indices = @transform_3, window_bounds = array<i64: 16, 768>}, {pipeline_mode = #tpu.pipeline_mode<synchronous>, transform_indices = @transform_4, window_bounds = array<i64: 1, 768>}, {pipeline_mode = #tpu.pipeline_mode<synchronous>, transform_indices = @transform_5, window_bounds = array<i64: 1, 768>}, {transform_indices = @transform_6, window_bounds = array<i64: 16, 768>}]} {
    %c0 = arith.constant 0 : index
    %c0_0 = arith.constant 0 : index
    %0 = vector.load %arg1[%c0, %c0_0] : memref<16x768xbf16, #tpu.memory_space<vmem>>, vector<16x768xbf16>
    %c0_1 = arith.constant 0 : index
    %c0_2 = arith.constant 0 : index
    %1 = vector.load %arg2[%c0_1, %c0_2] : memref<768x768xbf16, #tpu.memory_space<vmem>>, vector<768x768xbf16>
    %cst = arith.constant dense<0.000000e+00> : vector<16x768xf32>
    %2 = tpu.matmul %0, %1, %cst {dimension_numbers = #tpu.dot_dimension_numbers<[1], [0], [0], [1], [0, 0, 1, 1], [], []>} : vector<16x768xbf16>, vector<768x768xbf16>, vector<16x768xf32> -> vector<16x768xf32>
    %c0_3 = arith.constant 0 : index
    %c0_4 = arith.constant 0 : index
    %3 = vector.load %arg3[%c0_3, %c0_4] : memref<1x768xf32, #tpu.memory_space<vmem>>, vector<1x768xf32>
    %c0_5 = arith.constant 0 : index
    %c0_6 = arith.constant 0 : index
    %4 = vector.load %arg4[%c0_5, %c0_6] : memref<16x768xbf16, #tpu.memory_space<vmem>>, vector<16x768xbf16>
    %c0_7 = arith.constant 0 : index
    %c0_8 = arith.constant 0 : index
    %5 = vector.load %arg5[%c0_7, %c0_8] : memref<1x768xf32, #tpu.memory_space<vmem>>, vector<1x768xf32>
    %c0_9 = arith.constant 0 : index
    %c0_10 = arith.constant 0 : index
    %6 = vector.load %arg6[%c0_9, %c0_10] : memref<1x768xf32, #tpu.memory_space<vmem>>, vector<1x768xf32>
    %7 = vector.broadcast %3 : vector<1x768xf32> to vector<16x768xf32>
    %8 = arith.addf %2, %7 : vector<16x768xf32>
    %9 = arith.extf %4 : vector<16x768xbf16> to vector<16x768xf32>
    %10 = arith.addf %8, %9 : vector<16x768xf32>
    %cst_11 = arith.constant dense<0.000000e+00> : vector<16xf32>
    %11 = vector.multi_reduction <add>, %10, %cst_11 [1] : vector<16x768xf32> to vector<16xf32>
    %12 = vector.shape_cast %11 : vector<16xf32> to vector<16x1xf32>
    %cst_12 = arith.constant 7.680000e+02 : f32
    %13 = vector.broadcast %cst_12 : f32 to vector<16x1xf32>
    %14 = arith.divf %12, %13 : vector<16x1xf32>
    %15 = vector.broadcast %14 : vector<16x1xf32> to vector<16x768xf32>
    %16 = arith.subf %10, %15 : vector<16x768xf32>
    %17 = arith.mulf %16, %16 : vector<16x768xf32>
    %cst_13 = arith.constant dense<0.000000e+00> : vector<16xf32>
    %18 = vector.multi_reduction <add>, %17, %cst_13 [1] : vector<16x768xf32> to vector<16xf32>
    %19 = vector.shape_cast %18 : vector<16xf32> to vector<16x1xf32>
    %cst_14 = arith.constant 7.680000e+02 : f32
    %20 = vector.broadcast %cst_14 : f32 to vector<16x1xf32>
    %21 = arith.divf %19, %20 : vector<16x1xf32>
    %22 = vector.broadcast %14 : vector<16x1xf32> to vector<16x768xf32>
    %23 = arith.subf %10, %22 : vector<16x768xf32>
    %cst_15 = arith.constant 9.99999996E-13 : f32
    %24 = vector.broadcast %cst_15 : f32 to vector<16x1xf32>
    %25 = arith.addf %21, %24 : vector<16x1xf32>
    %26 = math.rsqrt %25 : vector<16x1xf32>
    %27 = vector.broadcast %26 : vector<16x1xf32> to vector<16x768xf32>
    %28 = arith.mulf %23, %27 : vector<16x768xf32>
    %29 = vector.broadcast %5 : vector<1x768xf32> to vector<16x768xf32>
    %30 = arith.mulf %28, %29 : vector<16x768xf32>
    %31 = vector.broadcast %6 : vector<1x768xf32> to vector<16x768xf32>
    %32 = arith.addf %30, %31 : vector<16x768xf32>
    %33 = arith.truncf %32 : vector<16x768xf32> to vector<16x768xbf16>
    %c0_16 = arith.constant 0 : index
    %c0_17 = arith.constant 0 : index
    %34 = vector.load %arg7[%c0_16, %c0_17] : memref<16x768xbf16, #tpu.memory_space<vmem>>, vector<16x768xbf16>
    tpu.vector_store %arg7[%c0_16, %c0_17], %33 {strides = array<i32>} : memref<16x768xbf16, #tpu.memory_space<vmem>>, vector<16x768xbf16>,
    return
  }
  func.func @transform_0(%arg0: i32) -> (i32, i32) {
    %c0_i32 = arith.constant 0 : i32
    %c0_i32_0 = arith.constant 0 : i32
    return %arg0, %c0_i32 : i32, i32
  }
  func.func @transform_1(%arg0: i32) -> (i32, i32) {
    %c0_i32 = arith.constant 0 : i32
    %c0_i32_0 = arith.constant 0 : i32
    %c0_i32_1 = arith.constant 0 : i32
    return %c0_i32, %c0_i32_0 : i32, i32
  }
  func.func @transform_2(%arg0: i32) -> (i32, i32) {
    %c0_i32 = arith.constant 0 : i32
    %c0_i32_0 = arith.constant 0 : i32
    %c0_i32_1 = arith.constant 0 : i32
    return %c0_i32, %c0_i32_0 : i32, i32
  }
  func.func @transform_3(%arg0: i32) -> (i32, i32) {
    %c0_i32 = arith.constant 0 : i32
    %c0_i32_0 = arith.constant 0 : i32
    return %arg0, %c0_i32 : i32, i32
  }
  func.func @transform_4(%arg0: i32) -> (i32, i32) {
    %c0_i32 = arith.constant 0 : i32
    %c0_i32_0 = arith.constant 0 : i32
    %c0_i32_1 = arith.constant 0 : i32
    return %c0_i32, %c0_i32_0 : i32, i32
  }
  func.func @transform_5(%arg0: i32) -> (i32, i32) {
    %c0_i32 = arith.constant 0 : i32
    %c0_i32_0 = arith.constant 0 : i32
    %c0_i32_1 = arith.constant 0 : i32
    return %c0_i32, %c0_i32_0 : i32, i32
  }
  func.func @transform_6(%arg0: i32) -> (i32, i32) {
    %c0_i32 = arith.constant 0 : i32
    %c0_i32_0 = arith.constant 0 : i32
    return %arg0, %c0_i32 : i32, i32
  }
}

module attributes {stable_mosaic.version = 11 : i64} {
  func.func @_dense_kernel(%arg0: i32, %arg1: i32, %arg2: memref<16x768xbf16, #tpu.memory_space<vmem>>, %arg3: memref<768x768xbf16, #tpu.memory_space<vmem>>, %arg4: memref<1x768xf32, #tpu.memory_space<vmem>>, %arg5: memref<16x768xbf16, #tpu.memory_space<vmem>>) attributes {dimension_semantics = [#tpu.dimension_semantics<parallel>, #tpu.dimension_semantics<parallel>], iteration_bounds = array<i64: 4, 1>, scalar_prefetch = 0 : i64, scratch_operands = 0 : i64, tpu.core_type = #tpu.core_type<tc>, window_params = [{transform_indices = @transform_0, window_bounds = array<i64: 16, 768>}, {transform_indices = @transform_1, window_bounds = array<i64: 768, 768>}, {transform_indices = @transform_2, window_bounds = array<i64: 1, 768>}, {transform_indices = @transform_3, window_bounds = array<i64: 16, 768>}]} {
    %c0 = arith.constant 0 : index
    %c0_0 = arith.constant 0 : index
    %0 = vector.load %arg2[%c0, %c0_0] : memref<16x768xbf16, #tpu.memory_space<vmem>>, vector<16x768xbf16>
    %c0_1 = arith.constant 0 : index
    %c0_2 = arith.constant 0 : index
    %1 = vector.load %arg3[%c0_1, %c0_2] : memref<768x768xbf16, #tpu.memory_space<vmem>>, vector<768x768xbf16>
    %cst = arith.constant dense<0.000000e+00> : vector<16x768xf32>
    %2 = tpu.matmul %0, %1, %cst {dimension_numbers = #tpu.dot_dimension_numbers<[1], [0], [0], [1], [0, 0, 1, 1], [], []>} : vector<16x768xbf16>, vector<768x768xbf16>, vector<16x768xf32> -> vector<16x768xf32>
    %c0_3 = arith.constant 0 : index
    %c0_4 = arith.constant 0 : index
    %3 = vector.load %arg4[%c0_3, %c0_4] : memref<1x768xf32, #tpu.memory_space<vmem>>, vector<1x768xf32>
    %4 = vector.broadcast %3 : vector<1x768xf32> to vector<16x768xf32>
    %5 = arith.addf %2, %4 : vector<16x768xf32>
    %cst_5 = arith.constant 5.000000e-01 : f32
    %6 = vector.broadcast %cst_5 : f32 to vector<16x768xf32>
    %7 = arith.mulf %6, %5 : vector<16x768xf32>
    %cst_6 = arith.constant 4.471500e-02 : f32
    %8 = vector.broadcast %cst_6 : f32 to vector<16x768xf32>
    %9 = arith.mulf %8, %5 : vector<16x768xf32>
    %10 = arith.mulf %9, %5 : vector<16x768xf32>
    %11 = arith.mulf %10, %5 : vector<16x768xf32>
    %12 = arith.addf %5, %11 : vector<16x768xf32>
    %cst_7 = arith.constant 0.797884583 : f32
    %13 = vector.broadcast %cst_7 : f32 to vector<16x768xf32>
    %14 = arith.mulf %13, %12 : vector<16x768xf32>
    %15 = math.tanh %14 : vector<16x768xf32>
    %cst_8 = arith.constant 1.000000e+00 : f32
    %16 = vector.broadcast %cst_8 : f32 to vector<16x768xf32>
    %17 = arith.addf %16, %15 : vector<16x768xf32>
    %18 = arith.mulf %7, %17 : vector<16x768xf32>
    %19 = arith.truncf %18 : vector<16x768xf32> to vector<16x768xbf16>
    %c0_9 = arith.constant 0 : index
    %c0_10 = arith.constant 0 : index
    %20 = vector.load %arg5[%c0_9, %c0_10] : memref<16x768xbf16, #tpu.memory_space<vmem>>, vector<16x768xbf16>
    tpu.vector_store %arg5[%c0_9, %c0_10], %19 {strides = array<i32>} : memref<16x768xbf16, #tpu.memory_space<vmem>>, vector<16x768xbf16>,
    return
  }
  func.func @transform_0(%arg0: i32, %arg1: i32) -> (i32, i32) {
    %c0_i32 = arith.constant 0 : i32
    %c0_i32_0 = arith.constant 0 : i32
    return %arg1, %c0_i32 : i32, i32
  }
  func.func @transform_1(%arg0: i32, %arg1: i32) -> (i32, i32) {
    %c0_i32 = arith.constant 0 : i32
    %c0_i32_0 = arith.constant 0 : i32
    return %c0_i32, %arg0 : i32, i32
  }
  func.func @transform_2(%arg0: i32, %arg1: i32) -> (i32, i32) {
    %c0_i32 = arith.constant 0 : i32
    %c0_i32_0 = arith.constant 0 : i32
    return %c0_i32, %arg0 : i32, i32
  }
  func.func @transform_3(%arg0: i32, %arg1: i32) -> (i32, i32) {
    %c0_i32 = arith.constant 0 : i32
    return %arg1, %arg0 : i32, i32
  }
}

module attributes {stable_mosaic.version = 11 : i64} {
  func.func @_dense_res_ln_reduce_kernel(%arg0: i32, %arg1: i32, %arg2: memref<16x768xbf16, #tpu.memory_space<vmem>>, %arg3: memref<768x768xbf16, #tpu.memory_space<vmem>>, %arg4: memref<1x768xf32, #tpu.memory_space<vmem>>, %arg5: memref<16x768xbf16, #tpu.memory_space<vmem>>, %arg6: memref<1x768xf32, #tpu.memory_space<vmem>>, %arg7: memref<1x768xf32, #tpu.memory_space<vmem>>, %arg8: memref<16x768xbf16, #tpu.memory_space<vmem>>, %arg9: memref<16x768xf32, #tpu.memory_space<vmem>>) attributes {dimension_semantics = [#tpu.dimension_semantics<parallel>, #tpu.dimension_semantics<arbitrary>], iteration_bounds = array<i64: 1, 4>, scalar_prefetch = 0 : i64, scratch_operands = 1 : i64, tpu.core_type = #tpu.core_type<tc>, window_params = [{transform_indices = @transform_0, window_bounds = array<i64: 16, 768>}, {transform_indices = @transform_1, window_bounds = array<i64: 768, 768>}, {pipeline_mode = #tpu.pipeline_mode<synchronous>, transform_indices = @transform_2, window_bounds = array<i64: 1, 768>}, {transform_indices = @transform_3, window_bounds = array<i64: 16, 768>}, {pipeline_mode = #tpu.pipeline_mode<synchronous>, transform_indices = @transform_4, window_bounds = array<i64: 1, 768>}, {pipeline_mode = #tpu.pipeline_mode<synchronous>, transform_indices = @transform_5, window_bounds = array<i64: 1, 768>}, {transform_indices = @transform_6, window_bounds = array<i64: 16, 768>}]} {
    %c0_i32 = arith.constant 0 : i32
    %0 = arith.cmpi eq, %arg1, %c0_i32 : i32
    %1 = arith.extui %0 : i1 to i32
    %c0_i32_0 = arith.constant 0 : i32
    %2 = arith.cmpi ne, %1, %c0_i32_0 : i32
    scf.if %2 {
      %cst_9 = arith.constant 0.000000e+00 : f32
      %12 = vector.broadcast %cst_9 : f32 to vector<16x768xf32>
      %c0_10 = arith.constant 0 : index
      %c0_11 = arith.constant 0 : index
      %13 = vector.load %arg9[%c0_10, %c0_11] : memref<16x768xf32, #tpu.memory_space<vmem>>, vector<16x768xf32>
      tpu.vector_store %arg9[%c0_10, %c0_11], %12 {strides = array<i32>} : memref<16x768xf32, #tpu.memory_space<vmem>>, vector<16x768xf32>,
    } else {
    }
    %c0 = arith.constant 0 : index
    %c0_1 = arith.constant 0 : index
    %3 = vector.load %arg9[%c0, %c0_1] : memref<16x768xf32, #tpu.memory_space<vmem>>, vector<16x768xf32>
    %c0_2 = arith.constant 0 : index
    %c0_3 = arith.constant 0 : index
    %4 = vector.load %arg2[%c0_2, %c0_3] : memref<16x768xbf16, #tpu.memory_space<vmem>>, vector<16x768xbf16>
    %c0_4 = arith.constant 0 : index
    %c0_5 = arith.constant 0 : index
    %5 = vector.load %arg3[%c0_4, %c0_5] : memref<768x768xbf16, #tpu.memory_space<vmem>>, vector<768x768xbf16>
    %cst = arith.constant dense<0.000000e+00> : vector<16x768xf32>
    %6 = tpu.matmul %4, %5, %cst {dimension_numbers = #tpu.dot_dimension_numbers<[1], [0], [0], [1], [0, 0, 1, 1], [], []>} : vector<16x768xbf16>, vector<768x768xbf16>, vector<16x768xf32> -> vector<16x768xf32>
    %7 = arith.addf %3, %6 : vector<16x768xf32>
    %c0_6 = arith.constant 0 : index
    %c0_7 = arith.constant 0 : index
    %8 = vector.load %arg9[%c0_6, %c0_7] : memref<16x768xf32, #tpu.memory_space<vmem>>, vector<16x768xf32>
    tpu.vector_store %arg9[%c0_6, %c0_7], %7 {strides = array<i32>} : memref<16x768xf32, #tpu.memory_space<vmem>>, vector<16x768xf32>,
    %c3_i32 = arith.constant 3 : i32
    %9 = arith.cmpi eq, %arg1, %c3_i32 : i32
    %10 = arith.extui %9 : i1 to i32
    %c0_i32_8 = arith.constant 0 : i32
    %11 = arith.cmpi ne, %10, %c0_i32_8 : i32
    scf.if %11 {
      %c0_9 = arith.constant 0 : index
      %c0_10 = arith.constant 0 : index
      %12 = vector.load %arg9[%c0_9, %c0_10] : memref<16x768xf32, #tpu.memory_space<vmem>>, vector<16x768xf32>
      %c0_11 = arith.constant 0 : index
      %c0_12 = arith.constant 0 : index
      %13 = vector.load %arg4[%c0_11, %c0_12] : memref<1x768xf32, #tpu.memory_space<vmem>>, vector<1x768xf32>
      %c0_13 = arith.constant 0 : index
      %c0_14 = arith.constant 0 : index
      %14 = vector.load %arg5[%c0_13, %c0_14] : memref<16x768xbf16, #tpu.memory_space<vmem>>, vector<16x768xbf16>
      %c0_15 = arith.constant 0 : index
      %c0_16 = arith.constant 0 : index
      %15 = vector.load %arg6[%c0_15, %c0_16] : memref<1x768xf32, #tpu.memory_space<vmem>>, vector<1x768xf32>
      %c0_17 = arith.constant 0 : index
      %c0_18 = arith.constant 0 : index
      %16 = vector.load %arg7[%c0_17, %c0_18] : memref<1x768xf32, #tpu.memory_space<vmem>>, vector<1x768xf32>
      %17 = vector.broadcast %13 : vector<1x768xf32> to vector<16x768xf32>
      %18 = arith.addf %12, %17 : vector<16x768xf32>
      %19 = arith.extf %14 : vector<16x768xbf16> to vector<16x768xf32>
      %20 = arith.addf %18, %19 : vector<16x768xf32>
      %cst_19 = arith.constant dense<0.000000e+00> : vector<16xf32>
      %21 = vector.multi_reduction <add>, %20, %cst_19 [1] : vector<16x768xf32> to vector<16xf32>
      %22 = vector.shape_cast %21 : vector<16xf32> to vector<16x1xf32>
      %cst_20 = arith.constant 7.680000e+02 : f32
      %23 = vector.broadcast %cst_20 : f32 to vector<16x1xf32>
      %24 = arith.divf %22, %23 : vector<16x1xf32>
      %25 = vector.broadcast %24 : vector<16x1xf32> to vector<16x768xf32>
      %26 = arith.subf %20, %25 : vector<16x768xf32>
      %27 = arith.mulf %26, %26 : vector<16x768xf32>
      %cst_21 = arith.constant dense<0.000000e+00> : vector<16xf32>
      %28 = vector.multi_reduction <add>, %27, %cst_21 [1] : vector<16x768xf32> to vector<16xf32>
      %29 = vector.shape_cast %28 : vector<16xf32> to vector<16x1xf32>
      %cst_22 = arith.constant 7.680000e+02 : f32
      %30 = vector.broadcast %cst_22 : f32 to vector<16x1xf32>
      %31 = arith.divf %29, %30 : vector<16x1xf32>
      %32 = vector.broadcast %24 : vector<16x1xf32> to vector<16x768xf32>
      %33 = arith.subf %20, %32 : vector<16x768xf32>
      %cst_23 = arith.constant 9.99999996E-13 : f32
      %34 = vector.broadcast %cst_23 : f32 to vector<16x1xf32>
      %35 = arith.addf %31, %34 : vector<16x1xf32>
      %36 = math.rsqrt %35 : vector<16x1xf32>
      %37 = vector.broadcast %36 : vector<16x1xf32> to vector<16x768xf32>
      %38 = arith.mulf %33, %37 : vector<16x768xf32>
      %39 = vector.broadcast %15 : vector<1x768xf32> to vector<16x768xf32>
      %40 = arith.mulf %38, %39 : vector<16x768xf32>
      %41 = vector.broadcast %16 : vector<1x768xf32> to vector<16x768xf32>
      %42 = arith.addf %40, %41 : vector<16x768xf32>
      %43 = arith.truncf %42 : vector<16x768xf32> to vector<16x768xbf16>
      %c0_24 = arith.constant 0 : index
      %c0_25 = arith.constant 0 : index
      %44 = vector.load %arg8[%c0_24, %c0_25] : memref<16x768xbf16, #tpu.memory_space<vmem>>, vector<16x768xbf16>
      tpu.vector_store %arg8[%c0_24, %c0_25], %43 {strides = array<i32>} : memref<16x768xbf16, #tpu.memory_space<vmem>>, vector<16x768xbf16>,
    } else {
    }
    return
  }
  func.func @transform_0(%arg0: i32, %arg1: i32) -> (i32, i32) {
    %c0_i32 = arith.constant 0 : i32
    return %arg0, %arg1 : i32, i32
  }
  func.func @transform_1(%arg0: i32, %arg1: i32) -> (i32, i32) {
    %c0_i32 = arith.constant 0 : i32
    %c0_i32_0 = arith.constant 0 : i32
    return %arg1, %c0_i32 : i32, i32
  }
  func.func @transform_2(%arg0: i32, %arg1: i32) -> (i32, i32) {
    %c0_i32 = arith.constant 0 : i32
    %c0_i32_0 = arith.constant 0 : i32
    %c0_i32_1 = arith.constant 0 : i32
    return %c0_i32, %c0_i32_0 : i32, i32
  }
  func.func @transform_3(%arg0: i32, %arg1: i32) -> (i32, i32) {
    %c0_i32 = arith.constant 0 : i32
    %c0_i32_0 = arith.constant 0 : i32
    return %arg0, %c0_i32 : i32, i32
  }
  func.func @transform_4(%arg0: i32, %arg1: i32) -> (i32, i32) {
    %c0_i32 = arith.constant 0 : i32
    %c0_i32_0 = arith.constant 0 : i32
    %c0_i32_1 = arith.constant 0 : i32
    return %c0_i32, %c0_i32_0 : i32, i32
  }
  func.func @transform_5(%arg0: i32, %arg1: i32) -> (i32, i32) {
    %c0_i32 = arith.constant 0 : i32
    %c0_i32_0 = arith.constant 0 : i32
    %c0_i32_1 = arith.constant 0 : i32
    return %c0_i32, %c0_i32_0 : i32, i32
  }
  func.func @transform_6(%arg0: i32, %arg1: i32) -> (i32, i32) {
    %c0_i32 = arith.constant 0 : i32
    %c0_i32_0 = arith.constant 0 : i32
    return %arg0, %c0_i32 : i32, i32
  }
}

module attributes {stable_mosaic.version = 11 : i64} {
  func.func @_dense_res_ln_heads_kernel(%arg0: i32, %arg1: i32, %arg2: memref<16x768xbf16, #tpu.memory_space<vmem>>, %arg3: memref<768x768xbf16, #tpu.memory_space<vmem>>, %arg4: memref<1x768xf32, #tpu.memory_space<vmem>>, %arg5: memref<16x768xbf16, #tpu.memory_space<vmem>>, %arg6: memref<1x768xf32, #tpu.memory_space<vmem>>, %arg7: memref<1x768xf32, #tpu.memory_space<vmem>>, %arg8: memref<768x128xbf16, #tpu.memory_space<vmem>>, %arg9: memref<1x128xf32, #tpu.memory_space<vmem>>, %arg10: memref<16x128xf32, #tpu.memory_space<vmem>>, %arg11: memref<16x768xf32, #tpu.memory_space<vmem>>) attributes {dimension_semantics = [#tpu.dimension_semantics<parallel>, #tpu.dimension_semantics<arbitrary>], iteration_bounds = array<i64: 1, 4>, scalar_prefetch = 0 : i64, scratch_operands = 1 : i64, tpu.core_type = #tpu.core_type<tc>, window_params = [{transform_indices = @transform_0, window_bounds = array<i64: 16, 768>}, {transform_indices = @transform_1, window_bounds = array<i64: 768, 768>}, {pipeline_mode = #tpu.pipeline_mode<synchronous>, transform_indices = @transform_2, window_bounds = array<i64: 1, 768>}, {transform_indices = @transform_3, window_bounds = array<i64: 16, 768>}, {pipeline_mode = #tpu.pipeline_mode<synchronous>, transform_indices = @transform_4, window_bounds = array<i64: 1, 768>}, {pipeline_mode = #tpu.pipeline_mode<synchronous>, transform_indices = @transform_5, window_bounds = array<i64: 1, 768>}, {pipeline_mode = #tpu.pipeline_mode<synchronous>, transform_indices = @transform_6, window_bounds = array<i64: 768, 128>}, {pipeline_mode = #tpu.pipeline_mode<synchronous>, transform_indices = @transform_7, window_bounds = array<i64: 1, 128>}, {transform_indices = @transform_8, window_bounds = array<i64: 16, 128>}]} {
    %c0_i32 = arith.constant 0 : i32
    %0 = arith.cmpi eq, %arg1, %c0_i32 : i32
    %1 = arith.extui %0 : i1 to i32
    %c0_i32_0 = arith.constant 0 : i32
    %2 = arith.cmpi ne, %1, %c0_i32_0 : i32
    scf.if %2 {
      %cst_9 = arith.constant 0.000000e+00 : f32
      %12 = vector.broadcast %cst_9 : f32 to vector<16x768xf32>
      %c0_10 = arith.constant 0 : index
      %c0_11 = arith.constant 0 : index
      %13 = vector.load %arg11[%c0_10, %c0_11] : memref<16x768xf32, #tpu.memory_space<vmem>>, vector<16x768xf32>
      tpu.vector_store %arg11[%c0_10, %c0_11], %12 {strides = array<i32>} : memref<16x768xf32, #tpu.memory_space<vmem>>, vector<16x768xf32>,
    } else {
    }
    %c0 = arith.constant 0 : index
    %c0_1 = arith.constant 0 : index
    %3 = vector.load %arg11[%c0, %c0_1] : memref<16x768xf32, #tpu.memory_space<vmem>>, vector<16x768xf32>
    %c0_2 = arith.constant 0 : index
    %c0_3 = arith.constant 0 : index
    %4 = vector.load %arg2[%c0_2, %c0_3] : memref<16x768xbf16, #tpu.memory_space<vmem>>, vector<16x768xbf16>
    %c0_4 = arith.constant 0 : index
    %c0_5 = arith.constant 0 : index
    %5 = vector.load %arg3[%c0_4, %c0_5] : memref<768x768xbf16, #tpu.memory_space<vmem>>, vector<768x768xbf16>
    %cst = arith.constant dense<0.000000e+00> : vector<16x768xf32>
    %6 = tpu.matmul %4, %5, %cst {dimension_numbers = #tpu.dot_dimension_numbers<[1], [0], [0], [1], [0, 0, 1, 1], [], []>} : vector<16x768xbf16>, vector<768x768xbf16>, vector<16x768xf32> -> vector<16x768xf32>
    %7 = arith.addf %3, %6 : vector<16x768xf32>
    %c0_6 = arith.constant 0 : index
    %c0_7 = arith.constant 0 : index
    %8 = vector.load %arg11[%c0_6, %c0_7] : memref<16x768xf32, #tpu.memory_space<vmem>>, vector<16x768xf32>
    tpu.vector_store %arg11[%c0_6, %c0_7], %7 {strides = array<i32>} : memref<16x768xf32, #tpu.memory_space<vmem>>, vector<16x768xf32>,
    %c3_i32 = arith.constant 3 : i32
    %9 = arith.cmpi eq, %arg1, %c3_i32 : i32
    %10 = arith.extui %9 : i1 to i32
    %c0_i32_8 = arith.constant 0 : i32
    %11 = arith.cmpi ne, %10, %c0_i32_8 : i32
    scf.if %11 {
      %c0_9 = arith.constant 0 : index
      %c0_10 = arith.constant 0 : index
      %12 = vector.load %arg11[%c0_9, %c0_10] : memref<16x768xf32, #tpu.memory_space<vmem>>, vector<16x768xf32>
      %c0_11 = arith.constant 0 : index
      %c0_12 = arith.constant 0 : index
      %13 = vector.load %arg4[%c0_11, %c0_12] : memref<1x768xf32, #tpu.memory_space<vmem>>, vector<1x768xf32>
      %c0_13 = arith.constant 0 : index
      %c0_14 = arith.constant 0 : index
      %14 = vector.load %arg5[%c0_13, %c0_14] : memref<16x768xbf16, #tpu.memory_space<vmem>>, vector<16x768xbf16>
      %c0_15 = arith.constant 0 : index
      %c0_16 = arith.constant 0 : index
      %15 = vector.load %arg6[%c0_15, %c0_16] : memref<1x768xf32, #tpu.memory_space<vmem>>, vector<1x768xf32>
      %c0_17 = arith.constant 0 : index
      %c0_18 = arith.constant 0 : index
      %16 = vector.load %arg7[%c0_17, %c0_18] : memref<1x768xf32, #tpu.memory_space<vmem>>, vector<1x768xf32>
      %17 = vector.broadcast %13 : vector<1x768xf32> to vector<16x768xf32>
      %18 = arith.addf %12, %17 : vector<16x768xf32>
      %19 = arith.extf %14 : vector<16x768xbf16> to vector<16x768xf32>
      %20 = arith.addf %18, %19 : vector<16x768xf32>
      %cst_19 = arith.constant dense<0.000000e+00> : vector<16xf32>
      %21 = vector.multi_reduction <add>, %20, %cst_19 [1] : vector<16x768xf32> to vector<16xf32>
      %22 = vector.shape_cast %21 : vector<16xf32> to vector<16x1xf32>
      %cst_20 = arith.constant 7.680000e+02 : f32
      %23 = vector.broadcast %cst_20 : f32 to vector<16x1xf32>
      %24 = arith.divf %22, %23 : vector<16x1xf32>
      %25 = vector.broadcast %24 : vector<16x1xf32> to vector<16x768xf32>
      %26 = arith.subf %20, %25 : vector<16x768xf32>
      %27 = arith.mulf %26, %26 : vector<16x768xf32>
      %cst_21 = arith.constant dense<0.000000e+00> : vector<16xf32>
      %28 = vector.multi_reduction <add>, %27, %cst_21 [1] : vector<16x768xf32> to vector<16xf32>
      %29 = vector.shape_cast %28 : vector<16xf32> to vector<16x1xf32>
      %cst_22 = arith.constant 7.680000e+02 : f32
      %30 = vector.broadcast %cst_22 : f32 to vector<16x1xf32>
      %31 = arith.divf %29, %30 : vector<16x1xf32>
      %32 = vector.broadcast %24 : vector<16x1xf32> to vector<16x768xf32>
      %33 = arith.subf %20, %32 : vector<16x768xf32>
      %cst_23 = arith.constant 9.99999996E-13 : f32
      %34 = vector.broadcast %cst_23 : f32 to vector<16x1xf32>
      %35 = arith.addf %31, %34 : vector<16x1xf32>
      %36 = math.rsqrt %35 : vector<16x1xf32>
      %37 = vector.broadcast %36 : vector<16x1xf32> to vector<16x768xf32>
      %38 = arith.mulf %33, %37 : vector<16x768xf32>
      %39 = vector.broadcast %15 : vector<1x768xf32> to vector<16x768xf32>
      %40 = arith.mulf %38, %39 : vector<16x768xf32>
      %41 = vector.broadcast %16 : vector<1x768xf32> to vector<16x768xf32>
      %42 = arith.addf %40, %41 : vector<16x768xf32>
      %43 = arith.truncf %42 : vector<16x768xf32> to vector<16x768xbf16>
      %c0_24 = arith.constant 0 : index
      %c0_25 = arith.constant 0 : index
      %44 = vector.load %arg8[%c0_24, %c0_25] : memref<768x128xbf16, #tpu.memory_space<vmem>>, vector<768x128xbf16>
      %cst_26 = arith.constant dense<0.000000e+00> : vector<16x128xf32>
      %45 = tpu.matmul %43, %44, %cst_26 {dimension_numbers = #tpu.dot_dimension_numbers<[1], [0], [0], [1], [0, 0, 1, 1], [], []>} : vector<16x768xbf16>, vector<768x128xbf16>, vector<16x128xf32> -> vector<16x128xf32>
      %c0_27 = arith.constant 0 : index
      %c0_28 = arith.constant 0 : index
      %46 = vector.load %arg9[%c0_27, %c0_28] : memref<1x128xf32, #tpu.memory_space<vmem>>, vector<1x128xf32>
      %47 = vector.broadcast %46 : vector<1x128xf32> to vector<16x128xf32>
      %48 = arith.addf %45, %47 : vector<16x128xf32>
      %49 = tpu.iota {dimensions = array<i32: 1>} : vector<16x128xi32>
      %c0_i32_29 = arith.constant 0 : i32
      %50 = vector.broadcast %c0_i32_29 : i32 to vector<16x128xi32>
      %51 = arith.cmpi eq, %49, %50 : vector<16x128xi32>
      %52 = arith.negf %48 : vector<16x128xf32>
      %53 = math.exp %52 : vector<16x128xf32>
      %cst_30 = arith.constant 1.000000e+00 : f32
      %54 = vector.broadcast %cst_30 : f32 to vector<16x128xf32>
      %55 = arith.addf %54, %53 : vector<16x128xf32>
      %56 = arith.divf %54, %55 : vector<16x128xf32>
      %c1_i32 = arith.constant 1 : i32
      %57 = vector.broadcast %c1_i32 : i32 to vector<16x128xi32>
      %58 = arith.cmpi eq, %49, %57 : vector<16x128xi32>
      %59 = math.tanh %48 : vector<16x128xf32>
      %cst_31 = arith.constant 0.000000e+00 : f32
      %60 = vector.broadcast %cst_31 : f32 to vector<16x128xf32>
      %61 = arith.select %58, %59, %60 : vector<16x128xi1>, vector<16x128xf32>
      %62 = arith.select %51, %56, %61 : vector<16x128xi1>, vector<16x128xf32>
      %c0_32 = arith.constant 0 : index
      %c0_33 = arith.constant 0 : index
      %63 = vector.load %arg10[%c0_32, %c0_33] : memref<16x128xf32, #tpu.memory_space<vmem>>, vector<16x128xf32>
      tpu.vector_store %arg10[%c0_32, %c0_33], %62 {strides = array<i32>} : memref<16x128xf32, #tpu.memory_space<vmem>>, vector<16x128xf32>,
    } else {
    }
    return
  }
  func.func @transform_0(%arg0: i32, %arg1: i32) -> (i32, i32) {
    %c0_i32 = arith.constant 0 : i32
    return %arg0, %arg1 : i32, i32
  }
  func.func @transform_1(%arg0: i32, %arg1: i32) -> (i32, i32) {
    %c0_i32 = arith.constant 0 : i32
    %c0_i32_0 = arith.constant 0 : i32
    return %arg1, %c0_i32 : i32, i32
  }
  func.func @transform_2(%arg0: i32, %arg1: i32) -> (i32, i32) {
    %c0_i32 = arith.constant 0 : i32
    %c0_i32_0 = arith.constant 0 : i32
    %c0_i32_1 = arith.constant 0 : i32
    return %c0_i32, %c0_i32_0 : i32, i32
  }
  func.func @transform_3(%arg0: i32, %arg1: i32) -> (i32, i32) {
    %c0_i32 = arith.constant 0 : i32
    %c0_i32_0 = arith.constant 0 : i32
    return %arg0, %c0_i32 : i32, i32
  }
  func.func @transform_4(%arg0: i32, %arg1: i32) -> (i32, i32) {
    %c0_i32 = arith.constant 0 : i32
    %c0_i32_0 = arith.constant 0 : i32
    %c0_i32_1 = arith.constant 0 : i32
    return %c0_i32, %c0_i32_0 : i32, i32
  }
  func.func @transform_5(%arg0: i32, %arg1: i32) -> (i32, i32) {
    %c0_i32 = arith.constant 0 : i32
    %c0_i32_0 = arith.constant 0 : i32
    %c0_i32_1 = arith.constant 0 : i32
    return %c0_i32, %c0_i32_0 : i32, i32
  }
  func.func @transform_6(%arg0: i32, %arg1: i32) -> (i32, i32) {
    %c0_i32 = arith.constant 0 : i32
    %c0_i32_0 = arith.constant 0 : i32
    %c0_i32_1 = arith.constant 0 : i32
    return %c0_i32, %c0_i32_0 : i32, i32
  }
  func.func @transform_7(%arg0: i32, %arg1: i32) -> (i32, i32) {
    %c0_i32 = arith.constant 0 : i32
    %c0_i32_0 = arith.constant 0 : i32
    %c0_i32_1 = arith.constant 0 : i32
    return %c0_i32, %c0_i32_0 : i32, i32
  }
  func.func @transform_8(%arg0: i32, %arg1: i32) -> (i32, i32) {
    %c0_i32 = arith.constant 0 : i32
    %c0_i32_0 = arith.constant 0 : i32
    return %arg0, %c0_i32 : i32, i32
  }
}

</mosaic_0001>

<bundles_post_ra>
// kernel: metaphor_forward.11
= control target key start
LH: loop header
LB: loop body
LE: loop exit
PB: predicated region body
PF: predicated region fallthrough
CT: control target
= control target key end

     0   :  { %v101_v63 = vlaneseq  ;;  %s384_s0 = inlined_call_operand.vmem [shape: f32[16,768], index: 0, kind: input, shape index: {}]   ;;  %s385_s1 = inlined_call_operand.vmem [shape: f32[1,768], index: 1, kind: input, shape index: {}]   ;;  %s386_s2 = inlined_call_operand.vmem [shape: f32[1,768], index: 2, kind: input, shape index: {}]   ;;  %s387_s3 = inlined_call_operand.vmem [shape: bf16[16,768], index: 3, kind: output, shape index: {}]  }
   0x1   :  { %v14_v0 = vld [vmem:[%s384_s0] sm:$0xff]  ;;  %v15_v1 = vld [vmem:[%s384_s0 + $0x8] sm:$0xff]  ;;  %v16_v2 = vld [vmem:[%s384_s0 + $0x10] sm:$0xff] }
   0x2   :  { %v17_v3 = vld [vmem:[%s384_s0 + $0x18] sm:$0xff]  ;;  %v26_v4 = vadd.f32 %v15_v1, %v14_v0  ;;  %v20_v5 = vld [vmem:[%s384_s0 + $0x30] sm:$0xff]  ;;  %v22_v7 = vld [vmem:[%s384_s0 + $0x40] sm:$0xff] }
   0x3   :  { %v21_v6 = vld [vmem:[%s384_s0 + $0x38] sm:$0xff]  ;;  %v18_v10 = vld [vmem:[%s384_s0 + $0x20] sm:$0xff]  ;;  %v23_v11 = vld [vmem:[%s384_s0 + $0x48] sm:$0xff] }
   0x4   :  { %v27_v8 = vadd.f32 %v26_v4, %v16_v2  ;;  %v33_v9 = vadd.f32 %v21_v6, %v20_v5  ;;  %v19_v14 = vld [vmem:[%s384_s0 + $0x28] sm:$0xff]  ;;  %v24_v15 = vld [vmem:[%s384_s0 + $0x50] sm:$0xff]  ;;  %v25_v18 = vld [vmem:[%s384_s0 + $0x58] sm:$0xff] }
   0x6   :  { %v28_v12 = vadd.f32 %v27_v8, %v17_v3  ;;  %v34_v13 = vadd.f32 %v33_v9, %v22_v7 }
   0x8   :  { %v29_v16 = vadd.f32 %v28_v12, %v18_v10  ;;  %v35_v17 = vadd.f32 %v34_v13, %v23_v11 }
   0xa   :  { %v30_v19 = vadd.f32 %v29_v16, %v19_v14  ;;  %v36_v20 = vadd.f32 %v35_v17, %v24_v15 }
   0xc   :  { %31 = vadd.xlane.f32.xlu0 %v30_v19  ;;  %v37_v21 = vadd.f32 %v36_v20, %v25_v18 }
  0x10   :  { %38 = vadd.xlane.f32.xlu0 %v37_v21 }
  0x95   :  { %v32_v22 = vpop.xlane.xlu0 %31 }
  0x96   :  { %v41_v23 = vmul.f32 0.0013020834, %v32_v22 }
  0x98   :  { %v305_v24 = vsub.f32 %v14_v0, %v41_v23  ;;  %v307_v25 = vsub.f32 %v15_v1, %v41_v23  ;;  %v309_v26 = vsub.f32 %v16_v2, %v41_v23  ;;  %v311_v28 = vsub.f32 %v17_v3, %v41_v23 }
  0x99   :  { %v39_v27 = vpop.xlane.xlu0 %38  ;;  %v317_v32 = vsub.f32 %v18_v10, %v41_v23  ;;  %v48_v38 = vsub.f32 %v19_v14, %v41_v23  ;;  %v102_v3 = vshrl.u32 %v101_v63, 7 }
  0x9a   :  { %v42_v29 = vmul.f32 0.0013020834, %v39_v27  ;;  %v55_v30 = vmul.f32 %v305_v24, %v305_v24  ;;  %v56_v31 = vmul.f32 %v307_v25, %v307_v25  ;;  %v57_v33 = vmul.f32 %v309_v26, %v309_v26 }
  0x9b   :  { %v58_v39 = vmul.f32 %v311_v28, %v311_v28  ;;  %v59_v44 = vmul.f32 %v317_v32, %v317_v32  ;;  %v60_v49 = vmul.f32 %v48_v38, %v48_v38  ;;  %v103_v4 = vsub.s32 0, %v102_v3 }
  0x9c   :  { %v67_v34 = vadd.f32 %v56_v31, %v55_v30  ;;  %v321_v35 = vsub.f32 %v20_v5, %v42_v29  ;;  %v323_v36 = vsub.f32 %v21_v6, %v42_v29  ;;  %v325_v37 = vsub.f32 %v22_v7, %v42_v29  ;;  %v99_v6 = vld [vmem:[%s385_s1] sm:$0x3f] }
  0x9d   :  { %v329_v41 = vsub.f32 %v23_v11, %v42_v29  ;;  %v337_v46 = vsub.f32 %v24_v15, %v42_v29  ;;  %v341_v51 = vsub.f32 %v25_v18, %v42_v29  ;;  %v107_v5 = vsub.s32 1, %v102_v3  ;;  %v143_v11 = vld [vmem:[%s386_s2] sm:$0x3f] }
  0x9e   :  { %v68_v40 = vadd.f32 %v67_v34, %v57_v33  ;;  %v61_v42 = vmul.f32 %v321_v35, %v321_v35  ;;  %v62_v43 = vmul.f32 %v323_v36, %v323_v36  ;;  %v63_v47 = vmul.f32 %v325_v37, %v325_v37 }
  0x9f   :  { %v64_v52 = vmul.f32 %v329_v41, %v329_v41  ;;  %v65_v55 = vmul.f32 %v337_v46, %v337_v46  ;;  %v66_v57 = vmul.f32 %v341_v51, %v341_v51  ;;  %v111_v7 = vsub.s32 2, %v102_v3 }
  0xa0   :  { %v69_v45 = vadd.f32 %v68_v40, %v58_v39  ;;  %v74_v48 = vadd.f32 %v62_v43, %v61_v42  ;;  %v115_v8 = vsub.s32 3, %v102_v3  ;;  %v119_v9 = vsub.s32 4, %v102_v3 }
  0xa1   :  { %v123_v10 = vsub.s32 5, %v102_v3  ;;  %v104_v12 = vrot.slane %v99_v6, %v103_v4  ;;  %v108_v13 = vrot.slane %v99_v6, %v107_v5  ;;  %v112_v14 = vrot.slane %v99_v6, %v111_v7 }
  0xa2   :  { %v70_v50 = vadd.f32 %v69_v45, %v59_v44  ;;  %v75_v53 = vadd.f32 %v74_v48, %v63_v47  ;;  %v116_v15 = vrot.slane %v99_v6, %v115_v8  ;;  %v120_v16 = vrot.slane %v99_v6, %v119_v9 }
  0xa3   :  { %v124_v17 = vrot.slane %v99_v6, %v123_v10  ;;  %v148_v19 = vrot.slane %v143_v11, %v103_v4  ;;  %v152_v20 = vrot.slane %v143_v11, %v107_v5  ;;  %v156_v21 = vrot.slane %v143_v11, %v111_v7 }
  0xa4   :  { %v71_v54 = vadd.f32 %v70_v50, %v60_v49  ;;  %v76_v56 = vadd.f32 %v75_v53, %v64_v52  ;;  %v160_v22 = vrot.slane %v143_v11, %v115_v8  ;;  %v164_v31 = vrot.slane %v143_v11, %v119_v9 }
  0xa5   :  { %v168_v33 = vrot.slane %v143_v11, %v123_v10 }
  0xa6   :  { %72 = vadd.xlane.f32.xlu1 %v71_v54  ;;  %v77_v58 = vadd.f32 %v76_v56, %v65_v55 }
  0xa8   :  { %v78_v59 = vadd.f32 %v77_v58, %v66_v57 }
  0xaa   :  { %79 = vadd.xlane.f32.xlu1 %v78_v59 }
 0x12f   :  { %v73_v60 = vpop.xlane.xlu1 %72 }
 0x130   :  { %v81_v61 = vmul.f32 0.0013020834, %v73_v60 }
 0x132   :  { %v83_v62 = vadd.f32 1e-12, %v81_v61 }
 0x133   :  { %v80_v0 = vpop.xlane.xlu1 %79 }
 0x134   :  { %245 = vrsqrt.f32 %v83_v62  ;;  %v82_v1 = vmul.f32 0.0013020834, %v80_v0 }
 0x136   :  { %v84_v2 = vadd.f32 1e-12, %v82_v1 }
 0x138   :  { %247 = vrsqrt.f32 %v84_v2 }
 0x141   :  { %v246_v18 = vpop.eup %245 }
 0x142   :  { %v87_v23 = vmul.f32 %v246_v18, %v305_v24  ;;  %v88_v27 = vmul.f32 %v246_v18, %v307_v25  ;;  %v89_v29 = vmul.f32 %v246_v18, %v309_v26  ;;  %v90_v30 = vmul.f32 %v246_v18, %v311_v28 }
 0x143   :  { %v91_v34 = vmul.f32 %v246_v18, %v317_v32  ;;  %v92_v39 = vmul.f32 %v246_v18, %v48_v38 }
 0x144   :  { %v131_v40 = vmul.f32 %v104_v12, %v87_v23  ;;  %v132_v42 = vmul.f32 %v108_v13, %v88_v27  ;;  %v133_v43 = vmul.f32 %v112_v14, %v89_v29  ;;  %v134_v44 = vmul.f32 %v116_v15, %v90_v30 }
 0x145   :  { %v248_v45 = vpop.eup %247  ;;  %v135_v47 = vmul.f32 %v120_v16, %v91_v34  ;;  %v136_v48 = vmul.f32 %v124_v17, %v92_v39 }
 0x146   :  { %v175_v49 = vadd.f32 %v148_v19, %v131_v40  ;;  %v176_v24 = vadd.f32 %v152_v20, %v132_v42  ;;  %v177_v50 = vadd.f32 %v156_v21, %v133_v43  ;;  %v178_v25 = vadd.f32 %v160_v22, %v134_v44 }
 0x147   :  { %v179_v52 = vadd.f32 %v164_v31, %v135_v47  ;;  %v180_v26 = vadd.f32 %v168_v33, %v136_v48  ;;  %v93_v28 = vmul.f32 %v248_v45, %v321_v35  ;;  %v94_v53 = vmul.f32 %v248_v45, %v323_v36 }
 0x148   :  { %v239_v54 = vpack.c.bf16 %v176_v24, %v175_v49  ;;  %v240_v32 = vpack.c.bf16 %v178_v25, %v177_v50  ;;  %v95_v38 = vmul.f32 %v248_v45, %v325_v37  ;;  %v96_v55 = vmul.f32 %v248_v45, %v329_v41 }
 0x149   :  { %v241_v56 = vpack.c.bf16 %v180_v26, %v179_v52  ;;  %v97_v57 = vmul.f32 %v248_v45, %v337_v46  ;;  %v98_v58 = vmul.f32 %v248_v45, %v341_v51  ;;  %v137_v59 = vmul.f32 %v104_v12, %v93_v28 }
 0x14a   :  { %223 = vst [vmem:[%s387_s3] sm:$0xff] %v239_v54  ;;  %224 = vst [vmem:[%s387_s3 + $0x8] sm:$0xff] %v240_v32  ;;  %v138_v35 = vmul.f32 %v108_v13, %v94_v53  ;;  %v139_v36 = vmul.f32 %v112_v14, %v95_v38  ;;  %v140_v60 = vmul.f32 %v116_v15, %v96_v55 }
 0x14b   :  { %225 = vst [vmem:[%s387_s3 + $0x10] sm:$0xff] %v241_v56  ;;  %v141_v37 = vmul.f32 %v120_v16, %v97_v57  ;;  %v142_v41 = vmul.f32 %v124_v17, %v98_v58  ;;  %v181_v46 = vadd.f32 %v148_v19, %v137_v59 }
 0x14c   :  { %v182_v51 = vadd.f32 %v152_v20, %v138_v35  ;;  %v183_v61 = vadd.f32 %v156_v21, %v139_v36  ;;  %v184_v62 = vadd.f32 %v160_v22, %v140_v60 }
 0x14d   :  { %v185_v63 = vadd.f32 %v164_v31, %v141_v37  ;;  %v186_v0 = vadd.f32 %v168_v33, %v142_v41 }
 0x14e   :  { %v242_v1 = vpack.c.bf16 %v182_v51, %v181_v46  ;;  %v243_v2 = vpack.c.bf16 %v184_v62, %v183_v61 }
 0x14f   :  { %v244_v3 = vpack.c.bf16 %v186_v0, %v185_v63 }
 0x150   :  { %226 = vst [vmem:[%s387_s3 + $0x18] sm:$0xff] %v242_v1  ;;  %227 = vst [vmem:[%s387_s3 + $0x20] sm:$0xff] %v243_v2 }
 0x151   :  { %228 = vst [vmem:[%s387_s3 + $0x28] sm:$0xff] %v244_v3 }

// kernel: metaphor_forward.13
= control target key start
LH: loop header
LB: loop body
LE: loop exit
PB: predicated region body
PF: predicated region fallthrough
CT: control target
= control target key end

     0   :  { %s870_s15 = smov 0   ;;  %s872_s16 = smov 0   ;;  %s977_s0 = inlined_call_operand.vmem [shape: bf16[2,8,2304], index: 0, kind: input, shape index: {}, may-alias: {0,1,2}]   ;;  %s978_s1 = inlined_call_operand.vmem [shape: bf16[2,8,2304], index: 1, kind: input, shape index: {}, may-alias: {0,1,2}]   ;;  %s979_s2 = inlined_call_operand.vmem [shape: bf16[2,8,2304], index: 2, kind: input, shape index: {}, may-alias: {0,1,2}]   ;;  %s980_s3 = inlined_call_operand.vmem [shape: f32[2,1,8], index: 3, kind: input, shape index: {}]   ;;  %s981_s4 = inlined_call_operand.vmem [shape: bf16[2,8,768], index: 4, kind: output, shape index: {}]  }
   0x1   :  { %s874_s17 = smov 0   ;;  %s876_s18 = smov 0  }
   0x2   :  { %s878_s19 = smov 0  }
   0x3 LB: > { %s23_s20 = sadd.s32 1, %s832_s17  ;;  %s26_s21 = sadd.s32 1, %s836_s18  ;;  %s840_s19 = sphi %s878_s19, %s14_s19   ;;  %s836_s18 = sphi %s876_s18, %s985_s18   ;;  %s832_s17 = sphi %s874_s17, %s984_s17   ;;  %s828_s16 = sphi %s872_s16, %s983_s16   ;;  %s824_s15 = sphi %s870_s15, %s982_s15  }
   0x4   : > { %p24_p0 = scmp.ge.s32.totalorder %s23_s20, 6  ;;  %p700_p1 = scmp.ge.s32.totalorder %s840_s19, 1 }
   0x5   : > { %p227_p2 = scmp.lt.s32.totalorder %s840_s19, 13 }
   0x6   : > { %s987_s20 = smov (%p24_p0, %s23_s20), 0  ;;  %s989_s21 = smov (!%p24_p0, %s26_s21), %s836_s18 }
   0x7   : > { %p228_p3 = pnand %p700_p1, %p227_p2  ;;  %p28_p4 = scmp.ge.s32.totalorder %s989_s21, 2 }
   0x8   : > { %p280_p5 = scmp.lt.s32.totalorder (!%p228_p3), %s828_s16, 1  ;;  %s288_s22 = sadd.s32 (!%p228_p3), 6, %s824_s15 }
   0x9   : > { %s991_s21 = smov (%p28_p4, %s989_s21), 0  ;;  %231 = sbr.rel (%p228_p3) target bundleno = 1367 (0x557), region = 36 }
   0xa   : > { %p291_p6 = scmp.lt.s32.totalorder (!%p228_p3), %s288_s22, 17  ;;  %p282_p7 = scmp.lt.s32.totalorder (!%p228_p3), %s824_s15, 17 }
   0xb   : > { %s844_s12 = smov (!%p228_p3), 64   ;;  %s298_s13 = sadd.s32 (!%p228_p3), 12, %s824_s15 }
   0xc   : > { %p301_p8 = scmp.lt.s32.totalorder (!%p228_p3), %s298_s13, 17  ;;  %p313_p9 = scmp.lt.s32.totalorder (!%p228_p3), %s824_s15, 5 }
   0xe   : > { %v842_v0 = vmov 0.0   ;;  %vm843_vm0 = vmmov 0   ;;  %s993_s16 = smov (!%p280_p5, %s828_s16), 1  ;;  %s995_s22 = smov (!%p291_p6, %s288_s22), 17  ;;  %vm332_vm1 = vcmask 523264   ;;  %vm379_vm2 = vcmask 64512  }
   0xf   : > { %723 = vmatprep.subr.bf16.mxu0 %v842_v0  ;;  %725 = vmatprep.mubr.msk.bf16.mxu0 %vm843_vm0, %v842_v0  ;;  %s913_s23 = smul.u32 18, %s993_s16  ;;  %s310_s11 = scalar_lea.vmem %s980_s3, %s993_s16  ;;  %vm395_vm3 = vcmask 1043456  }
  0x10   : > { %729 = vmatprep.subr.bf16.mxu1 %v842_v0  ;;  %731 = vmatprep.mubr.msk.bf16.mxu1 %vm843_vm0, %v842_v0  ;;  %s283_s24 = scalar_select %p282_p7, %s824_s15, 17  ;;  %v705_v5 = vld [vmem:[%s310_s11] ss:$0 sm:$0xff] }
  0x11   : > { %s294_s25 = sadd.s32 %s913_s23, %s995_s22  ;;  %s997_s13 = smov (!%p301_p8, %s298_s13), 17 }
  0x12   : > { %s702_s26 = sshll.u32 %s294_s25, 2  ;;  %s285_s27 = sadd.s32 %s913_s23, %s283_s24 }
  0x13   : > { %s296_s30 = scalar_lea.vmem %s978_s1, %s702_s26  ;;  %s701_s5 = sshll.u32 %s285_s27, 2 }
  0x14   : > { %v322_v1 = vld [vmem:[%s296_s30] sm:$0xf]  ;;  %s287_s8 = scalar_lea.vmem %s977_s0, %s701_s5  ;;  %s304_s14 = sadd.s32 %s913_s23, %s997_s13 }
  0x15   : > { %v337_v2 = vsel %vm332_vm1, %v322_v1, 0  ;;  %v321_v3 = vld [vmem:[%s287_s8] sm:$0xf]  ;;  %v709_v12 = vcombine.low %v322_v1, %v322_v1  ;;  %s703_s22 = sshll.u32 %s304_s14, 2  ;;  %s748_s23 = smul.u32 6, %s993_s16 }
  0x16   : > { %724 = vmatpush3.bf16.xpose.msra.mxu0 %v337_v2  ;;  %v325_v4 = vmul.bf16 1040203264, %v321_v3  ;;  %s306_s26 = scalar_lea.vmem %s979_s2, %s703_s22  ;;  %s999_s15 = smov (!%p313_p9, %s824_s15), 5 }
  0x17   : > { %741 = vmatprep.subr.bf16.mxu0 %v842_v0  ;;  %447 = vrot.lane.b32.xlu1 %v709_v12, %s844_s12  ;;  %v323_v19 = vld [vmem:[%s306_s26] sm:$0xf]  ;;  %s316_s27 = sadd.s32 %s748_s23, %s999_s15 }
  0x18   : > { %v708_v13 = vcombine.low %v325_v4, %v325_v4  ;;  %v397_v20 = vsel %vm395_vm3, %v323_v19, 0  ;;  %v711_v38 = vcombine.low %v323_v19, %v323_v19  ;;  %s704_s28 = sshll.u32 %s316_s27, 2 }
  0x19   : > { %730 = vmatpush3.bf16.msra.mxu1 %v397_v20  ;;  %s318_s5 = scalar_lea.vmem %s981_s4, %s704_s28 }
  0x1a   : > { %735 = vmatprep.subr.bf16.mxu1 %v842_v0 }
  0x1b   : > { %442 = vrot.lane.b32.xlu1 %v708_v13, %s844_s12 }
  0x1d   : > { %726 = vmatmul.mubr.msk.bf16.vlgmr.msra.gmra.mxu0 %vm332_vm1, %v325_v4 }
  0x1e   : > { %743 = vmatprep.mubr.msk.bf16.mxu0 %vm843_vm0, %v842_v0 }
  0x89   : > { %v448_v23 = vpop.permute.xlu1 %447 }
  0x8a   : > { %v453_v25 = vsel %vm332_vm1, %v448_v23, 0 }
  0x8d   : > { %v443_v27 = vpop.permute.xlu1 %442 }
  0xdd   : > { %v373_v6 = vpop.f32.mrf.mxu0 }
  0xde   : > { %v374_v7 = vadd.f32 %v705_v5, %v373_v6 }
  0xdf   : > { %v727_v8 = vpop.f32.mrf.mxu0 }
  0xe0   : > { %v380_v9 = vsel %vm379_vm2, %v374_v7, -inf }
  0xe1   : > { %381 = vmax.xlane.f32.xlu0 %v380_v9  ;;  %v376_v10 = vpop.f32.mrf.mxu0 }
  0xe3   : > { %v728_v11 = vpop.f32.mrf.mxu0 }
 0x16a   : > { %v382_v14 = vpop.xlane.xlu0 %381 }
 0x16b   : > { %v383_v15 = vsub.f32 %v374_v7, %v382_v14 }
 0x16d   : > { %v384_v16 = vmul.f32 1.442695, %v383_v15 }
 0x16f   : > { %794 = vpow2.f32 %v384_v16 }
 0x17c   : > { %v795_v17 = vpop.eup %794 }
 0x17d   : > { %v386_v18 = vsel %vm379_vm2, %v795_v17, 0.0 }
 0x17e   : > { %387 = vadd.xlane.f32.xlu0 %v386_v18 }
 0x207   : > { %v388_v21 = vpop.xlane.xlu0 %387 }
 0x208   : > { %796 = vrcp.f32 %v388_v21 }
 0x215   : > { %v797_v22 = vpop.eup %796 }
 0x216   : > { %v390_v24 = vmul.f32 %v797_v22, %v795_v17 }
 0x218   : > { %v391_v26 = vpack.c.bf16 %v390_v24, %v390_v24 }
 0x21a   : > { %732 = vmatmul.mubr.msk.bf16.vlgmr.msra.gmra.mxu1 %vm379_vm2, %v391_v26 }
 0x21b   : > { %736 = vmatpush3.bf16.xpose.msra.mxu1 %v453_v25  ;;  %737 = vmatprep.mubr.msk.bf16.mxu1 %vm843_vm0, %v842_v0 }
 0x222   : > { %738 = vmatmul.mubr.msk.bf16.vlgmr.msra.gmra.mxu1 %vm332_vm1, %v443_v27 }
 0x2da   : > { %v433_v28 = vpop.f32.mrf.mxu1 }
 0x2dc   : > { %v733_v29 = vpop.f32.mrf.mxu1 }
 0x2de   : > { %v436_v30 = vpop.f32.mrf.mxu1 }
 0x2e0   : > { %v734_v31 = vpop.f32.mrf.mxu1 }
 0x2e2   : > { %v489_v32 = vpop.f32.mrf.mxu1 }
 0x2e3   : > { %v490_v33 = vadd.f32 %v705_v5, %v489_v32 }
 0x2e4   : > { %v739_v34 = vpop.f32.mrf.mxu1 }
 0x2e5   : > { %v495_v35 = vsel %vm379_vm2, %v490_v33, -inf }
 0x2e6   : > { %496 = vmax.xlane.f32.xlu0 %v495_v35  ;;  %v492_v36 = vpop.f32.mrf.mxu1 }
 0x2e8   : > { %v740_v37 = vpop.f32.mrf.mxu1 }
 0x2fc   : > { %510 = vrot.lane.b32.xlu0 %v711_v38, %s844_s12 }
 0x36f   : > { %v497_v39 = vpop.xlane.xlu0 %496 }
 0x370   : > { %v498_v40 = vsub.f32 %v490_v33, %v497_v39 }
 0x372   : > { %v499_v41 = vmul.f32 1.442695, %v498_v40 }
 0x373   : > { %v511_v44 = vpop.permute.xlu0 %510 }
 0x374   : > { %798 = vpow2.f32 %v499_v41  ;;  %v516_v45 = vsel %vm395_vm3, %v511_v44, 0 }
 0x375   : > { %742 = vmatpush3.bf16.msra.mxu0 %v516_v45 }
 0x381   : > { %v799_v42 = vpop.eup %798 }
 0x382   : > { %v501_v43 = vsel %vm379_vm2, %v799_v42, 0.0 }
 0x383   : > { %502 = vadd.xlane.f32.xlu1 %v501_v43 }
 0x40c   : > { %v503_v46 = vpop.xlane.xlu1 %502 }
 0x40d   : > { %800 = vrcp.f32 %v503_v46 }
 0x41a   : > { %v801_v47 = vpop.eup %800 }
 0x41b   : > { %v505_v48 = vmul.f32 %v801_v47, %v799_v42 }
 0x41d   : > { %v506_v49 = vpack.c.bf16 %v505_v48, %v505_v48 }
 0x41f   : > { %744 = vmatmul.mubr.msk.bf16.vlgmr.msra.gmra.mxu0 %vm379_vm2, %v506_v49 }
 0x4df   : > { %v552_v50 = vpop.f32.mrf.mxu0 }
 0x4e0   : > { %559 = vrot.lane.b32.xlu0 %v552_v50, %s844_s12 }
 0x4e1   : > { %v745_v51 = vpop.f32.mrf.mxu0 }
 0x4e3   : > { %v555_v52 = vpop.f32.mrf.mxu0 }
 0x4e5   : > { %v746_v53 = vpop.f32.mrf.mxu0 }
 0x552   : > { %v560_v54 = vpop.permute.xlu0 %559 }
 0x553   : > { %v562_v55 = vsel %vm332_vm1, %v433_v28, %v560_v54 }
 0x554   : > { %v563_v56 = vpack.c.bf16 %v562_v55, %v562_v55 }
 0x556   : > { %564 = vst [vmem:[%s318_s5] sm:$0xf] %v563_v56 }
 0x557 PF: > { %s14_s19 = sadd.s32 1, %s840_s19   ;;  %s982_s15 = smov %s832_s17 }
 0x558   : > { %p11_p10 = scmp.ge.s32.totalorder %s14_s19, 14   ;;  %s983_s16 = smov %s836_s18 }
 0x559   : > { %s984_s17 = smov %s987_s20  ;;  %s985_s18 = smov %s991_s21 }
 0x55a   :  { %13 = sbr.rel (!%p11_p10) target bundleno = 3 (0x3), region = 75 }

// kernel: metaphor_forward.12
= control target key start
LH: loop header
LB: loop body
LE: loop exit
PB: predicated region body
PF: predicated region fallthrough
CT: control target
= control target key end

     0   :  { %s4044_s12 = smov 0   ;;  %s4046_s13 = smov 0   ;;  %s5082_s0 = inlined_call_operand.vmem [shape: bf16[16,768], index: 0, kind: input, shape index: {}]   ;;  %s5083_s1 = inlined_call_operand.vmem [shape: bf16[768,2304], index: 1, kind: input, shape index: {}]   ;;  %s5084_s2 = inlined_call_operand.vmem [shape: f32[1,2304], index: 2, kind: input, shape index: {}]   ;;  %s5085_s3 = inlined_call_operand.vmem [shape: bf16[16,2304], index: 3, kind: output, shape index: {}]  }
   0x1   :  { %s4048_s14 = smov 0   ;;  %s4050_s15 = smov 0  }
   0x2   :  { %s4052_s16 = smov 0  }
   0x3 LB: > { %s25_s17 = sadd.s32 1, %s4018_s15  ;;  %s3177_s18 = sadd.s32 4294967295, %s4022_s16   ;;  %s4022_s16 = sphi %s4052_s16, %s13_s16   ;;  %s4018_s15 = sphi %s4050_s15, %s5090_s15   ;;  %s4014_s14 = sphi %s4048_s14, %s5089_s14   ;;  %s4010_s13 = sphi %s4046_s13, %s5088_s13   ;;  %s4006_s12 = sphi %s4044_s12, %s5087_s12  }
   0x4   : > { %p27_p0 = scmp.ge.s32.totalorder %s25_s17, 3  ;;  %p65_p1 = scmp.ne.s32.totalorder %s4010_s13, %s4006_s12 }
   0x5   : > { %p66_p2 = scmp.eq.s32.totalorder %s4022_s16, 0  ;;  %p123_p4 = scmp.eq.s32.totalorder %s3177_s18, 2 }
   0x6   : > { %s5092_s17 = smov (%p27_p0, %s25_s17), 0  ;;  %s58_s20 = sadd.s32 1, %s4010_s13 }
   0x7   : > { %p67_p3 = por %p66_p2, %p65_p1  ;;  %s55_s19 = ssub.s32 %s4018_s15, %s5092_s17 }
   0x8   : > { %p56_p5 = scmp.eq.s32.totalorder %s55_s19, 0  ;;  %p4079_p6 = por %p123_p4, %p65_p1 }
   0x9   : > { %p3181_p7 = scmp.ge.s32.totalorder %s4022_s16, 3 }
   0xa   : > { %s4084_s22 = scalar_select %p56_p5, %s4010_s13, %s58_s20  }
   0xb   : > { %155 = sbr.rel (%p3181_p7) target bundleno = 165 (0xa5), region = 20 }
  0x10   : > { %158 = sbr.rel (!%p67_p3) target bundleno = 165 (0xa5), region = 24  ;;  %s160_s23 = sand.u32 (%p67_p3), 1, %s4010_s13  }
  0x11   : > { %s3487_s24 = smul.u32 (%p67_p3), 24, %s4018_s15 }
  0x12   : > { %s3495_s25 = smul.u32 (%p67_p3), 2304, %s160_s23 }
  0x13   : > { %s4092_s28 = scalar_lea.vmem (%p67_p3), %s5083_s1, %s3487_s24 }
  0x14   : > { %v178_v0 = vld [vmem:[%s4092_s28] sm:$0xff] (%p67_p3)  ;;  %v180_v1 = vld [vmem:[%s4092_s28 + $0x8] sm:$0xff] (%p67_p3)  ;;  %v182_v2 = vld [vmem:[%s4092_s28 + $0x10] sm:$0xff] (%p67_p3)  ;;  %s4097_s29 = scalar_lea.vmem (%p67_p3), [#allocation2], %s3495_s25 }
  0x15   : > { %179 = vst [vmem:[%s4097_s29] sm:$0xff] %v178_v0  ;;  %181 = vst [vmem:[%s4097_s29 + $0x8] sm:$0xff] %v180_v1  ;;  %v184_v3 = vld [vmem:[%s4092_s28 + $0x48] sm:$0xff]  ;;  %v186_v4 = vld [vmem:[%s4092_s28 + $0x50] sm:$0xff] }
  0x16   : > { %183 = vst [vmem:[%s4097_s29 + $0x10] sm:$0xff] %v182_v2  ;;  %v188_v5 = vld [vmem:[%s4092_s28 + $0x58] sm:$0xff]  ;;  %185 = vst [vmem:[%s4097_s29 + $0x18] sm:$0xff] %v184_v3  ;;  %v190_v6 = vld [vmem:[%s4092_s28 + $0x90] sm:$0xff] }
  0x17   : > { %187 = vst [vmem:[%s4097_s29 + $0x20] sm:$0xff] %v186_v4  ;;  %189 = vst [vmem:[%s4097_s29 + $0x28] sm:$0xff] %v188_v5  ;;  %v192_v7 = vld [vmem:[%s4092_s28 + $0x98] sm:$0xff]  ;;  %v194_v8 = vld [vmem:[%s4092_s28 + $0xa0] sm:$0xff] }
  0x18   : > { %191 = vst [vmem:[%s4097_s29 + $0x30] sm:$0xff] %v190_v6  ;;  %193 = vst [vmem:[%s4097_s29 + $0x38] sm:$0xff] %v192_v7  ;;  %v196_v9 = vld [vmem:[%s4092_s28 + $0xd8] sm:$0xff]  ;;  %v198_v10 = vld [vmem:[%s4092_s28 + $0xe0] sm:$0xff] }
  0x19   : > { %195 = vst [vmem:[%s4097_s29 + $0x40] sm:$0xff] %v194_v8  ;;  %v200_v11 = vld [vmem:[%s4092_s28 + $0xe8] sm:$0xff]  ;;  %197 = vst [vmem:[%s4097_s29 + $0x48] sm:$0xff] %v196_v9  ;;  %v202_v12 = vld [vmem:[%s4092_s28 + $0x120] sm:$0xff] }
  0x1a   : > { %199 = vst [vmem:[%s4097_s29 + $0x50] sm:$0xff] %v198_v10  ;;  %201 = vst [vmem:[%s4097_s29 + $0x58] sm:$0xff] %v200_v11  ;;  %v204_v13 = vld [vmem:[%s4092_s28 + $0x128] sm:$0xff]  ;;  %v206_v14 = vld [vmem:[%s4092_s28 + $0x130] sm:$0xff] }
  0x1b   : > { %203 = vst [vmem:[%s4097_s29 + $0x60] sm:$0xff] %v202_v12  ;;  %205 = vst [vmem:[%s4097_s29 + $0x68] sm:$0xff] %v204_v13  ;;  %v208_v15 = vld [vmem:[%s4092_s28 + $0x168] sm:$0xff]  ;;  %v210_v16 = vld [vmem:[%s4092_s28 + $0x170] sm:$0xff] }
  0x1c   : > { %207 = vst [vmem:[%s4097_s29 + $0x70] sm:$0xff] %v206_v14  ;;  %v212_v17 = vld [vmem:[%s4092_s28 + $0x178] sm:$0xff]  ;;  %209 = vst [vmem:[%s4097_s29 + $0x78] sm:$0xff] %v208_v15  ;;  %v214_v18 = vld [vmem:[%s4092_s28 + $0x1b0] sm:$0xff] }
  0x1d   : > { %211 = vst [vmem:[%s4097_s29 + $0x80] sm:$0xff] %v210_v16  ;;  %213 = vst [vmem:[%s4097_s29 + $0x88] sm:$0xff] %v212_v17  ;;  %v216_v19 = vld [vmem:[%s4092_s28 + $0x1b8] sm:$0xff]  ;;  %v218_v20 = vld [vmem:[%s4092_s28 + $0x1c0] sm:$0xff] }
  0x1e   : > { %215 = vst [vmem:[%s4097_s29 + $0x90] sm:$0xff] %v214_v18  ;;  %217 = vst [vmem:[%s4097_s29 + $0x98] sm:$0xff] %v216_v19  ;;  %v220_v21 = vld [vmem:[%s4092_s28 + $0x1f8] sm:$0xff]  ;;  %v222_v22 = vld [vmem:[%s4092_s28 + $0x200] sm:$0xff] }
  0x1f   : > { %219 = vst [vmem:[%s4097_s29 + $0xa0] sm:$0xff] %v218_v20  ;;  %v224_v23 = vld [vmem:[%s4092_s28 + $0x208] sm:$0xff]  ;;  %221 = vst [vmem:[%s4097_s29 + $0xa8] sm:$0xff] %v220_v21  ;;  %v226_v24 = vld [vmem:[%s4092_s28 + $0x240] sm:$0xff] }
  0x20   : > { %223 = vst [vmem:[%s4097_s29 + $0xb0] sm:$0xff] %v222_v22  ;;  %225 = vst [vmem:[%s4097_s29 + $0xb8] sm:$0xff] %v224_v23  ;;  %v228_v25 = vld [vmem:[%s4092_s28 + $0x248] sm:$0xff]  ;;  %v230_v26 = vld [vmem:[%s4092_s28 + $0x250] sm:$0xff] }
  0x21   : > { %227 = vst [vmem:[%s4097_s29 + $0xc0] sm:$0xff] %v226_v24  ;;  %229 = vst [vmem:[%s4097_s29 + $0xc8] sm:$0xff] %v228_v25  ;;  %v232_v27 = vld [vmem:[%s4092_s28 + $0x288] sm:$0xff]  ;;  %v234_v28 = vld [vmem:[%s4092_s28 + $0x290] sm:$0xff] }
  0x22   : > { %231 = vst [vmem:[%s4097_s29 + $0xd0] sm:$0xff] %v230_v26  ;;  %v236_v29 = vld [vmem:[%s4092_s28 + $0x298] sm:$0xff]  ;;  %233 = vst [vmem:[%s4097_s29 + $0xd8] sm:$0xff] %v232_v27  ;;  %v238_v30 = vld [vmem:[%s4092_s28 + $0x2d0] sm:$0xff] }
  0x23   : > { %235 = vst [vmem:[%s4097_s29 + $0xe0] sm:$0xff] %v234_v28  ;;  %237 = vst [vmem:[%s4097_s29 + $0xe8] sm:$0xff] %v236_v29  ;;  %v240_v31 = vld [vmem:[%s4092_s28 + $0x2d8] sm:$0xff]  ;;  %v242_v32 = vld [vmem:[%s4092_s28 + $0x2e0] sm:$0xff] }
  0x24   : > { %239 = vst [vmem:[%s4097_s29 + $0xf0] sm:$0xff] %v238_v30  ;;  %241 = vst [vmem:[%s4097_s29 + $0xf8] sm:$0xff] %v240_v31  ;;  %v244_v33 = vld [vmem:[%s4092_s28 + $0x318] sm:$0xff]  ;;  %v246_v34 = vld [vmem:[%s4092_s28 + $0x320] sm:$0xff] }
  0x25   : > { %243 = vst [vmem:[%s4097_s29 + $0x100] sm:$0xff] %v242_v32  ;;  %v248_v35 = vld [vmem:[%s4092_s28 + $0x328] sm:$0xff]  ;;  %245 = vst [vmem:[%s4097_s29 + $0x108] sm:$0xff] %v244_v33  ;;  %v250_v36 = vld [vmem:[%s4092_s28 + $0x360] sm:$0xff] }
  0x26   : > { %247 = vst [vmem:[%s4097_s29 + $0x110] sm:$0xff] %v246_v34  ;;  %249 = vst [vmem:[%s4097_s29 + $0x118] sm:$0xff] %v248_v35  ;;  %v252_v37 = vld [vmem:[%s4092_s28 + $0x368] sm:$0xff]  ;;  %v254_v38 = vld [vmem:[%s4092_s28 + $0x370] sm:$0xff] }
  0x27   : > { %251 = vst [vmem:[%s4097_s29 + $0x120] sm:$0xff] %v250_v36  ;;  %253 = vst [vmem:[%s4097_s29 + $0x128] sm:$0xff] %v252_v37  ;;  %v256_v39 = vld [vmem:[%s4092_s28 + $0x3a8] sm:$0xff]  ;;  %v258_v40 = vld [vmem:[%s4092_s28 + $0x3b0] sm:$0xff] }
  0x28   : > { %255 = vst [vmem:[%s4097_s29 + $0x130] sm:$0xff] %v254_v38  ;;  %v260_v41 = vld [vmem:[%s4092_s28 + $0x3b8] sm:$0xff]  ;;  %257 = vst [vmem:[%s4097_s29 + $0x138] sm:$0xff] %v256_v39  ;;  %v262_v42 = vld [vmem:[%s4092_s28 + $0x3f0] sm:$0xff] }
  0x29   : > { %259 = vst [vmem:[%s4097_s29 + $0x140] sm:$0xff] %v258_v40  ;;  %261 = vst [vmem:[%s4097_s29 + $0x148] sm:$0xff] %v260_v41  ;;  %v264_v43 = vld [vmem:[%s4092_s28 + $0x3f8] sm:$0xff]  ;;  %v266_v44 = vld [vmem:[%s4092_s28 + $0x400] sm:$0xff] }
  0x2a   : > { %263 = vst [vmem:[%s4097_s29 + $0x150] sm:$0xff] %v262_v42  ;;  %265 = vst [vmem:[%s4097_s29 + $0x158] sm:$0xff] %v264_v43  ;;  %v268_v45 = vld [vmem:[%s4092_s28 + $0x438] sm:$0xff]  ;;  %v270_v46 = vld [vmem:[%s4092_s28 + $0x440] sm:$0xff] }
  0x2b   : > { %267 = vst [vmem:[%s4097_s29 + $0x160] sm:$0xff] %v266_v44  ;;  %v272_v47 = vld [vmem:[%s4092_s28 + $0x448] sm:$0xff]  ;;  %269 = vst [vmem:[%s4097_s29 + $0x168] sm:$0xff] %v268_v45  ;;  %v274_v48 = vld [vmem:[%s4092_s28 + $0x480] sm:$0xff] }
  0x2c   : > { %271 = vst [vmem:[%s4097_s29 + $0x170] sm:$0xff] %v270_v46  ;;  %273 = vst [vmem:[%s4097_s29 + $0x178] sm:$0xff] %v272_v47  ;;  %v276_v49 = vld [vmem:[%s4092_s28 + $0x488] sm:$0xff]  ;;  %v278_v50 = vld [vmem:[%s4092_s28 + $0x490] sm:$0xff] }
  0x2d   : > { %275 = vst [vmem:[%s4097_s29 + $0x180] sm:$0xff] %v274_v48  ;;  %277 = vst [vmem:[%s4097_s29 + $0x188] sm:$0xff] %v276_v49  ;;  %v280_v51 = vld [vmem:[%s4092_s28 + $0x4c8] sm:$0xff]  ;;  %v282_v52 = vld [vmem:[%s4092_s28 + $0x4d0] sm:$0xff] }
  0x2e   : > { %279 = vst [vmem:[%s4097_s29 + $0x190] sm:$0xff] %v278_v50  ;;  %v284_v53 = vld [vmem:[%s4092_s28 + $0x4d8] sm:$0xff]  ;;  %281 = vst [vmem:[%s4097_s29 + $0x198] sm:$0xff] %v280_v51  ;;  %v286_v54 = vld [vmem:[%s4092_s28 + $0x510] sm:$0xff] }
  0x2f   : > { %283 = vst [vmem:[%s4097_s29 + $0x1a0] sm:$0xff] %v282_v52  ;;  %285 = vst [vmem:[%s4097_s29 + $0x1a8] sm:$0xff] %v284_v53  ;;  %v288_v55 = vld [vmem:[%s4092_s28 + $0x518] sm:$0xff]  ;;  %v290_v56 = vld [vmem:[%s4092_s28 + $0x520] sm:$0xff] }
  0x30   : > { %287 = vst [vmem:[%s4097_s29 + $0x1b0] sm:$0xff] %v286_v54  ;;  %289 = vst [vmem:[%s4097_s29 + $0x1b8] sm:$0xff] %v288_v55  ;;  %v292_v57 = vld [vmem:[%s4092_s28 + $0x558] sm:$0xff]  ;;  %v294_v58 = vld [vmem:[%s4092_s28 + $0x560] sm:$0xff] }
  0x31   : > { %291 = vst [vmem:[%s4097_s29 + $0x1c0] sm:$0xff] %v290_v56  ;;  %v296_v59 = vld [vmem:[%s4092_s28 + $0x568] sm:$0xff]  ;;  %293 = vst [vmem:[%s4097_s29 + $0x1c8] sm:$0xff] %v292_v57  ;;  %v298_v60 = vld [vmem:[%s4092_s28 + $0x5a0] sm:$0xff] }
  0x32   : > { %295 = vst [vmem:[%s4097_s29 + $0x1d0] sm:$0xff] %v294_v58  ;;  %297 = vst [vmem:[%s4097_s29 + $0x1d8] sm:$0xff] %v296_v59  ;;  %v300_v61 = vld [vmem:[%s4092_s28 + $0x5a8] sm:$0xff]  ;;  %v302_v62 = vld [vmem:[%s4092_s28 + $0x5b0] sm:$0xff] }
  0x33   : > { %299 = vst [vmem:[%s4097_s29 + $0x1e0] sm:$0xff] %v298_v60  ;;  %301 = vst [vmem:[%s4097_s29 + $0x1e8] sm:$0xff] %v300_v61  ;;  %v304_v63 = vld [vmem:[%s4092_s28 + $0x5e8] sm:$0xff]  ;;  %v306_v0 = vld [vmem:[%s4092_s28 + $0x5f0] sm:$0xff] }
  0x34   : > { %303 = vst [vmem:[%s4097_s29 + $0x1f0] sm:$0xff] %v302_v62  ;;  %v308_v1 = vld [vmem:[%s4092_s28 + $0x5f8] sm:$0xff]  ;;  %305 = vst [vmem:[%s4097_s29 + $0x1f8] sm:$0xff] %v304_v63  ;;  %v310_v2 = vld [vmem:[%s4092_s28 + $0x630] sm:$0xff] }
  0x35   : > { %307 = vst [vmem:[%s4097_s29 + $0x200] sm:$0xff] %v306_v0  ;;  %309 = vst [vmem:[%s4097_s29 + $0x208] sm:$0xff] %v308_v1  ;;  %v312_v3 = vld [vmem:[%s4092_s28 + $0x638] sm:$0xff]  ;;  %v314_v4 = vld [vmem:[%s4092_s28 + $0x640] sm:$0xff] }
  0x36   : > { %311 = vst [vmem:[%s4097_s29 + $0x210] sm:$0xff] %v310_v2  ;;  %313 = vst [vmem:[%s4097_s29 + $0x218] sm:$0xff] %v312_v3  ;;  %v316_v5 = vld [vmem:[%s4092_s28 + $0x678] sm:$0xff]  ;;  %v318_v6 = vld [vmem:[%s4092_s28 + $0x680] sm:$0xff] }
  0x37   : > { %315 = vst [vmem:[%s4097_s29 + $0x220] sm:$0xff] %v314_v4  ;;  %v320_v7 = vld [vmem:[%s4092_s28 + $0x688] sm:$0xff]  ;;  %317 = vst [vmem:[%s4097_s29 + $0x228] sm:$0xff] %v316_v5  ;;  %v322_v8 = vld [vmem:[%s4092_s28 + $0x6c0] sm:$0xff] }
  0x38   : > { %319 = vst [vmem:[%s4097_s29 + $0x230] sm:$0xff] %v318_v6  ;;  %321 = vst [vmem:[%s4097_s29 + $0x238] sm:$0xff] %v320_v7  ;;  %v324_v9 = vld [vmem:[%s4092_s28 + $0x6c8] sm:$0xff]  ;;  %v326_v10 = vld [vmem:[%s4092_s28 + $0x6d0] sm:$0xff] }
  0x39   : > { %323 = vst [vmem:[%s4097_s29 + $0x240] sm:$0xff] %v322_v8  ;;  %325 = vst [vmem:[%s4097_s29 + $0x248] sm:$0xff] %v324_v9  ;;  %v328_v11 = vld [vmem:[%s4092_s28 + $0x708] sm:$0xff]  ;;  %v330_v12 = vld [vmem:[%s4092_s28 + $0x710] sm:$0xff] }
  0x3a   : > { %327 = vst [vmem:[%s4097_s29 + $0x250] sm:$0xff] %v326_v10  ;;  %v332_v13 = vld [vmem:[%s4092_s28 + $0x718] sm:$0xff]  ;;  %329 = vst [vmem:[%s4097_s29 + $0x258] sm:$0xff] %v328_v11  ;;  %v334_v14 = vld [vmem:[%s4092_s28 + $0x750] sm:$0xff] }
  0x3b   : > { %331 = vst [vmem:[%s4097_s29 + $0x260] sm:$0xff] %v330_v12  ;;  %333 = vst [vmem:[%s4097_s29 + $0x268] sm:$0xff] %v332_v13  ;;  %v336_v15 = vld [vmem:[%s4092_s28 + $0x758] sm:$0xff]  ;;  %v338_v16 = vld [vmem:[%s4092_s28 + $0x760] sm:$0xff] }
  0x3c   : > { %335 = vst [vmem:[%s4097_s29 + $0x270] sm:$0xff] %v334_v14  ;;  %337 = vst [vmem:[%s4097_s29 + $0x278] sm:$0xff] %v336_v15  ;;  %v340_v17 = vld [vmem:[%s4092_s28 + $0x798] sm:$0xff]  ;;  %v342_v18 = vld [vmem:[%s4092_s28 + $0x7a0] sm:$0xff] }
  0x3d   : > { %339 = vst [vmem:[%s4097_s29 + $0x280] sm:$0xff] %v338_v16  ;;  %v344_v19 = vld [vmem:[%s4092_s28 + $0x7a8] sm:$0xff]  ;;  %341 = vst [vmem:[%s4097_s29 + $0x288] sm:$0xff] %v340_v17  ;;  %v346_v20 = vld [vmem:[%s4092_s28 + $0x7e0] sm:$0xff] }
  0x3e   : > { %343 = vst [vmem:[%s4097_s29 + $0x290] sm:$0xff] %v342_v18  ;;  %345 = vst [vmem:[%s4097_s29 + $0x298] sm:$0xff] %v344_v19  ;;  %v348_v21 = vld [vmem:[%s4092_s28 + $0x7e8] sm:$0xff]  ;;  %v350_v22 = vld [vmem:[%s4092_s28 + $0x7f0] sm:$0xff] }
  0x3f   : > { %347 = vst [vmem:[%s4097_s29 + $0x2a0] sm:$0xff] %v346_v20  ;;  %349 = vst [vmem:[%s4097_s29 + $0x2a8] sm:$0xff] %v348_v21  ;;  %v352_v23 = vld [vmem:[%s4092_s28 + $0x828] sm:$0xff]  ;;  %v354_v24 = vld [vmem:[%s4092_s28 + $0x830] sm:$0xff] }
  0x40   : > { %351 = vst [vmem:[%s4097_s29 + $0x2b0] sm:$0xff] %v350_v22  ;;  %v356_v25 = vld [vmem:[%s4092_s28 + $0x838] sm:$0xff]  ;;  %353 = vst [vmem:[%s4097_s29 + $0x2b8] sm:$0xff] %v352_v23  ;;  %v358_v26 = vld [vmem:[%s4092_s28 + $0x870] sm:$0xff] }
  0x41   : > { %355 = vst [vmem:[%s4097_s29 + $0x2c0] sm:$0xff] %v354_v24  ;;  %357 = vst [vmem:[%s4097_s29 + $0x2c8] sm:$0xff] %v356_v25  ;;  %v360_v27 = vld [vmem:[%s4092_s28 + $0x878] sm:$0xff]  ;;  %v362_v28 = vld [vmem:[%s4092_s28 + $0x880] sm:$0xff] }
  0x42   : > { %359 = vst [vmem:[%s4097_s29 + $0x2d0] sm:$0xff] %v358_v26  ;;  %361 = vst [vmem:[%s4097_s29 + $0x2d8] sm:$0xff] %v360_v27  ;;  %v364_v29 = vld [vmem:[%s4092_s28 + $0x8b8] sm:$0xff]  ;;  %v366_v30 = vld [vmem:[%s4092_s28 + $0x8c0] sm:$0xff] }
  0x43   : > { %363 = vst [vmem:[%s4097_s29 + $0x2e0] sm:$0xff] %v362_v28  ;;  %v368_v31 = vld [vmem:[%s4092_s28 + $0x8c8] sm:$0xff]  ;;  %365 = vst [vmem:[%s4097_s29 + $0x2e8] sm:$0xff] %v364_v29  ;;  %v370_v32 = vld [vmem:[%s4092_s28 + $0x900] sm:$0xff] }
  0x44   : > { %367 = vst [vmem:[%s4097_s29 + $0x2f0] sm:$0xff] %v366_v30  ;;  %369 = vst [vmem:[%s4097_s29 + $0x2f8] sm:$0xff] %v368_v31  ;;  %v372_v33 = vld [vmem:[%s4092_s28 + $0x908] sm:$0xff]  ;;  %v374_v34 = vld [vmem:[%s4092_s28 + $0x910] sm:$0xff] }
  0x45   : > { %371 = vst [vmem:[%s4097_s29 + $0x300] sm:$0xff] %v370_v32  ;;  %373 = vst [vmem:[%s4097_s29 + $0x308] sm:$0xff] %v372_v33  ;;  %v376_v35 = vld [vmem:[%s4092_s28 + $0x948] sm:$0xff]  ;;  %v378_v36 = vld [vmem:[%s4092_s28 + $0x950] sm:$0xff] }
  0x46   : > { %375 = vst [vmem:[%s4097_s29 + $0x310] sm:$0xff] %v374_v34  ;;  %v380_v37 = vld [vmem:[%s4092_s28 + $0x958] sm:$0xff]  ;;  %377 = vst [vmem:[%s4097_s29 + $0x318] sm:$0xff] %v376_v35  ;;  %v382_v38 = vld [vmem:[%s4092_s28 + $0x990] sm:$0xff] }
  0x47   : > { %379 = vst [vmem:[%s4097_s29 + $0x320] sm:$0xff] %v378_v36  ;;  %381 = vst [vmem:[%s4097_s29 + $0x328] sm:$0xff] %v380_v37  ;;  %v384_v39 = vld [vmem:[%s4092_s28 + $0x998] sm:$0xff]  ;;  %v386_v40 = vld [vmem:[%s4092_s28 + $0x9a0] sm:$0xff] }
  0x48   : > { %383 = vst [vmem:[%s4097_s29 + $0x330] sm:$0xff] %v382_v38  ;;  %385 = vst [vmem:[%s4097_s29 + $0x338] sm:$0xff] %v384_v39  ;;  %v388_v41 = vld [vmem:[%s4092_s28 + $0x9d8] sm:$0xff]  ;;  %v390_v42 = vld [vmem:[%s4092_s28 + $0x9e0] sm:$0xff] }
  0x49   : > { %387 = vst [vmem:[%s4097_s29 + $0x340] sm:$0xff] %v386_v40  ;;  %v392_v43 = vld [vmem:[%s4092_s28 + $0x9e8] sm:$0xff]  ;;  %389 = vst [vmem:[%s4097_s29 + $0x348] sm:$0xff] %v388_v41  ;;  %v394_v44 = vld [vmem:[%s4092_s28 + $0xa20] sm:$0xff] }
  0x4a   : > { %391 = vst [vmem:[%s4097_s29 + $0x350] sm:$0xff] %v390_v42  ;;  %393 = vst [vmem:[%s4097_s29 + $0x358] sm:$0xff] %v392_v43  ;;  %v396_v45 = vld [vmem:[%s4092_s28 + $0xa28] sm:$0xff]  ;;  %v398_v46 = vld [vmem:[%s4092_s28 + $0xa30] sm:$0xff] }
  0x4b   : > { %395 = vst [vmem:[%s4097_s29 + $0x360] sm:$0xff] %v394_v44  ;;  %397 = vst [vmem:[%s4097_s29 + $0x368] sm:$0xff] %v396_v45  ;;  %v400_v47 = vld [vmem:[%s4092_s28 + $0xa68] sm:$0xff]  ;;  %v402_v48 = vld [vmem:[%s4092_s28 + $0xa70] sm:$0xff] }
  0x4c   : > { %399 = vst [vmem:[%s4097_s29 + $0x370] sm:$0xff] %v398_v46  ;;  %v404_v49 = vld [vmem:[%s4092_s28 + $0xa78] sm:$0xff]  ;;  %401 = vst [vmem:[%s4097_s29 + $0x378] sm:$0xff] %v400_v47  ;;  %v406_v50 = vld [vmem:[%s4092_s28 + $0xab0] sm:$0xff] }
  0x4d   : > { %403 = vst [vmem:[%s4097_s29 + $0x380] sm:$0xff] %v402_v48  ;;  %405 = vst [vmem:[%s4097_s29 + $0x388] sm:$0xff] %v404_v49  ;;  %v408_v51 = vld [vmem:[%s4092_s28 + $0xab8] sm:$0xff]  ;;  %v410_v52 = vld [vmem:[%s4092_s28 + $0xac0] sm:$0xff] }
  0x4e   : > { %407 = vst [vmem:[%s4097_s29 + $0x390] sm:$0xff] %v406_v50  ;;  %409 = vst [vmem:[%s4097_s29 + $0x398] sm:$0xff] %v408_v51  ;;  %v412_v53 = vld [vmem:[%s4092_s28 + $0xaf8] sm:$0xff]  ;;  %v414_v54 = vld [vmem:[%s4092_s28 + $0xb00] sm:$0xff] }
  0x4f   : > { %411 = vst [vmem:[%s4097_s29 + $0x3a0] sm:$0xff] %v410_v52  ;;  %v416_v55 = vld [vmem:[%s4092_s28 + $0xb08] sm:$0xff]  ;;  %413 = vst [vmem:[%s4097_s29 + $0x3a8] sm:$0xff] %v412_v53  ;;  %v418_v56 = vld [vmem:[%s4092_s28 + $0xb40] sm:$0xff] }
  0x50   : > { %415 = vst [vmem:[%s4097_s29 + $0x3b0] sm:$0xff] %v414_v54  ;;  %417 = vst [vmem:[%s4097_s29 + $0x3b8] sm:$0xff] %v416_v55  ;;  %v420_v57 = vld [vmem:[%s4092_s28 + $0xb48] sm:$0xff]  ;;  %v422_v58 = vld [vmem:[%s4092_s28 + $0xb50] sm:$0xff] }
  0x51   : > { %419 = vst [vmem:[%s4097_s29 + $0x3c0] sm:$0xff] %v418_v56  ;;  %421 = vst [vmem:[%s4097_s29 + $0x3c8] sm:$0xff] %v420_v57  ;;  %v424_v59 = vld [vmem:[%s4092_s28 + $0xb88] sm:$0xff]  ;;  %v426_v60 = vld [vmem:[%s4092_s28 + $0xb90] sm:$0xff] }
  0x52   : > { %423 = vst [vmem:[%s4097_s29 + $0x3d0] sm:$0xff] %v422_v58  ;;  %v428_v61 = vld [vmem:[%s4092_s28 + $0xb98] sm:$0xff]  ;;  %425 = vst [vmem:[%s4097_s29 + $0x3d8] sm:$0xff] %v424_v59  ;;  %v430_v62 = vld [vmem:[%s4092_s28 + $0xbd0] sm:$0xff] }
  0x53   : > { %427 = vst [vmem:[%s4097_s29 + $0x3e0] sm:$0xff] %v426_v60  ;;  %429 = vst [vmem:[%s4097_s29 + $0x3e8] sm:$0xff] %v428_v61  ;;  %v432_v63 = vld [vmem:[%s4092_s28 + $0xbd8] sm:$0xff]  ;;  %v434_v0 = vld [vmem:[%s4092_s28 + $0xbe0] sm:$0xff] }
  0x54   : > { %431 = vst [vmem:[%s4097_s29 + $0x3f0] sm:$0xff] %v430_v62  ;;  %433 = vst [vmem:[%s4097_s29 + $0x3f8] sm:$0xff] %v432_v63  ;;  %v436_v1 = vld [vmem:[%s4092_s28 + $0xc18] sm:$0xff]  ;;  %v438_v2 = vld [vmem:[%s4092_s28 + $0xc20] sm:$0xff] }
  0x55   : > { %435 = vst [vmem:[%s4097_s29 + $0x400] sm:$0xff] %v434_v0  ;;  %v440_v3 = vld [vmem:[%s4092_s28 + $0xc28] sm:$0xff]  ;;  %437 = vst [vmem:[%s4097_s29 + $0x408] sm:$0xff] %v436_v1  ;;  %v442_v4 = vld [vmem:[%s4092_s28 + $0xc60] sm:$0xff] }
  0x56   : > { %439 = vst [vmem:[%s4097_s29 + $0x410] sm:$0xff] %v438_v2  ;;  %441 = vst [vmem:[%s4097_s29 + $0x418] sm:$0xff] %v440_v3  ;;  %v444_v5 = vld [vmem:[%s4092_s28 + $0xc68] sm:$0xff]  ;;  %v446_v6 = vld [vmem:[%s4092_s28 + $0xc70] sm:$0xff] }
  0x57   : > { %443 = vst [vmem:[%s4097_s29 + $0x420] sm:$0xff] %v442_v4  ;;  %445 = vst [vmem:[%s4097_s29 + $0x428] sm:$0xff] %v444_v5  ;;  %v448_v7 = vld [vmem:[%s4092_s28 + $0xca8] sm:$0xff]  ;;  %v450_v8 = vld [vmem:[%s4092_s28 + $0xcb0] sm:$0xff] }
  0x58   : > { %447 = vst [vmem:[%s4097_s29 + $0x430] sm:$0xff] %v446_v6  ;;  %v452_v9 = vld [vmem:[%s4092_s28 + $0xcb8] sm:$0xff]  ;;  %449 = vst [vmem:[%s4097_s29 + $0x438] sm:$0xff] %v448_v7  ;;  %v454_v10 = vld [vmem:[%s4092_s28 + $0xcf0] sm:$0xff] }
  0x59   : > { %451 = vst [vmem:[%s4097_s29 + $0x440] sm:$0xff] %v450_v8  ;;  %453 = vst [vmem:[%s4097_s29 + $0x448] sm:$0xff] %v452_v9  ;;  %v456_v11 = vld [vmem:[%s4092_s28 + $0xcf8] sm:$0xff]  ;;  %v458_v12 = vld [vmem:[%s4092_s28 + $0xd00] sm:$0xff] }
  0x5a   : > { %455 = vst [vmem:[%s4097_s29 + $0x450] sm:$0xff] %v454_v10  ;;  %457 = vst [vmem:[%s4097_s29 + $0x458] sm:$0xff] %v456_v11  ;;  %v460_v13 = vld [vmem:[%s4092_s28 + $0xd38] sm:$0xff]  ;;  %v462_v14 = vld [vmem:[%s4092_s28 + $0xd40] sm:$0xff] }
  0x5b   : > { %459 = vst [vmem:[%s4097_s29 + $0x460] sm:$0xff] %v458_v12  ;;  %v464_v15 = vld [vmem:[%s4092_s28 + $0xd48] sm:$0xff]  ;;  %461 = vst [vmem:[%s4097_s29 + $0x468] sm:$0xff] %v460_v13  ;;  %v466_v16 = vld [vmem:[%s4092_s28 + $0xd80] sm:$0xff] }
  0x5c   : > { %463 = vst [vmem:[%s4097_s29 + $0x470] sm:$0xff] %v462_v14  ;;  %465 = vst [vmem:[%s4097_s29 + $0x478] sm:$0xff] %v464_v15  ;;  %v468_v17 = vld [vmem:[%s4092_s28 + $0xd88] sm:$0xff]  ;;  %v470_v18 = vld [vmem:[%s4092_s28 + $0xd90] sm:$0xff] }
  0x5d   : > { %467 = vst [vmem:[%s4097_s29 + $0x480] sm:$0xff] %v466_v16  ;;  %469 = vst [vmem:[%s4097_s29 + $0x488] sm:$0xff] %v468_v17  ;;  %v472_v19 = vld [vmem:[%s4092_s28 + $0xdc8] sm:$0xff]  ;;  %v474_v20 = vld [vmem:[%s4092_s28 + $0xdd0] sm:$0xff] }
  0x5e   : > { %471 = vst [vmem:[%s4097_s29 + $0x490] sm:$0xff] %v470_v18  ;;  %v476_v21 = vld [vmem:[%s4092_s28 + $0xdd8] sm:$0xff]  ;;  %473 = vst [vmem:[%s4097_s29 + $0x498] sm:$0xff] %v472_v19  ;;  %v478_v22 = vld [vmem:[%s4092_s28 + $0xe10] sm:$0xff] }
  0x5f   : > { %475 = vst [vmem:[%s4097_s29 + $0x4a0] sm:$0xff] %v474_v20  ;;  %477 = vst [vmem:[%s4097_s29 + $0x4a8] sm:$0xff] %v476_v21  ;;  %v480_v23 = vld [vmem:[%s4092_s28 + $0xe18] sm:$0xff]  ;;  %v482_v24 = vld [vmem:[%s4092_s28 + $0xe20] sm:$0xff] }
  0x60   : > { %479 = vst [vmem:[%s4097_s29 + $0x4b0] sm:$0xff] %v478_v22  ;;  %481 = vst [vmem:[%s4097_s29 + $0x4b8] sm:$0xff] %v480_v23  ;;  %v484_v25 = vld [vmem:[%s4092_s28 + $0xe58] sm:$0xff]  ;;  %v486_v26 = vld [vmem:[%s4092_s28 + $0xe60] sm:$0xff] }
  0x61   : > { %483 = vst [vmem:[%s4097_s29 + $0x4c0] sm:$0xff] %v482_v24  ;;  %v488_v27 = vld [vmem:[%s4092_s28 + $0xe68] sm:$0xff]  ;;  %485 = vst [vmem:[%s4097_s29 + $0x4c8] sm:$0xff] %v484_v25  ;;  %v490_v28 = vld [vmem:[%s4092_s28 + $0xea0] sm:$0xff] }
  0x62   : > { %487 = vst [vmem:[%s4097_s29 + $0x4d0] sm:$0xff] %v486_v26  ;;  %489 = vst [vmem:[%s4097_s29 + $0x4d8] sm:$0xff] %v488_v27  ;;  %v492_v29 = vld [vmem:[%s4092_s28 + $0xea8] sm:$0xff]  ;;  %v494_v30 = vld [vmem:[%s4092_s28 + $0xeb0] sm:$0xff] }
  0x63   : > { %491 = vst [vmem:[%s4097_s29 + $0x4e0] sm:$0xff] %v490_v28  ;;  %493 = vst [vmem:[%s4097_s29 + $0x4e8] sm:$0xff] %v492_v29  ;;  %v496_v31 = vld [vmem:[%s4092_s28 + $0xee8] sm:$0xff]  ;;  %v498_v32 = vld [vmem:[%s4092_s28 + $0xef0] sm:$0xff] }
  0x64   : > { %495 = vst [vmem:[%s4097_s29 + $0x4f0] sm:$0xff] %v494_v30  ;;  %v500_v33 = vld [vmem:[%s4092_s28 + $0xef8] sm:$0xff]  ;;  %497 = vst [vmem:[%s4097_s29 + $0x4f8] sm:$0xff] %v496_v31  ;;  %v502_v34 = vld [vmem:[%s4092_s28 + $0xf30] sm:$0xff] }
  0x65   : > { %499 = vst [vmem:[%s4097_s29 + $0x500] sm:$0xff] %v498_v32  ;;  %501 = vst [vmem:[%s4097_s29 + $0x508] sm:$0xff] %v500_v33  ;;  %v504_v35 = vld [vmem:[%s4092_s28 + $0xf38] sm:$0xff]  ;;  %v506_v36 = vld [vmem:[%s4092_s28 + $0xf40] sm:$0xff] }
  0x66   : > { %503 = vst [vmem:[%s4097_s29 + $0x510] sm:$0xff] %v502_v34  ;;  %505 = vst [vmem:[%s4097_s29 + $0x518] sm:$0xff] %v504_v35  ;;  %v508_v37 = vld [vmem:[%s4092_s28 + $0xf78] sm:$0xff]  ;;  %v510_v38 = vld [vmem:[%s4092_s28 + $0xf80] sm:$0xff] }
  0x67   : > { %507 = vst [vmem:[%s4097_s29 + $0x520] sm:$0xff] %v506_v36  ;;  %v512_v39 = vld [vmem:[%s4092_s28 + $0xf88] sm:$0xff]  ;;  %509 = vst [vmem:[%s4097_s29 + $0x528] sm:$0xff] %v508_v37  ;;  %v514_v40 = vld [vmem:[%s4092_s28 + $0xfc0] sm:$0xff] }
  0x68   : > { %511 = vst [vmem:[%s4097_s29 + $0x530] sm:$0xff] %v510_v38  ;;  %513 = vst [vmem:[%s4097_s29 + $0x538] sm:$0xff] %v512_v39  ;;  %v516_v41 = vld [vmem:[%s4092_s28 + $0xfc8] sm:$0xff]  ;;  %v518_v42 = vld [vmem:[%s4092_s28 + $0xfd0] sm:$0xff] }
  0x69   : > { %515 = vst [vmem:[%s4097_s29 + $0x540] sm:$0xff] %v514_v40  ;;  %517 = vst [vmem:[%s4097_s29 + $0x548] sm:$0xff] %v516_v41  ;;  %v520_v43 = vld [vmem:[%s4092_s28 + $0x1008] sm:$0xff]  ;;  %v522_v44 = vld [vmem:[%s4092_s28 + $0x1010] sm:$0xff] }
  0x6a   : > { %519 = vst [vmem:[%s4097_s29 + $0x550] sm:$0xff] %v518_v42  ;;  %v524_v45 = vld [vmem:[%s4092_s28 + $0x1018] sm:$0xff]  ;;  %521 = vst [vmem:[%s4097_s29 + $0x558] sm:$0xff] %v520_v43  ;;  %v526_v46 = vld [vmem:[%s4092_s28 + $0x1050] sm:$0xff] }
  0x6b   : > { %523 = vst [vmem:[%s4097_s29 + $0x560] sm:$0xff] %v522_v44  ;;  %525 = vst [vmem:[%s4097_s29 + $0x568] sm:$0xff] %v524_v45  ;;  %v528_v47 = vld [vmem:[%s4092_s28 + $0x1058] sm:$0xff]  ;;  %v530_v48 = vld [vmem:[%s4092_s28 + $0x1060] sm:$0xff] }
  0x6c   : > { %527 = vst [vmem:[%s4097_s29 + $0x570] sm:$0xff] %v526_v46  ;;  %529 = vst [vmem:[%s4097_s29 + $0x578] sm:$0xff] %v528_v47  ;;  %v532_v49 = vld [vmem:[%s4092_s28 + $0x1098] sm:$0xff]  ;;  %v534_v50 = vld [vmem:[%s4092_s28 + $0x10a0] sm:$0xff] }
  0x6d   : > { %531 = vst [vmem:[%s4097_s29 + $0x580] sm:$0xff] %v530_v48  ;;  %v536_v51 = vld [vmem:[%s4092_s28 + $0x10a8] sm:$0xff]  ;;  %533 = vst [vmem:[%s4097_s29 + $0x588] sm:$0xff] %v532_v49  ;;  %v538_v52 = vld [vmem:[%s4092_s28 + $0x10e0] sm:$0xff] }
  0x6e   : > { %535 = vst [vmem:[%s4097_s29 + $0x590] sm:$0xff] %v534_v50  ;;  %537 = vst [vmem:[%s4097_s29 + $0x598] sm:$0xff] %v536_v51  ;;  %v540_v53 = vld [vmem:[%s4092_s28 + $0x10e8] sm:$0xff]  ;;  %v542_v54 = vld [vmem:[%s4092_s28 + $0x10f0] sm:$0xff] }
  0x6f   : > { %539 = vst [vmem:[%s4097_s29 + $0x5a0] sm:$0xff] %v538_v52  ;;  %541 = vst [vmem:[%s4097_s29 + $0x5a8] sm:$0xff] %v540_v53  ;;  %v544_v55 = vld [vmem:[%s4092_s28 + $0x1128] sm:$0xff]  ;;  %v546_v56 = vld [vmem:[%s4092_s28 + $0x1130] sm:$0xff] }
  0x70   : > { %543 = vst [vmem:[%s4097_s29 + $0x5b0] sm:$0xff] %v542_v54  ;;  %v548_v57 = vld [vmem:[%s4092_s28 + $0x1138] sm:$0xff]  ;;  %545 = vst [vmem:[%s4097_s29 + $0x5b8] sm:$0xff] %v544_v55  ;;  %v550_v58 = vld [vmem:[%s4092_s28 + $0x1170] sm:$0xff] }
  0x71   : > { %547 = vst [vmem:[%s4097_s29 + $0x5c0] sm:$0xff] %v546_v56  ;;  %549 = vst [vmem:[%s4097_s29 + $0x5c8] sm:$0xff] %v548_v57  ;;  %v552_v59 = vld [vmem:[%s4092_s28 + $0x1178] sm:$0xff]  ;;  %v554_v60 = vld [vmem:[%s4092_s28 + $0x1180] sm:$0xff] }
  0x72   : > { %551 = vst [vmem:[%s4097_s29 + $0x5d0] sm:$0xff] %v550_v58  ;;  %553 = vst [vmem:[%s4097_s29 + $0x5d8] sm:$0xff] %v552_v59  ;;  %v556_v61 = vld [vmem:[%s4092_s28 + $0x11b8] sm:$0xff]  ;;  %v558_v62 = vld [vmem:[%s4092_s28 + $0x11c0] sm:$0xff] }
  0x73   : > { %555 = vst [vmem:[%s4097_s29 + $0x5e0] sm:$0xff] %v554_v60  ;;  %v560_v63 = vld [vmem:[%s4092_s28 + $0x11c8] sm:$0xff]  ;;  %557 = vst [vmem:[%s4097_s29 + $0x5e8] sm:$0xff] %v556_v61  ;;  %v562_v0 = vld [vmem:[%s4092_s28 + $0x1200] sm:$0xff] }
  0x74   : > { %559 = vst [vmem:[%s4097_s29 + $0x5f0] sm:$0xff] %v558_v62  ;;  %561 = vst [vmem:[%s4097_s29 + $0x5f8] sm:$0xff] %v560_v63  ;;  %v564_v1 = vld [vmem:[%s4092_s28 + $0x1208] sm:$0xff]  ;;  %v566_v2 = vld [vmem:[%s4092_s28 + $0x1210] sm:$0xff] }
  0x75   : > { %563 = vst [vmem:[%s4097_s29 + $0x600] sm:$0xff] %v562_v0  ;;  %565 = vst [vmem:[%s4097_s29 + $0x608] sm:$0xff] %v564_v1  ;;  %v568_v3 = vld [vmem:[%s4092_s28 + $0x1248] sm:$0xff]  ;;  %v570_v4 = vld [vmem:[%s4092_s28 + $0x1250] sm:$0xff] }
  0x76   : > { %567 = vst [vmem:[%s4097_s29 + $0x610] sm:$0xff] %v566_v2  ;;  %v572_v5 = vld [vmem:[%s4092_s28 + $0x1258] sm:$0xff]  ;;  %569 = vst [vmem:[%s4097_s29 + $0x618] sm:$0xff] %v568_v3  ;;  %v574_v6 = vld [vmem:[%s4092_s28 + $0x1290] sm:$0xff] }
  0x77   : > { %571 = vst [vmem:[%s4097_s29 + $0x620] sm:$0xff] %v570_v4  ;;  %573 = vst [vmem:[%s4097_s29 + $0x628] sm:$0xff] %v572_v5  ;;  %v576_v7 = vld [vmem:[%s4092_s28 + $0x1298] sm:$0xff]  ;;  %v578_v8 = vld [vmem:[%s4092_s28 + $0x12a0] sm:$0xff] }
  0x78   : > { %575 = vst [vmem:[%s4097_s29 + $0x630] sm:$0xff] %v574_v6  ;;  %577 = vst [vmem:[%s4097_s29 + $0x638] sm:$0xff] %v576_v7  ;;  %v580_v9 = vld [vmem:[%s4092_s28 + $0x12d8] sm:$0xff]  ;;  %v582_v10 = vld [vmem:[%s4092_s28 + $0x12e0] sm:$0xff] }
  0x79   : > { %579 = vst [vmem:[%s4097_s29 + $0x640] sm:$0xff] %v578_v8  ;;  %v584_v11 = vld [vmem:[%s4092_s28 + $0x12e8] sm:$0xff]  ;;  %581 = vst [vmem:[%s4097_s29 + $0x648] sm:$0xff] %v580_v9  ;;  %v586_v12 = vld [vmem:[%s4092_s28 + $0x1320] sm:$0xff] }
  0x7a   : > { %583 = vst [vmem:[%s4097_s29 + $0x650] sm:$0xff] %v582_v10  ;;  %585 = vst [vmem:[%s4097_s29 + $0x658] sm:$0xff] %v584_v11  ;;  %v588_v13 = vld [vmem:[%s4092_s28 + $0x1328] sm:$0xff]  ;;  %v590_v14 = vld [vmem:[%s4092_s28 + $0x1330] sm:$0xff] }
  0x7b   : > { %587 = vst [vmem:[%s4097_s29 + $0x660] sm:$0xff] %v586_v12  ;;  %589 = vst [vmem:[%s4097_s29 + $0x668] sm:$0xff] %v588_v13  ;;  %v592_v15 = vld [vmem:[%s4092_s28 + $0x1368] sm:$0xff]  ;;  %v594_v16 = vld [vmem:[%s4092_s28 + $0x1370] sm:$0xff] }
  0x7c   : > { %591 = vst [vmem:[%s4097_s29 + $0x670] sm:$0xff] %v590_v14  ;;  %v596_v17 = vld [vmem:[%s4092_s28 + $0x1378] sm:$0xff]  ;;  %593 = vst [vmem:[%s4097_s29 + $0x678] sm:$0xff] %v592_v15  ;;  %v598_v18 = vld [vmem:[%s4092_s28 + $0x13b0] sm:$0xff] }
  0x7d   : > { %595 = vst [vmem:[%s4097_s29 + $0x680] sm:$0xff] %v594_v16  ;;  %597 = vst [vmem:[%s4097_s29 + $0x688] sm:$0xff] %v596_v17  ;;  %v600_v19 = vld [vmem:[%s4092_s28 + $0x13b8] sm:$0xff]  ;;  %v602_v20 = vld [vmem:[%s4092_s28 + $0x13c0] sm:$0xff] }
  0x7e   : > { %599 = vst [vmem:[%s4097_s29 + $0x690] sm:$0xff] %v598_v18  ;;  %601 = vst [vmem:[%s4097_s29 + $0x698] sm:$0xff] %v600_v19  ;;  %v604_v21 = vld [vmem:[%s4092_s28 + $0x13f8] sm:$0xff]  ;;  %v606_v22 = vld [vmem:[%s4092_s28 + $0x1400] sm:$0xff] }
  0x7f   : > { %603 = vst [vmem:[%s4097_s29 + $0x6a0] sm:$0xff] %v602_v20  ;;  %v608_v23 = vld [vmem:[%s4092_s28 + $0x1408] sm:$0xff]  ;;  %605 = vst [vmem:[%s4097_s29 + $0x6a8] sm:$0xff] %v604_v21  ;;  %v610_v24 = vld [vmem:[%s4092_s28 + $0x1440] sm:$0xff] }
  0x80   : > { %607 = vst [vmem:[%s4097_s29 + $0x6b0] sm:$0xff] %v606_v22  ;;  %609 = vst [vmem:[%s4097_s29 + $0x6b8] sm:$0xff] %v608_v23  ;;  %v612_v25 = vld [vmem:[%s4092_s28 + $0x1448] sm:$0xff]  ;;  %v614_v26 = vld [vmem:[%s4092_s28 + $0x1450] sm:$0xff] }
  0x81   : > { %611 = vst [vmem:[%s4097_s29 + $0x6c0] sm:$0xff] %v610_v24  ;;  %613 = vst [vmem:[%s4097_s29 + $0x6c8] sm:$0xff] %v612_v25  ;;  %v616_v27 = vld [vmem:[%s4092_s28 + $0x1488] sm:$0xff]  ;;  %v618_v28 = vld [vmem:[%s4092_s28 + $0x1490] sm:$0xff] }
  0x82   : > { %615 = vst [vmem:[%s4097_s29 + $0x6d0] sm:$0xff] %v614_v26  ;;  %v620_v29 = vld [vmem:[%s4092_s28 + $0x1498] sm:$0xff]  ;;  %617 = vst [vmem:[%s4097_s29 + $0x6d8] sm:$0xff] %v616_v27  ;;  %v622_v30 = vld [vmem:[%s4092_s28 + $0x14d0] sm:$0xff] }
  0x83   : > { %619 = vst [vmem:[%s4097_s29 + $0x6e0] sm:$0xff] %v618_v28  ;;  %621 = vst [vmem:[%s4097_s29 + $0x6e8] sm:$0xff] %v620_v29  ;;  %v624_v31 = vld [vmem:[%s4092_s28 + $0x14d8] sm:$0xff]  ;;  %v626_v32 = vld [vmem:[%s4092_s28 + $0x14e0] sm:$0xff] }
  0x84   : > { %623 = vst [vmem:[%s4097_s29 + $0x6f0] sm:$0xff] %v622_v30  ;;  %625 = vst [vmem:[%s4097_s29 + $0x6f8] sm:$0xff] %v624_v31  ;;  %v628_v33 = vld [vmem:[%s4092_s28 + $0x1518] sm:$0xff]  ;;  %v630_v34 = vld [vmem:[%s4092_s28 + $0x1520] sm:$0xff] }
  0x85   : > { %627 = vst [vmem:[%s4097_s29 + $0x700] sm:$0xff] %v626_v32  ;;  %v632_v35 = vld [vmem:[%s4092_s28 + $0x1528] sm:$0xff]  ;;  %629 = vst [vmem:[%s4097_s29 + $0x708] sm:$0xff] %v628_v33  ;;  %v634_v36 = vld [vmem:[%s4092_s28 + $0x1560] sm:$0xff] }
  0x86   : > { %631 = vst [vmem:[%s4097_s29 + $0x710] sm:$0xff] %v630_v34  ;;  %633 = vst [vmem:[%s4097_s29 + $0x718] sm:$0xff] %v632_v35  ;;  %v636_v37 = vld [vmem:[%s4092_s28 + $0x1568] sm:$0xff]  ;;  %v638_v38 = vld [vmem:[%s4092_s28 + $0x1570] sm:$0xff] }
  0x87   : > { %635 = vst [vmem:[%s4097_s29 + $0x720] sm:$0xff] %v634_v36  ;;  %637 = vst [vmem:[%s4097_s29 + $0x728] sm:$0xff] %v636_v37  ;;  %v640_v39 = vld [vmem:[%s4092_s28 + $0x15a8] sm:$0xff]  ;;  %v642_v40 = vld [vmem:[%s4092_s28 + $0x15b0] sm:$0xff] }
  0x88   : > { %639 = vst [vmem:[%s4097_s29 + $0x730] sm:$0xff] %v638_v38  ;;  %v644_v41 = vld [vmem:[%s4092_s28 + $0x15b8] sm:$0xff]  ;;  %641 = vst [vmem:[%s4097_s29 + $0x738] sm:$0xff] %v640_v39  ;;  %v646_v42 = vld [vmem:[%s4092_s28 + $0x15f0] sm:$0xff] }
  0x89   : > { %643 = vst [vmem:[%s4097_s29 + $0x740] sm:$0xff] %v642_v40  ;;  %645 = vst [vmem:[%s4097_s29 + $0x748] sm:$0xff] %v644_v41  ;;  %v648_v43 = vld [vmem:[%s4092_s28 + $0x15f8] sm:$0xff]  ;;  %v650_v44 = vld [vmem:[%s4092_s28 + $0x1600] sm:$0xff] }
  0x8a   : > { %647 = vst [vmem:[%s4097_s29 + $0x750] sm:$0xff] %v646_v42  ;;  %649 = vst [vmem:[%s4097_s29 + $0x758] sm:$0xff] %v648_v43  ;;  %v652_v45 = vld [vmem:[%s4092_s28 + $0x1638] sm:$0xff]  ;;  %v654_v46 = vld [vmem:[%s4092_s28 + $0x1640] sm:$0xff] }
  0x8b   : > { %651 = vst [vmem:[%s4097_s29 + $0x760] sm:$0xff] %v650_v44  ;;  %v656_v47 = vld [vmem:[%s4092_s28 + $0x1648] sm:$0xff]  ;;  %653 = vst [vmem:[%s4097_s29 + $0x768] sm:$0xff] %v652_v45  ;;  %v658_v48 = vld [vmem:[%s4092_s28 + $0x1680] sm:$0xff] }
  0x8c   : > { %655 = vst [vmem:[%s4097_s29 + $0x770] sm:$0xff] %v654_v46  ;;  %657 = vst [vmem:[%s4097_s29 + $0x778] sm:$0xff] %v656_v47  ;;  %v660_v49 = vld [vmem:[%s4092_s28 + $0x1688] sm:$0xff]  ;;  %v662_v50 = vld [vmem:[%s4092_s28 + $0x1690] sm:$0xff] }
  0x8d   : > { %659 = vst [vmem:[%s4097_s29 + $0x780] sm:$0xff] %v658_v48  ;;  %661 = vst [vmem:[%s4097_s29 + $0x788] sm:$0xff] %v660_v49  ;;  %v664_v51 = vld [vmem:[%s4092_s28 + $0x16c8] sm:$0xff]  ;;  %v666_v52 = vld [vmem:[%s4092_s28 + $0x16d0] sm:$0xff] }
  0x8e   : > { %663 = vst [vmem:[%s4097_s29 + $0x790] sm:$0xff] %v662_v50  ;;  %v668_v53 = vld [vmem:[%s4092_s28 + $0x16d8] sm:$0xff]  ;;  %665 = vst [vmem:[%s4097_s29 + $0x798] sm:$0xff] %v664_v51  ;;  %v670_v54 = vld [vmem:[%s4092_s28 + $0x1710] sm:$0xff] }
  0x8f   : > { %667 = vst [vmem:[%s4097_s29 + $0x7a0] sm:$0xff] %v666_v52  ;;  %669 = vst [vmem:[%s4097_s29 + $0x7a8] sm:$0xff] %v668_v53  ;;  %v672_v55 = vld [vmem:[%s4092_s28 + $0x1718] sm:$0xff]  ;;  %v674_v56 = vld [vmem:[%s4092_s28 + $0x1720] sm:$0xff] }
  0x90   : > { %671 = vst [vmem:[%s4097_s29 + $0x7b0] sm:$0xff] %v670_v54  ;;  %673 = vst [vmem:[%s4097_s29 + $0x7b8] sm:$0xff] %v672_v55  ;;  %v676_v57 = vld [vmem:[%s4092_s28 + $0x1758] sm:$0xff]  ;;  %v678_v58 = vld [vmem:[%s4092_s28 + $0x1760] sm:$0xff] }
  0x91   : > { %675 = vst [vmem:[%s4097_s29 + $0x7c0] sm:$0xff] %v674_v56  ;;  %v680_v59 = vld [vmem:[%s4092_s28 + $0x1768] sm:$0xff]  ;;  %677 = vst [vmem:[%s4097_s29 + $0x7c8] sm:$0xff] %v676_v57  ;;  %v682_v60 = vld [vmem:[%s4092_s28 + $0x17a0] sm:$0xff] }
  0x92   : > { %679 = vst [vmem:[%s4097_s29 + $0x7d0] sm:$0xff] %v678_v58  ;;  %681 = vst [vmem:[%s4097_s29 + $0x7d8] sm:$0xff] %v680_v59  ;;  %v684_v61 = vld [vmem:[%s4092_s28 + $0x17a8] sm:$0xff]  ;;  %v686_v62 = vld [vmem:[%s4092_s28 + $0x17b0] sm:$0xff] }
  0x93   : > { %683 = vst [vmem:[%s4097_s29 + $0x7e0] sm:$0xff] %v682_v60  ;;  %685 = vst [vmem:[%s4097_s29 + $0x7e8] sm:$0xff] %v684_v61  ;;  %v688_v63 = vld [vmem:[%s4092_s28 + $0x17e8] sm:$0xff]  ;;  %v690_v0 = vld [vmem:[%s4092_s28 + $0x17f0] sm:$0xff] }
  0x94   : > { %687 = vst [vmem:[%s4097_s29 + $0x7f0] sm:$0xff] %v686_v62  ;;  %v692_v1 = vld [vmem:[%s4092_s28 + $0x17f8] sm:$0xff]  ;;  %689 = vst [vmem:[%s4097_s29 + $0x7f8] sm:$0xff] %v688_v63  ;;  %v694_v2 = vld [vmem:[%s4092_s28 + $0x1830] sm:$0xff] }
  0x95   : > { %691 = vst [vmem:[%s4097_s29 + $0x800] sm:$0xff] %v690_v0  ;;  %693 = vst [vmem:[%s4097_s29 + $0x808] sm:$0xff] %v692_v1  ;;  %v696_v3 = vld [vmem:[%s4092_s28 + $0x1838] sm:$0xff]  ;;  %v698_v4 = vld [vmem:[%s4092_s28 + $0x1840] sm:$0xff] }
  0x96   : > { %695 = vst [vmem:[%s4097_s29 + $0x810] sm:$0xff] %v694_v2  ;;  %697 = vst [vmem:[%s4097_s29 + $0x818] sm:$0xff] %v696_v3  ;;  %v700_v5 = vld [vmem:[%s4092_s28 + $0x1878] sm:$0xff]  ;;  %v702_v6 = vld [vmem:[%s4092_s28 + $0x1880] sm:$0xff] }
  0x97   : > { %699 = vst [vmem:[%s4097_s29 + $0x820] sm:$0xff] %v698_v4  ;;  %v704_v7 = vld [vmem:[%s4092_s28 + $0x1888] sm:$0xff]  ;;  %701 = vst [vmem:[%s4097_s29 + $0x828] sm:$0xff] %v700_v5  ;;  %v706_v8 = vld [vmem:[%s4092_s28 + $0x18c0] sm:$0xff] }
  0x98   : > { %703 = vst [vmem:[%s4097_s29 + $0x830] sm:$0xff] %v702_v6  ;;  %705 = vst [vmem:[%s4097_s29 + $0x838] sm:$0xff] %v704_v7  ;;  %v708_v9 = vld [vmem:[%s4092_s28 + $0x18c8] sm:$0xff]  ;;  %v710_v10 = vld [vmem:[%s4092_s28 + $0x18d0] sm:$0xff] }
  0x99   : > { %707 = vst [vmem:[%s4097_s29 + $0x840] sm:$0xff] %v706_v8  ;;  %709 = vst [vmem:[%s4097_s29 + $0x848] sm:$0xff] %v708_v9  ;;  %v712_v11 = vld [vmem:[%s4092_s28 + $0x1908] sm:$0xff]  ;;  %v714_v12 = vld [vmem:[%s4092_s28 + $0x1910] sm:$0xff] }
  0x9a   : > { %711 = vst [vmem:[%s4097_s29 + $0x850] sm:$0xff] %v710_v10  ;;  %v716_v13 = vld [vmem:[%s4092_s28 + $0x1918] sm:$0xff]  ;;  %713 = vst [vmem:[%s4097_s29 + $0x858] sm:$0xff] %v712_v11  ;;  %v718_v14 = vld [vmem:[%s4092_s28 + $0x1950] sm:$0xff] }
  0x9b   : > { %715 = vst [vmem:[%s4097_s29 + $0x860] sm:$0xff] %v714_v12  ;;  %717 = vst [vmem:[%s4097_s29 + $0x868] sm:$0xff] %v716_v13  ;;  %v720_v15 = vld [vmem:[%s4092_s28 + $0x1958] sm:$0xff]  ;;  %v722_v16 = vld [vmem:[%s4092_s28 + $0x1960] sm:$0xff] }
  0x9c   : > { %719 = vst [vmem:[%s4097_s29 + $0x870] sm:$0xff] %v718_v14  ;;  %721 = vst [vmem:[%s4097_s29 + $0x878] sm:$0xff] %v720_v15  ;;  %v724_v17 = vld [vmem:[%s4092_s28 + $0x1998] sm:$0xff]  ;;  %v726_v18 = vld [vmem:[%s4092_s28 + $0x19a0] sm:$0xff] }
  0x9d   : > { %723 = vst [vmem:[%s4097_s29 + $0x880] sm:$0xff] %v722_v16  ;;  %v728_v19 = vld [vmem:[%s4092_s28 + $0x19a8] sm:$0xff]  ;;  %725 = vst [vmem:[%s4097_s29 + $0x888] sm:$0xff] %v724_v17  ;;  %v730_v20 = vld [vmem:[%s4092_s28 + $0x19e0] sm:$0xff] }
  0x9e   : > { %727 = vst [vmem:[%s4097_s29 + $0x890] sm:$0xff] %v726_v18  ;;  %729 = vst [vmem:[%s4097_s29 + $0x898] sm:$0xff] %v728_v19  ;;  %v732_v21 = vld [vmem:[%s4092_s28 + $0x19e8] sm:$0xff]  ;;  %v734_v22 = vld [vmem:[%s4092_s28 + $0x19f0] sm:$0xff] }
  0x9f   : > { %731 = vst [vmem:[%s4097_s29 + $0x8a0] sm:$0xff] %v730_v20  ;;  %733 = vst [vmem:[%s4097_s29 + $0x8a8] sm:$0xff] %v732_v21  ;;  %v736_v23 = vld [vmem:[%s4092_s28 + $0x1a28] sm:$0xff]  ;;  %v738_v24 = vld [vmem:[%s4092_s28 + $0x1a30] sm:$0xff] }
  0xa0   : > { %735 = vst [vmem:[%s4097_s29 + $0x8b0] sm:$0xff] %v734_v22  ;;  %v740_v25 = vld [vmem:[%s4092_s28 + $0x1a38] sm:$0xff]  ;;  %737 = vst [vmem:[%s4097_s29 + $0x8b8] sm:$0xff] %v736_v23  ;;  %v742_v26 = vld [vmem:[%s4092_s28 + $0x1a70] sm:$0xff] }
  0xa1   : > { %739 = vst [vmem:[%s4097_s29 + $0x8c0] sm:$0xff] %v738_v24  ;;  %741 = vst [vmem:[%s4097_s29 + $0x8c8] sm:$0xff] %v740_v25  ;;  %v744_v27 = vld [vmem:[%s4092_s28 + $0x1a78] sm:$0xff]  ;;  %v746_v28 = vld [vmem:[%s4092_s28 + $0x1a80] sm:$0xff] }
  0xa2   : > { %743 = vst [vmem:[%s4097_s29 + $0x8d0] sm:$0xff] %v742_v26  ;;  %745 = vst [vmem:[%s4097_s29 + $0x8d8] sm:$0xff] %v744_v27  ;;  %v748_v29 = vld [vmem:[%s4092_s28 + $0x1ab8] sm:$0xff]  ;;  %v750_v30 = vld [vmem:[%s4092_s28 + $0x1ac0] sm:$0xff] }
  0xa3   : > { %747 = vst [vmem:[%s4097_s29 + $0x8e0] sm:$0xff] %v746_v28  ;;  %v752_v31 = vld [vmem:[%s4092_s28 + $0x1ac8] sm:$0xff]  ;;  %749 = vst [vmem:[%s4097_s29 + $0x8e8] sm:$0xff] %v748_v29 }
  0xa4   : > { %751 = vst [vmem:[%s4097_s29 + $0x8f0] sm:$0xff] %v750_v30  ;;  %753 = vst [vmem:[%s4097_s29 + $0x8f8] sm:$0xff] %v752_v31 }
  0xa5 PF: > { %p3183_p8 = scmp.ge.s32.totalorder %s4022_s16, 1  ;;  %p766_p9 = scmp.lt.s32.totalorder %s4022_s16, 4 }
  0xa7   : > { %p767_p10 = pnand %p3183_p8, %p766_p9 }
  0xa8   : > { %s773_s30 = sand.u32 (!%p767_p10), 1, %s4006_s12   ;;  %s813_s11 = smul.u32 (!%p767_p10), 6, %s4014_s14 }
  0xa9   : > { %770 = sbr.rel (%p767_p10) target bundleno = 707 (0x2c3), region = 51 }
  0xaa   : > { %s3496_s6 = smul.u32 (!%p767_p10), 2304, %s773_s30  ;;  %p814_p11 = scmp.lt.s32.totalorder (!%p767_p10), %s813_s11, 17 }
  0xab   : > { %s3497_s23 = smul.u32 (!%p767_p10), 48, %s773_s30 }
  0xac   : > { %s4688_s9 = scalar_lea.vmem (!%p767_p10), [#allocation2], %s3496_s6 }
  0xae   : > { %v4678_v32 = vld [vmem:[%s5082_s0 + $0x4] ss:$24 sps:$4 sm:$0xff]   ;;  %v3538_v34 = vld [vmem:[%s4688_s9 + $0x154] ss:$24 sps:$4 sm:$0xff]   ;;  %v3540_v35 = vld [vmem:[%s4688_s9 + $0x150] ss:$24 sps:$4 sm:$0xff]  }
  0xaf   : > { %2648 = vmatprep.mubr.bf16.mxu0 %v4678_v32  ;;  %v4686_v33 = vld [vmem:[%s5082_s0 + $0xc] ss:$24 sps:$4 sm:$0xff]   ;;  %2616 = vmatprep.subr.bf16.mxu0 %v3538_v34  ;;  %v3543_v37 = vld [vmem:[%s4688_s9 + $0x450] ss:$24 sps:$4 sm:$0xff]   ;;  %v3546_v39 = vld [vmem:[%s4688_s9 + $0x120] ss:$24 sps:$4 sm:$0xff]  }
  0xb0   : > { %2691 = vmatprep.mubr.bf16.mxu1 %v4686_v33  ;;  %v3541_v36 = vld [vmem:[%s4688_s9 + $0x454] ss:$24 sps:$4 sm:$0xff]   ;;  %2617 = vmatpush1.bf16.msra.mxu0 %v3540_v35  ;;  %v3544_v38 = vld [vmem:[%s4688_s9 + $0x124] ss:$24 sps:$4 sm:$0xff]   ;;  %v3549_v41 = vld [vmem:[%s4688_s9 + $0x420] ss:$24 sps:$4 sm:$0xff]  }
  0xb1   : > { %2659 = vmatprep.subr.bf16.mxu1 %v3541_v36  ;;  %v3547_v40 = vld [vmem:[%s4688_s9 + $0x424] ss:$24 sps:$4 sm:$0xff]   ;;  %2618 = vmatprep.subr.bf16.mxu0 %v3544_v38  ;;  %v3550_v42 = vld [vmem:[%s4688_s9 + $0xf4] ss:$24 sps:$4 sm:$0xff]   ;;  %v3552_v43 = vld [vmem:[%s4688_s9 + $0xf0] ss:$24 sps:$4 sm:$0xff]  }
  0xb2   : > { %2660 = vmatpush1.bf16.msra.mxu1 %v3543_v37  ;;  %v3553_v44 = vld [vmem:[%s4688_s9 + $0x3f4] ss:$24 sps:$4 sm:$0xff]   ;;  %v3556_v45 = vld [vmem:[%s4688_s9 + $0xc4] ss:$24 sps:$4 sm:$0xff]   ;;  %v3555_v46 = vld [vmem:[%s4688_s9 + $0x3f0] ss:$24 sps:$4 sm:$0xff]  }
  0xb3   : > { %2661 = vmatprep.subr.bf16.mxu1 %v3547_v40  ;;  %v3559_v47 = vld [vmem:[%s4688_s9 + $0x3c4] ss:$24 sps:$4 sm:$0xff]   ;;  %v3558_v48 = vld [vmem:[%s4688_s9 + $0xc0] ss:$24 sps:$4 sm:$0xff]   ;;  %v3562_v49 = vld [vmem:[%s4688_s9 + $0x94] ss:$24 sps:$4 sm:$0xff]  }
  0xb4   : > { %2619 = vmatpush1.bf16.msra.mxu0 %v3546_v39  ;;  %v3561_v50 = vld [vmem:[%s4688_s9 + $0x3c0] ss:$24 sps:$4 sm:$0xff]   ;;  %v3565_v51 = vld [vmem:[%s4688_s9 + $0x394] ss:$24 sps:$4 sm:$0xff]   ;;  %v3564_v52 = vld [vmem:[%s4688_s9 + $0x90] ss:$24 sps:$4 sm:$0xff]  }
  0xb5   : > { %2620 = vmatprep.subr.bf16.mxu0 %v3550_v42  ;;  %v3568_v53 = vld [vmem:[%s4688_s9 + $0x64] ss:$24 sps:$4 sm:$0xff]   ;;  %v3567_v54 = vld [vmem:[%s4688_s9 + $0x390] ss:$24 sps:$4 sm:$0xff]   ;;  %v3570_v56 = vld [vmem:[%s4688_s9 + $0x60] ss:$24 sps:$4 sm:$0xff]  }
  0xb6   : > { %2662 = vmatpush1.bf16.msra.mxu1 %v3549_v41  ;;  %v3571_v55 = vld [vmem:[%s4688_s9 + $0x364] ss:$24 sps:$4 sm:$0xff]   ;;  %v3574_v57 = vld [vmem:[%s4688_s9 + $0x34] ss:$24 sps:$4 sm:$0xff]   ;;  %v3573_v58 = vld [vmem:[%s4688_s9 + $0x360] ss:$24 sps:$4 sm:$0xff]  }
  0xb7   : > { %2663 = vmatprep.subr.bf16.mxu1 %v3553_v44  ;;  %v3577_v59 = vld [vmem:[%s4688_s9 + $0x334] ss:$24 sps:$4 sm:$0xff]   ;;  %v3576_v60 = vld [vmem:[%s4688_s9 + $0x30] ss:$24 sps:$4 sm:$0xff]   ;;  %v3580_v61 = vld [vmem:[%s4688_s9 + $0x4] ss:$24 sps:$4 sm:$0xff]  }
  0xb8   : > { %2621 = vmatpush1.bf16.msra.mxu0 %v3552_v43  ;;  %v3579_v62 = vld [vmem:[%s4688_s9 + $0x330] ss:$24 sps:$4 sm:$0xff]   ;;  %v3583_v63 = vld [vmem:[%s4688_s9 + $0x304] ss:$24 sps:$4 sm:$0xff]   ;;  %v3582_v0 = vld [vmem:[%s4688_s9] ss:$24 sps:$4 sm:$0xff]  }
  0xb9   : > { %2622 = vmatprep.subr.bf16.mxu0 %v3556_v45  ;;  %v3586_v1 = vld [vmem:[%s4688_s9 + $0x2d4] ss:$24 sps:$4 sm:$0xff]   ;;  %v3585_v2 = vld [vmem:[%s4688_s9 + $0x300] ss:$24 sps:$4 sm:$0xff]   ;;  %v3588_v4 = vld [vmem:[%s4688_s9 + $0x2d0] ss:$24 sps:$4 sm:$0xff]  }
  0xba   : > { %2664 = vmatpush1.bf16.msra.mxu1 %v3555_v46  ;;  %v3589_v3 = vld [vmem:[%s4688_s9 + $0x5d4] ss:$24 sps:$4 sm:$0xff]   ;;  %v3592_v5 = vld [vmem:[%s4688_s9 + $0x2a4] ss:$24 sps:$4 sm:$0xff]   ;;  %v3591_v6 = vld [vmem:[%s4688_s9 + $0x5d0] ss:$24 sps:$4 sm:$0xff]  }
  0xbb   : > { %2665 = vmatprep.subr.bf16.mxu1 %v3559_v47  ;;  %v3595_v7 = vld [vmem:[%s4688_s9 + $0x5a4] ss:$24 sps:$4 sm:$0xff]   ;;  %v3594_v8 = vld [vmem:[%s4688_s9 + $0x2a0] ss:$24 sps:$4 sm:$0xff]   ;;  %v3598_v9 = vld [vmem:[%s4688_s9 + $0x274] ss:$24 sps:$4 sm:$0xff]  }
  0xbc   : > { %2623 = vmatpush1.bf16.msra.mxu0 %v3558_v48  ;;  %v3597_v10 = vld [vmem:[%s4688_s9 + $0x5a0] ss:$24 sps:$4 sm:$0xff]   ;;  %v3601_v11 = vld [vmem:[%s4688_s9 + $0x574] ss:$24 sps:$4 sm:$0xff]   ;;  %v3600_v12 = vld [vmem:[%s4688_s9 + $0x270] ss:$24 sps:$4 sm:$0xff]  }
  0xbd   : > { %2624 = vmatprep.subr.bf16.mxu0 %v3562_v49  ;;  %v3604_v13 = vld [vmem:[%s4688_s9 + $0x244] ss:$24 sps:$4 sm:$0xff]   ;;  %v3603_v14 = vld [vmem:[%s4688_s9 + $0x570] ss:$24 sps:$4 sm:$0xff]   ;;  %v3606_v16 = vld [vmem:[%s4688_s9 + $0x240] ss:$24 sps:$4 sm:$0xff]  }
  0xbe   : > { %2666 = vmatpush1.bf16.msra.mxu1 %v3561_v50  ;;  %v3607_v15 = vld [vmem:[%s4688_s9 + $0x544] ss:$24 sps:$4 sm:$0xff]   ;;  %v3610_v17 = vld [vmem:[%s4688_s9 + $0x214] ss:$24 sps:$4 sm:$0xff]   ;;  %v3609_v18 = vld [vmem:[%s4688_s9 + $0x540] ss:$24 sps:$4 sm:$0xff]  }
  0xbf   : > { %2667 = vmatprep.subr.bf16.mxu1 %v3565_v51  ;;  %v3613_v19 = vld [vmem:[%s4688_s9 + $0x514] ss:$24 sps:$4 sm:$0xff]   ;;  %v3612_v20 = vld [vmem:[%s4688_s9 + $0x210] ss:$24 sps:$4 sm:$0xff]   ;;  %v3616_v21 = vld [vmem:[%s4688_s9 + $0x1e4] ss:$24 sps:$4 sm:$0xff]  }
  0xc0   : > { %2625 = vmatpush1.bf16.msra.mxu0 %v3564_v52  ;;  %v3615_v22 = vld [vmem:[%s4688_s9 + $0x510] ss:$24 sps:$4 sm:$0xff]   ;;  %v3619_v23 = vld [vmem:[%s4688_s9 + $0x4e4] ss:$24 sps:$4 sm:$0xff]   ;;  %v3618_v24 = vld [vmem:[%s4688_s9 + $0x1e0] ss:$24 sps:$4 sm:$0xff]  }
  0xc1   : > { %2626 = vmatprep.subr.bf16.mxu0 %v3568_v53  ;;  %v3622_v25 = vld [vmem:[%s4688_s9 + $0x1b4] ss:$24 sps:$4 sm:$0xff]   ;;  %v3621_v26 = vld [vmem:[%s4688_s9 + $0x4e0] ss:$24 sps:$4 sm:$0xff]   ;;  %v3624_v28 = vld [vmem:[%s4688_s9 + $0x1b0] ss:$24 sps:$4 sm:$0xff]  }
  0xc2   : > { %2668 = vmatpush1.bf16.msra.mxu1 %v3567_v54  ;;  %v3625_v27 = vld [vmem:[%s4688_s9 + $0x4b4] ss:$24 sps:$4 sm:$0xff]   ;;  %v3628_v29 = vld [vmem:[%s4688_s9 + $0x184] ss:$24 sps:$4 sm:$0xff]   ;;  %v3627_v30 = vld [vmem:[%s4688_s9 + $0x4b0] ss:$24 sps:$4 sm:$0xff]  }
  0xc3   : > { %2669 = vmatprep.subr.bf16.mxu1 %v3571_v55  ;;  %v3631_v31 = vld [vmem:[%s4688_s9 + $0x484] ss:$24 sps:$4 sm:$0xff]   ;;  %v3630_v34 = vld [vmem:[%s4688_s9 + $0x180] ss:$24 sps:$4 sm:$0xff]   ;;  %v3639_v36 = vld [vmem:[%s4688_s9 + $0x754] ss:$24 sps:$4 sm:$0xff]  }
  0xc4   : > { %2627 = vmatpush1.bf16.msra.mxu0 %v3570_v56  ;;  %v4757_v35 = vld [vmem:[%s5082_s0] ss:$24 sps:$4 sm:$0xff]   ;;  %v3645_v39 = vld [vmem:[%s4688_s9 + $0x15c] ss:$24 sps:$4 sm:$0xff]   ;;  %v3637_v40 = vld [vmem:[%s4688_s9 + $0x750] ss:$24 sps:$4 sm:$0xff]  }
  0xc5   : > { %2628 = vmatprep.subr.bf16.mxu0 %v3574_v57  ;;  %v3635_v37 = vld [vmem:[%s4688_s9 + $0x480] ss:$24 sps:$4 sm:$0xff]   ;;  %v4771_v41 = vld [vmem:[%s5082_s0 + $0x14] ss:$24 sps:$4 sm:$0xff]   ;;  %v3648_v42 = vld [vmem:[%s4688_s9 + $0x724] ss:$24 sps:$4 sm:$0xff]  }
  0xc6   : > { %2670 = vmatpush1.bf16.msra.mxu1 %v3573_v58  ;;  %v4764_v38 = vld [vmem:[%s5082_s0 + $0x8] ss:$24 sps:$4 sm:$0xff]   ;;  %v3643_v43 = vld [vmem:[%s4688_s9 + $0x158] ss:$24 sps:$4 sm:$0xff]   ;;  %v3651_v44 = vld [vmem:[%s4688_s9 + $0x12c] ss:$24 sps:$4 sm:$0xff]  }
  0xc7   : > { %2671 = vmatprep.subr.bf16.mxu1 %v3577_v59  ;;  %v3646_v45 = vld [vmem:[%s4688_s9 + $0x720] ss:$24 sps:$4 sm:$0xff]   ;;  %v3654_v46 = vld [vmem:[%s4688_s9 + $0x6f4] ss:$24 sps:$4 sm:$0xff]   ;;  %v3652_v49 = vld [vmem:[%s4688_s9 + $0x6f0] ss:$24 sps:$4 sm:$0xff]  }
  0xc8   : > { %2629 = vmatpush1.bf16.msra.mxu0 %v3576_v60  ;;  %v3649_v47 = vld [vmem:[%s4688_s9 + $0x128] ss:$24 sps:$4 sm:$0xff]   ;;  %v3657_v48 = vld [vmem:[%s4688_s9 + $0xfc] ss:$24 sps:$4 sm:$0xff]   ;;  %v3655_v51 = vld [vmem:[%s4688_s9 + $0xf8] ss:$24 sps:$4 sm:$0xff]  }
  0xc9   : > { %2630 = vmatprep.subr.bf16.mxu0 %v3580_v61  ;;  %v3660_v50 = vld [vmem:[%s4688_s9 + $0x6c4] ss:$24 sps:$4 sm:$0xff]   ;;  %v3658_v53 = vld [vmem:[%s4688_s9 + $0x6c0] ss:$24 sps:$4 sm:$0xff]   ;;  %v3664_v56 = vld [vmem:[%s4688_s9 + $0x690] ss:$24 sps:$4 sm:$0xff]  }
  0xca   : > { %2672 = vmatpush1.bf16.msra.mxu1 %v3579_v62  ;;  %v3663_v52 = vld [vmem:[%s4688_s9 + $0xcc] ss:$24 sps:$4 sm:$0xff]   ;;  %v3661_v54 = vld [vmem:[%s4688_s9 + $0xc8] ss:$24 sps:$4 sm:$0xff]   ;;  %v3669_v55 = vld [vmem:[%s4688_s9 + $0x9c] ss:$24 sps:$4 sm:$0xff]  }
  0xcb   : > { %2673 = vmatprep.subr.bf16.mxu1 %v3583_v63  ;;  %v3672_v57 = vld [vmem:[%s4688_s9 + $0x664] ss:$24 sps:$4 sm:$0xff]   ;;  %v3667_v58 = vld [vmem:[%s4688_s9 + $0x98] ss:$24 sps:$4 sm:$0xff]   ;;  %v3678_v61 = vld [vmem:[%s4688_s9 + $0x634] ss:$24 sps:$4 sm:$0xff]  }
  0xcc   : > { %2631 = vmatpush1.bf16.msra.mxu0 %v3582_v0  ;;  %v3675_v59 = vld [vmem:[%s4688_s9 + $0x6c] ss:$24 sps:$4 sm:$0xff]   ;;  %v3670_v60 = vld [vmem:[%s4688_s9 + $0x660] ss:$24 sps:$4 sm:$0xff]   ;;  %v3681_v63 = vld [vmem:[%s4688_s9 + $0x3c] ss:$24 sps:$4 sm:$0xff]  }
  0xcd   : > { %2632 = vmatprep.subr.bf16.mxu0 %v3586_v1  ;;  %v3673_v62 = vld [vmem:[%s4688_s9 + $0x68] ss:$24 sps:$4 sm:$0xff]   ;;  %v3684_v1 = vld [vmem:[%s4688_s9 + $0x604] ss:$24 sps:$4 sm:$0xff]   ;;  %s5094_s11 = smov (!%p814_p11, %s813_s11), 17  ;;  %s3494_s12 = smul.u32 (%p4079_p6), 24, %s4014_s14 }
  0xce   : > { %2674 = vmatpush1.bf16.msra.mxu1 %v3585_v2  ;;  %v3676_v0 = vld [vmem:[%s4688_s9 + $0x630] ss:$24 sps:$4 sm:$0xff]   ;;  %s816_s20 = scalar_lea.vmem %s5084_s2, %s5094_s11 }
  0xcf   : > { %2675 = vmatprep.subr.bf16.mxu1 %v3589_v3  ;;  %v3679_v2 = vld [vmem:[%s4688_s9 + $0x38] ss:$24 sps:$4 sm:$0xff]   ;;  %v3687_v3 = vld [vmem:[%s4688_s9 + $0xc] ss:$24 sps:$4 sm:$0xff]   ;;  %s3057_s25 = scalar_lea.vmem (%p4079_p6), %s5085_s3, %s3494_s12 }
  0xd0   : > { %2633 = vmatpush2.bf16.msra.mxu0 %v3588_v4  ;;  %v3682_v4 = vld [vmem:[%s4688_s9 + $0x600] ss:$24 sps:$4 sm:$0xff]  }
  0xd1   : > { %2634 = vmatprep.subr.bf16.mxu0 %v3592_v5  ;;  %v3690_v5 = vld [vmem:[%s4688_s9 + $0x8d4] ss:$24 sps:$4 sm:$0xff]  }
  0xd2   : > { %2676 = vmatpush2.bf16.msra.mxu1 %v3591_v6  ;;  %v3685_v6 = vld [vmem:[%s4688_s9 + $0x8] ss:$24 sps:$4 sm:$0xff]  }
  0xd3   : > { %2677 = vmatprep.subr.bf16.mxu1 %v3595_v7  ;;  %v3693_v7 = vld [vmem:[%s4688_s9 + $0x2dc] ss:$24 sps:$4 sm:$0xff]  }
  0xd4   : > { %2635 = vmatpush2.bf16.msra.mxu0 %v3594_v8  ;;  %v3688_v8 = vld [vmem:[%s4688_s9 + $0x8d0] ss:$24 sps:$4 sm:$0xff]  }
  0xd5   : > { %2636 = vmatprep.subr.bf16.mxu0 %v3598_v9  ;;  %v3696_v9 = vld [vmem:[%s4688_s9 + $0x8a4] ss:$24 sps:$4 sm:$0xff]  }
  0xd6   : > { %2678 = vmatpush2.bf16.msra.mxu1 %v3597_v10  ;;  %v3691_v10 = vld [vmem:[%s4688_s9 + $0x2d8] ss:$24 sps:$4 sm:$0xff]  }
  0xd7   : > { %2679 = vmatprep.subr.bf16.mxu1 %v3601_v11  ;;  %v3699_v11 = vld [vmem:[%s4688_s9 + $0x2ac] ss:$24 sps:$4 sm:$0xff]  }
  0xd8   : > { %2637 = vmatpush2.bf16.msra.mxu0 %v3600_v12  ;;  %v3694_v12 = vld [vmem:[%s4688_s9 + $0x8a0] ss:$24 sps:$4 sm:$0xff]  }
  0xd9   : > { %2638 = vmatprep.subr.bf16.mxu0 %v3604_v13  ;;  %v3702_v13 = vld [vmem:[%s4688_s9 + $0x874] ss:$24 sps:$4 sm:$0xff]  }
  0xda   : > { %2680 = vmatpush2.bf16.msra.mxu1 %v3603_v14  ;;  %v3697_v14 = vld [vmem:[%s4688_s9 + $0x2a8] ss:$24 sps:$4 sm:$0xff]  }
  0xdb   : > { %2681 = vmatprep.subr.bf16.mxu1 %v3607_v15  ;;  %v3705_v15 = vld [vmem:[%s4688_s9 + $0x27c] ss:$24 sps:$4 sm:$0xff]  }
  0xdc   : > { %2639 = vmatpush2.bf16.msra.mxu0 %v3606_v16  ;;  %v3700_v16 = vld [vmem:[%s4688_s9 + $0x870] ss:$24 sps:$4 sm:$0xff]  }
  0xdd   : > { %2640 = vmatprep.subr.bf16.mxu0 %v3610_v17  ;;  %v3708_v17 = vld [vmem:[%s4688_s9 + $0x844] ss:$24 sps:$4 sm:$0xff]  }
  0xde   : > { %2682 = vmatpush2.bf16.msra.mxu1 %v3609_v18  ;;  %v3703_v18 = vld [vmem:[%s4688_s9 + $0x278] ss:$24 sps:$4 sm:$0xff]  }
  0xdf   : > { %2683 = vmatprep.subr.bf16.mxu1 %v3613_v19  ;;  %v3711_v19 = vld [vmem:[%s4688_s9 + $0x24c] ss:$24 sps:$4 sm:$0xff]  }
  0xe0   : > { %2641 = vmatpush2.bf16.msra.mxu0 %v3612_v20  ;;  %v3706_v20 = vld [vmem:[%s4688_s9 + $0x840] ss:$24 sps:$4 sm:$0xff]  }
  0xe1   : > { %2642 = vmatprep.subr.bf16.mxu0 %v3616_v21  ;;  %v3714_v21 = vld [vmem:[%s4688_s9 + $0x814] ss:$24 sps:$4 sm:$0xff]  }
  0xe2   : > { %2684 = vmatpush2.bf16.msra.mxu1 %v3615_v22  ;;  %v3709_v22 = vld [vmem:[%s4688_s9 + $0x248] ss:$24 sps:$4 sm:$0xff]  }
  0xe3   : > { %2685 = vmatprep.subr.bf16.mxu1 %v3619_v23  ;;  %v3717_v23 = vld [vmem:[%s4688_s9 + $0x21c] ss:$24 sps:$4 sm:$0xff]  }
  0xe4   : > { %2643 = vmatpush2.bf16.msra.mxu0 %v3618_v24  ;;  %v3712_v24 = vld [vmem:[%s4688_s9 + $0x810] ss:$24 sps:$4 sm:$0xff]  }
  0xe5   : > { %2644 = vmatprep.subr.bf16.mxu0 %v3622_v25  ;;  %v3720_v25 = vld [vmem:[%s4688_s9 + $0x7e4] ss:$24 sps:$4 sm:$0xff]  }
  0xe6   : > { %2686 = vmatpush2.bf16.msra.mxu1 %v3621_v26  ;;  %v3715_v26 = vld [vmem:[%s4688_s9 + $0x218] ss:$24 sps:$4 sm:$0xff]  }
  0xe7   : > { %2687 = vmatprep.subr.bf16.mxu1 %v3625_v27  ;;  %v3723_v27 = vld [vmem:[%s4688_s9 + $0x1ec] ss:$24 sps:$4 sm:$0xff]  }
  0xe8   : > { %2645 = vmatpush2.bf16.msra.mxu0 %v3624_v28  ;;  %v3718_v28 = vld [vmem:[%s4688_s9 + $0x7e0] ss:$24 sps:$4 sm:$0xff]  }
  0xe9   : > { %2646 = vmatprep.subr.bf16.mxu0 %v3628_v29  ;;  %v3726_v29 = vld [vmem:[%s4688_s9 + $0x7b4] ss:$24 sps:$4 sm:$0xff]  }
  0xea   : > { %2688 = vmatpush2.bf16.msra.mxu1 %v3627_v30  ;;  %v3721_v30 = vld [vmem:[%s4688_s9 + $0x1e8] ss:$24 sps:$4 sm:$0xff]  }
  0xeb   : > { %2689 = vmatprep.subr.bf16.mxu1 %v3631_v31  ;;  %v3729_v31 = vld [vmem:[%s4688_s9 + $0x1bc] ss:$24 sps:$4 sm:$0xff]  }
  0xec   : > { %2647 = vmatpush2.bf16.msra.mxu0 %v3630_v34  ;;  %v3724_v34 = vld [vmem:[%s4688_s9 + $0x7b0] ss:$24 sps:$4 sm:$0xff]  }
  0xed   : > { %2702 = vmatprep.subr.bf16.mxu0 %v3639_v36  ;;  %v3732_v36 = vld [vmem:[%s4688_s9 + $0x784] ss:$24 sps:$4 sm:$0xff]  }
  0xee   : > { %2690 = vmatpush2.bf16.msra.mxu1 %v3635_v37  ;;  %v3727_v37 = vld [vmem:[%s4688_s9 + $0x1b8] ss:$24 sps:$4 sm:$0xff]  }
  0xef   : > { %2649 = vmatmul.mubr.bf16.vlgmr.msra.gmra.mxu0 %v4757_v35  ;;  %2745 = vmatprep.subr.bf16.mxu1 %v3645_v39  ;;  %v3735_v39 = vld [vmem:[%s4688_s9 + $0x18c] ss:$24 sps:$4 sm:$0xff]  }
  0xf0   : > { %2703 = vmatpush1.bf16.msra.mxu0 %v3637_v40  ;;  %2734 = vmatprep.mubr.bf16.mxu0 %v4771_v41  ;;  %v3730_v40 = vld [vmem:[%s4688_s9 + $0x780] ss:$24 sps:$4 sm:$0xff]  }
  0xf1   : > { %2692 = vmatmul.mubr.bf16.vlgmr.msra.gmra.mxu1 %v4764_v38  ;;  %2704 = vmatprep.subr.bf16.mxu0 %v3648_v42  ;;  %v3741_v42 = vld [vmem:[%s4688_s9 + $0x45c] ss:$24 sps:$4 sm:$0xff]  }
  0xf2   : > { %2746 = vmatpush1.bf16.msra.mxu1 %v3643_v43  ;;  %2777 = vmatprep.mubr.bf16.mxu1 %v4678_v32  ;;  %v3666_v32 = vld [vmem:[%s4688_s9 + $0x694] ss:$24 sps:$4 sm:$0xff]   ;;  %v3733_v43 = vld [vmem:[%s4688_s9 + $0x188] ss:$24 sps:$4 sm:$0xff]  }
  0xf3   : > { %2747 = vmatprep.subr.bf16.mxu1 %v3651_v44  ;;  %v4842_v44 = vld [vmem:[%s5082_s0 + $0x10] ss:$24 sps:$4 sm:$0xff]  }
  0xf4   : > { %2705 = vmatpush1.bf16.msra.mxu0 %v3646_v45  ;;  %v3744_v45 = vld [vmem:[%s4688_s9 + $0x75c] ss:$24 sps:$4 sm:$0xff]  }
  0xf5   : > { %2706 = vmatprep.subr.bf16.mxu0 %v3654_v46  ;;  %v3739_v46 = vld [vmem:[%s4688_s9 + $0x458] ss:$24 sps:$4 sm:$0xff]  }
  0xf6   : > { %2748 = vmatpush1.bf16.msra.mxu1 %v3649_v47  ;;  %v3747_v47 = vld [vmem:[%s4688_s9 + $0x42c] ss:$24 sps:$4 sm:$0xff]  }
  0xf7   : > { %2749 = vmatprep.subr.bf16.mxu1 %v3657_v48  ;;  %v3742_v48 = vld [vmem:[%s4688_s9 + $0x758] ss:$24 sps:$4 sm:$0xff]  }
  0xf8   : > { %2707 = vmatpush1.bf16.msra.mxu0 %v3652_v49  ;;  %v3750_v49 = vld [vmem:[%s4688_s9 + $0x72c] ss:$24 sps:$4 sm:$0xff]  }
  0xf9   : > { %2708 = vmatprep.subr.bf16.mxu0 %v3660_v50  ;;  %v3745_v50 = vld [vmem:[%s4688_s9 + $0x428] ss:$24 sps:$4 sm:$0xff]  }
  0xfa   : > { %2750 = vmatpush1.bf16.msra.mxu1 %v3655_v51  ;;  %v3753_v51 = vld [vmem:[%s4688_s9 + $0x3fc] ss:$24 sps:$4 sm:$0xff]  }
  0xfb   : > { %2751 = vmatprep.subr.bf16.mxu1 %v3663_v52  ;;  %v3748_v52 = vld [vmem:[%s4688_s9 + $0x728] ss:$24 sps:$4 sm:$0xff]  }
  0xfc   : > { %2709 = vmatpush1.bf16.msra.mxu0 %v3658_v53  ;;  %v3756_v53 = vld [vmem:[%s4688_s9 + $0x6fc] ss:$24 sps:$4 sm:$0xff]  }
  0xfd   : > { %2710 = vmatprep.subr.bf16.mxu0 %v3666_v32  ;;  %v3751_v32 = vld [vmem:[%s4688_s9 + $0x3f8] ss:$24 sps:$4 sm:$0xff]  }
  0xfe   : > { %2752 = vmatpush1.bf16.msra.mxu1 %v3661_v54  ;;  %v3762_v54 = vld [vmem:[%s4688_s9 + $0x6cc] ss:$24 sps:$4 sm:$0xff]  }
  0xff   : > { %2753 = vmatprep.subr.bf16.mxu1 %v3669_v55  ;;  %v3757_v55 = vld [vmem:[%s4688_s9 + $0x3c8] ss:$24 sps:$4 sm:$0xff]  }
 0x100   : > { %2711 = vmatpush1.bf16.msra.mxu0 %v3664_v56  ;;  %v3760_v56 = vld [vmem:[%s4688_s9 + $0x6c8] ss:$24 sps:$4 sm:$0xff]  }
 0x101   : > { %2712 = vmatprep.subr.bf16.mxu0 %v3672_v57  ;;  %v3768_v57 = vld [vmem:[%s4688_s9 + $0x69c] ss:$24 sps:$4 sm:$0xff]  }
 0x102   : > { %2754 = vmatpush1.bf16.msra.mxu1 %v3667_v58  ;;  %v3763_v58 = vld [vmem:[%s4688_s9 + $0x398] ss:$24 sps:$4 sm:$0xff]  }
 0x103   : > { %2755 = vmatprep.subr.bf16.mxu1 %v3675_v59  ;;  %v3771_v59 = vld [vmem:[%s4688_s9 + $0x36c] ss:$24 sps:$4 sm:$0xff]  }
 0x104   : > { %2713 = vmatpush1.bf16.msra.mxu0 %v3670_v60  ;;  %v3766_v60 = vld [vmem:[%s4688_s9 + $0x698] ss:$24 sps:$4 sm:$0xff]  }
 0x105   : > { %2714 = vmatprep.subr.bf16.mxu0 %v3678_v61  ;;  %v3774_v61 = vld [vmem:[%s4688_s9 + $0x66c] ss:$24 sps:$4 sm:$0xff]  }
 0x106   : > { %2756 = vmatpush1.bf16.msra.mxu1 %v3673_v62  ;;  %v3769_v62 = vld [vmem:[%s4688_s9 + $0x368] ss:$24 sps:$4 sm:$0xff]  }
 0x107   : > { %2757 = vmatprep.subr.bf16.mxu1 %v3681_v63  ;;  %v3777_v63 = vld [vmem:[%s4688_s9 + $0x33c] ss:$24 sps:$4 sm:$0xff]  }
 0x108   : > { %2715 = vmatpush1.bf16.msra.mxu0 %v3676_v0  ;;  %v3772_v0 = vld [vmem:[%s4688_s9 + $0x668] ss:$24 sps:$4 sm:$0xff]  }
 0x109   : > { %2716 = vmatprep.subr.bf16.mxu0 %v3684_v1  ;;  %v3780_v1 = vld [vmem:[%s4688_s9 + $0x63c] ss:$24 sps:$4 sm:$0xff]  }
 0x10a   : > { %2758 = vmatpush1.bf16.msra.mxu1 %v3679_v2  ;;  %v3775_v2 = vld [vmem:[%s4688_s9 + $0x338] ss:$24 sps:$4 sm:$0xff]  }
 0x10b   : > { %2759 = vmatprep.subr.bf16.mxu1 %v3687_v3  ;;  %v3783_v3 = vld [vmem:[%s4688_s9 + $0x30c] ss:$24 sps:$4 sm:$0xff]  }
 0x10c   : > { %2717 = vmatpush1.bf16.msra.mxu0 %v3682_v4  ;;  %v3778_v4 = vld [vmem:[%s4688_s9 + $0x638] ss:$24 sps:$4 sm:$0xff]  }
 0x10d   : > { %2718 = vmatprep.subr.bf16.mxu0 %v3690_v5  ;;  %v3786_v5 = vld [vmem:[%s4688_s9 + $0x60c] ss:$24 sps:$4 sm:$0xff]  }
 0x10e   : > { %2760 = vmatpush1.bf16.msra.mxu1 %v3685_v6  ;;  %v3781_v6 = vld [vmem:[%s4688_s9 + $0x308] ss:$24 sps:$4 sm:$0xff]  }
 0x10f   : > { %2761 = vmatprep.subr.bf16.mxu1 %v3693_v7  ;;  %v3789_v7 = vld [vmem:[%s4688_s9 + $0x5dc] ss:$24 sps:$4 sm:$0xff]  }
 0x110   : > { %2719 = vmatpush2.bf16.msra.mxu0 %v3688_v8  ;;  %v3784_v8 = vld [vmem:[%s4688_s9 + $0x608] ss:$24 sps:$4 sm:$0xff]  }
 0x111   : > { %2720 = vmatprep.subr.bf16.mxu0 %v3696_v9  ;;  %v3792_v9 = vld [vmem:[%s4688_s9 + $0x8dc] ss:$24 sps:$4 sm:$0xff]  }
 0x112   : > { %2762 = vmatpush2.bf16.msra.mxu1 %v3691_v10  ;;  %v3787_v10 = vld [vmem:[%s4688_s9 + $0x5d8] ss:$24 sps:$4 sm:$0xff]  }
 0x113   : > { %2763 = vmatprep.subr.bf16.mxu1 %v3699_v11  ;;  %v3795_v11 = vld [vmem:[%s4688_s9 + $0x5ac] ss:$24 sps:$4 sm:$0xff]  }
 0x114   : > { %2721 = vmatpush2.bf16.msra.mxu0 %v3694_v12  ;;  %v3790_v12 = vld [vmem:[%s4688_s9 + $0x8d8] ss:$24 sps:$4 sm:$0xff]  }
 0x115   : > { %2722 = vmatprep.subr.bf16.mxu0 %v3702_v13  ;;  %v3798_v13 = vld [vmem:[%s4688_s9 + $0x8ac] ss:$24 sps:$4 sm:$0xff]  }
 0x116   : > { %2764 = vmatpush2.bf16.msra.mxu1 %v3697_v14  ;;  %v3793_v14 = vld [vmem:[%s4688_s9 + $0x5a8] ss:$24 sps:$4 sm:$0xff]  }
 0x117   : > { %2765 = vmatprep.subr.bf16.mxu1 %v3705_v15  ;;  %v3801_v15 = vld [vmem:[%s4688_s9 + $0x57c] ss:$24 sps:$4 sm:$0xff]  }
 0x118   : > { %2723 = vmatpush2.bf16.msra.mxu0 %v3700_v16  ;;  %v3796_v16 = vld [vmem:[%s4688_s9 + $0x8a8] ss:$24 sps:$4 sm:$0xff]  }
 0x119   : > { %2724 = vmatprep.subr.bf16.mxu0 %v3708_v17  ;;  %v3804_v17 = vld [vmem:[%s4688_s9 + $0x87c] ss:$24 sps:$4 sm:$0xff]  }
 0x11a   : > { %2766 = vmatpush2.bf16.msra.mxu1 %v3703_v18  ;;  %v3799_v18 = vld [vmem:[%s4688_s9 + $0x578] ss:$24 sps:$4 sm:$0xff]  }
 0x11b   : > { %2767 = vmatprep.subr.bf16.mxu1 %v3711_v19  ;;  %v3807_v19 = vld [vmem:[%s4688_s9 + $0x54c] ss:$24 sps:$4 sm:$0xff]  }
 0x11c   : > { %2725 = vmatpush2.bf16.msra.mxu0 %v3706_v20  ;;  %v3802_v20 = vld [vmem:[%s4688_s9 + $0x878] ss:$24 sps:$4 sm:$0xff]  }
 0x11d   : > { %2726 = vmatprep.subr.bf16.mxu0 %v3714_v21  ;;  %v3810_v21 = vld [vmem:[%s4688_s9 + $0x84c] ss:$24 sps:$4 sm:$0xff]  }
 0x11e   : > { %2768 = vmatpush2.bf16.msra.mxu1 %v3709_v22  ;;  %v3805_v22 = vld [vmem:[%s4688_s9 + $0x548] ss:$24 sps:$4 sm:$0xff]  }
 0x11f   : > { %2769 = vmatprep.subr.bf16.mxu1 %v3717_v23  ;;  %v3813_v23 = vld [vmem:[%s4688_s9 + $0x51c] ss:$24 sps:$4 sm:$0xff]  }
 0x120   : > { %2727 = vmatpush2.bf16.msra.mxu0 %v3712_v24  ;;  %v3808_v24 = vld [vmem:[%s4688_s9 + $0x848] ss:$24 sps:$4 sm:$0xff]  }
 0x121   : > { %2728 = vmatprep.subr.bf16.mxu0 %v3720_v25  ;;  %v3816_v25 = vld [vmem:[%s4688_s9 + $0x81c] ss:$24 sps:$4 sm:$0xff]  }
 0x122   : > { %2770 = vmatpush2.bf16.msra.mxu1 %v3715_v26  ;;  %v3811_v26 = vld [vmem:[%s4688_s9 + $0x518] ss:$24 sps:$4 sm:$0xff]  }
 0x123   : > { %2771 = vmatprep.subr.bf16.mxu1 %v3723_v27  ;;  %v3819_v27 = vld [vmem:[%s4688_s9 + $0x4ec] ss:$24 sps:$4 sm:$0xff]  }
 0x124   : > { %2729 = vmatpush2.bf16.msra.mxu0 %v3718_v28  ;;  %v3814_v28 = vld [vmem:[%s4688_s9 + $0x818] ss:$24 sps:$4 sm:$0xff]  }
 0x125   : > { %2730 = vmatprep.subr.bf16.mxu0 %v3726_v29  ;;  %v3822_v29 = vld [vmem:[%s4688_s9 + $0x7ec] ss:$24 sps:$4 sm:$0xff]  }
 0x126   : > { %2772 = vmatpush2.bf16.msra.mxu1 %v3721_v30  ;;  %v3817_v30 = vld [vmem:[%s4688_s9 + $0x4e8] ss:$24 sps:$4 sm:$0xff]  }
 0x127   : > { %2773 = vmatprep.subr.bf16.mxu1 %v3729_v31  ;;  %v3825_v31 = vld [vmem:[%s4688_s9 + $0x4bc] ss:$24 sps:$4 sm:$0xff]  }
 0x128   : > { %2731 = vmatpush2.bf16.msra.mxu0 %v3724_v34  ;;  %v3820_v34 = vld [vmem:[%s4688_s9 + $0x7e8] ss:$24 sps:$4 sm:$0xff]  }
 0x129   : > { %2732 = vmatprep.subr.bf16.mxu0 %v3732_v36  ;;  %v3828_v36 = vld [vmem:[%s4688_s9 + $0x7bc] ss:$24 sps:$4 sm:$0xff]  }
 0x12a   : > { %2774 = vmatpush2.bf16.msra.mxu1 %v3727_v37  ;;  %v3823_v37 = vld [vmem:[%s4688_s9 + $0x4b8] ss:$24 sps:$4 sm:$0xff]  }
 0x12b   : > { %2775 = vmatprep.subr.bf16.mxu1 %v3735_v39  ;;  %v3831_v39 = vld [vmem:[%s4688_s9 + $0x48c] ss:$24 sps:$4 sm:$0xff]  }
 0x12c   : > { %2733 = vmatpush2.bf16.msra.mxu0 %v3730_v40  ;;  %v3826_v40 = vld [vmem:[%s4688_s9 + $0x7b8] ss:$24 sps:$4 sm:$0xff]  }
 0x12d   : > { %2788 = vmatprep.subr.bf16.mxu0 %v3741_v42  ;;  %v3834_v42 = vld [vmem:[%s4688_s9 + $0x78c] ss:$24 sps:$4 sm:$0xff]  }
 0x12e   : > { %2776 = vmatpush2.bf16.msra.mxu1 %v3733_v43  ;;  %v3829_v43 = vld [vmem:[%s4688_s9 + $0x488] ss:$24 sps:$4 sm:$0xff]  }
 0x12f   : > { %2735 = vmatmul.mubr.bf16.vlgmr.msra.gmra.mxu0 %v4842_v44  ;;  %2831 = vmatprep.subr.bf16.mxu1 %v3744_v45  ;;  %v3837_v45 = vld [vmem:[%s4688_s9 + $0x164] ss:$24 sps:$4 sm:$0xff]  }
 0x130   : > { %2789 = vmatpush1.bf16.msra.mxu0 %v3739_v46  ;;  %2820 = vmatprep.mubr.bf16.mxu0 %v4686_v33  ;;  %v3759_v33 = vld [vmem:[%s4688_s9 + $0x3cc] ss:$24 sps:$4 sm:$0xff]   ;;  %v3832_v46 = vld [vmem:[%s4688_s9 + $0x788] ss:$24 sps:$4 sm:$0xff]  }
 0x131   : > { %2778 = vmatmul.mubr.bf16.vlgmr.msra.gmra.mxu1 %v4757_v35  ;;  %2790 = vmatprep.subr.bf16.mxu0 %v3747_v47  ;;  %v3754_v35 = vld [vmem:[%s4688_s9 + $0x6f8] ss:$24 sps:$4 sm:$0xff]   ;;  %v3840_v47 = vld [vmem:[%s4688_s9 + $0x464] ss:$24 sps:$4 sm:$0xff]  }
 0x132   : > { %2832 = vmatpush1.bf16.msra.mxu1 %v3742_v48  ;;  %2863 = vmatprep.mubr.bf16.mxu1 %v4771_v41  ;;  %v3765_v41 = vld [vmem:[%s4688_s9 + $0x39c] ss:$24 sps:$4 sm:$0xff]   ;;  %v3835_v48 = vld [vmem:[%s4688_s9 + $0x160] ss:$24 sps:$4 sm:$0xff]  }
 0x133   : > { %2833 = vmatprep.subr.bf16.mxu1 %v3750_v49  ;;  %v3843_v49 = vld [vmem:[%s4688_s9 + $0x134] ss:$24 sps:$4 sm:$0xff]  }
 0x134   : > { %2791 = vmatpush1.bf16.msra.mxu0 %v3745_v50  ;;  %v3838_v50 = vld [vmem:[%s4688_s9 + $0x460] ss:$24 sps:$4 sm:$0xff]  }
 0x135   : > { %2792 = vmatprep.subr.bf16.mxu0 %v3753_v51  ;;  %v3846_v51 = vld [vmem:[%s4688_s9 + $0x434] ss:$24 sps:$4 sm:$0xff]  }
 0x136   : > { %2834 = vmatpush1.bf16.msra.mxu1 %v3748_v52  ;;  %v3841_v52 = vld [vmem:[%s4688_s9 + $0x130] ss:$24 sps:$4 sm:$0xff]  }
 0x137   : > { %2835 = vmatprep.subr.bf16.mxu1 %v3756_v53  ;;  %v3979_v53 = vld [vmem:[%s5082_s0 + $0x4] ss:$24 sps:$4 sm:$0xff]  }
 0x138   : > { %2793 = vmatpush1.bf16.msra.mxu0 %v3751_v32  ;;  %v3849_v32 = vld [vmem:[%s4688_s9 + $0x104] ss:$24 sps:$4 sm:$0xff]  }
 0x139   : > { %2794 = vmatprep.subr.bf16.mxu0 %v3759_v33  ;;  %v3980_v33 = vld [vmem:[%s5082_s0 + $0xc] ss:$24 sps:$4 sm:$0xff]  }
 0x13a   : > { %2836 = vmatpush1.bf16.msra.mxu1 %v3754_v35  ;;  %v3852_v35 = vld [vmem:[%s4688_s9 + $0x404] ss:$24 sps:$4 sm:$0xff]  }
 0x13b   : > { %2837 = vmatprep.subr.bf16.mxu1 %v3762_v54  ;;  %v3847_v54 = vld [vmem:[%s4688_s9 + $0x100] ss:$24 sps:$4 sm:$0xff]  }
 0x13c   : > { %2795 = vmatpush1.bf16.msra.mxu0 %v3757_v55  ;;  %v3855_v55 = vld [vmem:[%s4688_s9 + $0xd4] ss:$24 sps:$4 sm:$0xff]  }
 0x13d   : > { %2796 = vmatprep.subr.bf16.mxu0 %v3765_v41  ;;  %v3850_v41 = vld [vmem:[%s4688_s9 + $0x400] ss:$24 sps:$4 sm:$0xff]  }
 0x13e   : > { %2838 = vmatpush1.bf16.msra.mxu1 %v3760_v56  ;;  %v3858_v56 = vld [vmem:[%s4688_s9 + $0x3d4] ss:$24 sps:$4 sm:$0xff]  }
 0x13f   : > { %2839 = vmatprep.subr.bf16.mxu1 %v3768_v57  ;;  %v3853_v57 = vld [vmem:[%s4688_s9 + $0xd0] ss:$24 sps:$4 sm:$0xff]  }
 0x140   : > { %2797 = vmatpush1.bf16.msra.mxu0 %v3763_v58  ;;  %v3861_v58 = vld [vmem:[%s4688_s9 + $0xa4] ss:$24 sps:$4 sm:$0xff]  }
 0x141   : > { %2798 = vmatprep.subr.bf16.mxu0 %v3771_v59  ;;  %v3856_v59 = vld [vmem:[%s4688_s9 + $0x3d0] ss:$24 sps:$4 sm:$0xff]  }
 0x142   : > { %2840 = vmatpush1.bf16.msra.mxu1 %v3766_v60  ;;  %v3864_v60 = vld [vmem:[%s4688_s9 + $0x3a4] ss:$24 sps:$4 sm:$0xff]  }
 0x143   : > { %2841 = vmatprep.subr.bf16.mxu1 %v3774_v61  ;;  %v3859_v61 = vld [vmem:[%s4688_s9 + $0xa0] ss:$24 sps:$4 sm:$0xff]  }
 0x144   : > { %2799 = vmatpush1.bf16.msra.mxu0 %v3769_v62  ;;  %v3867_v62 = vld [vmem:[%s4688_s9 + $0x74] ss:$24 sps:$4 sm:$0xff]  }
 0x145   : > { %2800 = vmatprep.subr.bf16.mxu0 %v3777_v63  ;;  %v3862_v63 = vld [vmem:[%s4688_s9 + $0x3a0] ss:$24 sps:$4 sm:$0xff]  }
 0x146   : > { %2842 = vmatpush1.bf16.msra.mxu1 %v3772_v0  ;;  %v3870_v0 = vld [vmem:[%s4688_s9 + $0x374] ss:$24 sps:$4 sm:$0xff]  }
 0x147   : > { %2843 = vmatprep.subr.bf16.mxu1 %v3780_v1  ;;  %v3865_v1 = vld [vmem:[%s4688_s9 + $0x70] ss:$24 sps:$4 sm:$0xff]  }
 0x148   : > { %2801 = vmatpush1.bf16.msra.mxu0 %v3775_v2  ;;  %v3873_v2 = vld [vmem:[%s4688_s9 + $0x44] ss:$24 sps:$4 sm:$0xff]  }
 0x149   : > { %2802 = vmatprep.subr.bf16.mxu0 %v3783_v3  ;;  %v3868_v3 = vld [vmem:[%s4688_s9 + $0x370] ss:$24 sps:$4 sm:$0xff]  }
 0x14a   : > { %2844 = vmatpush1.bf16.msra.mxu1 %v3778_v4  ;;  %v3876_v4 = vld [vmem:[%s4688_s9 + $0x344] ss:$24 sps:$4 sm:$0xff]  }
 0x14b   : > { %2845 = vmatprep.subr.bf16.mxu1 %v3786_v5  ;;  %v3871_v5 = vld [vmem:[%s4688_s9 + $0x40] ss:$24 sps:$4 sm:$0xff]  }
 0x14c   : > { %2803 = vmatpush1.bf16.msra.mxu0 %v3781_v6  ;;  %v3879_v6 = vld [vmem:[%s4688_s9 + $0x14] ss:$24 sps:$4 sm:$0xff]  }
 0x14d   : > { %2804 = vmatprep.subr.bf16.mxu0 %v3789_v7  ;;  %v3874_v7 = vld [vmem:[%s4688_s9 + $0x340] ss:$24 sps:$4 sm:$0xff]  }
 0x14e   : > { %2846 = vmatpush1.bf16.msra.mxu1 %v3784_v8  ;;  %v3882_v8 = vld [vmem:[%s4688_s9 + $0x314] ss:$24 sps:$4 sm:$0xff]  }
 0x14f   : > { %2847 = vmatprep.subr.bf16.mxu1 %v3792_v9  ;;  %v3877_v9 = vld [vmem:[%s4688_s9 + $0x10] ss:$24 sps:$4 sm:$0xff]  }
 0x150   : > { %2805 = vmatpush2.bf16.msra.mxu0 %v3787_v10  ;;  %v3885_v10 = vld [vmem:[%s4688_s9 + $0x2e4] ss:$24 sps:$4 sm:$0xff]  }
 0x151   : > { %2806 = vmatprep.subr.bf16.mxu0 %v3795_v11  ;;  %v3880_v11 = vld [vmem:[%s4688_s9 + $0x310] ss:$24 sps:$4 sm:$0xff]  }
 0x152   : > { %2848 = vmatpush2.bf16.msra.mxu1 %v3790_v12  ;;  %v3888_v12 = vld [vmem:[%s4688_s9 + $0x5e4] ss:$24 sps:$4 sm:$0xff]  }
 0x153   : > { %2849 = vmatprep.subr.bf16.mxu1 %v3798_v13  ;;  %v3883_v13 = vld [vmem:[%s4688_s9 + $0x2e0] ss:$24 sps:$4 sm:$0xff]  }
 0x154   : > { %2807 = vmatpush2.bf16.msra.mxu0 %v3793_v14  ;;  %v3891_v14 = vld [vmem:[%s4688_s9 + $0x2b4] ss:$24 sps:$4 sm:$0xff]  }
 0x155   : > { %2808 = vmatprep.subr.bf16.mxu0 %v3801_v15  ;;  %v3886_v15 = vld [vmem:[%s4688_s9 + $0x5e0] ss:$24 sps:$4 sm:$0xff]  }
 0x156   : > { %2850 = vmatpush2.bf16.msra.mxu1 %v3796_v16  ;;  %v3894_v16 = vld [vmem:[%s4688_s9 + $0x5b4] ss:$24 sps:$4 sm:$0xff]  }
 0x157   : > { %2851 = vmatprep.subr.bf16.mxu1 %v3804_v17  ;;  %v3889_v17 = vld [vmem:[%s4688_s9 + $0x2b0] ss:$24 sps:$4 sm:$0xff]  }
 0x158   : > { %2809 = vmatpush2.bf16.msra.mxu0 %v3799_v18  ;;  %v3897_v18 = vld [vmem:[%s4688_s9 + $0x284] ss:$24 sps:$4 sm:$0xff]  }
 0x159   : > { %2810 = vmatprep.subr.bf16.mxu0 %v3807_v19  ;;  %v3892_v19 = vld [vmem:[%s4688_s9 + $0x5b0] ss:$24 sps:$4 sm:$0xff]  }
 0x15a   : > { %2852 = vmatpush2.bf16.msra.mxu1 %v3802_v20  ;;  %v3900_v20 = vld [vmem:[%s4688_s9 + $0x584] ss:$24 sps:$4 sm:$0xff]  }
 0x15b   : > { %2853 = vmatprep.subr.bf16.mxu1 %v3810_v21  ;;  %v3895_v21 = vld [vmem:[%s4688_s9 + $0x280] ss:$24 sps:$4 sm:$0xff]  }
 0x15c   : > { %2811 = vmatpush2.bf16.msra.mxu0 %v3805_v22  ;;  %v3903_v22 = vld [vmem:[%s4688_s9 + $0x254] ss:$24 sps:$4 sm:$0xff]  }
 0x15d   : > { %2812 = vmatprep.subr.bf16.mxu0 %v3813_v23  ;;  %v3898_v23 = vld [vmem:[%s4688_s9 + $0x580] ss:$24 sps:$4 sm:$0xff]  }
 0x15e   : > { %2854 = vmatpush2.bf16.msra.mxu1 %v3808_v24  ;;  %v3906_v24 = vld [vmem:[%s4688_s9 + $0x554] ss:$24 sps:$4 sm:$0xff]  }
 0x15f   : > { %2855 = vmatprep.subr.bf16.mxu1 %v3816_v25  ;;  %v3901_v25 = vld [vmem:[%s4688_s9 + $0x250] ss:$24 sps:$4 sm:$0xff]  }
 0x160   : > { %2813 = vmatpush2.bf16.msra.mxu0 %v3811_v26  ;;  %v3909_v26 = vld [vmem:[%s4688_s9 + $0x224] ss:$24 sps:$4 sm:$0xff]  }
 0x161   : > { %2814 = vmatprep.subr.bf16.mxu0 %v3819_v27  ;;  %v3904_v27 = vld [vmem:[%s4688_s9 + $0x550] ss:$24 sps:$4 sm:$0xff]  }
 0x162   : > { %2856 = vmatpush2.bf16.msra.mxu1 %v3814_v28  ;;  %v3912_v28 = vld [vmem:[%s4688_s9 + $0x524] ss:$24 sps:$4 sm:$0xff]  }
 0x163   : > { %2857 = vmatprep.subr.bf16.mxu1 %v3822_v29  ;;  %v3907_v29 = vld [vmem:[%s4688_s9 + $0x220] ss:$24 sps:$4 sm:$0xff]  }
 0x164   : > { %2815 = vmatpush2.bf16.msra.mxu0 %v3817_v30  ;;  %v3915_v30 = vld [vmem:[%s4688_s9 + $0x1f4] ss:$24 sps:$4 sm:$0xff]  }
 0x165   : > { %2816 = vmatprep.subr.bf16.mxu0 %v3825_v31  ;;  %v3910_v31 = vld [vmem:[%s4688_s9 + $0x520] ss:$24 sps:$4 sm:$0xff]  }
 0x166   : > { %2858 = vmatpush2.bf16.msra.mxu1 %v3820_v34  ;;  %v3918_v34 = vld [vmem:[%s4688_s9 + $0x4f4] ss:$24 sps:$4 sm:$0xff]  }
 0x167   : > { %2859 = vmatprep.subr.bf16.mxu1 %v3828_v36  ;;  %v3913_v36 = vld [vmem:[%s4688_s9 + $0x1f0] ss:$24 sps:$4 sm:$0xff]  }
 0x168   : > { %2817 = vmatpush2.bf16.msra.mxu0 %v3823_v37  ;;  %v3921_v37 = vld [vmem:[%s4688_s9 + $0x1c4] ss:$24 sps:$4 sm:$0xff]  }
 0x169   : > { %2818 = vmatprep.subr.bf16.mxu0 %v3831_v39  ;;  %v3916_v39 = vld [vmem:[%s4688_s9 + $0x4f0] ss:$24 sps:$4 sm:$0xff]  }
 0x16a   : > { %2860 = vmatpush2.bf16.msra.mxu1 %v3826_v40  ;;  %v3924_v40 = vld [vmem:[%s4688_s9 + $0x4c4] ss:$24 sps:$4 sm:$0xff]  }
 0x16b   : > { %2861 = vmatprep.subr.bf16.mxu1 %v3834_v42  ;;  %v3919_v42 = vld [vmem:[%s4688_s9 + $0x1c0] ss:$24 sps:$4 sm:$0xff]  }
 0x16c   : > { %2819 = vmatpush2.bf16.msra.mxu0 %v3829_v43  ;;  %v3927_v43 = vld [vmem:[%s4688_s9 + $0x194] ss:$24 sps:$4 sm:$0xff]  }
 0x16d   : > { %2874 = vmatprep.subr.bf16.mxu0 %v3837_v45  ;;  %v3922_v45 = vld [vmem:[%s4688_s9 + $0x4c0] ss:$24 sps:$4 sm:$0xff]  }
 0x16e   : > { %2862 = vmatpush2.bf16.msra.mxu1 %v3832_v46  ;;  %v3930_v46 = vld [vmem:[%s4688_s9 + $0x494] ss:$24 sps:$4 sm:$0xff]  }
 0x16f   : > { %2821 = vmatmul.mubr.bf16.vlgmr.msra.gmra.mxu0 %v4764_v38  ;;  %2917 = vmatprep.subr.bf16.mxu1 %v3840_v47  ;;  %v3844_v38 = vld [vmem:[%s4688_s9 + $0x430] ss:$24 sps:$4 sm:$0xff]  }
 0x170   : > { %2875 = vmatpush1.bf16.msra.mxu0 %v3835_v48  ;;  %2906 = vmatprep.mubr.bf16.mxu0 %v3979_v53  ;;  %v3925_v47 = vld [vmem:[%s4688_s9 + $0x190] ss:$24 sps:$4 sm:$0xff]   ;;  %v3933_v48 = vld [vmem:[%s4688_s9 + $0x764] ss:$24 sps:$4 sm:$0xff]  }
 0x171   : > { %2864 = vmatmul.mubr.bf16.vlgmr.msra.gmra.mxu1 %v4842_v44  ;;  %2876 = vmatprep.subr.bf16.mxu0 %v3843_v49  ;;  %v3928_v49 = vld [vmem:[%s4688_s9 + $0x490] ss:$24 sps:$4 sm:$0xff]  }
 0x172   : > { %2918 = vmatpush1.bf16.msra.mxu1 %v3838_v50  ;;  %2949 = vmatprep.mubr.bf16.mxu1 %v3980_v33  ;;  %v3931_v50 = vld [vmem:[%s4688_s9 + $0x760] ss:$24 sps:$4 sm:$0xff]   ;;  %v3934_v53 = vld [vmem:[%s4688_s9 + $0x730] ss:$24 sps:$4 sm:$0xff]   ;;  %v3939_v33 = vld [vmem:[%s4688_s9 + $0x704] ss:$24 sps:$4 sm:$0xff]  }
 0x173   : > { %2919 = vmatprep.subr.bf16.mxu1 %v3846_v51  ;;  %v3936_v51 = vld [vmem:[%s4688_s9 + $0x734] ss:$24 sps:$4 sm:$0xff]  }
 0x174   : > { %2877 = vmatpush1.bf16.msra.mxu0 %v3841_v52  ;;  %v3981_v52 = vld [vmem:[%s5082_s0] ss:$24 sps:$4 sm:$0xff]  }
 0x175   : > { %2878 = vmatprep.subr.bf16.mxu0 %v3849_v32  ;;  %v3982_v32 = vld [vmem:[%s5082_s0 + $0x14] ss:$24 sps:$4 sm:$0xff]  }
 0x176   : > { %2920 = vmatpush1.bf16.msra.mxu1 %v3844_v38  ;;  %v3983_v38 = vld [vmem:[%s5082_s0 + $0x8] ss:$24 sps:$4 sm:$0xff]  }
 0x177   : > { %2921 = vmatprep.subr.bf16.mxu1 %v3852_v35  ;;  %v3937_v35 = vld [vmem:[%s4688_s9 + $0x700] ss:$24 sps:$4 sm:$0xff]  }
 0x178   : > { %2879 = vmatpush1.bf16.msra.mxu0 %v3847_v54  ;;  %v3942_v54 = vld [vmem:[%s4688_s9 + $0x6d4] ss:$24 sps:$4 sm:$0xff]  }
 0x179   : > { %2880 = vmatprep.subr.bf16.mxu0 %v3855_v55  ;;  %v3940_v55 = vld [vmem:[%s4688_s9 + $0x6d0] ss:$24 sps:$4 sm:$0xff]  }
 0x17a   : > { %2922 = vmatpush1.bf16.msra.mxu1 %v3850_v41  ;;  %v3945_v41 = vld [vmem:[%s4688_s9 + $0x6a4] ss:$24 sps:$4 sm:$0xff]  }
 0x17b   : > { %2923 = vmatprep.subr.bf16.mxu1 %v3858_v56  ;;  %v3943_v56 = vld [vmem:[%s4688_s9 + $0x6a0] ss:$24 sps:$4 sm:$0xff]  }
 0x17c   : > { %2881 = vmatpush1.bf16.msra.mxu0 %v3853_v57  ;;  %v3948_v57 = vld [vmem:[%s4688_s9 + $0x674] ss:$24 sps:$4 sm:$0xff]  }
 0x17d   : > { %2882 = vmatprep.subr.bf16.mxu0 %v3861_v58  ;;  %v3946_v58 = vld [vmem:[%s4688_s9 + $0x670] ss:$24 sps:$4 sm:$0xff]  }
 0x17e   : > { %2924 = vmatpush1.bf16.msra.mxu1 %v3856_v59  ;;  %v3951_v59 = vld [vmem:[%s4688_s9 + $0x644] ss:$24 sps:$4 sm:$0xff]  }
 0x17f   : > { %2925 = vmatprep.subr.bf16.mxu1 %v3864_v60  ;;  %v3949_v60 = vld [vmem:[%s4688_s9 + $0x640] ss:$24 sps:$4 sm:$0xff]  }
 0x180   : > { %2883 = vmatpush1.bf16.msra.mxu0 %v3859_v61  ;;  %v3954_v61 = vld [vmem:[%s4688_s9 + $0x614] ss:$24 sps:$4 sm:$0xff]  }
 0x181   : > { %2884 = vmatprep.subr.bf16.mxu0 %v3867_v62  ;;  %v3952_v62 = vld [vmem:[%s4688_s9 + $0x610] ss:$24 sps:$4 sm:$0xff]  }
 0x182   : > { %2926 = vmatpush1.bf16.msra.mxu1 %v3862_v63  ;;  %v3957_v63 = vld [vmem:[%s4688_s9 + $0x8e4] ss:$24 sps:$4 sm:$0xff]  }
 0x183   : > { %2927 = vmatprep.subr.bf16.mxu1 %v3870_v0  ;;  %v3955_v0 = vld [vmem:[%s4688_s9 + $0x8e0] ss:$24 sps:$4 sm:$0xff]  }
 0x184   : > { %2885 = vmatpush1.bf16.msra.mxu0 %v3865_v1  ;;  %v3960_v1 = vld [vmem:[%s4688_s9 + $0x8b4] ss:$24 sps:$4 sm:$0xff]  }
 0x185   : > { %2886 = vmatprep.subr.bf16.mxu0 %v3873_v2  ;;  %v3958_v2 = vld [vmem:[%s4688_s9 + $0x8b0] ss:$24 sps:$4 sm:$0xff]  }
 0x186   : > { %2928 = vmatpush1.bf16.msra.mxu1 %v3868_v3  ;;  %v3963_v3 = vld [vmem:[%s4688_s9 + $0x884] ss:$24 sps:$4 sm:$0xff]  }
 0x187   : > { %2929 = vmatprep.subr.bf16.mxu1 %v3876_v4  ;;  %v3961_v4 = vld [vmem:[%s4688_s9 + $0x880] ss:$24 sps:$4 sm:$0xff]  }
 0x188   : > { %2887 = vmatpush1.bf16.msra.mxu0 %v3871_v5  ;;  %v3966_v5 = vld [vmem:[%s4688_s9 + $0x854] ss:$24 sps:$4 sm:$0xff]  }
 0x189   : > { %2888 = vmatprep.subr.bf16.mxu0 %v3879_v6  ;;  %v3964_v6 = vld [vmem:[%s4688_s9 + $0x850] ss:$24 sps:$4 sm:$0xff]  }
 0x18a   : > { %2930 = vmatpush1.bf16.msra.mxu1 %v3874_v7  ;;  %v3969_v7 = vld [vmem:[%s4688_s9 + $0x824] ss:$24 sps:$4 sm:$0xff]  }
 0x18b   : > { %2931 = vmatprep.subr.bf16.mxu1 %v3882_v8  ;;  %v1116_v8 = vlaneseq }
 0x18c   : > { %2889 = vmatpush1.bf16.msra.mxu0 %v3877_v9  ;;  %v3967_v9 = vld [vmem:[%s4688_s9 + $0x820] ss:$24 sps:$4 sm:$0xff]  }
 0x18d   : > { %2890 = vmatprep.subr.bf16.mxu0 %v3885_v10  ;;  %v3972_v10 = vld [vmem:[%s4688_s9 + $0x7f4] ss:$24 sps:$4 sm:$0xff]  }
 0x18e   : > { %2932 = vmatpush1.bf16.msra.mxu1 %v3880_v11  ;;  %v5020_v11 = vshrl.u32 %v1116_v8, 7 }
 0x18f   : > { %2933 = vmatprep.subr.bf16.mxu1 %v3888_v12  ;;  %v3970_v12 = vld [vmem:[%s4688_s9 + $0x7f0] ss:$24 sps:$4 sm:$0xff]  }
 0x190   : > { %2891 = vmatpush2.bf16.msra.mxu0 %v3883_v13 }
 0x191   : > { %2892 = vmatprep.subr.bf16.mxu0 %v3891_v14  ;;  %v3975_v14 = vld [vmem:[%s4688_s9 + $0x7c4] ss:$24 sps:$4 sm:$0xff]  }
 0x192   : > { %2934 = vmatpush2.bf16.msra.mxu1 %v3886_v15  ;;  %v1118_v15 = vsub.s32 0, %v5020_v11 }
 0x193   : > { %2935 = vmatprep.subr.bf16.mxu1 %v3894_v16  ;;  %v1122_v16 = vsub.s32 1, %v5020_v11 }
 0x194   : > { %2893 = vmatpush2.bf16.msra.mxu0 %v3889_v17  ;;  %v3973_v17 = vld [vmem:[%s4688_s9 + $0x7c0] ss:$24 sps:$4 sm:$0xff]  }
 0x195   : > { %2894 = vmatprep.subr.bf16.mxu0 %v3897_v18  ;;  %v5030_v18 = vld [vmem:[%s816_s20] sm:$0x3f] }
 0x196   : > { %2936 = vmatpush2.bf16.msra.mxu1 %v3892_v19 }
 0x197   : > { %2937 = vmatprep.subr.bf16.mxu1 %v3900_v20 }
 0x198   : > { %2895 = vmatpush2.bf16.msra.mxu0 %v3895_v21  ;;  %v3978_v21 = vld [vmem:[%s4688_s9 + $0x794] ss:$24 sps:$4 sm:$0xff]  }
 0x199   : > { %2896 = vmatprep.subr.bf16.mxu0 %v3903_v22  ;;  %v1119_v22 = vrot.slane %v5030_v18, %v1118_v15 }
 0x19a   : > { %2938 = vmatpush2.bf16.msra.mxu1 %v3898_v23  ;;  %v1123_v23 = vrot.slane %v5030_v18, %v1122_v16  ;;  %v1134_v16 = vsub.s32 4, %v5020_v11 }
 0x19b   : > { %2939 = vmatprep.subr.bf16.mxu1 %v3906_v24  ;;  %v3976_v24 = vld [vmem:[%s4688_s9 + $0x790] ss:$24 sps:$4 sm:$0xff]   ;;  %s5039_s9 = scalar_lea.vmem [#allocation3], %s3497_s23 }
 0x19c   : > { %2897 = vmatpush2.bf16.msra.mxu0 %v3901_v25 }
 0x19d   : > { %2898 = vmatprep.subr.bf16.mxu0 %v3909_v26 }
 0x19e   : > { %2940 = vmatpush2.bf16.msra.mxu1 %v3904_v27 }
 0x19f   : > { %2941 = vmatprep.subr.bf16.mxu1 %v3912_v28 }
 0x1a0   : > { %2899 = vmatpush2.bf16.msra.mxu0 %v3907_v29 }
 0x1a1   : > { %2900 = vmatprep.subr.bf16.mxu0 %v3915_v30 }
 0x1a2   : > { %2942 = vmatpush2.bf16.msra.mxu1 %v3910_v31 }
 0x1a3   : > { %2943 = vmatprep.subr.bf16.mxu1 %v3918_v34 }
 0x1a4   : > { %2901 = vmatpush2.bf16.msra.mxu0 %v3913_v36 }
 0x1a5   : > { %2902 = vmatprep.subr.bf16.mxu0 %v3921_v37 }
 0x1a6   : > { %2944 = vmatpush2.bf16.msra.mxu1 %v3916_v39 }
 0x1a7   : > { %2945 = vmatprep.subr.bf16.mxu1 %v3924_v40 }
 0x1a8   : > { %2903 = vmatpush2.bf16.msra.mxu0 %v3919_v42 }
 0x1a9   : > { %2904 = vmatprep.subr.bf16.mxu0 %v3927_v43 }
 0x1aa   : > { %2946 = vmatpush2.bf16.msra.mxu1 %v3922_v45 }
 0x1ab   : > { %2947 = vmatprep.subr.bf16.mxu1 %v3930_v46 }
 0x1ac   : > { %2905 = vmatpush2.bf16.msra.mxu0 %v3925_v47 }
 0x1ad   : > { %2960 = vmatprep.subr.bf16.mxu0 %v3933_v48 }
 0x1ae   : > { %2948 = vmatpush2.bf16.msra.mxu1 %v3928_v49 }
 0x1af   : > { %2907 = vmatmul.mubr.bf16.vlgmr.msra.gmra.mxu0 %v3981_v52  ;;  %v2650_v13 = vpop.f32.mrf.mxu0 }
 0x1b0   : > { %2961 = vmatpush1.bf16.msra.mxu0 %v3931_v50  ;;  %2992 = vmatprep.mubr.bf16.mxu0 %v3982_v32  ;;  %v2651_v27 = vadd.f32 %v2650_v13, %v1119_v22  ;;  %v1126_v32 = vsub.s32 2, %v5020_v11 }
 0x1b1   : > { %2950 = vmatmul.mubr.bf16.vlgmr.msra.gmra.mxu1 %v3983_v38  ;;  %2962 = vmatprep.subr.bf16.mxu0 %v3936_v51  ;;  %v2652_v19 = vpop.f32.mrf.mxu0  ;;  %v2693_v20 = vpop.f32.mrf.mxu1 }
 0x1b2   : > { %v2653_v28 = vadd.f32 %v2652_v19, %v1123_v23  ;;  %v2694_v34 = vadd.f32 %v2693_v20, %v2651_v27 }
 0x1b3   : > { %v2654_v25 = vpop.f32.mrf.mxu0  ;;  %v2695_v26 = vpop.f32.mrf.mxu1 }
 0x1b4   : > { %2963 = vmatpush1.bf16.msra.mxu0 %v3934_v53  ;;  %v2655_v36 = vadd.f32 %v2654_v25, %v1119_v22  ;;  %v2696_v37 = vadd.f32 %v2695_v26, %v2653_v28 }
 0x1b5   : > { %2964 = vmatprep.subr.bf16.mxu0 %v3939_v33  ;;  %v2656_v29 = vpop.f32.mrf.mxu0  ;;  %v2697_v30 = vpop.f32.mrf.mxu1  ;;  %v1130_v33 = vsub.s32 3, %v5020_v11 }
 0x1b6   : > { %v2657_v39 = vadd.f32 %v2656_v29, %v1123_v23  ;;  %v2698_v47 = vadd.f32 %v2697_v30, %v2655_v36 }
 0x1b7   : > { %v2699_v40 = vpop.f32.mrf.mxu1 }
 0x1b8   : > { %2965 = vmatpush1.bf16.msra.mxu0 %v3937_v35  ;;  %v2700_v48 = vadd.f32 %v2699_v40, %v2657_v39  ;;  %v1127_v35 = vrot.slane %v5030_v18, %v1126_v32 }
 0x1b9   : > { %2966 = vmatprep.subr.bf16.mxu0 %v3942_v54 }
 0x1bc   : > { %2967 = vmatpush1.bf16.msra.mxu0 %v3940_v55  ;;  %v1131_v55 = vrot.slane %v5030_v18, %v1130_v33 }
 0x1bd   : > { %2968 = vmatprep.subr.bf16.mxu0 %v3945_v41 }
 0x1c0   : > { %2969 = vmatpush1.bf16.msra.mxu0 %v3943_v56 }
 0x1c1   : > { %2970 = vmatprep.subr.bf16.mxu0 %v3948_v57 }
 0x1c4   : > { %2971 = vmatpush1.bf16.msra.mxu0 %v3946_v58 }
 0x1c5   : > { %2972 = vmatprep.subr.bf16.mxu0 %v3951_v59 }
 0x1c8   : > { %2973 = vmatpush1.bf16.msra.mxu0 %v3949_v60 }
 0x1c9   : > { %2974 = vmatprep.subr.bf16.mxu0 %v3954_v61 }
 0x1cc   : > { %2975 = vmatpush1.bf16.msra.mxu0 %v3952_v62 }
 0x1cd   : > { %2976 = vmatprep.subr.bf16.mxu0 %v3957_v63 }
 0x1d0   : > { %2977 = vmatpush2.bf16.msra.mxu0 %v3955_v0 }
 0x1d1   : > { %2978 = vmatprep.subr.bf16.mxu0 %v3960_v1 }
 0x1d4   : > { %2979 = vmatpush2.bf16.msra.mxu0 %v3958_v2 }
 0x1d5   : > { %2980 = vmatprep.subr.bf16.mxu0 %v3963_v3 }
 0x1d8   : > { %2981 = vmatpush2.bf16.msra.mxu0 %v3961_v4 }
 0x1d9   : > { %2982 = vmatprep.subr.bf16.mxu0 %v3966_v5 }
 0x1dc   : > { %2983 = vmatpush2.bf16.msra.mxu0 %v3964_v6 }
 0x1dd   : > { %2984 = vmatprep.subr.bf16.mxu0 %v3969_v7 }
 0x1e0   : > { %2985 = vmatpush2.bf16.msra.mxu0 %v3967_v9 }
 0x1e1   : > { %2986 = vmatprep.subr.bf16.mxu0 %v3972_v10 }
 0x1e4   : > { %2987 = vmatpush2.bf16.msra.mxu0 %v3970_v12 }
 0x1e5   : > { %2988 = vmatprep.subr.bf16.mxu0 %v3975_v14 }
 0x1e8   : > { %2989 = vmatpush2.bf16.msra.mxu0 %v3973_v17  ;;  %v1138_v17 = vsub.s32 5, %v5020_v11 }
 0x1e9   : > { %2990 = vmatprep.subr.bf16.mxu0 %v3978_v21  ;;  %v1135_v21 = vrot.slane %v5030_v18, %v1134_v16 }
 0x1ea   : > { %v1139_v22 = vrot.slane %v5030_v18, %v1138_v17 }
 0x1ec   : > { %2991 = vmatpush2.bf16.msra.mxu0 %v3976_v24 }
 0x1ef   : > { %v2736_v31 = vpop.f32.mrf.mxu0  ;;  %2993 = vmatmul.mubr.bf16.vlgmr.msra.gmra.mxu0 %v4842_v44 }
 0x1f0   : > { %v2737_v43 = vadd.f32 %v2736_v31, %v2694_v34 }
 0x1f1   : > { %v2738_v42 = vpop.f32.mrf.mxu0  ;;  %v2779_v53 = vpop.f32.mrf.mxu1 }
 0x1f2   : > { %v2739_v45 = vadd.f32 %v2738_v42, %v2696_v37  ;;  %v2780_v41 = vadd.f32 %v2779_v53, %v1127_v35 }
 0x1f3   : > { %v2740_v46 = vpop.f32.mrf.mxu0  ;;  %v2781_v38 = vpop.f32.mrf.mxu1 }
 0x1f4   : > { %v3488_v49 = vpack.c.bf16 %v2739_v45, %v2737_v43  ;;  %v2741_v44 = vadd.f32 %v2740_v46, %v2698_v47  ;;  %v2782_v57 = vadd.f32 %v2781_v38, %v1131_v55 }
 0x1f5   : > { %v2742_v50 = vpop.f32.mrf.mxu0  ;;  %v2783_v54 = vpop.f32.mrf.mxu1 }
 0x1f6   : > { %3039 = vst [vmem:[%s5039_s9] sm:$0xff] %v3488_v49  ;;  %v2743_v51 = vadd.f32 %v2742_v50, %v2700_v48  ;;  %v2784_v62 = vadd.f32 %v2783_v54, %v1127_v35 }
 0x1f7   : > { %v2785_v56 = vpop.f32.mrf.mxu1 }
 0x1f8   : > { %v3491_v52 = vpack.c.bf16 %v2743_v51, %v2741_v44  ;;  %v2786_v3 = vadd.f32 %v2785_v56, %v1131_v55 }
 0x1fa   : > { %3042 = vst [vmem:[%s5039_s9 + $0x18] sm:$0xff] %v3491_v52 }
 0x1fd   : > { %v3070_v50 = vld [vmem:[%s5039_s9] sm:$0xff] (%p4079_p6) }
 0x1fe   : > { %3071 = vst [vmem:[%s3057_s25] sm:$0xff] (%p4079_p6), %v3070_v50 }
 0x201   : > { %v3076_v52 = vld [vmem:[%s5039_s9 + $0x18] sm:$0xff] (%p4079_p6) }
 0x202   : > { %3077 = vst [vmem:[%s3057_s25 + $0x48] sm:$0xff] (%p4079_p6), %v3076_v52 }
 0x22f   : > { %v2822_v58 = vpop.f32.mrf.mxu0 }
 0x230   : > { %v2823_v59 = vadd.f32 %v2822_v58, %v2780_v41 }
 0x231   : > { %v2824_v60 = vpop.f32.mrf.mxu0  ;;  %v2865_v61 = vpop.f32.mrf.mxu1 }
 0x232   : > { %v2825_v63 = vadd.f32 %v2824_v60, %v2782_v57  ;;  %v2866_v0 = vadd.f32 %v2865_v61, %v2823_v59 }
 0x233   : > { %v2826_v1 = vpop.f32.mrf.mxu0  ;;  %v2867_v2 = vpop.f32.mrf.mxu1 }
 0x234   : > { %v2827_v4 = vadd.f32 %v2826_v1, %v2784_v62  ;;  %v2868_v5 = vadd.f32 %v2867_v2, %v2825_v63 }
 0x235   : > { %v2828_v6 = vpop.f32.mrf.mxu0  ;;  %v2869_v7 = vpop.f32.mrf.mxu1 }
 0x236   : > { %v3489_v8 = vpack.c.bf16 %v2868_v5, %v2866_v0  ;;  %v2829_v9 = vadd.f32 %v2828_v6, %v2786_v3  ;;  %v2870_v12 = vadd.f32 %v2869_v7, %v2827_v4 }
 0x237   : > { %v2871_v10 = vpop.f32.mrf.mxu1 }
 0x238   : > { %3040 = vst [vmem:[%s5039_s9 + $0x8] sm:$0xff] %v3489_v8  ;;  %v2872_v13 = vadd.f32 %v2871_v10, %v2829_v9 }
 0x23a   : > { %v3492_v14 = vpack.c.bf16 %v2872_v13, %v2870_v12 }
 0x23c   : > { %3043 = vst [vmem:[%s5039_s9 + $0x20] sm:$0xff] %v3492_v14 }
 0x23f   : > { %v3072_v44 = vld [vmem:[%s5039_s9 + $0x8] sm:$0xff] (%p4079_p6) }
 0x240   : > { %3073 = vst [vmem:[%s3057_s25 + $0x8] sm:$0xff] (%p4079_p6), %v3072_v44 }
 0x243   : > { %v3078_v53 = vld [vmem:[%s5039_s9 + $0x20] sm:$0xff] (%p4079_p6) }
 0x244   : > { %3079 = vst [vmem:[%s3057_s25 + $0x50] sm:$0xff] (%p4079_p6), %v3078_v53 }
 0x26f   : > { %v2908_v15 = vpop.f32.mrf.mxu0 }
 0x270   : > { %v2909_v25 = vadd.f32 %v2908_v15, %v1135_v21 }
 0x271   : > { %v2910_v19 = vpop.f32.mrf.mxu0  ;;  %v2951_v20 = vpop.f32.mrf.mxu1 }
 0x272   : > { %v2911_v26 = vadd.f32 %v2910_v19, %v1139_v22  ;;  %v2952_v30 = vadd.f32 %v2951_v20, %v2909_v25 }
 0x273   : > { %v2912_v23 = vpop.f32.mrf.mxu0  ;;  %v2953_v24 = vpop.f32.mrf.mxu1 }
 0x274   : > { %v2913_v31 = vadd.f32 %v2912_v23, %v1135_v21  ;;  %v2954_v34 = vadd.f32 %v2953_v24, %v2911_v26 }
 0x275   : > { %v2914_v27 = vpop.f32.mrf.mxu0  ;;  %v2955_v28 = vpop.f32.mrf.mxu1 }
 0x276   : > { %v2915_v36 = vadd.f32 %v2914_v27, %v1139_v22  ;;  %v2956_v43 = vadd.f32 %v2955_v28, %v2913_v31 }
 0x277   : > { %v2957_v11 = vpop.f32.mrf.mxu1 }
 0x278   : > { %v2958_v18 = vadd.f32 %v2957_v11, %v2915_v36 }
 0x2af   : > { %v2994_v29 = vpop.f32.mrf.mxu0 }
 0x2b0   : > { %v2995_v39 = vadd.f32 %v2994_v29, %v2952_v30 }
 0x2b1   : > { %v2996_v37 = vpop.f32.mrf.mxu0 }
 0x2b2   : > { %v2997_v40 = vadd.f32 %v2996_v37, %v2954_v34 }
 0x2b3   : > { %v2998_v42 = vpop.f32.mrf.mxu0 }
 0x2b4   : > { %v3490_v45 = vpack.c.bf16 %v2997_v40, %v2995_v39  ;;  %v2999_v47 = vadd.f32 %v2998_v42, %v2956_v43 }
 0x2b5   : > { %v3000_v46 = vpop.f32.mrf.mxu0 }
 0x2b6   : > { %3041 = vst [vmem:[%s5039_s9 + $0x10] sm:$0xff] %v3490_v45  ;;  %v3001_v48 = vadd.f32 %v3000_v46, %v2958_v18  ;;  %3051 = sbr.rel (!%p4079_p6) target bundleno = 707 (0x2c3), region = 59 }
 0x2b8   : > { %v3493_v49 = vpack.c.bf16 %v3001_v48, %v2999_v47 }
 0x2ba   : > { %3044 = vst [vmem:[%s5039_s9 + $0x28] sm:$0xff] %v3493_v49 }
 0x2bd   : > { %v3074_v51 = vld [vmem:[%s5039_s9 + $0x10] sm:$0xff] }
 0x2be   : > { %3075 = vst [vmem:[%s3057_s25 + $0x10] sm:$0xff] %v3074_v51 }
 0x2c1   : > { %v3080_v32 = vld [vmem:[%s5039_s9 + $0x28] sm:$0xff] }
 0x2c2   : > { %3081 = vst [vmem:[%s3057_s25 + $0x58] sm:$0xff] %v3080_v32 }
 0x2c3 PF: > { %s13_s16 = sadd.s32 1, %s4022_s16   ;;  %s5087_s12 = smov %s4010_s13 }
 0x2c4   : > { %p10_p12 = scmp.ge.s32.totalorder %s13_s16, 5   ;;  %s5088_s13 = smov %s4084_s22 }
 0x2c5   : > { %s5089_s14 = smov %s4018_s15  ;;  %s5090_s15 = smov %s5092_s17 }
 0x2c6   :  { %12 = sbr.rel (!%p10_p12) target bundleno = 3 (0x3), region = 119 }

// kernel: metaphor_forward.14
= control target key start
LH: loop header
LB: loop body
LE: loop exit
PB: predicated region body
PF: predicated region fallthrough
CT: control target
= control target key end

     0   :  { %s4264_s1 = inlined_call_operand.vmem [shape: bf16[768,768], index: 1, kind: input, shape index: {}]   ;;  %s4265_s0 = inlined_call_operand.vmem [shape: bf16[16,768], index: 0, kind: input, shape index: {}]   ;;  %s4266_s2 = inlined_call_operand.vmem [shape: f32[1,768], index: 2, kind: input, shape index: {}]   ;;  %s4267_s3 = inlined_call_operand.vmem [shape: bf16[16,768], index: 3, kind: input, shape index: {}]   ;;  %s4268_s4 = inlined_call_operand.vmem [shape: f32[1,768], index: 4, kind: input, shape index: {}]   ;;  %s4269_s5 = inlined_call_operand.vmem [shape: f32[1,768], index: 5, kind: input, shape index: {}]   ;;  %s4270_s6 = inlined_call_operand.vmem [shape: bf16[16,768], index: 6, kind: output, shape index: {}]  }
   0x1   :  { %v2749_v0 = vld [vmem:[%s4264_s1 + $0x154] ss:$24 sps:$4 sm:$0xff]   ;;  %v2751_v1 = vld [vmem:[%s4264_s1 + $0x150] ss:$24 sps:$4 sm:$0xff]   ;;  %v2755_v4 = vld [vmem:[%s4264_s1 + $0x124] ss:$24 sps:$4 sm:$0xff]  }
   0x2   :  { %1827 = vmatprep.subr.bf16.mxu0 %v2749_v0  ;;  %v2752_v2 = vld [vmem:[%s4264_s1 + $0x454] ss:$24 sps:$4 sm:$0xff]   ;;  %v2754_v3 = vld [vmem:[%s4264_s1 + $0x450] ss:$24 sps:$4 sm:$0xff]   ;;  %v2757_v5 = vld [vmem:[%s4264_s1 + $0x120] ss:$24 sps:$4 sm:$0xff]  }
   0x3   :  { %1828 = vmatpush1.bf16.msra.mxu0 %v2751_v1  ;;  %1870 = vmatprep.subr.bf16.mxu1 %v2752_v2  ;;  %v2758_v6 = vld [vmem:[%s4264_s1 + $0x424] ss:$24 sps:$4 sm:$0xff]   ;;  %v2760_v7 = vld [vmem:[%s4264_s1 + $0x420] ss:$24 sps:$4 sm:$0xff]   ;;  %v2761_v8 = vld [vmem:[%s4264_s1 + $0xf4] ss:$24 sps:$4 sm:$0xff]  }
   0x4   :  { %1871 = vmatpush1.bf16.msra.mxu1 %v2754_v3  ;;  %1829 = vmatprep.subr.bf16.mxu0 %v2755_v4  ;;  %v2763_v9 = vld [vmem:[%s4264_s1 + $0xf0] ss:$24 sps:$4 sm:$0xff]   ;;  %v2764_v10 = vld [vmem:[%s4264_s1 + $0x3f4] ss:$24 sps:$4 sm:$0xff]   ;;  %v2767_v11 = vld [vmem:[%s4264_s1 + $0xc4] ss:$24 sps:$4 sm:$0xff]  }
   0x5   :  { %1872 = vmatprep.subr.bf16.mxu1 %v2758_v6  ;;  %v2766_v12 = vld [vmem:[%s4264_s1 + $0x3f0] ss:$24 sps:$4 sm:$0xff]   ;;  %v2770_v13 = vld [vmem:[%s4264_s1 + $0x3c4] ss:$24 sps:$4 sm:$0xff]   ;;  %v2769_v14 = vld [vmem:[%s4264_s1 + $0xc0] ss:$24 sps:$4 sm:$0xff]  }
   0x6   :  { %v2773_v15 = vld [vmem:[%s4264_s1 + $0x94] ss:$24 sps:$4 sm:$0xff]   ;;  %v2772_v16 = vld [vmem:[%s4264_s1 + $0x3c0] ss:$24 sps:$4 sm:$0xff]   ;;  %v2775_v18 = vld [vmem:[%s4264_s1 + $0x90] ss:$24 sps:$4 sm:$0xff]  }
   0x7   :  { %1830 = vmatpush1.bf16.msra.mxu0 %v2757_v5  ;;  %v2776_v17 = vld [vmem:[%s4264_s1 + $0x394] ss:$24 sps:$4 sm:$0xff]   ;;  %v2779_v19 = vld [vmem:[%s4264_s1 + $0x64] ss:$24 sps:$4 sm:$0xff]   ;;  %v2778_v20 = vld [vmem:[%s4264_s1 + $0x390] ss:$24 sps:$4 sm:$0xff]  }
   0x8   :  { %1831 = vmatprep.subr.bf16.mxu0 %v2761_v8  ;;  %1873 = vmatpush1.bf16.msra.mxu1 %v2760_v7  ;;  %v2782_v21 = vld [vmem:[%s4264_s1 + $0x364] ss:$24 sps:$4 sm:$0xff]   ;;  %v2781_v22 = vld [vmem:[%s4264_s1 + $0x60] ss:$24 sps:$4 sm:$0xff]   ;;  %v2785_v23 = vld [vmem:[%s4264_s1 + $0x34] ss:$24 sps:$4 sm:$0xff]  }
   0x9   :  { %1874 = vmatprep.subr.bf16.mxu1 %v2764_v10  ;;  %v2784_v24 = vld [vmem:[%s4264_s1 + $0x360] ss:$24 sps:$4 sm:$0xff]   ;;  %v2788_v25 = vld [vmem:[%s4264_s1 + $0x334] ss:$24 sps:$4 sm:$0xff]   ;;  %v2787_v26 = vld [vmem:[%s4264_s1 + $0x30] ss:$24 sps:$4 sm:$0xff]  }
   0xa   :  { %v2791_v27 = vld [vmem:[%s4264_s1 + $0x4] ss:$24 sps:$4 sm:$0xff]   ;;  %v2790_v28 = vld [vmem:[%s4264_s1 + $0x330] ss:$24 sps:$4 sm:$0xff]   ;;  %v2793_v30 = vld [vmem:[%s4264_s1] ss:$24 sps:$4 sm:$0xff]  }
   0xb   :  { %1832 = vmatpush1.bf16.msra.mxu0 %v2763_v9  ;;  %v2794_v29 = vld [vmem:[%s4264_s1 + $0x304] ss:$24 sps:$4 sm:$0xff]   ;;  %v2797_v31 = vld [vmem:[%s4264_s1 + $0x2d4] ss:$24 sps:$4 sm:$0xff]   ;;  %v2796_v32 = vld [vmem:[%s4264_s1 + $0x300] ss:$24 sps:$4 sm:$0xff]  }
   0xc   :  { %1833 = vmatprep.subr.bf16.mxu0 %v2767_v11  ;;  %1875 = vmatpush1.bf16.msra.mxu1 %v2766_v12  ;;  %v2800_v33 = vld [vmem:[%s4264_s1 + $0x5d4] ss:$24 sps:$4 sm:$0xff]   ;;  %v2799_v34 = vld [vmem:[%s4264_s1 + $0x2d0] ss:$24 sps:$4 sm:$0xff]   ;;  %v2803_v35 = vld [vmem:[%s4264_s1 + $0x2a4] ss:$24 sps:$4 sm:$0xff]  }
   0xd   :  { %1876 = vmatprep.subr.bf16.mxu1 %v2770_v13  ;;  %v2802_v36 = vld [vmem:[%s4264_s1 + $0x5d0] ss:$24 sps:$4 sm:$0xff]   ;;  %v2806_v37 = vld [vmem:[%s4264_s1 + $0x5a4] ss:$24 sps:$4 sm:$0xff]   ;;  %v2805_v38 = vld [vmem:[%s4264_s1 + $0x2a0] ss:$24 sps:$4 sm:$0xff]  }
   0xe   :  { %v2809_v39 = vld [vmem:[%s4264_s1 + $0x274] ss:$24 sps:$4 sm:$0xff]   ;;  %v2808_v40 = vld [vmem:[%s4264_s1 + $0x5a0] ss:$24 sps:$4 sm:$0xff]   ;;  %v2811_v42 = vld [vmem:[%s4264_s1 + $0x270] ss:$24 sps:$4 sm:$0xff]  }
   0xf   :  { %1834 = vmatpush1.bf16.msra.mxu0 %v2769_v14  ;;  %v2812_v41 = vld [vmem:[%s4264_s1 + $0x574] ss:$24 sps:$4 sm:$0xff]   ;;  %v2815_v43 = vld [vmem:[%s4264_s1 + $0x244] ss:$24 sps:$4 sm:$0xff]   ;;  %v2814_v44 = vld [vmem:[%s4264_s1 + $0x570] ss:$24 sps:$4 sm:$0xff]  }
  0x10   :  { %1835 = vmatprep.subr.bf16.mxu0 %v2773_v15  ;;  %1877 = vmatpush1.bf16.msra.mxu1 %v2772_v16  ;;  %v2818_v45 = vld [vmem:[%s4264_s1 + $0x544] ss:$24 sps:$4 sm:$0xff]   ;;  %v2817_v46 = vld [vmem:[%s4264_s1 + $0x240] ss:$24 sps:$4 sm:$0xff]   ;;  %v2821_v48 = vld [vmem:[%s4264_s1 + $0x214] ss:$24 sps:$4 sm:$0xff]  }
  0x11   :  { %1878 = vmatprep.subr.bf16.mxu1 %v2776_v17  ;;  %v2844_v47 = vld [vmem:[%s4265_s0 + $0x4] ss:$24 sps:$4 sm:$0xff]   ;;  %v2820_v49 = vld [vmem:[%s4264_s1 + $0x540] ss:$24 sps:$4 sm:$0xff]   ;;  %v2824_v50 = vld [vmem:[%s4264_s1 + $0x514] ss:$24 sps:$4 sm:$0xff]  }
  0x12   :  { %1859 = vmatprep.mubr.bf16.mxu0 %v2844_v47  ;;  %v3389_v51 = vld [vmem:[%s4265_s0 + $0xc] ss:$24 sps:$4 sm:$0xff]   ;;  %v2823_v52 = vld [vmem:[%s4264_s1 + $0x210] ss:$24 sps:$4 sm:$0xff]   ;;  %v2829_v56 = vld [vmem:[%s4264_s1 + $0x1e0] ss:$24 sps:$4 sm:$0xff]  }
  0x13   :  { %1836 = vmatpush1.bf16.msra.mxu0 %v2775_v18  ;;  %v2827_v53 = vld [vmem:[%s4264_s1 + $0x1e4] ss:$24 sps:$4 sm:$0xff]   ;;  %1902 = vmatprep.mubr.bf16.mxu1 %v3389_v51  ;;  %v2826_v54 = vld [vmem:[%s4264_s1 + $0x510] ss:$24 sps:$4 sm:$0xff]   ;;  %v2833_v57 = vld [vmem:[%s4264_s1 + $0x1b4] ss:$24 sps:$4 sm:$0xff]  }
  0x14   :  { %1837 = vmatprep.subr.bf16.mxu0 %v2779_v19  ;;  %1879 = vmatpush1.bf16.msra.mxu1 %v2778_v20  ;;  %v2830_v55 = vld [vmem:[%s4264_s1 + $0x4e4] ss:$24 sps:$4 sm:$0xff]   ;;  %v2832_v58 = vld [vmem:[%s4264_s1 + $0x4e0] ss:$24 sps:$4 sm:$0xff]   ;;  %v2836_v59 = vld [vmem:[%s4264_s1 + $0x4b4] ss:$24 sps:$4 sm:$0xff]  }
  0x15   :  { %1880 = vmatprep.subr.bf16.mxu1 %v2782_v21  ;;  %v2835_v60 = vld [vmem:[%s4264_s1 + $0x1b0] ss:$24 sps:$4 sm:$0xff]   ;;  %v2839_v61 = vld [vmem:[%s4264_s1 + $0x184] ss:$24 sps:$4 sm:$0xff]   ;;  %v2841_v0 = vld [vmem:[%s4264_s1 + $0x180] ss:$24 sps:$4 sm:$0xff]  }
  0x16   :  { %v2838_v62 = vld [vmem:[%s4264_s1 + $0x4b0] ss:$24 sps:$4 sm:$0xff]   ;;  %v2842_v63 = vld [vmem:[%s4264_s1 + $0x484] ss:$24 sps:$4 sm:$0xff]   ;;  %v2850_v1 = vld [vmem:[%s4264_s1 + $0x754] ss:$24 sps:$4 sm:$0xff]  }
  0x17   :  { %1838 = vmatpush1.bf16.msra.mxu0 %v2781_v22  ;;  %v2846_v2 = vld [vmem:[%s4264_s1 + $0x480] ss:$24 sps:$4 sm:$0xff]   ;;  %v2856_v4 = vld [vmem:[%s4264_s1 + $0x15c] ss:$24 sps:$4 sm:$0xff]   ;;  %v2848_v5 = vld [vmem:[%s4264_s1 + $0x750] ss:$24 sps:$4 sm:$0xff]  }
  0x18   :  { %1839 = vmatprep.subr.bf16.mxu0 %v2785_v23  ;;  %1881 = vmatpush1.bf16.msra.mxu1 %v2784_v24  ;;  %v3440_v3 = vld [vmem:[%s4265_s0] ss:$24 sps:$4 sm:$0xff]   ;;  %v2859_v7 = vld [vmem:[%s4264_s1 + $0x724] ss:$24 sps:$4 sm:$0xff]   ;;  %v2865_v11 = vld [vmem:[%s4264_s1 + $0x6f4] ss:$24 sps:$4 sm:$0xff]  }
  0x19   :  { %1882 = vmatprep.subr.bf16.mxu1 %v2788_v25  ;;  %v3451_v6 = vld [vmem:[%s4265_s0 + $0x8] ss:$24 sps:$4 sm:$0xff]   ;;  %v2854_v8 = vld [vmem:[%s4264_s1 + $0x158] ss:$24 sps:$4 sm:$0xff]   ;;  %v2862_v9 = vld [vmem:[%s4264_s1 + $0x12c] ss:$24 sps:$4 sm:$0xff]  }
  0x1a   :  { %v2857_v10 = vld [vmem:[%s4264_s1 + $0x720] ss:$24 sps:$4 sm:$0xff]   ;;  %v2868_v13 = vld [vmem:[%s4264_s1 + $0xfc] ss:$24 sps:$4 sm:$0xff]   ;;  %v2863_v14 = vld [vmem:[%s4264_s1 + $0x6f0] ss:$24 sps:$4 sm:$0xff]  }
  0x1b   :  { %1840 = vmatpush1.bf16.msra.mxu0 %v2787_v26  ;;  %v2860_v12 = vld [vmem:[%s4264_s1 + $0x128] ss:$24 sps:$4 sm:$0xff]   ;;  %v2871_v15 = vld [vmem:[%s4264_s1 + $0x6c4] ss:$24 sps:$4 sm:$0xff]   ;;  %v2866_v16 = vld [vmem:[%s4264_s1 + $0xf8] ss:$24 sps:$4 sm:$0xff]  }
  0x1c   :  { %1841 = vmatprep.subr.bf16.mxu0 %v2791_v27  ;;  %1883 = vmatpush1.bf16.msra.mxu1 %v2790_v28  ;;  %v2874_v17 = vld [vmem:[%s4264_s1 + $0xcc] ss:$24 sps:$4 sm:$0xff]   ;;  %v2869_v18 = vld [vmem:[%s4264_s1 + $0x6c0] ss:$24 sps:$4 sm:$0xff]   ;;  %v2880_v21 = vld [vmem:[%s4264_s1 + $0x9c] ss:$24 sps:$4 sm:$0xff]  }
  0x1d   :  { %1884 = vmatprep.subr.bf16.mxu1 %v2794_v29  ;;  %v2877_v19 = vld [vmem:[%s4264_s1 + $0x694] ss:$24 sps:$4 sm:$0xff]   ;;  %v2872_v20 = vld [vmem:[%s4264_s1 + $0xc8] ss:$24 sps:$4 sm:$0xff]   ;;  %v2883_v23 = vld [vmem:[%s4264_s1 + $0x664] ss:$24 sps:$4 sm:$0xff]  }
  0x1e   :  { %v2875_v22 = vld [vmem:[%s4264_s1 + $0x690] ss:$24 sps:$4 sm:$0xff]   ;;  %v2886_v25 = vld [vmem:[%s4264_s1 + $0x6c] ss:$24 sps:$4 sm:$0xff]   ;;  %v2881_v26 = vld [vmem:[%s4264_s1 + $0x660] ss:$24 sps:$4 sm:$0xff]  }
  0x1f   :  { %1842 = vmatpush1.bf16.msra.mxu0 %v2793_v30  ;;  %v2878_v24 = vld [vmem:[%s4264_s1 + $0x98] ss:$24 sps:$4 sm:$0xff]   ;;  %v2889_v27 = vld [vmem:[%s4264_s1 + $0x634] ss:$24 sps:$4 sm:$0xff]   ;;  %v2884_v28 = vld [vmem:[%s4264_s1 + $0x68] ss:$24 sps:$4 sm:$0xff]  }
  0x20   :  { %1843 = vmatprep.subr.bf16.mxu0 %v2797_v31  ;;  %1885 = vmatpush1.bf16.msra.mxu1 %v2796_v32  ;;  %v2892_v29 = vld [vmem:[%s4264_s1 + $0x3c] ss:$24 sps:$4 sm:$0xff]   ;;  %v2887_v30 = vld [vmem:[%s4264_s1 + $0x630] ss:$24 sps:$4 sm:$0xff]  }
  0x21   :  { %1886 = vmatprep.subr.bf16.mxu1 %v2800_v33  ;;  %v2890_v31 = vld [vmem:[%s4264_s1 + $0x38] ss:$24 sps:$4 sm:$0xff]   ;;  %v2895_v32 = vld [vmem:[%s4264_s1 + $0x604] ss:$24 sps:$4 sm:$0xff]   ;;  %v3536_v33 = vld [vmem:[%s4265_s0 + $0x14] ss:$24 sps:$4 sm:$0xff]  }
  0x23   :  { %1844 = vmatpush2.bf16.msra.mxu0 %v2799_v34  ;;  %v2898_v34 = vld [vmem:[%s4264_s1 + $0xc] ss:$24 sps:$4 sm:$0xff]  }
  0x24   :  { %1845 = vmatprep.subr.bf16.mxu0 %v2803_v35  ;;  %1887 = vmatpush2.bf16.msra.mxu1 %v2802_v36  ;;  %v2893_v35 = vld [vmem:[%s4264_s1 + $0x600] ss:$24 sps:$4 sm:$0xff]   ;;  %v2901_v36 = vld [vmem:[%s4264_s1 + $0x8d4] ss:$24 sps:$4 sm:$0xff]  }
  0x25   :  { %1888 = vmatprep.subr.bf16.mxu1 %v2806_v37  ;;  %v2896_v37 = vld [vmem:[%s4264_s1 + $0x8] ss:$24 sps:$4 sm:$0xff]  }
  0x27   :  { %1846 = vmatpush2.bf16.msra.mxu0 %v2805_v38  ;;  %v2904_v38 = vld [vmem:[%s4264_s1 + $0x2dc] ss:$24 sps:$4 sm:$0xff]  }
  0x28   :  { %1847 = vmatprep.subr.bf16.mxu0 %v2809_v39  ;;  %1889 = vmatpush2.bf16.msra.mxu1 %v2808_v40  ;;  %v2899_v39 = vld [vmem:[%s4264_s1 + $0x8d0] ss:$24 sps:$4 sm:$0xff]   ;;  %v2907_v40 = vld [vmem:[%s4264_s1 + $0x8a4] ss:$24 sps:$4 sm:$0xff]  }
  0x29   :  { %1890 = vmatprep.subr.bf16.mxu1 %v2812_v41  ;;  %v2902_v41 = vld [vmem:[%s4264_s1 + $0x2d8] ss:$24 sps:$4 sm:$0xff]  }
  0x2b   :  { %1848 = vmatpush2.bf16.msra.mxu0 %v2811_v42  ;;  %v2910_v42 = vld [vmem:[%s4264_s1 + $0x2ac] ss:$24 sps:$4 sm:$0xff]  }
  0x2c   :  { %1849 = vmatprep.subr.bf16.mxu0 %v2815_v43  ;;  %1891 = vmatpush2.bf16.msra.mxu1 %v2814_v44  ;;  %v2905_v43 = vld [vmem:[%s4264_s1 + $0x8a0] ss:$24 sps:$4 sm:$0xff]   ;;  %v2913_v44 = vld [vmem:[%s4264_s1 + $0x874] ss:$24 sps:$4 sm:$0xff]  }
  0x2d   :  { %1892 = vmatprep.subr.bf16.mxu1 %v2818_v45  ;;  %v2908_v45 = vld [vmem:[%s4264_s1 + $0x2a8] ss:$24 sps:$4 sm:$0xff]  }
  0x2f   :  { %1850 = vmatpush2.bf16.msra.mxu0 %v2817_v46  ;;  %v2916_v46 = vld [vmem:[%s4264_s1 + $0x27c] ss:$24 sps:$4 sm:$0xff]  }
  0x30   :  { %1851 = vmatprep.subr.bf16.mxu0 %v2821_v48  ;;  %1893 = vmatpush2.bf16.msra.mxu1 %v2820_v49  ;;  %v2919_v48 = vld [vmem:[%s4264_s1 + $0x844] ss:$24 sps:$4 sm:$0xff]   ;;  %v2914_v49 = vld [vmem:[%s4264_s1 + $0x278] ss:$24 sps:$4 sm:$0xff]  }
  0x31   :  { %1894 = vmatprep.subr.bf16.mxu1 %v2824_v50  ;;  %v2922_v50 = vld [vmem:[%s4264_s1 + $0x24c] ss:$24 sps:$4 sm:$0xff]  }
  0x33   :  { %1852 = vmatpush2.bf16.msra.mxu0 %v2823_v52  ;;  %v2917_v52 = vld [vmem:[%s4264_s1 + $0x840] ss:$24 sps:$4 sm:$0xff]  }
  0x34   :  { %1853 = vmatprep.subr.bf16.mxu0 %v2827_v53  ;;  %1895 = vmatpush2.bf16.msra.mxu1 %v2826_v54  ;;  %v2925_v53 = vld [vmem:[%s4264_s1 + $0x814] ss:$24 sps:$4 sm:$0xff]   ;;  %v2920_v54 = vld [vmem:[%s4264_s1 + $0x248] ss:$24 sps:$4 sm:$0xff]  }
  0x35   :  { %1896 = vmatprep.subr.bf16.mxu1 %v2830_v55  ;;  %v2928_v55 = vld [vmem:[%s4264_s1 + $0x21c] ss:$24 sps:$4 sm:$0xff]  }
  0x37   :  { %1854 = vmatpush2.bf16.msra.mxu0 %v2829_v56  ;;  %v2923_v56 = vld [vmem:[%s4264_s1 + $0x810] ss:$24 sps:$4 sm:$0xff]  }
  0x38   :  { %1855 = vmatprep.subr.bf16.mxu0 %v2833_v57  ;;  %1897 = vmatpush2.bf16.msra.mxu1 %v2832_v58  ;;  %v2931_v57 = vld [vmem:[%s4264_s1 + $0x7e4] ss:$24 sps:$4 sm:$0xff]   ;;  %v2926_v58 = vld [vmem:[%s4264_s1 + $0x218] ss:$24 sps:$4 sm:$0xff]  }
  0x39   :  { %1898 = vmatprep.subr.bf16.mxu1 %v2836_v59  ;;  %v2934_v59 = vld [vmem:[%s4264_s1 + $0x1ec] ss:$24 sps:$4 sm:$0xff]  }
  0x3b   :  { %1856 = vmatpush2.bf16.msra.mxu0 %v2835_v60  ;;  %v2929_v60 = vld [vmem:[%s4264_s1 + $0x7e0] ss:$24 sps:$4 sm:$0xff]  }
  0x3c   :  { %1857 = vmatprep.subr.bf16.mxu0 %v2839_v61  ;;  %1899 = vmatpush2.bf16.msra.mxu1 %v2838_v62  ;;  %v2937_v61 = vld [vmem:[%s4264_s1 + $0x7b4] ss:$24 sps:$4 sm:$0xff]   ;;  %v2932_v62 = vld [vmem:[%s4264_s1 + $0x1e8] ss:$24 sps:$4 sm:$0xff]  }
  0x3d   :  { %1900 = vmatprep.subr.bf16.mxu1 %v2842_v63  ;;  %v2940_v63 = vld [vmem:[%s4264_s1 + $0x1bc] ss:$24 sps:$4 sm:$0xff]  }
  0x3f   :  { %1858 = vmatpush2.bf16.msra.mxu0 %v2841_v0  ;;  %v2935_v0 = vld [vmem:[%s4264_s1 + $0x7b0] ss:$24 sps:$4 sm:$0xff]  }
  0x40   :  { %1913 = vmatprep.subr.bf16.mxu0 %v2850_v1  ;;  %1901 = vmatpush2.bf16.msra.mxu1 %v2846_v2  ;;  %v2943_v1 = vld [vmem:[%s4264_s1 + $0x784] ss:$24 sps:$4 sm:$0xff]   ;;  %v2938_v2 = vld [vmem:[%s4264_s1 + $0x1b8] ss:$24 sps:$4 sm:$0xff]  }
  0x41   :  { %1956 = vmatprep.subr.bf16.mxu1 %v2856_v4  ;;  %v2946_v4 = vld [vmem:[%s4264_s1 + $0x18c] ss:$24 sps:$4 sm:$0xff]  }
  0x42   :  { %1860 = vmatmul.mubr.bf16.vlgmr.msra.gmra.mxu0 %v3440_v3 }
  0x43   :  { %1914 = vmatpush1.bf16.msra.mxu0 %v2848_v5  ;;  %1903 = vmatmul.mubr.bf16.vlgmr.msra.gmra.mxu1 %v3451_v6  ;;  %v2941_v5 = vld [vmem:[%s4264_s1 + $0x780] ss:$24 sps:$4 sm:$0xff]  }
  0x44   :  { %1915 = vmatprep.subr.bf16.mxu0 %v2859_v7  ;;  %1957 = vmatpush1.bf16.msra.mxu1 %v2854_v8  ;;  %v2952_v7 = vld [vmem:[%s4264_s1 + $0x45c] ss:$24 sps:$4 sm:$0xff]   ;;  %v2944_v8 = vld [vmem:[%s4264_s1 + $0x188] ss:$24 sps:$4 sm:$0xff]  }
  0x45   :  { %1988 = vmatprep.mubr.bf16.mxu1 %v2844_v47  ;;  %1958 = vmatprep.subr.bf16.mxu1 %v2862_v9  ;;  %v2911_v47 = vld [vmem:[%s4264_s1 + $0x870] ss:$24 sps:$4 sm:$0xff]  }
  0x46   :  { %1945 = vmatprep.mubr.bf16.mxu0 %v3536_v33  ;;  %v3650_v9 = vld [vmem:[%s4265_s0 + $0x10] ss:$24 sps:$4 sm:$0xff]  }
  0x47   :  { %1916 = vmatpush1.bf16.msra.mxu0 %v2857_v10  ;;  %v2955_v10 = vld [vmem:[%s4264_s1 + $0x75c] ss:$24 sps:$4 sm:$0xff]  }
  0x48   :  { %1917 = vmatprep.subr.bf16.mxu0 %v2865_v11  ;;  %1959 = vmatpush1.bf16.msra.mxu1 %v2860_v12  ;;  %v2950_v11 = vld [vmem:[%s4264_s1 + $0x458] ss:$24 sps:$4 sm:$0xff]   ;;  %v2958_v12 = vld [vmem:[%s4264_s1 + $0x42c] ss:$24 sps:$4 sm:$0xff]  }
  0x49   :  { %1960 = vmatprep.subr.bf16.mxu1 %v2868_v13  ;;  %v2953_v13 = vld [vmem:[%s4264_s1 + $0x758] ss:$24 sps:$4 sm:$0xff]  }
  0x4b   :  { %1918 = vmatpush1.bf16.msra.mxu0 %v2863_v14  ;;  %v2961_v14 = vld [vmem:[%s4264_s1 + $0x72c] ss:$24 sps:$4 sm:$0xff]  }
  0x4c   :  { %1919 = vmatprep.subr.bf16.mxu0 %v2871_v15  ;;  %1961 = vmatpush1.bf16.msra.mxu1 %v2866_v16  ;;  %v2956_v15 = vld [vmem:[%s4264_s1 + $0x428] ss:$24 sps:$4 sm:$0xff]   ;;  %v2964_v16 = vld [vmem:[%s4264_s1 + $0x3fc] ss:$24 sps:$4 sm:$0xff]  }
  0x4d   :  { %1962 = vmatprep.subr.bf16.mxu1 %v2874_v17  ;;  %v2959_v17 = vld [vmem:[%s4264_s1 + $0x728] ss:$24 sps:$4 sm:$0xff]  }
  0x4f   :  { %1920 = vmatpush1.bf16.msra.mxu0 %v2869_v18  ;;  %v2967_v18 = vld [vmem:[%s4264_s1 + $0x6fc] ss:$24 sps:$4 sm:$0xff]  }
  0x50   :  { %1921 = vmatprep.subr.bf16.mxu0 %v2877_v19  ;;  %1963 = vmatpush1.bf16.msra.mxu1 %v2872_v20  ;;  %v2965_v19 = vld [vmem:[%s4264_s1 + $0x6f8] ss:$24 sps:$4 sm:$0xff]   ;;  %v2973_v20 = vld [vmem:[%s4264_s1 + $0x6cc] ss:$24 sps:$4 sm:$0xff]  }
  0x51   :  { %1964 = vmatprep.subr.bf16.mxu1 %v2880_v21  ;;  %v2968_v21 = vld [vmem:[%s4264_s1 + $0x3c8] ss:$24 sps:$4 sm:$0xff]  }
  0x53   :  { %1922 = vmatpush1.bf16.msra.mxu0 %v2875_v22  ;;  %v2976_v22 = vld [vmem:[%s4264_s1 + $0x39c] ss:$24 sps:$4 sm:$0xff]  }
  0x54   :  { %1923 = vmatprep.subr.bf16.mxu0 %v2883_v23  ;;  %1965 = vmatpush1.bf16.msra.mxu1 %v2878_v24  ;;  %v2971_v23 = vld [vmem:[%s4264_s1 + $0x6c8] ss:$24 sps:$4 sm:$0xff]   ;;  %v2979_v24 = vld [vmem:[%s4264_s1 + $0x69c] ss:$24 sps:$4 sm:$0xff]  }
  0x55   :  { %1966 = vmatprep.subr.bf16.mxu1 %v2886_v25  ;;  %v2974_v25 = vld [vmem:[%s4264_s1 + $0x398] ss:$24 sps:$4 sm:$0xff]  }
  0x57   :  { %1924 = vmatpush1.bf16.msra.mxu0 %v2881_v26  ;;  %v2982_v26 = vld [vmem:[%s4264_s1 + $0x36c] ss:$24 sps:$4 sm:$0xff]  }
  0x58   :  { %1925 = vmatprep.subr.bf16.mxu0 %v2889_v27  ;;  %1967 = vmatpush1.bf16.msra.mxu1 %v2884_v28  ;;  %v2977_v27 = vld [vmem:[%s4264_s1 + $0x698] ss:$24 sps:$4 sm:$0xff]   ;;  %v2985_v28 = vld [vmem:[%s4264_s1 + $0x66c] ss:$24 sps:$4 sm:$0xff]  }
  0x59   :  { %1968 = vmatprep.subr.bf16.mxu1 %v2892_v29  ;;  %v2980_v29 = vld [vmem:[%s4264_s1 + $0x368] ss:$24 sps:$4 sm:$0xff]  }
  0x5b   :  { %1926 = vmatpush1.bf16.msra.mxu0 %v2887_v30  ;;  %v2988_v30 = vld [vmem:[%s4264_s1 + $0x33c] ss:$24 sps:$4 sm:$0xff]  }
  0x5c   :  { %1927 = vmatprep.subr.bf16.mxu0 %v2895_v32  ;;  %1969 = vmatpush1.bf16.msra.mxu1 %v2890_v31  ;;  %v2983_v31 = vld [vmem:[%s4264_s1 + $0x668] ss:$24 sps:$4 sm:$0xff]   ;;  %v2991_v32 = vld [vmem:[%s4264_s1 + $0x63c] ss:$24 sps:$4 sm:$0xff]  }
  0x5d   :  { %1970 = vmatprep.subr.bf16.mxu1 %v2898_v34  ;;  %v2986_v34 = vld [vmem:[%s4264_s1 + $0x338] ss:$24 sps:$4 sm:$0xff]  }
  0x5f   :  { %1928 = vmatpush1.bf16.msra.mxu0 %v2893_v35  ;;  %v2994_v35 = vld [vmem:[%s4264_s1 + $0x30c] ss:$24 sps:$4 sm:$0xff]  }
  0x60   :  { %1929 = vmatprep.subr.bf16.mxu0 %v2901_v36  ;;  %1971 = vmatpush1.bf16.msra.mxu1 %v2896_v37  ;;  %v2989_v36 = vld [vmem:[%s4264_s1 + $0x638] ss:$24 sps:$4 sm:$0xff]   ;;  %v2997_v37 = vld [vmem:[%s4264_s1 + $0x60c] ss:$24 sps:$4 sm:$0xff]  }
  0x61   :  { %1972 = vmatprep.subr.bf16.mxu1 %v2904_v38  ;;  %v2992_v38 = vld [vmem:[%s4264_s1 + $0x308] ss:$24 sps:$4 sm:$0xff]  }
  0x63   :  { %1930 = vmatpush2.bf16.msra.mxu0 %v2899_v39  ;;  %v3000_v39 = vld [vmem:[%s4264_s1 + $0x5dc] ss:$24 sps:$4 sm:$0xff]  }
  0x64   :  { %1931 = vmatprep.subr.bf16.mxu0 %v2907_v40  ;;  %1973 = vmatpush2.bf16.msra.mxu1 %v2902_v41  ;;  %v2995_v40 = vld [vmem:[%s4264_s1 + $0x608] ss:$24 sps:$4 sm:$0xff]   ;;  %v3003_v41 = vld [vmem:[%s4264_s1 + $0x8dc] ss:$24 sps:$4 sm:$0xff]  }
  0x65   :  { %1974 = vmatprep.subr.bf16.mxu1 %v2910_v42  ;;  %v2998_v42 = vld [vmem:[%s4264_s1 + $0x5d8] ss:$24 sps:$4 sm:$0xff]  }
  0x67   :  { %1932 = vmatpush2.bf16.msra.mxu0 %v2905_v43  ;;  %v3006_v43 = vld [vmem:[%s4264_s1 + $0x5ac] ss:$24 sps:$4 sm:$0xff]  }
  0x68   :  { %1933 = vmatprep.subr.bf16.mxu0 %v2913_v44  ;;  %1975 = vmatpush2.bf16.msra.mxu1 %v2908_v45  ;;  %v3001_v44 = vld [vmem:[%s4264_s1 + $0x8d8] ss:$24 sps:$4 sm:$0xff]   ;;  %v3009_v45 = vld [vmem:[%s4264_s1 + $0x8ac] ss:$24 sps:$4 sm:$0xff]  }
  0x69   :  { %1976 = vmatprep.subr.bf16.mxu1 %v2916_v46  ;;  %v3004_v46 = vld [vmem:[%s4264_s1 + $0x5a8] ss:$24 sps:$4 sm:$0xff]  }
  0x6b   :  { %1934 = vmatpush2.bf16.msra.mxu0 %v2911_v47  ;;  %v3012_v47 = vld [vmem:[%s4264_s1 + $0x57c] ss:$24 sps:$4 sm:$0xff]  }
  0x6c   :  { %1935 = vmatprep.subr.bf16.mxu0 %v2919_v48  ;;  %1977 = vmatpush2.bf16.msra.mxu1 %v2914_v49  ;;  %v3007_v48 = vld [vmem:[%s4264_s1 + $0x8a8] ss:$24 sps:$4 sm:$0xff]   ;;  %v3015_v49 = vld [vmem:[%s4264_s1 + $0x87c] ss:$24 sps:$4 sm:$0xff]  }
  0x6d   :  { %1978 = vmatprep.subr.bf16.mxu1 %v2922_v50  ;;  %v3010_v50 = vld [vmem:[%s4264_s1 + $0x578] ss:$24 sps:$4 sm:$0xff]  }
  0x6f   :  { %1936 = vmatpush2.bf16.msra.mxu0 %v2917_v52  ;;  %v3018_v52 = vld [vmem:[%s4264_s1 + $0x54c] ss:$24 sps:$4 sm:$0xff]  }
  0x70   :  { %1937 = vmatprep.subr.bf16.mxu0 %v2925_v53  ;;  %1979 = vmatpush2.bf16.msra.mxu1 %v2920_v54  ;;  %v3013_v53 = vld [vmem:[%s4264_s1 + $0x878] ss:$24 sps:$4 sm:$0xff]   ;;  %v3021_v54 = vld [vmem:[%s4264_s1 + $0x84c] ss:$24 sps:$4 sm:$0xff]  }
  0x71   :  { %1980 = vmatprep.subr.bf16.mxu1 %v2928_v55  ;;  %v3016_v55 = vld [vmem:[%s4264_s1 + $0x548] ss:$24 sps:$4 sm:$0xff]  }
  0x73   :  { %1938 = vmatpush2.bf16.msra.mxu0 %v2923_v56  ;;  %v3024_v56 = vld [vmem:[%s4264_s1 + $0x51c] ss:$24 sps:$4 sm:$0xff]  }
  0x74   :  { %1939 = vmatprep.subr.bf16.mxu0 %v2931_v57  ;;  %1981 = vmatpush2.bf16.msra.mxu1 %v2926_v58  ;;  %v3019_v57 = vld [vmem:[%s4264_s1 + $0x848] ss:$24 sps:$4 sm:$0xff]   ;;  %v3027_v58 = vld [vmem:[%s4264_s1 + $0x81c] ss:$24 sps:$4 sm:$0xff]  }
  0x75   :  { %1982 = vmatprep.subr.bf16.mxu1 %v2934_v59  ;;  %v3022_v59 = vld [vmem:[%s4264_s1 + $0x518] ss:$24 sps:$4 sm:$0xff]  }
  0x77   :  { %1940 = vmatpush2.bf16.msra.mxu0 %v2929_v60  ;;  %v3030_v60 = vld [vmem:[%s4264_s1 + $0x4ec] ss:$24 sps:$4 sm:$0xff]  }
  0x78   :  { %1941 = vmatprep.subr.bf16.mxu0 %v2937_v61  ;;  %1983 = vmatpush2.bf16.msra.mxu1 %v2932_v62  ;;  %v3025_v61 = vld [vmem:[%s4264_s1 + $0x818] ss:$24 sps:$4 sm:$0xff]   ;;  %v3033_v62 = vld [vmem:[%s4264_s1 + $0x7ec] ss:$24 sps:$4 sm:$0xff]  }
  0x79   :  { %1984 = vmatprep.subr.bf16.mxu1 %v2940_v63  ;;  %v3028_v63 = vld [vmem:[%s4264_s1 + $0x4e8] ss:$24 sps:$4 sm:$0xff]  }
  0x7b   :  { %1942 = vmatpush2.bf16.msra.mxu0 %v2935_v0  ;;  %v3036_v0 = vld [vmem:[%s4264_s1 + $0x4bc] ss:$24 sps:$4 sm:$0xff]  }
  0x7c   :  { %1943 = vmatprep.subr.bf16.mxu0 %v2943_v1  ;;  %1985 = vmatpush2.bf16.msra.mxu1 %v2938_v2  ;;  %v3031_v1 = vld [vmem:[%s4264_s1 + $0x7e8] ss:$24 sps:$4 sm:$0xff]   ;;  %v3039_v2 = vld [vmem:[%s4264_s1 + $0x7bc] ss:$24 sps:$4 sm:$0xff]  }
  0x7d   :  { %1986 = vmatprep.subr.bf16.mxu1 %v2946_v4  ;;  %v3034_v4 = vld [vmem:[%s4264_s1 + $0x4b8] ss:$24 sps:$4 sm:$0xff]  }
  0x7f   :  { %1944 = vmatpush2.bf16.msra.mxu0 %v2941_v5  ;;  %v3042_v5 = vld [vmem:[%s4264_s1 + $0x48c] ss:$24 sps:$4 sm:$0xff]  }
  0x80   :  { %1999 = vmatprep.subr.bf16.mxu0 %v2952_v7  ;;  %1987 = vmatpush2.bf16.msra.mxu1 %v2944_v8  ;;  %v3037_v7 = vld [vmem:[%s4264_s1 + $0x7b8] ss:$24 sps:$4 sm:$0xff]   ;;  %v3045_v8 = vld [vmem:[%s4264_s1 + $0x78c] ss:$24 sps:$4 sm:$0xff]  }
  0x81   :  { %2042 = vmatprep.subr.bf16.mxu1 %v2955_v10  ;;  %v3040_v10 = vld [vmem:[%s4264_s1 + $0x488] ss:$24 sps:$4 sm:$0xff]  }
  0x82   :  { %1946 = vmatmul.mubr.bf16.vlgmr.msra.gmra.mxu0 %v3650_v9 }
  0x83   :  { %2000 = vmatpush1.bf16.msra.mxu0 %v2950_v11  ;;  %2031 = vmatprep.mubr.bf16.mxu0 %v3389_v51  ;;  %v2962_v51 = vld [vmem:[%s4264_s1 + $0x3f8] ss:$24 sps:$4 sm:$0xff]   ;;  %v3048_v11 = vld [vmem:[%s4264_s1 + $0x164] ss:$24 sps:$4 sm:$0xff]  }
  0x84   :  { %1989 = vmatmul.mubr.bf16.vlgmr.msra.gmra.mxu1 %v3440_v3  ;;  %2001 = vmatprep.subr.bf16.mxu0 %v2958_v12  ;;  %v2970_v3 = vld [vmem:[%s4264_s1 + $0x3cc] ss:$24 sps:$4 sm:$0xff]   ;;  %v3043_v12 = vld [vmem:[%s4264_s1 + $0x788] ss:$24 sps:$4 sm:$0xff]  }
  0x85   :  { %2043 = vmatpush1.bf16.msra.mxu1 %v2953_v13  ;;  %2074 = vmatprep.mubr.bf16.mxu1 %v3536_v33  ;;  %v3051_v13 = vld [vmem:[%s4264_s1 + $0x464] ss:$24 sps:$4 sm:$0xff]  }
  0x86   :  { %2044 = vmatprep.subr.bf16.mxu1 %v2961_v14  ;;  %v3046_v14 = vld [vmem:[%s4264_s1 + $0x160] ss:$24 sps:$4 sm:$0xff]  }
  0x87   :  { %2002 = vmatpush1.bf16.msra.mxu0 %v2956_v15  ;;  %v3054_v15 = vld [vmem:[%s4264_s1 + $0x134] ss:$24 sps:$4 sm:$0xff]  }
  0x88   :  { %2003 = vmatprep.subr.bf16.mxu0 %v2964_v16  ;;  %v3049_v16 = vld [vmem:[%s4264_s1 + $0x460] ss:$24 sps:$4 sm:$0xff]  }
  0x89   :  { %2045 = vmatpush1.bf16.msra.mxu1 %v2959_v17  ;;  %v3057_v17 = vld [vmem:[%s4264_s1 + $0x434] ss:$24 sps:$4 sm:$0xff]  }
  0x8a   :  { %2046 = vmatprep.subr.bf16.mxu1 %v2967_v18  ;;  %v3052_v18 = vld [vmem:[%s4264_s1 + $0x130] ss:$24 sps:$4 sm:$0xff]  }
  0x8b   :  { %2004 = vmatpush1.bf16.msra.mxu0 %v2962_v51  ;;  %v3194_v51 = vld [vmem:[%s4265_s0 + $0x4] ss:$24 sps:$4 sm:$0xff]  }
  0x8c   :  { %2005 = vmatprep.subr.bf16.mxu0 %v2970_v3  ;;  %v3055_v3 = vld [vmem:[%s4264_s1 + $0x430] ss:$24 sps:$4 sm:$0xff]  }
  0x8d   :  { %2047 = vmatpush1.bf16.msra.mxu1 %v2965_v19  ;;  %v3195_v19 = vld [vmem:[%s4265_s0 + $0xc] ss:$24 sps:$4 sm:$0xff]  }
  0x8e   :  { %2048 = vmatprep.subr.bf16.mxu1 %v2973_v20  ;;  %v3063_v20 = vld [vmem:[%s4264_s1 + $0x404] ss:$24 sps:$4 sm:$0xff]  }
  0x8f   :  { %2006 = vmatpush1.bf16.msra.mxu0 %v2968_v21  ;;  %v3058_v21 = vld [vmem:[%s4264_s1 + $0x100] ss:$24 sps:$4 sm:$0xff]  }
  0x90   :  { %2007 = vmatprep.subr.bf16.mxu0 %v2976_v22  ;;  %v3066_v22 = vld [vmem:[%s4264_s1 + $0xd4] ss:$24 sps:$4 sm:$0xff]  }
  0x91   :  { %2049 = vmatpush1.bf16.msra.mxu1 %v2971_v23  ;;  %v3061_v23 = vld [vmem:[%s4264_s1 + $0x400] ss:$24 sps:$4 sm:$0xff]  }
  0x92   :  { %2050 = vmatprep.subr.bf16.mxu1 %v2979_v24  ;;  %v3069_v24 = vld [vmem:[%s4264_s1 + $0x3d4] ss:$24 sps:$4 sm:$0xff]  }
  0x93   :  { %2008 = vmatpush1.bf16.msra.mxu0 %v2974_v25  ;;  %v3064_v25 = vld [vmem:[%s4264_s1 + $0xd0] ss:$24 sps:$4 sm:$0xff]  }
  0x94   :  { %2009 = vmatprep.subr.bf16.mxu0 %v2982_v26  ;;  %v3072_v26 = vld [vmem:[%s4264_s1 + $0xa4] ss:$24 sps:$4 sm:$0xff]  }
  0x95   :  { %2051 = vmatpush1.bf16.msra.mxu1 %v2977_v27  ;;  %v3067_v27 = vld [vmem:[%s4264_s1 + $0x3d0] ss:$24 sps:$4 sm:$0xff]  }
  0x96   :  { %2052 = vmatprep.subr.bf16.mxu1 %v2985_v28  ;;  %v3075_v28 = vld [vmem:[%s4264_s1 + $0x3a4] ss:$24 sps:$4 sm:$0xff]  }
  0x97   :  { %2010 = vmatpush1.bf16.msra.mxu0 %v2980_v29  ;;  %v3070_v29 = vld [vmem:[%s4264_s1 + $0xa0] ss:$24 sps:$4 sm:$0xff]  }
  0x98   :  { %2011 = vmatprep.subr.bf16.mxu0 %v2988_v30  ;;  %v3078_v30 = vld [vmem:[%s4264_s1 + $0x74] ss:$24 sps:$4 sm:$0xff]  }
  0x99   :  { %2053 = vmatpush1.bf16.msra.mxu1 %v2983_v31  ;;  %v3073_v31 = vld [vmem:[%s4264_s1 + $0x3a0] ss:$24 sps:$4 sm:$0xff]  }
  0x9a   :  { %2054 = vmatprep.subr.bf16.mxu1 %v2991_v32  ;;  %v3081_v32 = vld [vmem:[%s4264_s1 + $0x374] ss:$24 sps:$4 sm:$0xff]  }
  0x9b   :  { %2012 = vmatpush1.bf16.msra.mxu0 %v2986_v34  ;;  %v3076_v34 = vld [vmem:[%s4264_s1 + $0x70] ss:$24 sps:$4 sm:$0xff]  }
  0x9c   :  { %2013 = vmatprep.subr.bf16.mxu0 %v2994_v35  ;;  %v3084_v35 = vld [vmem:[%s4264_s1 + $0x44] ss:$24 sps:$4 sm:$0xff]  }
  0x9d   :  { %2055 = vmatpush1.bf16.msra.mxu1 %v2989_v36  ;;  %v3079_v36 = vld [vmem:[%s4264_s1 + $0x370] ss:$24 sps:$4 sm:$0xff]  }
  0x9e   :  { %2056 = vmatprep.subr.bf16.mxu1 %v2997_v37  ;;  %v3087_v37 = vld [vmem:[%s4264_s1 + $0x344] ss:$24 sps:$4 sm:$0xff]  }
  0x9f   :  { %2014 = vmatpush1.bf16.msra.mxu0 %v2992_v38  ;;  %v3082_v38 = vld [vmem:[%s4264_s1 + $0x40] ss:$24 sps:$4 sm:$0xff]  }
  0xa0   :  { %2015 = vmatprep.subr.bf16.mxu0 %v3000_v39  ;;  %v3090_v39 = vld [vmem:[%s4264_s1 + $0x14] ss:$24 sps:$4 sm:$0xff]  }
  0xa1   :  { %2057 = vmatpush1.bf16.msra.mxu1 %v2995_v40  ;;  %v3085_v40 = vld [vmem:[%s4264_s1 + $0x340] ss:$24 sps:$4 sm:$0xff]  }
  0xa2   :  { %2058 = vmatprep.subr.bf16.mxu1 %v3003_v41  ;;  %v3093_v41 = vld [vmem:[%s4264_s1 + $0x314] ss:$24 sps:$4 sm:$0xff]  }
  0xa3   :  { %2016 = vmatpush2.bf16.msra.mxu0 %v2998_v42  ;;  %v3088_v42 = vld [vmem:[%s4264_s1 + $0x10] ss:$24 sps:$4 sm:$0xff]  }
  0xa4   :  { %2017 = vmatprep.subr.bf16.mxu0 %v3006_v43  ;;  %v3096_v43 = vld [vmem:[%s4264_s1 + $0x2e4] ss:$24 sps:$4 sm:$0xff]  }
  0xa5   :  { %2059 = vmatpush2.bf16.msra.mxu1 %v3001_v44  ;;  %v3091_v44 = vld [vmem:[%s4264_s1 + $0x310] ss:$24 sps:$4 sm:$0xff]  }
  0xa6   :  { %2060 = vmatprep.subr.bf16.mxu1 %v3009_v45  ;;  %v3099_v45 = vld [vmem:[%s4264_s1 + $0x5e4] ss:$24 sps:$4 sm:$0xff]  }
  0xa7   :  { %2018 = vmatpush2.bf16.msra.mxu0 %v3004_v46  ;;  %v3094_v46 = vld [vmem:[%s4264_s1 + $0x2e0] ss:$24 sps:$4 sm:$0xff]  }
  0xa8   :  { %2019 = vmatprep.subr.bf16.mxu0 %v3012_v47  ;;  %v3102_v47 = vld [vmem:[%s4264_s1 + $0x2b4] ss:$24 sps:$4 sm:$0xff]  }
  0xa9   :  { %2061 = vmatpush2.bf16.msra.mxu1 %v3007_v48  ;;  %v3097_v48 = vld [vmem:[%s4264_s1 + $0x5e0] ss:$24 sps:$4 sm:$0xff]  }
  0xaa   :  { %2062 = vmatprep.subr.bf16.mxu1 %v3015_v49  ;;  %v3105_v49 = vld [vmem:[%s4264_s1 + $0x5b4] ss:$24 sps:$4 sm:$0xff]  }
  0xab   :  { %2020 = vmatpush2.bf16.msra.mxu0 %v3010_v50  ;;  %v3100_v50 = vld [vmem:[%s4264_s1 + $0x2b0] ss:$24 sps:$4 sm:$0xff]  }
  0xac   :  { %2021 = vmatprep.subr.bf16.mxu0 %v3018_v52  ;;  %v3108_v52 = vld [vmem:[%s4264_s1 + $0x284] ss:$24 sps:$4 sm:$0xff]  }
  0xad   :  { %2063 = vmatpush2.bf16.msra.mxu1 %v3013_v53  ;;  %v3103_v53 = vld [vmem:[%s4264_s1 + $0x5b0] ss:$24 sps:$4 sm:$0xff]  }
  0xae   :  { %2064 = vmatprep.subr.bf16.mxu1 %v3021_v54  ;;  %v3111_v54 = vld [vmem:[%s4264_s1 + $0x584] ss:$24 sps:$4 sm:$0xff]  }
  0xaf   :  { %2022 = vmatpush2.bf16.msra.mxu0 %v3016_v55  ;;  %v3106_v55 = vld [vmem:[%s4264_s1 + $0x280] ss:$24 sps:$4 sm:$0xff]  }
  0xb0   :  { %2023 = vmatprep.subr.bf16.mxu0 %v3024_v56  ;;  %v3114_v56 = vld [vmem:[%s4264_s1 + $0x254] ss:$24 sps:$4 sm:$0xff]  }
  0xb1   :  { %2065 = vmatpush2.bf16.msra.mxu1 %v3019_v57  ;;  %v3109_v57 = vld [vmem:[%s4264_s1 + $0x580] ss:$24 sps:$4 sm:$0xff]  }
  0xb2   :  { %2066 = vmatprep.subr.bf16.mxu1 %v3027_v58  ;;  %v3117_v58 = vld [vmem:[%s4264_s1 + $0x554] ss:$24 sps:$4 sm:$0xff]  }
  0xb3   :  { %2024 = vmatpush2.bf16.msra.mxu0 %v3022_v59  ;;  %v3112_v59 = vld [vmem:[%s4264_s1 + $0x250] ss:$24 sps:$4 sm:$0xff]  }
  0xb4   :  { %2025 = vmatprep.subr.bf16.mxu0 %v3030_v60  ;;  %v3120_v60 = vld [vmem:[%s4264_s1 + $0x224] ss:$24 sps:$4 sm:$0xff]  }
  0xb5   :  { %2067 = vmatpush2.bf16.msra.mxu1 %v3025_v61  ;;  %v3115_v61 = vld [vmem:[%s4264_s1 + $0x550] ss:$24 sps:$4 sm:$0xff]  }
  0xb6   :  { %2068 = vmatprep.subr.bf16.mxu1 %v3033_v62  ;;  %v3123_v62 = vld [vmem:[%s4264_s1 + $0x524] ss:$24 sps:$4 sm:$0xff]  }
  0xb7   :  { %2026 = vmatpush2.bf16.msra.mxu0 %v3028_v63  ;;  %v3118_v63 = vld [vmem:[%s4264_s1 + $0x220] ss:$24 sps:$4 sm:$0xff]  }
  0xb8   :  { %2027 = vmatprep.subr.bf16.mxu0 %v3036_v0  ;;  %v3126_v0 = vld [vmem:[%s4264_s1 + $0x1f4] ss:$24 sps:$4 sm:$0xff]  }
  0xb9   :  { %2069 = vmatpush2.bf16.msra.mxu1 %v3031_v1  ;;  %v3121_v1 = vld [vmem:[%s4264_s1 + $0x520] ss:$24 sps:$4 sm:$0xff]  }
  0xba   :  { %2070 = vmatprep.subr.bf16.mxu1 %v3039_v2  ;;  %v3129_v2 = vld [vmem:[%s4264_s1 + $0x4f4] ss:$24 sps:$4 sm:$0xff]  }
  0xbb   :  { %2028 = vmatpush2.bf16.msra.mxu0 %v3034_v4  ;;  %v3124_v4 = vld [vmem:[%s4264_s1 + $0x1f0] ss:$24 sps:$4 sm:$0xff]  }
  0xbc   :  { %2029 = vmatprep.subr.bf16.mxu0 %v3042_v5  ;;  %v3132_v5 = vld [vmem:[%s4264_s1 + $0x1c4] ss:$24 sps:$4 sm:$0xff]  }
  0xbd   :  { %2071 = vmatpush2.bf16.msra.mxu1 %v3037_v7  ;;  %v3127_v7 = vld [vmem:[%s4264_s1 + $0x4f0] ss:$24 sps:$4 sm:$0xff]  }
  0xbe   :  { %2072 = vmatprep.subr.bf16.mxu1 %v3045_v8  ;;  %v3135_v8 = vld [vmem:[%s4264_s1 + $0x4c4] ss:$24 sps:$4 sm:$0xff]  }
  0xbf   :  { %2030 = vmatpush2.bf16.msra.mxu0 %v3040_v10  ;;  %v3130_v10 = vld [vmem:[%s4264_s1 + $0x1c0] ss:$24 sps:$4 sm:$0xff]  }
  0xc0   :  { %2085 = vmatprep.subr.bf16.mxu0 %v3048_v11  ;;  %v3138_v11 = vld [vmem:[%s4264_s1 + $0x194] ss:$24 sps:$4 sm:$0xff]  }
  0xc1   :  { %2073 = vmatpush2.bf16.msra.mxu1 %v3043_v12  ;;  %v3133_v12 = vld [vmem:[%s4264_s1 + $0x4c0] ss:$24 sps:$4 sm:$0xff]  }
  0xc2   :  { %2032 = vmatmul.mubr.bf16.vlgmr.msra.gmra.mxu0 %v3451_v6  ;;  %2128 = vmatprep.subr.bf16.mxu1 %v3051_v13  ;;  %v3060_v6 = vld [vmem:[%s4264_s1 + $0x104] ss:$24 sps:$4 sm:$0xff]   ;;  %v3141_v13 = vld [vmem:[%s4264_s1 + $0x494] ss:$24 sps:$4 sm:$0xff]  }
  0xc3   :  { %2086 = vmatpush1.bf16.msra.mxu0 %v3046_v14  ;;  %2117 = vmatprep.mubr.bf16.mxu0 %v3194_v51  ;;  %v3136_v14 = vld [vmem:[%s4264_s1 + $0x190] ss:$24 sps:$4 sm:$0xff]   ;;  %v3196_v51 = vld [vmem:[%s4265_s0] ss:$24 sps:$4 sm:$0xff]  }
  0xc4   :  { %2075 = vmatmul.mubr.bf16.vlgmr.msra.gmra.mxu1 %v3650_v9  ;;  %2087 = vmatprep.subr.bf16.mxu0 %v3054_v15  ;;  %v3144_v15 = vld [vmem:[%s4264_s1 + $0x764] ss:$24 sps:$4 sm:$0xff]  }
  0xc5   :  { %2129 = vmatpush1.bf16.msra.mxu1 %v3049_v16  ;;  %2160 = vmatprep.mubr.bf16.mxu1 %v3195_v19  ;;  %v3139_v16 = vld [vmem:[%s4264_s1 + $0x490] ss:$24 sps:$4 sm:$0xff]   ;;  %v3150_v19 = vld [vmem:[%s4264_s1 + $0x704] ss:$24 sps:$4 sm:$0xff]  }
  0xc6   :  { %2130 = vmatprep.subr.bf16.mxu1 %v3057_v17  ;;  %v3142_v17 = vld [vmem:[%s4264_s1 + $0x760] ss:$24 sps:$4 sm:$0xff]  }
  0xc7   :  { %2088 = vmatpush1.bf16.msra.mxu0 %v3052_v18  ;;  %v3147_v18 = vld [vmem:[%s4264_s1 + $0x734] ss:$24 sps:$4 sm:$0xff]  }
  0xc8   :  { %2089 = vmatprep.subr.bf16.mxu0 %v3060_v6  ;;  %v3145_v6 = vld [vmem:[%s4264_s1 + $0x730] ss:$24 sps:$4 sm:$0xff]  }
  0xc9   :  { %2131 = vmatpush1.bf16.msra.mxu1 %v3055_v3  ;;  %v3197_v3 = vld [vmem:[%s4265_s0 + $0x8] ss:$24 sps:$4 sm:$0xff]  }
  0xca   :  { %2132 = vmatprep.subr.bf16.mxu1 %v3063_v20  ;;  %v3148_v20 = vld [vmem:[%s4264_s1 + $0x700] ss:$24 sps:$4 sm:$0xff]  }
  0xcb   :  { %2090 = vmatpush1.bf16.msra.mxu0 %v3058_v21  ;;  %v3151_v21 = vld [vmem:[%s4264_s1 + $0x6d0] ss:$24 sps:$4 sm:$0xff]  }
  0xcc   :  { %2091 = vmatprep.subr.bf16.mxu0 %v3066_v22  ;;  %v3156_v22 = vld [vmem:[%s4264_s1 + $0x6a4] ss:$24 sps:$4 sm:$0xff]  }
  0xcd   :  { %2133 = vmatpush1.bf16.msra.mxu1 %v3061_v23  ;;  %v3154_v23 = vld [vmem:[%s4264_s1 + $0x6a0] ss:$24 sps:$4 sm:$0xff]  }
  0xce   :  { %2134 = vmatprep.subr.bf16.mxu1 %v3069_v24  ;;  %v3159_v24 = vld [vmem:[%s4264_s1 + $0x674] ss:$24 sps:$4 sm:$0xff]  }
  0xcf   :  { %2092 = vmatpush1.bf16.msra.mxu0 %v3064_v25  ;;  %v3157_v25 = vld [vmem:[%s4264_s1 + $0x670] ss:$24 sps:$4 sm:$0xff]  }
  0xd0   :  { %2093 = vmatprep.subr.bf16.mxu0 %v3072_v26  ;;  %v3162_v26 = vld [vmem:[%s4264_s1 + $0x644] ss:$24 sps:$4 sm:$0xff]  }
  0xd1   :  { %2135 = vmatpush1.bf16.msra.mxu1 %v3067_v27  ;;  %v3160_v27 = vld [vmem:[%s4264_s1 + $0x640] ss:$24 sps:$4 sm:$0xff]  }
  0xd2   :  { %2136 = vmatprep.subr.bf16.mxu1 %v3075_v28  ;;  %v3165_v28 = vld [vmem:[%s4264_s1 + $0x614] ss:$24 sps:$4 sm:$0xff]  }
  0xd3   :  { %2094 = vmatpush1.bf16.msra.mxu0 %v3070_v29  ;;  %v3163_v29 = vld [vmem:[%s4264_s1 + $0x610] ss:$24 sps:$4 sm:$0xff]  }
  0xd4   :  { %2095 = vmatprep.subr.bf16.mxu0 %v3078_v30  ;;  %v3168_v30 = vld [vmem:[%s4264_s1 + $0x8e4] ss:$24 sps:$4 sm:$0xff]  }
  0xd5   :  { %2137 = vmatpush1.bf16.msra.mxu1 %v3073_v31  ;;  %v3166_v31 = vld [vmem:[%s4264_s1 + $0x8e0] ss:$24 sps:$4 sm:$0xff]  }
  0xd6   :  { %2138 = vmatprep.subr.bf16.mxu1 %v3081_v32  ;;  %v3171_v32 = vld [vmem:[%s4264_s1 + $0x8b4] ss:$24 sps:$4 sm:$0xff]  }
  0xd7   :  { %2096 = vmatpush1.bf16.msra.mxu0 %v3076_v34  ;;  %v3169_v34 = vld [vmem:[%s4264_s1 + $0x8b0] ss:$24 sps:$4 sm:$0xff]  }
  0xd8   :  { %2097 = vmatprep.subr.bf16.mxu0 %v3084_v35  ;;  %v3174_v35 = vld [vmem:[%s4264_s1 + $0x884] ss:$24 sps:$4 sm:$0xff]  }
  0xd9   :  { %2139 = vmatpush1.bf16.msra.mxu1 %v3079_v36  ;;  %v3172_v36 = vld [vmem:[%s4264_s1 + $0x880] ss:$24 sps:$4 sm:$0xff]  }
  0xda   :  { %2140 = vmatprep.subr.bf16.mxu1 %v3087_v37  ;;  %v3177_v37 = vld [vmem:[%s4264_s1 + $0x854] ss:$24 sps:$4 sm:$0xff]  }
  0xdb   :  { %2098 = vmatpush1.bf16.msra.mxu0 %v3082_v38  ;;  %v3175_v38 = vld [vmem:[%s4264_s1 + $0x850] ss:$24 sps:$4 sm:$0xff]  }
  0xdc   :  { %2099 = vmatprep.subr.bf16.mxu0 %v3090_v39  ;;  %v3180_v39 = vld [vmem:[%s4264_s1 + $0x824] ss:$24 sps:$4 sm:$0xff]  }
  0xdd   :  { %2141 = vmatpush1.bf16.msra.mxu1 %v3085_v40  ;;  %v3178_v40 = vld [vmem:[%s4264_s1 + $0x820] ss:$24 sps:$4 sm:$0xff]  }
  0xde   :  { %2142 = vmatprep.subr.bf16.mxu1 %v3093_v41  ;;  %v3183_v41 = vld [vmem:[%s4264_s1 + $0x7f4] ss:$24 sps:$4 sm:$0xff]  }
  0xdf   :  { %2100 = vmatpush1.bf16.msra.mxu0 %v3088_v42  ;;  %v3181_v42 = vld [vmem:[%s4264_s1 + $0x7f0] ss:$24 sps:$4 sm:$0xff]  }
  0xe0   :  { %2101 = vmatprep.subr.bf16.mxu0 %v3096_v43  ;;  %v3186_v43 = vld [vmem:[%s4264_s1 + $0x7c4] ss:$24 sps:$4 sm:$0xff]  }
  0xe1   :  { %2143 = vmatpush1.bf16.msra.mxu1 %v3091_v44  ;;  %v3184_v44 = vld [vmem:[%s4264_s1 + $0x7c0] ss:$24 sps:$4 sm:$0xff]  }
  0xe2   :  { %2144 = vmatprep.subr.bf16.mxu1 %v3099_v45  ;;  %v3189_v45 = vld [vmem:[%s4264_s1 + $0x794] ss:$24 sps:$4 sm:$0xff]  }
  0xe3   :  { %2102 = vmatpush2.bf16.msra.mxu0 %v3094_v46  ;;  %v3187_v46 = vld [vmem:[%s4264_s1 + $0x790] ss:$24 sps:$4 sm:$0xff]  }
  0xe4   :  { %2103 = vmatprep.subr.bf16.mxu0 %v3102_v47 }
  0xe5   :  { %2145 = vmatpush2.bf16.msra.mxu1 %v3097_v48 }
  0xe6   :  { %2146 = vmatprep.subr.bf16.mxu1 %v3105_v49 }
  0xe7   :  { %2104 = vmatpush2.bf16.msra.mxu0 %v3100_v50 }
  0xe8   :  { %2105 = vmatprep.subr.bf16.mxu0 %v3108_v52 }
  0xe9   :  { %2147 = vmatpush2.bf16.msra.mxu1 %v3103_v53 }
  0xea   :  { %2148 = vmatprep.subr.bf16.mxu1 %v3111_v54 }
  0xeb   :  { %2106 = vmatpush2.bf16.msra.mxu0 %v3106_v55 }
  0xec   :  { %2107 = vmatprep.subr.bf16.mxu0 %v3114_v56 }
  0xed   :  { %2149 = vmatpush2.bf16.msra.mxu1 %v3109_v57 }
  0xee   :  { %2150 = vmatprep.subr.bf16.mxu1 %v3117_v58 }
  0xef   :  { %2108 = vmatpush2.bf16.msra.mxu0 %v3112_v59 }
  0xf0   :  { %2109 = vmatprep.subr.bf16.mxu0 %v3120_v60  ;;  %v327_v60 = vlaneseq }
  0xf1   :  { %2151 = vmatpush2.bf16.msra.mxu1 %v3115_v61 }
  0xf2   :  { %2152 = vmatprep.subr.bf16.mxu1 %v3123_v62 }
  0xf3   :  { %2110 = vmatpush2.bf16.msra.mxu0 %v3118_v63  ;;  %v328_v63 = vshrl.u32 %v327_v60, 7 }
  0xf4   :  { %2111 = vmatprep.subr.bf16.mxu0 %v3126_v0 }
  0xf5   :  { %2153 = vmatpush2.bf16.msra.mxu1 %v3121_v1 }
  0xf6   :  { %2154 = vmatprep.subr.bf16.mxu1 %v3129_v2  ;;  %v4153_v2 = vsub.s32 1, %v328_v63 }
  0xf7   :  { %2112 = vmatpush2.bf16.msra.mxu0 %v3124_v4  ;;  %v4155_v4 = vsub.s32 2, %v328_v63 }
  0xf8   :  { %2113 = vmatprep.subr.bf16.mxu0 %v3132_v5  ;;  %v317_v5 = vld [vmem:[%s4266_s2] sm:$0x3f] }
  0xf9   :  { %2155 = vmatpush2.bf16.msra.mxu1 %v3127_v7  ;;  %v4160_v7 = vsub.s32 0, %v328_v63 }
  0xfa   :  { %2156 = vmatprep.subr.bf16.mxu1 %v3135_v8 }
  0xfb   :  { %2114 = vmatpush2.bf16.msra.mxu0 %v3130_v10 }
  0xfc   :  { %2115 = vmatprep.subr.bf16.mxu0 %v3138_v11  ;;  %v334_v11 = vrot.slane %v317_v5, %v4153_v2 }
  0xfd   :  { %2157 = vmatpush2.bf16.msra.mxu1 %v3133_v12  ;;  %v338_v12 = vrot.slane %v317_v5, %v4155_v4 }
  0xfe   :  { %2158 = vmatprep.subr.bf16.mxu1 %v3141_v13  ;;  %v4164_v13 = vsub.s32 3, %v328_v63 }
  0xff   :  { %2116 = vmatpush2.bf16.msra.mxu0 %v3136_v14  ;;  %v330_v14 = vrot.slane %v317_v5, %v4160_v7 }
 0x100   :  { %2171 = vmatprep.subr.bf16.mxu0 %v3144_v15 }
 0x101   :  { %2159 = vmatpush2.bf16.msra.mxu1 %v3139_v16 }
 0x102   :  { %2118 = vmatmul.mubr.bf16.vlgmr.msra.gmra.mxu0 %v3196_v51  ;;  %v1861_v47 = vpop.f32.mrf.mxu0  ;;  %v342_v51 = vrot.slane %v317_v5, %v4164_v13 }
 0x103   :  { %2172 = vmatpush1.bf16.msra.mxu0 %v3142_v17  ;;  %2203 = vmatprep.mubr.bf16.mxu0 %v3536_v33  ;;  %v3153_v33 = vld [vmem:[%s4264_s1 + $0x6d4] ss:$24 sps:$4 sm:$0xff]   ;;  %v1904_v48 = vpop.f32.mrf.mxu1 }
 0x104   :  { %2161 = vmatmul.mubr.bf16.vlgmr.msra.gmra.mxu1 %v3197_v3  ;;  %2173 = vmatprep.subr.bf16.mxu0 %v3147_v18  ;;  %v1863_v49 = vpop.f32.mrf.mxu0 }
 0x105   :  { %v1906_v50 = vpop.f32.mrf.mxu1  ;;  %v1864_v17 = vadd.f32 %v1863_v49, %v334_v11 }
 0x106   :  { %v1865_v52 = vpop.f32.mrf.mxu0 }
 0x107   :  { %2174 = vmatpush1.bf16.msra.mxu0 %v3145_v6  ;;  %v4149_v53 = vpop.f32.mrf.mxu1  ;;  %v1862_v6 = vadd.f32 %v1861_v47, %v330_v14 }
 0x108   :  { %2175 = vmatprep.subr.bf16.mxu0 %v3150_v19  ;;  %v1867_v54 = vpop.f32.mrf.mxu0 }
 0x109   :  { %v1910_v55 = vpop.f32.mrf.mxu1 }
 0x10b   :  { %2176 = vmatpush1.bf16.msra.mxu0 %v3148_v20  ;;  %v1907_v20 = vadd.f32 %v1906_v50, %v1864_v17 }
 0x10c   :  { %2177 = vmatprep.subr.bf16.mxu0 %v3153_v33  ;;  %v1868_v33 = vadd.f32 %v1867_v54, %v334_v11 }
 0x10f   :  { %2178 = vmatpush1.bf16.msra.mxu0 %v3151_v21  ;;  %v318_v21 = vld [vmem:[%s4267_s3] sm:$0xff] }
 0x110   :  { %2179 = vmatprep.subr.bf16.mxu0 %v3156_v22 }
 0x113   :  { %2180 = vmatpush1.bf16.msra.mxu0 %v3154_v23 }
 0x114   :  { %2181 = vmatprep.subr.bf16.mxu0 %v3159_v24  ;;  %v319_v24 = vld [vmem:[%s4267_s3 + $0x8] sm:$0xff] }
 0x115   :  { %v2217_v54 = vunpack.c.h.bf16 %v319_v24 }
 0x117   :  { %2182 = vmatpush1.bf16.msra.mxu0 %v3157_v25 }
 0x118   :  { %2183 = vmatprep.subr.bf16.mxu0 %v3162_v26  ;;  %v1905_v26 = vadd.f32 %v1904_v48, %v1862_v6 }
 0x11b   :  { %2184 = vmatpush1.bf16.msra.mxu0 %v3160_v27  ;;  %v4174_v27 = vsub.s32 4, %v328_v63 }
 0x11c   :  { %2185 = vmatprep.subr.bf16.mxu0 %v3165_v28  ;;  %v1866_v28 = vadd.f32 %v1865_v52, %v330_v14 }
 0x11d   :  { %v346_v48 = vrot.slane %v317_v5, %v4174_v27 }
 0x11e   :  { %v1909_v49 = vadd.f32 %v4149_v53, %v1866_v28 }
 0x11f   :  { %2186 = vmatpush1.bf16.msra.mxu0 %v3163_v29 }
 0x120   :  { %2187 = vmatprep.subr.bf16.mxu0 %v3168_v30  ;;  %v2215_v30 = vunpack.c.h.bf16 %v318_v21 }
 0x123   :  { %2188 = vmatpush2.bf16.msra.mxu0 %v3166_v31  ;;  %v321_v31 = vld [vmem:[%s4267_s3 + $0x18] sm:$0xff] }
 0x124   :  { %2189 = vmatprep.subr.bf16.mxu0 %v3171_v32  ;;  %v2221_v47 = vunpack.c.h.bf16 %v321_v31 }
 0x127   :  { %2190 = vmatpush2.bf16.msra.mxu0 %v3169_v34 }
 0x128   :  { %2191 = vmatprep.subr.bf16.mxu0 %v3174_v35 }
 0x12b   :  { %2192 = vmatpush2.bf16.msra.mxu0 %v3172_v36  ;;  %v2214_v36 = vunpack.c.l.bf16 %v318_v21 }
 0x12c   :  { %2193 = vmatprep.subr.bf16.mxu0 %v3177_v37  ;;  %v2216_v37 = vunpack.c.l.bf16 %v319_v24 }
 0x12f   :  { %2194 = vmatpush2.bf16.msra.mxu0 %v3175_v38  ;;  %v4179_v38 = vsub.s32 5, %v328_v63 }
 0x130   :  { %2195 = vmatprep.subr.bf16.mxu0 %v3180_v39  ;;  %v1911_v39 = vadd.f32 %v1910_v55, %v1868_v33 }
 0x133   :  { %2196 = vmatpush2.bf16.msra.mxu0 %v3178_v40 }
 0x134   :  { %2197 = vmatprep.subr.bf16.mxu0 %v3183_v41 }
 0x137   :  { %2198 = vmatpush2.bf16.msra.mxu0 %v3181_v42 }
 0x138   :  { %2199 = vmatprep.subr.bf16.mxu0 %v3186_v43  ;;  %v322_v43 = vld [vmem:[%s4267_s3 + $0x20] sm:$0xff] }
 0x13b   :  { %2200 = vmatpush2.bf16.msra.mxu0 %v3184_v44 }
 0x13c   :  { %2201 = vmatprep.subr.bf16.mxu0 %v3189_v45 }
 0x13f   :  { %2202 = vmatpush2.bf16.msra.mxu0 %v3187_v46  ;;  %v2220_v46 = vunpack.c.l.bf16 %v321_v31 }
 0x142   :  { %2204 = vmatmul.mubr.bf16.vlgmr.msra.gmra.mxu0 %v3650_v9  ;;  %v1947_v56 = vpop.f32.mrf.mxu0 }
 0x143   :  { %v1948_v35 = vadd.f32 %v1947_v56, %v1905_v26 }
 0x144   :  { %v1990_v57 = vpop.f32.mrf.mxu1  ;;  %v1949_v58 = vpop.f32.mrf.mxu0 }
 0x145   :  { %v1991_v18 = vadd.f32 %v1990_v57, %v338_v12  ;;  %v1950_v29 = vadd.f32 %v1949_v58, %v1907_v20  ;;  %v2226_v55 = vadd.f32 %v2214_v36, %v1948_v35  ;;  %v2222_v57 = vunpack.c.l.bf16 %v322_v43  ;;  %v323_v20 = vld [vmem:[%s4267_s3 + $0x28] sm:$0xff] }
 0x146   :  { %v1992_v59 = vpop.f32.mrf.mxu1  ;;  %v4151_v61 = vpop.f32.mrf.mxu0  ;;  %v350_v58 = vrot.slane %v317_v5, %v4179_v38 }
 0x147   :  { %v1993_v22 = vadd.f32 %v1992_v59, %v342_v51  ;;  %v4186_v50 = vadd.f32 %v2215_v30, %v1950_v29  ;;  %v1952_v59 = vadd.f32 %v4151_v61, %v1909_v49  ;;  %v2224_v30 = vunpack.c.l.bf16 %v323_v20 }
 0x148   :  { %v1994_v62 = vpop.f32.mrf.mxu1  ;;  %v1953_v0 = vpop.f32.mrf.mxu0 }
 0x149   :  { %v1995_v32 = vadd.f32 %v1994_v62, %v338_v12  ;;  %v1954_v52 = vadd.f32 %v1953_v0, %v1911_v39  ;;  %v2238_v53 = vadd.f32 %v4186_v50, %v2226_v55  ;;  %v320_v0 = vld [vmem:[%s4267_s3 + $0x10] sm:$0xff]  ;;  %v2225_v39 = vunpack.c.h.bf16 %v323_v20 }
 0x14a   :  { %v1996_v9 = vpop.f32.mrf.mxu1 }
 0x14b   :  { %v1997_v56 = vadd.f32 %v1996_v9, %v342_v51  ;;  %v2233_v12 = vadd.f32 %v2221_v47, %v1954_v52  ;;  %v2223_v9 = vunpack.c.h.bf16 %v322_v43 }
 0x182   :  { %v2033_v1 = vpop.f32.mrf.mxu0 }
 0x183   :  { %v2034_v23 = vadd.f32 %v2033_v1, %v1991_v18 }
 0x184   :  { %v2035_v8 = vpop.f32.mrf.mxu0  ;;  %v2076_v10 = vpop.f32.mrf.mxu1 }
 0x185   :  { %v2036_v40 = vadd.f32 %v2035_v8, %v1993_v22  ;;  %v2077_v41 = vadd.f32 %v2076_v10, %v2034_v23 }
 0x186   :  { %v2037_v15 = vpop.f32.mrf.mxu0  ;;  %v2078_v16 = vpop.f32.mrf.mxu1 }
 0x187   :  { %v2038_v42 = vadd.f32 %v2037_v15, %v1995_v32  ;;  %v2228_v60 = vadd.f32 %v2216_v37, %v2077_v41  ;;  %v2079_v62 = vadd.f32 %v2078_v16, %v2036_v40  ;;  %v2232_v15 = vadd.f32 %v2220_v46, %v1952_v59 }
 0x188   :  { %v2039_v3 = vpop.f32.mrf.mxu0  ;;  %v2080_v19 = vpop.f32.mrf.mxu1 }
 0x189   :  { %v2081_v63 = vadd.f32 %v2080_v19, %v2038_v42  ;;  %v2040_v10 = vadd.f32 %v2039_v3, %v1997_v56  ;;  %v2239_v5 = vadd.f32 %v2238_v53, %v2228_v60  ;;  %v2229_v17 = vadd.f32 %v2217_v54, %v2079_v62 }
 0x18a   :  { %v2082_v34 = vpop.f32.mrf.mxu1  ;;  %v2218_v3 = vunpack.c.l.bf16 %v320_v0  ;;  %v2245_v33 = vadd.f32 %v2233_v12, %v2232_v15 }
 0x18b   :  { %v2234_v61 = vadd.f32 %v2222_v57, %v2081_v63  ;;  %v2083_v51 = vadd.f32 %v2082_v34, %v2040_v10  ;;  %v2240_v31 = vadd.f32 %v2239_v5, %v2229_v17 }
 0x18d   :  { %v2246_v26 = vadd.f32 %v2245_v33, %v2234_v61  ;;  %v2235_v32 = vadd.f32 %v2223_v9, %v2083_v51 }
 0x1c2   :  { %v2119_v25 = vpop.f32.mrf.mxu0 }
 0x1c3   :  { %v2120_v11 = vadd.f32 %v2119_v25, %v346_v48  ;;  %v2219_v25 = vunpack.c.h.bf16 %v320_v0 }
 0x1c4   :  { %v2121_v44 = vpop.f32.mrf.mxu0  ;;  %v2162_v45 = vpop.f32.mrf.mxu1 }
 0x1c5   :  { %v2122_v14 = vadd.f32 %v2121_v44, %v350_v58  ;;  %v2163_v6 = vadd.f32 %v2162_v45, %v2120_v11  ;;  %v2247_v45 = vadd.f32 %v2246_v26, %v2235_v32 }
 0x1c6   :  { %v2123_v1 = vpop.f32.mrf.mxu0  ;;  %v2164_v8 = vpop.f32.mrf.mxu1 }
 0x1c7   :  { %v2124_v19 = vadd.f32 %v2123_v1, %v346_v48  ;;  %v2165_v22 = vadd.f32 %v2164_v8, %v2122_v14 }
 0x1c8   :  { %v2125_v18 = vpop.f32.mrf.mxu0  ;;  %v2166_v16 = vpop.f32.mrf.mxu1 }
 0x1c9   :  { %v2126_v23 = vadd.f32 %v2125_v18, %v350_v58  ;;  %v2167_v34 = vadd.f32 %v2166_v16, %v2124_v19 }
 0x1ca   :  { %v2168_v28 = vpop.f32.mrf.mxu1 }
 0x1cb   :  { %v2169_v40 = vadd.f32 %v2168_v28, %v2126_v23 }
 0x202   :  { %v2205_v21 = vpop.f32.mrf.mxu0 }
 0x203   :  { %v2206_v24 = vadd.f32 %v2205_v21, %v2163_v6 }
 0x204   :  { %v2207_v29 = vpop.f32.mrf.mxu0 }
 0x205   :  { %v2230_v35 = vadd.f32 %v2218_v3, %v2206_v24  ;;  %v2208_v36 = vadd.f32 %v2207_v29, %v2165_v22 }
 0x206   :  { %v2209_v37 = vpop.f32.mrf.mxu0 }
 0x207   :  { %v2210_v41 = vadd.f32 %v2209_v37, %v2167_v34  ;;  %v2231_v42 = vadd.f32 %v2219_v25, %v2208_v36  ;;  %v2241_v43 = vadd.f32 %v2240_v31, %v2230_v35  ;;  %v324_v37 = vld [vmem:[%s4268_s4] sm:$0x3f] }
 0x208   :  { %v2211_v44 = vpop.f32.mrf.mxu0 }
 0x209   :  { %v2236_v46 = vadd.f32 %v2224_v30, %v2210_v41  ;;  %v2212_v47 = vadd.f32 %v2211_v44, %v2169_v40  ;;  %v2242_v48 = vadd.f32 %v2241_v43, %v2231_v42  ;;  %v2315_v40 = vrot.slane %v324_v37, %v4160_v7 }
 0x20a   :  { %v2323_v44 = vrot.slane %v324_v37, %v4155_v4 }
 0x20b   :  { %v2237_v49 = vadd.f32 %v2225_v39, %v2212_v47  ;;  %2243 = vadd.xlane.f32.xlu0 %v2242_v48  ;;  %v2248_v52 = vadd.f32 %v2247_v45, %v2236_v46  ;;  %v325_v39 = vld [vmem:[%s4269_s5] sm:$0x3f]  ;;  %v2327_v45 = vrot.slane %v324_v37, %v4164_v13 }
 0x20c   :  { %v2358_v41 = vrot.slane %v325_v39, %v4160_v7  ;;  %v2362_v43 = vrot.slane %v325_v39, %v4153_v2  ;;  %v2366_v47 = vrot.slane %v325_v39, %v4155_v4  ;;  %v2370_v48 = vrot.slane %v325_v39, %v4164_v13 }
 0x20d   :  { %v2249_v54 = vadd.f32 %v2248_v52, %v2237_v49  ;;  %v2335_v52 = vrot.slane %v324_v37, %v4179_v38 }
 0x20f   :  { %2250 = vadd.xlane.f32.xlu0 %v2249_v54 }
 0x294   :  { %v2244_v56 = vpop.xlane.xlu0 %2243 }
 0x295   :  { %v2253_v57 = vmul.f32 0.0013020834, %v2244_v56 }
 0x297   :  { %v2255_v58 = vsub.f32 %v2226_v55, %v2253_v57  ;;  %v2256_v59 = vsub.f32 %v4186_v50, %v2253_v57  ;;  %v2257_v62 = vsub.f32 %v2228_v60, %v2253_v57  ;;  %v2258_v1 = vsub.f32 %v2229_v17, %v2253_v57 }
 0x298   :  { %v2251_v63 = vpop.xlane.xlu0 %2250  ;;  %v2259_v53 = vsub.f32 %v2230_v35, %v2253_v57  ;;  %v2260_v16 = vsub.f32 %v2231_v42, %v2253_v57  ;;  %v2319_v42 = vrot.slane %v324_v37, %v4153_v2  ;;  %v2378_v2 = vrot.slane %v325_v39, %v4179_v38 }
 0x299   :  { %v2254_v8 = vmul.f32 0.0013020834, %v2251_v63  ;;  %v2267_v10 = vmul.f32 %v2255_v58, %v2255_v58  ;;  %v2268_v11 = vmul.f32 %v2256_v59, %v2256_v59  ;;  %v2269_v0 = vmul.f32 %v2257_v62, %v2257_v62 }
 0x29a   :  { %v2270_v51 = vmul.f32 %v2258_v1, %v2258_v1  ;;  %v2271_v17 = vmul.f32 %v2259_v53, %v2259_v53  ;;  %v2374_v63 = vrot.slane %v325_v39, %v4174_v27 }
 0x29b   :  { %v2279_v9 = vadd.f32 %v2268_v11, %v2267_v10  ;;  %v4198_v14 = vsub.f32 %v2232_v15, %v2254_v8  ;;  %v4200_v5 = vsub.f32 %v2233_v12, %v2254_v8  ;;  %v4202_v18 = vsub.f32 %v2234_v61, %v2254_v8 }
 0x29c   :  { %v4204_v6 = vsub.f32 %v2235_v32, %v2254_v8  ;;  %v4210_v3 = vsub.f32 %v2236_v46, %v2254_v8  ;;  %v2272_v61 = vmul.f32 %v2260_v16, %v2260_v16  ;;  %v4214_v33 = vsub.f32 %v2237_v49, %v2254_v8 }
 0x29d   :  { %v2280_v55 = vadd.f32 %v2279_v9, %v2269_v0  ;;  %v2273_v50 = vmul.f32 %v4198_v14, %v4198_v14  ;;  %v2274_v60 = vmul.f32 %v4200_v5, %v4200_v5  ;;  %v2275_v12 = vmul.f32 %v4202_v18, %v4202_v18 }
 0x29e   :  { %v2276_v21 = vmul.f32 %v4204_v6, %v4204_v6  ;;  %v2277_v24 = vmul.f32 %v4210_v3, %v4210_v3  ;;  %v2278_v26 = vmul.f32 %v4214_v33, %v4214_v33  ;;  %v2331_v49 = vrot.slane %v324_v37, %v4174_v27 }
 0x29f   :  { %v2281_v19 = vadd.f32 %v2280_v55, %v2270_v51  ;;  %v2286_v15 = vadd.f32 %v2274_v60, %v2273_v50 }
 0x2a1   :  { %v2282_v20 = vadd.f32 %v2281_v19, %v2271_v17  ;;  %v2287_v22 = vadd.f32 %v2286_v15, %v2275_v12 }
 0x2a3   :  { %v2283_v23 = vadd.f32 %v2282_v20, %v2272_v61  ;;  %v2288_v25 = vadd.f32 %v2287_v22, %v2276_v21 }
 0x2a5   :  { %2284 = vadd.xlane.f32.xlu1 %v2283_v23  ;;  %v2289_v28 = vadd.f32 %v2288_v25, %v2277_v24 }
 0x2a7   :  { %v2290_v29 = vadd.f32 %v2289_v28, %v2278_v26 }
 0x2a9   :  { %2291 = vadd.xlane.f32.xlu1 %v2290_v29 }
 0x32e   :  { %v2285_v30 = vpop.xlane.xlu1 %2284 }
 0x32f   :  { %v2293_v31 = vmul.f32 0.0013020834, %v2285_v30 }
 0x331   :  { %v2295_v32 = vadd.f32 1e-12, %v2293_v31 }
 0x332   :  { %v2292_v34 = vpop.xlane.xlu1 %2291 }
 0x333   :  { %3190 = vrsqrt.f32 %v2295_v32  ;;  %v2294_v35 = vmul.f32 0.0013020834, %v2292_v34 }
 0x335   :  { %v2296_v36 = vadd.f32 1e-12, %v2294_v35 }
 0x337   :  { %3192 = vrsqrt.f32 %v2296_v36 }
 0x340   :  { %v3191_v46 = vpop.eup %3190 }
 0x341   :  { %v2299_v54 = vmul.f32 %v3191_v46, %v2255_v58  ;;  %v2300_v56 = vmul.f32 %v3191_v46, %v2256_v59  ;;  %v2301_v7 = vmul.f32 %v3191_v46, %v2257_v62  ;;  %v2302_v57 = vmul.f32 %v3191_v46, %v2258_v1 }
 0x342   :  { %v2303_v8 = vmul.f32 %v3191_v46, %v2259_v53  ;;  %v2304_v10 = vmul.f32 %v3191_v46, %v2260_v16 }
 0x343   :  { %v2342_v11 = vmul.f32 %v2315_v40, %v2299_v54  ;;  %v2343_v0 = vmul.f32 %v2319_v42, %v2300_v56  ;;  %v2344_v9 = vmul.f32 %v2323_v44, %v2301_v7  ;;  %v2345_v4 = vmul.f32 %v2327_v45, %v2302_v57 }
 0x344   :  { %v3193_v51 = vpop.eup %3192  ;;  %v2346_v13 = vmul.f32 %v2331_v49, %v2303_v8  ;;  %v2347_v55 = vmul.f32 %v2335_v52, %v2304_v10 }
 0x345   :  { %v2385_v50 = vadd.f32 %v2358_v41, %v2342_v11  ;;  %v2386_v60 = vadd.f32 %v2362_v43, %v2343_v0  ;;  %v2387_v17 = vadd.f32 %v2366_v47, %v2344_v9  ;;  %v2388_v58 = vadd.f32 %v2370_v48, %v2345_v4 }
 0x346   :  { %v2389_v59 = vadd.f32 %v2374_v63, %v2346_v13  ;;  %v2390_v62 = vadd.f32 %v2378_v2, %v2347_v55  ;;  %v2305_v1 = vmul.f32 %v3193_v51, %v4198_v14  ;;  %v2306_v27 = vmul.f32 %v3193_v51, %v4200_v5 }
 0x347   :  { %v2743_v38 = vpack.c.bf16 %v2386_v60, %v2385_v50  ;;  %v2744_v53 = vpack.c.bf16 %v2388_v58, %v2387_v17  ;;  %v2307_v16 = vmul.f32 %v3193_v51, %v4202_v18  ;;  %v2308_v19 = vmul.f32 %v3193_v51, %v4204_v6 }
 0x348   :  { %v2745_v12 = vpack.c.bf16 %v2390_v62, %v2389_v59  ;;  %v2309_v15 = vmul.f32 %v3193_v51, %v4210_v3  ;;  %v2310_v61 = vmul.f32 %v3193_v51, %v4214_v33  ;;  %v2348_v20 = vmul.f32 %v2315_v40, %v2305_v1 }
 0x349   :  { %2433 = vst [vmem:[%s4270_s6] sm:$0xff] %v2743_v38  ;;  %2434 = vst [vmem:[%s4270_s6 + $0x8] sm:$0xff] %v2744_v53  ;;  %v2349_v14 = vmul.f32 %v2319_v42, %v2306_v27  ;;  %v2350_v5 = vmul.f32 %v2323_v44, %v2307_v16  ;;  %v2351_v21 = vmul.f32 %v2327_v45, %v2308_v19 }
 0x34a   :  { %2435 = vst [vmem:[%s4270_s6 + $0x10] sm:$0xff] %v2745_v12  ;;  %v2352_v18 = vmul.f32 %v2331_v49, %v2309_v15  ;;  %v2353_v6 = vmul.f32 %v2335_v52, %v2310_v61  ;;  %v2391_v3 = vadd.f32 %v2358_v41, %v2348_v20 }
 0x34b   :  { %v2392_v33 = vadd.f32 %v2362_v43, %v2349_v14  ;;  %v2393_v22 = vadd.f32 %v2366_v47, %v2350_v5  ;;  %v2394_v23 = vadd.f32 %v2370_v48, %v2351_v21 }
 0x34c   :  { %v2395_v24 = vadd.f32 %v2374_v63, %v2352_v18  ;;  %v2396_v25 = vadd.f32 %v2378_v2, %v2353_v6 }
 0x34d   :  { %v2746_v26 = vpack.c.bf16 %v2392_v33, %v2391_v3  ;;  %v2747_v28 = vpack.c.bf16 %v2394_v23, %v2393_v22 }
 0x34e   :  { %v2748_v29 = vpack.c.bf16 %v2396_v25, %v2395_v24 }
 0x34f   :  { %2436 = vst [vmem:[%s4270_s6 + $0x18] sm:$0xff] %v2746_v26  ;;  %2437 = vst [vmem:[%s4270_s6 + $0x20] sm:$0xff] %v2747_v28 }
 0x350   :  { %2438 = vst [vmem:[%s4270_s6 + $0x28] sm:$0xff] %v2748_v29 }

// kernel: metaphor_forward.15
= control target key start
LH: loop header
LB: loop body
LE: loop exit
PB: predicated region body
PF: predicated region fallthrough
CT: control target
= control target key end

     0   :  { %s4176_s12 = smov 0   ;;  %s4178_s13 = smov 0   ;;  %s5214_s0 = inlined_call_operand.vmem [shape: bf16[16,768], index: 0, kind: input, shape index: {}]   ;;  %s5215_s1 = inlined_call_operand.vmem [shape: bf16[768,3072], index: 1, kind: input, shape index: {}]   ;;  %s5216_s2 = inlined_call_operand.vmem [shape: f32[1,3072], index: 2, kind: input, shape index: {}]   ;;  %s5217_s3 = inlined_call_operand.vmem [shape: bf16[16,3072], index: 3, kind: output, shape index: {}]  }
   0x1   :  { %s4180_s14 = smov 0   ;;  %s4182_s15 = smov 0  }
   0x2   :  { %s4184_s16 = smov 0  }
   0x3 LB: > { %s25_s17 = sadd.s32 1, %s4150_s15  ;;  %s3285_s18 = sadd.s32 4294967295, %s4154_s16   ;;  %s4154_s16 = sphi %s4184_s16, %s13_s16   ;;  %s4150_s15 = sphi %s4182_s15, %s5222_s15   ;;  %s4146_s14 = sphi %s4180_s14, %s5221_s14   ;;  %s4142_s13 = sphi %s4178_s13, %s5220_s13   ;;  %s4138_s12 = sphi %s4176_s12, %s5219_s12  }
   0x4   : > { %p27_p0 = scmp.ge.s32.totalorder %s25_s17, 4  ;;  %p65_p1 = scmp.ne.s32.totalorder %s4142_s13, %s4138_s12 }
   0x5   : > { %p66_p2 = scmp.eq.s32.totalorder %s4154_s16, 0  ;;  %p123_p4 = scmp.eq.s32.totalorder %s3285_s18, 3 }
   0x6   : > { %s5224_s17 = smov (%p27_p0, %s25_s17), 0  ;;  %s58_s20 = sadd.s32 1, %s4142_s13 }
   0x7   : > { %p67_p3 = por %p66_p2, %p65_p1  ;;  %s55_s19 = ssub.s32 %s4150_s15, %s5224_s17 }
   0x8   : > { %p56_p5 = scmp.eq.s32.totalorder %s55_s19, 0  ;;  %p4211_p6 = por %p123_p4, %p65_p1 }
   0x9   : > { %p3289_p7 = scmp.ge.s32.totalorder %s4154_s16, 4 }
   0xa   : > { %s4216_s22 = scalar_select %p56_p5, %s4142_s13, %s58_s20  }
   0xb   : > { %155 = sbr.rel (%p3289_p7) target bundleno = 165 (0xa5), region = 20 }
  0x10   : > { %158 = sbr.rel (!%p67_p3) target bundleno = 165 (0xa5), region = 24  ;;  %s160_s23 = sand.u32 (%p67_p3), 1, %s4142_s13  }
  0x11   : > { %s3595_s24 = smul.u32 (%p67_p3), 24, %s4150_s15 }
  0x12   : > { %s3603_s25 = smul.u32 (%p67_p3), 2304, %s160_s23 }
  0x13   : > { %s4224_s28 = scalar_lea.vmem (%p67_p3), %s5215_s1, %s3595_s24 }
  0x14   : > { %v178_v0 = vld [vmem:[%s4224_s28] sm:$0xff] (%p67_p3)  ;;  %v180_v1 = vld [vmem:[%s4224_s28 + $0x8] sm:$0xff] (%p67_p3)  ;;  %v182_v2 = vld [vmem:[%s4224_s28 + $0x10] sm:$0xff] (%p67_p3)  ;;  %s4229_s29 = scalar_lea.vmem (%p67_p3), [#allocation2], %s3603_s25 }
  0x15   : > { %179 = vst [vmem:[%s4229_s29] sm:$0xff] %v178_v0  ;;  %181 = vst [vmem:[%s4229_s29 + $0x8] sm:$0xff] %v180_v1  ;;  %v184_v3 = vld [vmem:[%s4224_s28 + $0x60] sm:$0xff]  ;;  %v186_v4 = vld [vmem:[%s4224_s28 + $0x68] sm:$0xff] }
  0x16   : > { %183 = vst [vmem:[%s4229_s29 + $0x10] sm:$0xff] %v182_v2  ;;  %v188_v5 = vld [vmem:[%s4224_s28 + $0x70] sm:$0xff]  ;;  %185 = vst [vmem:[%s4229_s29 + $0x18] sm:$0xff] %v184_v3  ;;  %v190_v6 = vld [vmem:[%s4224_s28 + $0xc0] sm:$0xff] }
  0x17   : > { %187 = vst [vmem:[%s4229_s29 + $0x20] sm:$0xff] %v186_v4  ;;  %189 = vst [vmem:[%s4229_s29 + $0x28] sm:$0xff] %v188_v5  ;;  %v192_v7 = vld [vmem:[%s4224_s28 + $0xc8] sm:$0xff]  ;;  %v194_v8 = vld [vmem:[%s4224_s28 + $0xd0] sm:$0xff] }
  0x18   : > { %191 = vst [vmem:[%s4229_s29 + $0x30] sm:$0xff] %v190_v6  ;;  %193 = vst [vmem:[%s4229_s29 + $0x38] sm:$0xff] %v192_v7  ;;  %v196_v9 = vld [vmem:[%s4224_s28 + $0x120] sm:$0xff]  ;;  %v198_v10 = vld [vmem:[%s4224_s28 + $0x128] sm:$0xff] }
  0x19   : > { %195 = vst [vmem:[%s4229_s29 + $0x40] sm:$0xff] %v194_v8  ;;  %v200_v11 = vld [vmem:[%s4224_s28 + $0x130] sm:$0xff]  ;;  %197 = vst [vmem:[%s4229_s29 + $0x48] sm:$0xff] %v196_v9  ;;  %v202_v12 = vld [vmem:[%s4224_s28 + $0x180] sm:$0xff] }
  0x1a   : > { %199 = vst [vmem:[%s4229_s29 + $0x50] sm:$0xff] %v198_v10  ;;  %201 = vst [vmem:[%s4229_s29 + $0x58] sm:$0xff] %v200_v11  ;;  %v204_v13 = vld [vmem:[%s4224_s28 + $0x188] sm:$0xff]  ;;  %v206_v14 = vld [vmem:[%s4224_s28 + $0x190] sm:$0xff] }
  0x1b   : > { %203 = vst [vmem:[%s4229_s29 + $0x60] sm:$0xff] %v202_v12  ;;  %205 = vst [vmem:[%s4229_s29 + $0x68] sm:$0xff] %v204_v13  ;;  %v208_v15 = vld [vmem:[%s4224_s28 + $0x1e0] sm:$0xff]  ;;  %v210_v16 = vld [vmem:[%s4224_s28 + $0x1e8] sm:$0xff] }
  0x1c   : > { %207 = vst [vmem:[%s4229_s29 + $0x70] sm:$0xff] %v206_v14  ;;  %v212_v17 = vld [vmem:[%s4224_s28 + $0x1f0] sm:$0xff]  ;;  %209 = vst [vmem:[%s4229_s29 + $0x78] sm:$0xff] %v208_v15  ;;  %v214_v18 = vld [vmem:[%s4224_s28 + $0x240] sm:$0xff] }
  0x1d   : > { %211 = vst [vmem:[%s4229_s29 + $0x80] sm:$0xff] %v210_v16  ;;  %213 = vst [vmem:[%s4229_s29 + $0x88] sm:$0xff] %v212_v17  ;;  %v216_v19 = vld [vmem:[%s4224_s28 + $0x248] sm:$0xff]  ;;  %v218_v20 = vld [vmem:[%s4224_s28 + $0x250] sm:$0xff] }
  0x1e   : > { %215 = vst [vmem:[%s4229_s29 + $0x90] sm:$0xff] %v214_v18  ;;  %217 = vst [vmem:[%s4229_s29 + $0x98] sm:$0xff] %v216_v19  ;;  %v220_v21 = vld [vmem:[%s4224_s28 + $0x2a0] sm:$0xff]  ;;  %v222_v22 = vld [vmem:[%s4224_s28 + $0x2a8] sm:$0xff] }
  0x1f   : > { %219 = vst [vmem:[%s4229_s29 + $0xa0] sm:$0xff] %v218_v20  ;;  %v224_v23 = vld [vmem:[%s4224_s28 + $0x2b0] sm:$0xff]  ;;  %221 = vst [vmem:[%s4229_s29 + $0xa8] sm:$0xff] %v220_v21  ;;  %v226_v24 = vld [vmem:[%s4224_s28 + $0x300] sm:$0xff] }
  0x20   : > { %223 = vst [vmem:[%s4229_s29 + $0xb0] sm:$0xff] %v222_v22  ;;  %225 = vst [vmem:[%s4229_s29 + $0xb8] sm:$0xff] %v224_v23  ;;  %v228_v25 = vld [vmem:[%s4224_s28 + $0x308] sm:$0xff]  ;;  %v230_v26 = vld [vmem:[%s4224_s28 + $0x310] sm:$0xff] }
  0x21   : > { %227 = vst [vmem:[%s4229_s29 + $0xc0] sm:$0xff] %v226_v24  ;;  %229 = vst [vmem:[%s4229_s29 + $0xc8] sm:$0xff] %v228_v25  ;;  %v232_v27 = vld [vmem:[%s4224_s28 + $0x360] sm:$0xff]  ;;  %v234_v28 = vld [vmem:[%s4224_s28 + $0x368] sm:$0xff] }
  0x22   : > { %231 = vst [vmem:[%s4229_s29 + $0xd0] sm:$0xff] %v230_v26  ;;  %v236_v29 = vld [vmem:[%s4224_s28 + $0x370] sm:$0xff]  ;;  %233 = vst [vmem:[%s4229_s29 + $0xd8] sm:$0xff] %v232_v27  ;;  %v238_v30 = vld [vmem:[%s4224_s28 + $0x3c0] sm:$0xff] }
  0x23   : > { %235 = vst [vmem:[%s4229_s29 + $0xe0] sm:$0xff] %v234_v28  ;;  %237 = vst [vmem:[%s4229_s29 + $0xe8] sm:$0xff] %v236_v29  ;;  %v240_v31 = vld [vmem:[%s4224_s28 + $0x3c8] sm:$0xff]  ;;  %v242_v32 = vld [vmem:[%s4224_s28 + $0x3d0] sm:$0xff] }
  0x24   : > { %239 = vst [vmem:[%s4229_s29 + $0xf0] sm:$0xff] %v238_v30  ;;  %241 = vst [vmem:[%s4229_s29 + $0xf8] sm:$0xff] %v240_v31  ;;  %v244_v33 = vld [vmem:[%s4224_s28 + $0x420] sm:$0xff]  ;;  %v246_v34 = vld [vmem:[%s4224_s28 + $0x428] sm:$0xff] }
  0x25   : > { %243 = vst [vmem:[%s4229_s29 + $0x100] sm:$0xff] %v242_v32  ;;  %v248_v35 = vld [vmem:[%s4224_s28 + $0x430] sm:$0xff]  ;;  %245 = vst [vmem:[%s4229_s29 + $0x108] sm:$0xff] %v244_v33  ;;  %v250_v36 = vld [vmem:[%s4224_s28 + $0x480] sm:$0xff] }
  0x26   : > { %247 = vst [vmem:[%s4229_s29 + $0x110] sm:$0xff] %v246_v34  ;;  %249 = vst [vmem:[%s4229_s29 + $0x118] sm:$0xff] %v248_v35  ;;  %v252_v37 = vld [vmem:[%s4224_s28 + $0x488] sm:$0xff]  ;;  %v254_v38 = vld [vmem:[%s4224_s28 + $0x490] sm:$0xff] }
  0x27   : > { %251 = vst [vmem:[%s4229_s29 + $0x120] sm:$0xff] %v250_v36  ;;  %253 = vst [vmem:[%s4229_s29 + $0x128] sm:$0xff] %v252_v37  ;;  %v256_v39 = vld [vmem:[%s4224_s28 + $0x4e0] sm:$0xff]  ;;  %v258_v40 = vld [vmem:[%s4224_s28 + $0x4e8] sm:$0xff] }
  0x28   : > { %255 = vst [vmem:[%s4229_s29 + $0x130] sm:$0xff] %v254_v38  ;;  %v260_v41 = vld [vmem:[%s4224_s28 + $0x4f0] sm:$0xff]  ;;  %257 = vst [vmem:[%s4229_s29 + $0x138] sm:$0xff] %v256_v39  ;;  %v262_v42 = vld [vmem:[%s4224_s28 + $0x540] sm:$0xff] }
  0x29   : > { %259 = vst [vmem:[%s4229_s29 + $0x140] sm:$0xff] %v258_v40  ;;  %261 = vst [vmem:[%s4229_s29 + $0x148] sm:$0xff] %v260_v41  ;;  %v264_v43 = vld [vmem:[%s4224_s28 + $0x548] sm:$0xff]  ;;  %v266_v44 = vld [vmem:[%s4224_s28 + $0x550] sm:$0xff] }
  0x2a   : > { %263 = vst [vmem:[%s4229_s29 + $0x150] sm:$0xff] %v262_v42  ;;  %265 = vst [vmem:[%s4229_s29 + $0x158] sm:$0xff] %v264_v43  ;;  %v268_v45 = vld [vmem:[%s4224_s28 + $0x5a0] sm:$0xff]  ;;  %v270_v46 = vld [vmem:[%s4224_s28 + $0x5a8] sm:$0xff] }
  0x2b   : > { %267 = vst [vmem:[%s4229_s29 + $0x160] sm:$0xff] %v266_v44  ;;  %v272_v47 = vld [vmem:[%s4224_s28 + $0x5b0] sm:$0xff]  ;;  %269 = vst [vmem:[%s4229_s29 + $0x168] sm:$0xff] %v268_v45  ;;  %v274_v48 = vld [vmem:[%s4224_s28 + $0x600] sm:$0xff] }
  0x2c   : > { %271 = vst [vmem:[%s4229_s29 + $0x170] sm:$0xff] %v270_v46  ;;  %273 = vst [vmem:[%s4229_s29 + $0x178] sm:$0xff] %v272_v47  ;;  %v276_v49 = vld [vmem:[%s4224_s28 + $0x608] sm:$0xff]  ;;  %v278_v50 = vld [vmem:[%s4224_s28 + $0x610] sm:$0xff] }
  0x2d   : > { %275 = vst [vmem:[%s4229_s29 + $0x180] sm:$0xff] %v274_v48  ;;  %277 = vst [vmem:[%s4229_s29 + $0x188] sm:$0xff] %v276_v49  ;;  %v280_v51 = vld [vmem:[%s4224_s28 + $0x660] sm:$0xff]  ;;  %v282_v52 = vld [vmem:[%s4224_s28 + $0x668] sm:$0xff] }
  0x2e   : > { %279 = vst [vmem:[%s4229_s29 + $0x190] sm:$0xff] %v278_v50  ;;  %v284_v53 = vld [vmem:[%s4224_s28 + $0x670] sm:$0xff]  ;;  %281 = vst [vmem:[%s4229_s29 + $0x198] sm:$0xff] %v280_v51  ;;  %v286_v54 = vld [vmem:[%s4224_s28 + $0x6c0] sm:$0xff] }
  0x2f   : > { %283 = vst [vmem:[%s4229_s29 + $0x1a0] sm:$0xff] %v282_v52  ;;  %285 = vst [vmem:[%s4229_s29 + $0x1a8] sm:$0xff] %v284_v53  ;;  %v288_v55 = vld [vmem:[%s4224_s28 + $0x6c8] sm:$0xff]  ;;  %v290_v56 = vld [vmem:[%s4224_s28 + $0x6d0] sm:$0xff] }
  0x30   : > { %287 = vst [vmem:[%s4229_s29 + $0x1b0] sm:$0xff] %v286_v54  ;;  %289 = vst [vmem:[%s4229_s29 + $0x1b8] sm:$0xff] %v288_v55  ;;  %v292_v57 = vld [vmem:[%s4224_s28 + $0x720] sm:$0xff]  ;;  %v294_v58 = vld [vmem:[%s4224_s28 + $0x728] sm:$0xff] }
  0x31   : > { %291 = vst [vmem:[%s4229_s29 + $0x1c0] sm:$0xff] %v290_v56  ;;  %v296_v59 = vld [vmem:[%s4224_s28 + $0x730] sm:$0xff]  ;;  %293 = vst [vmem:[%s4229_s29 + $0x1c8] sm:$0xff] %v292_v57  ;;  %v298_v60 = vld [vmem:[%s4224_s28 + $0x780] sm:$0xff] }
  0x32   : > { %295 = vst [vmem:[%s4229_s29 + $0x1d0] sm:$0xff] %v294_v58  ;;  %297 = vst [vmem:[%s4229_s29 + $0x1d8] sm:$0xff] %v296_v59  ;;  %v300_v61 = vld [vmem:[%s4224_s28 + $0x788] sm:$0xff]  ;;  %v302_v62 = vld [vmem:[%s4224_s28 + $0x790] sm:$0xff] }
  0x33   : > { %299 = vst [vmem:[%s4229_s29 + $0x1e0] sm:$0xff] %v298_v60  ;;  %301 = vst [vmem:[%s4229_s29 + $0x1e8] sm:$0xff] %v300_v61  ;;  %v304_v63 = vld [vmem:[%s4224_s28 + $0x7e0] sm:$0xff]  ;;  %v306_v0 = vld [vmem:[%s4224_s28 + $0x7e8] sm:$0xff] }
  0x34   : > { %303 = vst [vmem:[%s4229_s29 + $0x1f0] sm:$0xff] %v302_v62  ;;  %v308_v1 = vld [vmem:[%s4224_s28 + $0x7f0] sm:$0xff]  ;;  %305 = vst [vmem:[%s4229_s29 + $0x1f8] sm:$0xff] %v304_v63  ;;  %v310_v2 = vld [vmem:[%s4224_s28 + $0x840] sm:$0xff] }
  0x35   : > { %307 = vst [vmem:[%s4229_s29 + $0x200] sm:$0xff] %v306_v0  ;;  %309 = vst [vmem:[%s4229_s29 + $0x208] sm:$0xff] %v308_v1  ;;  %v312_v3 = vld [vmem:[%s4224_s28 + $0x848] sm:$0xff]  ;;  %v314_v4 = vld [vmem:[%s4224_s28 + $0x850] sm:$0xff] }
  0x36   : > { %311 = vst [vmem:[%s4229_s29 + $0x210] sm:$0xff] %v310_v2  ;;  %313 = vst [vmem:[%s4229_s29 + $0x218] sm:$0xff] %v312_v3  ;;  %v316_v5 = vld [vmem:[%s4224_s28 + $0x8a0] sm:$0xff]  ;;  %v318_v6 = vld [vmem:[%s4224_s28 + $0x8a8] sm:$0xff] }
  0x37   : > { %315 = vst [vmem:[%s4229_s29 + $0x220] sm:$0xff] %v314_v4  ;;  %v320_v7 = vld [vmem:[%s4224_s28 + $0x8b0] sm:$0xff]  ;;  %317 = vst [vmem:[%s4229_s29 + $0x228] sm:$0xff] %v316_v5  ;;  %v322_v8 = vld [vmem:[%s4224_s28 + $0x900] sm:$0xff] }
  0x38   : > { %319 = vst [vmem:[%s4229_s29 + $0x230] sm:$0xff] %v318_v6  ;;  %321 = vst [vmem:[%s4229_s29 + $0x238] sm:$0xff] %v320_v7  ;;  %v324_v9 = vld [vmem:[%s4224_s28 + $0x908] sm:$0xff]  ;;  %v326_v10 = vld [vmem:[%s4224_s28 + $0x910] sm:$0xff] }
  0x39   : > { %323 = vst [vmem:[%s4229_s29 + $0x240] sm:$0xff] %v322_v8  ;;  %325 = vst [vmem:[%s4229_s29 + $0x248] sm:$0xff] %v324_v9  ;;  %v328_v11 = vld [vmem:[%s4224_s28 + $0x960] sm:$0xff]  ;;  %v330_v12 = vld [vmem:[%s4224_s28 + $0x968] sm:$0xff] }
  0x3a   : > { %327 = vst [vmem:[%s4229_s29 + $0x250] sm:$0xff] %v326_v10  ;;  %v332_v13 = vld [vmem:[%s4224_s28 + $0x970] sm:$0xff]  ;;  %329 = vst [vmem:[%s4229_s29 + $0x258] sm:$0xff] %v328_v11  ;;  %v334_v14 = vld [vmem:[%s4224_s28 + $0x9c0] sm:$0xff] }
  0x3b   : > { %331 = vst [vmem:[%s4229_s29 + $0x260] sm:$0xff] %v330_v12  ;;  %333 = vst [vmem:[%s4229_s29 + $0x268] sm:$0xff] %v332_v13  ;;  %v336_v15 = vld [vmem:[%s4224_s28 + $0x9c8] sm:$0xff]  ;;  %v338_v16 = vld [vmem:[%s4224_s28 + $0x9d0] sm:$0xff] }
  0x3c   : > { %335 = vst [vmem:[%s4229_s29 + $0x270] sm:$0xff] %v334_v14  ;;  %337 = vst [vmem:[%s4229_s29 + $0x278] sm:$0xff] %v336_v15  ;;  %v340_v17 = vld [vmem:[%s4224_s28 + $0xa20] sm:$0xff]  ;;  %v342_v18 = vld [vmem:[%s4224_s28 + $0xa28] sm:$0xff] }
  0x3d   : > { %339 = vst [vmem:[%s4229_s29 + $0x280] sm:$0xff] %v338_v16  ;;  %v344_v19 = vld [vmem:[%s4224_s28 + $0xa30] sm:$0xff]  ;;  %341 = vst [vmem:[%s4229_s29 + $0x288] sm:$0xff] %v340_v17  ;;  %v346_v20 = vld [vmem:[%s4224_s28 + $0xa80] sm:$0xff] }
  0x3e   : > { %343 = vst [vmem:[%s4229_s29 + $0x290] sm:$0xff] %v342_v18  ;;  %345 = vst [vmem:[%s4229_s29 + $0x298] sm:$0xff] %v344_v19  ;;  %v348_v21 = vld [vmem:[%s4224_s28 + $0xa88] sm:$0xff]  ;;  %v350_v22 = vld [vmem:[%s4224_s28 + $0xa90] sm:$0xff] }
  0x3f   : > { %347 = vst [vmem:[%s4229_s29 + $0x2a0] sm:$0xff] %v346_v20  ;;  %349 = vst [vmem:[%s4229_s29 + $0x2a8] sm:$0xff] %v348_v21  ;;  %v352_v23 = vld [vmem:[%s4224_s28 + $0xae0] sm:$0xff]  ;;  %v354_v24 = vld [vmem:[%s4224_s28 + $0xae8] sm:$0xff] }
  0x40   : > { %351 = vst [vmem:[%s4229_s29 + $0x2b0] sm:$0xff] %v350_v22  ;;  %v356_v25 = vld [vmem:[%s4224_s28 + $0xaf0] sm:$0xff]  ;;  %353 = vst [vmem:[%s4229_s29 + $0x2b8] sm:$0xff] %v352_v23  ;;  %v358_v26 = vld [vmem:[%s4224_s28 + $0xb40] sm:$0xff] }
  0x41   : > { %355 = vst [vmem:[%s4229_s29 + $0x2c0] sm:$0xff] %v354_v24  ;;  %357 = vst [vmem:[%s4229_s29 + $0x2c8] sm:$0xff] %v356_v25  ;;  %v360_v27 = vld [vmem:[%s4224_s28 + $0xb48] sm:$0xff]  ;;  %v362_v28 = vld [vmem:[%s4224_s28 + $0xb50] sm:$0xff] }
  0x42   : > { %359 = vst [vmem:[%s4229_s29 + $0x2d0] sm:$0xff] %v358_v26  ;;  %361 = vst [vmem:[%s4229_s29 + $0x2d8] sm:$0xff] %v360_v27  ;;  %v364_v29 = vld [vmem:[%s4224_s28 + $0xba0] sm:$0xff]  ;;  %v366_v30 = vld [vmem:[%s4224_s28 + $0xba8] sm:$0xff] }
  0x43   : > { %363 = vst [vmem:[%s4229_s29 + $0x2e0] sm:$0xff] %v362_v28  ;;  %v368_v31 = vld [vmem:[%s4224_s28 + $0xbb0] sm:$0xff]  ;;  %365 = vst [vmem:[%s4229_s29 + $0x2e8] sm:$0xff] %v364_v29  ;;  %v370_v32 = vld [vmem:[%s4224_s28 + $0xc00] sm:$0xff] }
  0x44   : > { %367 = vst [vmem:[%s4229_s29 + $0x2f0] sm:$0xff] %v366_v30  ;;  %369 = vst [vmem:[%s4229_s29 + $0x2f8] sm:$0xff] %v368_v31  ;;  %v372_v33 = vld [vmem:[%s4224_s28 + $0xc08] sm:$0xff]  ;;  %v374_v34 = vld [vmem:[%s4224_s28 + $0xc10] sm:$0xff] }
  0x45   : > { %371 = vst [vmem:[%s4229_s29 + $0x300] sm:$0xff] %v370_v32  ;;  %373 = vst [vmem:[%s4229_s29 + $0x308] sm:$0xff] %v372_v33  ;;  %v376_v35 = vld [vmem:[%s4224_s28 + $0xc60] sm:$0xff]  ;;  %v378_v36 = vld [vmem:[%s4224_s28 + $0xc68] sm:$0xff] }
  0x46   : > { %375 = vst [vmem:[%s4229_s29 + $0x310] sm:$0xff] %v374_v34  ;;  %v380_v37 = vld [vmem:[%s4224_s28 + $0xc70] sm:$0xff]  ;;  %377 = vst [vmem:[%s4229_s29 + $0x318] sm:$0xff] %v376_v35  ;;  %v382_v38 = vld [vmem:[%s4224_s28 + $0xcc0] sm:$0xff] }
  0x47   : > { %379 = vst [vmem:[%s4229_s29 + $0x320] sm:$0xff] %v378_v36  ;;  %381 = vst [vmem:[%s4229_s29 + $0x328] sm:$0xff] %v380_v37  ;;  %v384_v39 = vld [vmem:[%s4224_s28 + $0xcc8] sm:$0xff]  ;;  %v386_v40 = vld [vmem:[%s4224_s28 + $0xcd0] sm:$0xff] }
  0x48   : > { %383 = vst [vmem:[%s4229_s29 + $0x330] sm:$0xff] %v382_v38  ;;  %385 = vst [vmem:[%s4229_s29 + $0x338] sm:$0xff] %v384_v39  ;;  %v388_v41 = vld [vmem:[%s4224_s28 + $0xd20] sm:$0xff]  ;;  %v390_v42 = vld [vmem:[%s4224_s28 + $0xd28] sm:$0xff] }
  0x49   : > { %387 = vst [vmem:[%s4229_s29 + $0x340] sm:$0xff] %v386_v40  ;;  %v392_v43 = vld [vmem:[%s4224_s28 + $0xd30] sm:$0xff]  ;;  %389 = vst [vmem:[%s4229_s29 + $0x348] sm:$0xff] %v388_v41  ;;  %v394_v44 = vld [vmem:[%s4224_s28 + $0xd80] sm:$0xff] }
  0x4a   : > { %391 = vst [vmem:[%s4229_s29 + $0x350] sm:$0xff] %v390_v42  ;;  %393 = vst [vmem:[%s4229_s29 + $0x358] sm:$0xff] %v392_v43  ;;  %v396_v45 = vld [vmem:[%s4224_s28 + $0xd88] sm:$0xff]  ;;  %v398_v46 = vld [vmem:[%s4224_s28 + $0xd90] sm:$0xff] }
  0x4b   : > { %395 = vst [vmem:[%s4229_s29 + $0x360] sm:$0xff] %v394_v44  ;;  %397 = vst [vmem:[%s4229_s29 + $0x368] sm:$0xff] %v396_v45  ;;  %v400_v47 = vld [vmem:[%s4224_s28 + $0xde0] sm:$0xff]  ;;  %v402_v48 = vld [vmem:[%s4224_s28 + $0xde8] sm:$0xff] }
  0x4c   : > { %399 = vst [vmem:[%s4229_s29 + $0x370] sm:$0xff] %v398_v46  ;;  %v404_v49 = vld [vmem:[%s4224_s28 + $0xdf0] sm:$0xff]  ;;  %401 = vst [vmem:[%s4229_s29 + $0x378] sm:$0xff] %v400_v47  ;;  %v406_v50 = vld [vmem:[%s4224_s28 + $0xe40] sm:$0xff] }
  0x4d   : > { %403 = vst [vmem:[%s4229_s29 + $0x380] sm:$0xff] %v402_v48  ;;  %405 = vst [vmem:[%s4229_s29 + $0x388] sm:$0xff] %v404_v49  ;;  %v408_v51 = vld [vmem:[%s4224_s28 + $0xe48] sm:$0xff]  ;;  %v410_v52 = vld [vmem:[%s4224_s28 + $0xe50] sm:$0xff] }
  0x4e   : > { %407 = vst [vmem:[%s4229_s29 + $0x390] sm:$0xff] %v406_v50  ;;  %409 = vst [vmem:[%s4229_s29 + $0x398] sm:$0xff] %v408_v51  ;;  %v412_v53 = vld [vmem:[%s4224_s28 + $0xea0] sm:$0xff]  ;;  %v414_v54 = vld [vmem:[%s4224_s28 + $0xea8] sm:$0xff] }
  0x4f   : > { %411 = vst [vmem:[%s4229_s29 + $0x3a0] sm:$0xff] %v410_v52  ;;  %v416_v55 = vld [vmem:[%s4224_s28 + $0xeb0] sm:$0xff]  ;;  %413 = vst [vmem:[%s4229_s29 + $0x3a8] sm:$0xff] %v412_v53  ;;  %v418_v56 = vld [vmem:[%s4224_s28 + $0xf00] sm:$0xff] }
  0x50   : > { %415 = vst [vmem:[%s4229_s29 + $0x3b0] sm:$0xff] %v414_v54  ;;  %417 = vst [vmem:[%s4229_s29 + $0x3b8] sm:$0xff] %v416_v55  ;;  %v420_v57 = vld [vmem:[%s4224_s28 + $0xf08] sm:$0xff]  ;;  %v422_v58 = vld [vmem:[%s4224_s28 + $0xf10] sm:$0xff] }
  0x51   : > { %419 = vst [vmem:[%s4229_s29 + $0x3c0] sm:$0xff] %v418_v56  ;;  %421 = vst [vmem:[%s4229_s29 + $0x3c8] sm:$0xff] %v420_v57  ;;  %v424_v59 = vld [vmem:[%s4224_s28 + $0xf60] sm:$0xff]  ;;  %v426_v60 = vld [vmem:[%s4224_s28 + $0xf68] sm:$0xff] }
  0x52   : > { %423 = vst [vmem:[%s4229_s29 + $0x3d0] sm:$0xff] %v422_v58  ;;  %v428_v61 = vld [vmem:[%s4224_s28 + $0xf70] sm:$0xff]  ;;  %425 = vst [vmem:[%s4229_s29 + $0x3d8] sm:$0xff] %v424_v59  ;;  %v430_v62 = vld [vmem:[%s4224_s28 + $0xfc0] sm:$0xff] }
  0x53   : > { %427 = vst [vmem:[%s4229_s29 + $0x3e0] sm:$0xff] %v426_v60  ;;  %429 = vst [vmem:[%s4229_s29 + $0x3e8] sm:$0xff] %v428_v61  ;;  %v432_v63 = vld [vmem:[%s4224_s28 + $0xfc8] sm:$0xff]  ;;  %v434_v0 = vld [vmem:[%s4224_s28 + $0xfd0] sm:$0xff] }
  0x54   : > { %431 = vst [vmem:[%s4229_s29 + $0x3f0] sm:$0xff] %v430_v62  ;;  %433 = vst [vmem:[%s4229_s29 + $0x3f8] sm:$0xff] %v432_v63  ;;  %v436_v1 = vld [vmem:[%s4224_s28 + $0x1020] sm:$0xff]  ;;  %v438_v2 = vld [vmem:[%s4224_s28 + $0x1028] sm:$0xff] }
  0x55   : > { %435 = vst [vmem:[%s4229_s29 + $0x400] sm:$0xff] %v434_v0  ;;  %v440_v3 = vld [vmem:[%s4224_s28 + $0x1030] sm:$0xff]  ;;  %437 = vst [vmem:[%s4229_s29 + $0x408] sm:$0xff] %v436_v1  ;;  %v442_v4 = vld [vmem:[%s4224_s28 + $0x1080] sm:$0xff] }
  0x56   : > { %439 = vst [vmem:[%s4229_s29 + $0x410] sm:$0xff] %v438_v2  ;;  %441 = vst [vmem:[%s4229_s29 + $0x418] sm:$0xff] %v440_v3  ;;  %v444_v5 = vld [vmem:[%s4224_s28 + $0x1088] sm:$0xff]  ;;  %v446_v6 = vld [vmem:[%s4224_s28 + $0x1090] sm:$0xff] }
  0x57   : > { %443 = vst [vmem:[%s4229_s29 + $0x420] sm:$0xff] %v442_v4  ;;  %445 = vst [vmem:[%s4229_s29 + $0x428] sm:$0xff] %v444_v5  ;;  %v448_v7 = vld [vmem:[%s4224_s28 + $0x10e0] sm:$0xff]  ;;  %v450_v8 = vld [vmem:[%s4224_s28 + $0x10e8] sm:$0xff] }
  0x58   : > { %447 = vst [vmem:[%s4229_s29 + $0x430] sm:$0xff] %v446_v6  ;;  %v452_v9 = vld [vmem:[%s4224_s28 + $0x10f0] sm:$0xff]  ;;  %449 = vst [vmem:[%s4229_s29 + $0x438] sm:$0xff] %v448_v7  ;;  %v454_v10 = vld [vmem:[%s4224_s28 + $0x1140] sm:$0xff] }
  0x59   : > { %451 = vst [vmem:[%s4229_s29 + $0x440] sm:$0xff] %v450_v8  ;;  %453 = vst [vmem:[%s4229_s29 + $0x448] sm:$0xff] %v452_v9  ;;  %v456_v11 = vld [vmem:[%s4224_s28 + $0x1148] sm:$0xff]  ;;  %v458_v12 = vld [vmem:[%s4224_s28 + $0x1150] sm:$0xff] }
  0x5a   : > { %455 = vst [vmem:[%s4229_s29 + $0x450] sm:$0xff] %v454_v10  ;;  %457 = vst [vmem:[%s4229_s29 + $0x458] sm:$0xff] %v456_v11  ;;  %v460_v13 = vld [vmem:[%s4224_s28 + $0x11a0] sm:$0xff]  ;;  %v462_v14 = vld [vmem:[%s4224_s28 + $0x11a8] sm:$0xff] }
  0x5b   : > { %459 = vst [vmem:[%s4229_s29 + $0x460] sm:$0xff] %v458_v12  ;;  %v464_v15 = vld [vmem:[%s4224_s28 + $0x11b0] sm:$0xff]  ;;  %461 = vst [vmem:[%s4229_s29 + $0x468] sm:$0xff] %v460_v13  ;;  %v466_v16 = vld [vmem:[%s4224_s28 + $0x1200] sm:$0xff] }
  0x5c   : > { %463 = vst [vmem:[%s4229_s29 + $0x470] sm:$0xff] %v462_v14  ;;  %465 = vst [vmem:[%s4229_s29 + $0x478] sm:$0xff] %v464_v15  ;;  %v468_v17 = vld [vmem:[%s4224_s28 + $0x1208] sm:$0xff]  ;;  %v470_v18 = vld [vmem:[%s4224_s28 + $0x1210] sm:$0xff] }
  0x5d   : > { %467 = vst [vmem:[%s4229_s29 + $0x480] sm:$0xff] %v466_v16  ;;  %469 = vst [vmem:[%s4229_s29 + $0x488] sm:$0xff] %v468_v17  ;;  %v472_v19 = vld [vmem:[%s4224_s28 + $0x1260] sm:$0xff]  ;;  %v474_v20 = vld [vmem:[%s4224_s28 + $0x1268] sm:$0xff] }
  0x5e   : > { %471 = vst [vmem:[%s4229_s29 + $0x490] sm:$0xff] %v470_v18  ;;  %v476_v21 = vld [vmem:[%s4224_s28 + $0x1270] sm:$0xff]  ;;  %473 = vst [vmem:[%s4229_s29 + $0x498] sm:$0xff] %v472_v19  ;;  %v478_v22 = vld [vmem:[%s4224_s28 + $0x12c0] sm:$0xff] }
  0x5f   : > { %475 = vst [vmem:[%s4229_s29 + $0x4a0] sm:$0xff] %v474_v20  ;;  %477 = vst [vmem:[%s4229_s29 + $0x4a8] sm:$0xff] %v476_v21  ;;  %v480_v23 = vld [vmem:[%s4224_s28 + $0x12c8] sm:$0xff]  ;;  %v482_v24 = vld [vmem:[%s4224_s28 + $0x12d0] sm:$0xff] }
  0x60   : > { %479 = vst [vmem:[%s4229_s29 + $0x4b0] sm:$0xff] %v478_v22  ;;  %481 = vst [vmem:[%s4229_s29 + $0x4b8] sm:$0xff] %v480_v23  ;;  %v484_v25 = vld [vmem:[%s4224_s28 + $0x1320] sm:$0xff]  ;;  %v486_v26 = vld [vmem:[%s4224_s28 + $0x1328] sm:$0xff] }
  0x61   : > { %483 = vst [vmem:[%s4229_s29 + $0x4c0] sm:$0xff] %v482_v24  ;;  %v488_v27 = vld [vmem:[%s4224_s28 + $0x1330] sm:$0xff]  ;;  %485 = vst [vmem:[%s4229_s29 + $0x4c8] sm:$0xff] %v484_v25  ;;  %v490_v28 = vld [vmem:[%s4224_s28 + $0x1380] sm:$0xff] }
  0x62   : > { %487 = vst [vmem:[%s4229_s29 + $0x4d0] sm:$0xff] %v486_v26  ;;  %489 = vst [vmem:[%s4229_s29 + $0x4d8] sm:$0xff] %v488_v27  ;;  %v492_v29 = vld [vmem:[%s4224_s28 + $0x1388] sm:$0xff]  ;;  %v494_v30 = vld [vmem:[%s4224_s28 + $0x1390] sm:$0xff] }
  0x63   : > { %491 = vst [vmem:[%s4229_s29 + $0x4e0] sm:$0xff] %v490_v28  ;;  %493 = vst [vmem:[%s4229_s29 + $0x4e8] sm:$0xff] %v492_v29  ;;  %v496_v31 = vld [vmem:[%s4224_s28 + $0x13e0] sm:$0xff]  ;;  %v498_v32 = vld [vmem:[%s4224_s28 + $0x13e8] sm:$0xff] }
  0x64   : > { %495 = vst [vmem:[%s4229_s29 + $0x4f0] sm:$0xff] %v494_v30  ;;  %v500_v33 = vld [vmem:[%s4224_s28 + $0x13f0] sm:$0xff]  ;;  %497 = vst [vmem:[%s4229_s29 + $0x4f8] sm:$0xff] %v496_v31  ;;  %v502_v34 = vld [vmem:[%s4224_s28 + $0x1440] sm:$0xff] }
  0x65   : > { %499 = vst [vmem:[%s4229_s29 + $0x500] sm:$0xff] %v498_v32  ;;  %501 = vst [vmem:[%s4229_s29 + $0x508] sm:$0xff] %v500_v33  ;;  %v504_v35 = vld [vmem:[%s4224_s28 + $0x1448] sm:$0xff]  ;;  %v506_v36 = vld [vmem:[%s4224_s28 + $0x1450] sm:$0xff] }
  0x66   : > { %503 = vst [vmem:[%s4229_s29 + $0x510] sm:$0xff] %v502_v34  ;;  %505 = vst [vmem:[%s4229_s29 + $0x518] sm:$0xff] %v504_v35  ;;  %v508_v37 = vld [vmem:[%s4224_s28 + $0x14a0] sm:$0xff]  ;;  %v510_v38 = vld [vmem:[%s4224_s28 + $0x14a8] sm:$0xff] }
  0x67   : > { %507 = vst [vmem:[%s4229_s29 + $0x520] sm:$0xff] %v506_v36  ;;  %v512_v39 = vld [vmem:[%s4224_s28 + $0x14b0] sm:$0xff]  ;;  %509 = vst [vmem:[%s4229_s29 + $0x528] sm:$0xff] %v508_v37  ;;  %v514_v40 = vld [vmem:[%s4224_s28 + $0x1500] sm:$0xff] }
  0x68   : > { %511 = vst [vmem:[%s4229_s29 + $0x530] sm:$0xff] %v510_v38  ;;  %513 = vst [vmem:[%s4229_s29 + $0x538] sm:$0xff] %v512_v39  ;;  %v516_v41 = vld [vmem:[%s4224_s28 + $0x1508] sm:$0xff]  ;;  %v518_v42 = vld [vmem:[%s4224_s28 + $0x1510] sm:$0xff] }
  0x69   : > { %515 = vst [vmem:[%s4229_s29 + $0x540] sm:$0xff] %v514_v40  ;;  %517 = vst [vmem:[%s4229_s29 + $0x548] sm:$0xff] %v516_v41  ;;  %v520_v43 = vld [vmem:[%s4224_s28 + $0x1560] sm:$0xff]  ;;  %v522_v44 = vld [vmem:[%s4224_s28 + $0x1568] sm:$0xff] }
  0x6a   : > { %519 = vst [vmem:[%s4229_s29 + $0x550] sm:$0xff] %v518_v42  ;;  %v524_v45 = vld [vmem:[%s4224_s28 + $0x1570] sm:$0xff]  ;;  %521 = vst [vmem:[%s4229_s29 + $0x558] sm:$0xff] %v520_v43  ;;  %v526_v46 = vld [vmem:[%s4224_s28 + $0x15c0] sm:$0xff] }
  0x6b   : > { %523 = vst [vmem:[%s4229_s29 + $0x560] sm:$0xff] %v522_v44  ;;  %525 = vst [vmem:[%s4229_s29 + $0x568] sm:$0xff] %v524_v45  ;;  %v528_v47 = vld [vmem:[%s4224_s28 + $0x15c8] sm:$0xff]  ;;  %v530_v48 = vld [vmem:[%s4224_s28 + $0x15d0] sm:$0xff] }
  0x6c   : > { %527 = vst [vmem:[%s4229_s29 + $0x570] sm:$0xff] %v526_v46  ;;  %529 = vst [vmem:[%s4229_s29 + $0x578] sm:$0xff] %v528_v47  ;;  %v532_v49 = vld [vmem:[%s4224_s28 + $0x1620] sm:$0xff]  ;;  %v534_v50 = vld [vmem:[%s4224_s28 + $0x1628] sm:$0xff] }
  0x6d   : > { %531 = vst [vmem:[%s4229_s29 + $0x580] sm:$0xff] %v530_v48  ;;  %v536_v51 = vld [vmem:[%s4224_s28 + $0x1630] sm:$0xff]  ;;  %533 = vst [vmem:[%s4229_s29 + $0x588] sm:$0xff] %v532_v49  ;;  %v538_v52 = vld [vmem:[%s4224_s28 + $0x1680] sm:$0xff] }
  0x6e   : > { %535 = vst [vmem:[%s4229_s29 + $0x590] sm:$0xff] %v534_v50  ;;  %537 = vst [vmem:[%s4229_s29 + $0x598] sm:$0xff] %v536_v51  ;;  %v540_v53 = vld [vmem:[%s4224_s28 + $0x1688] sm:$0xff]  ;;  %v542_v54 = vld [vmem:[%s4224_s28 + $0x1690] sm:$0xff] }
  0x6f   : > { %539 = vst [vmem:[%s4229_s29 + $0x5a0] sm:$0xff] %v538_v52  ;;  %541 = vst [vmem:[%s4229_s29 + $0x5a8] sm:$0xff] %v540_v53  ;;  %v544_v55 = vld [vmem:[%s4224_s28 + $0x16e0] sm:$0xff]  ;;  %v546_v56 = vld [vmem:[%s4224_s28 + $0x16e8] sm:$0xff] }
  0x70   : > { %543 = vst [vmem:[%s4229_s29 + $0x5b0] sm:$0xff] %v542_v54  ;;  %v548_v57 = vld [vmem:[%s4224_s28 + $0x16f0] sm:$0xff]  ;;  %545 = vst [vmem:[%s4229_s29 + $0x5b8] sm:$0xff] %v544_v55  ;;  %v550_v58 = vld [vmem:[%s4224_s28 + $0x1740] sm:$0xff] }
  0x71   : > { %547 = vst [vmem:[%s4229_s29 + $0x5c0] sm:$0xff] %v546_v56  ;;  %549 = vst [vmem:[%s4229_s29 + $0x5c8] sm:$0xff] %v548_v57  ;;  %v552_v59 = vld [vmem:[%s4224_s28 + $0x1748] sm:$0xff]  ;;  %v554_v60 = vld [vmem:[%s4224_s28 + $0x1750] sm:$0xff] }
  0x72   : > { %551 = vst [vmem:[%s4229_s29 + $0x5d0] sm:$0xff] %v550_v58  ;;  %553 = vst [vmem:[%s4229_s29 + $0x5d8] sm:$0xff] %v552_v59  ;;  %v556_v61 = vld [vmem:[%s4224_s28 + $0x17a0] sm:$0xff]  ;;  %v558_v62 = vld [vmem:[%s4224_s28 + $0x17a8] sm:$0xff] }
  0x73   : > { %555 = vst [vmem:[%s4229_s29 + $0x5e0] sm:$0xff] %v554_v60  ;;  %v560_v63 = vld [vmem:[%s4224_s28 + $0x17b0] sm:$0xff]  ;;  %557 = vst [vmem:[%s4229_s29 + $0x5e8] sm:$0xff] %v556_v61  ;;  %v562_v0 = vld [vmem:[%s4224_s28 + $0x1800] sm:$0xff] }
  0x74   : > { %559 = vst [vmem:[%s4229_s29 + $0x5f0] sm:$0xff] %v558_v62  ;;  %561 = vst [vmem:[%s4229_s29 + $0x5f8] sm:$0xff] %v560_v63  ;;  %v564_v1 = vld [vmem:[%s4224_s28 + $0x1808] sm:$0xff]  ;;  %v566_v2 = vld [vmem:[%s4224_s28 + $0x1810] sm:$0xff] }
  0x75   : > { %563 = vst [vmem:[%s4229_s29 + $0x600] sm:$0xff] %v562_v0  ;;  %565 = vst [vmem:[%s4229_s29 + $0x608] sm:$0xff] %v564_v1  ;;  %v568_v3 = vld [vmem:[%s4224_s28 + $0x1860] sm:$0xff]  ;;  %v570_v4 = vld [vmem:[%s4224_s28 + $0x1868] sm:$0xff] }
  0x76   : > { %567 = vst [vmem:[%s4229_s29 + $0x610] sm:$0xff] %v566_v2  ;;  %v572_v5 = vld [vmem:[%s4224_s28 + $0x1870] sm:$0xff]  ;;  %569 = vst [vmem:[%s4229_s29 + $0x618] sm:$0xff] %v568_v3  ;;  %v574_v6 = vld [vmem:[%s4224_s28 + $0x18c0] sm:$0xff] }
  0x77   : > { %571 = vst [vmem:[%s4229_s29 + $0x620] sm:$0xff] %v570_v4  ;;  %573 = vst [vmem:[%s4229_s29 + $0x628] sm:$0xff] %v572_v5  ;;  %v576_v7 = vld [vmem:[%s4224_s28 + $0x18c8] sm:$0xff]  ;;  %v578_v8 = vld [vmem:[%s4224_s28 + $0x18d0] sm:$0xff] }
  0x78   : > { %575 = vst [vmem:[%s4229_s29 + $0x630] sm:$0xff] %v574_v6  ;;  %577 = vst [vmem:[%s4229_s29 + $0x638] sm:$0xff] %v576_v7  ;;  %v580_v9 = vld [vmem:[%s4224_s28 + $0x1920] sm:$0xff]  ;;  %v582_v10 = vld [vmem:[%s4224_s28 + $0x1928] sm:$0xff] }
  0x79   : > { %579 = vst [vmem:[%s4229_s29 + $0x640] sm:$0xff] %v578_v8  ;;  %v584_v11 = vld [vmem:[%s4224_s28 + $0x1930] sm:$0xff]  ;;  %581 = vst [vmem:[%s4229_s29 + $0x648] sm:$0xff] %v580_v9  ;;  %v586_v12 = vld [vmem:[%s4224_s28 + $0x1980] sm:$0xff] }
  0x7a   : > { %583 = vst [vmem:[%s4229_s29 + $0x650] sm:$0xff] %v582_v10  ;;  %585 = vst [vmem:[%s4229_s29 + $0x658] sm:$0xff] %v584_v11  ;;  %v588_v13 = vld [vmem:[%s4224_s28 + $0x1988] sm:$0xff]  ;;  %v590_v14 = vld [vmem:[%s4224_s28 + $0x1990] sm:$0xff] }
  0x7b   : > { %587 = vst [vmem:[%s4229_s29 + $0x660] sm:$0xff] %v586_v12  ;;  %589 = vst [vmem:[%s4229_s29 + $0x668] sm:$0xff] %v588_v13  ;;  %v592_v15 = vld [vmem:[%s4224_s28 + $0x19e0] sm:$0xff]  ;;  %v594_v16 = vld [vmem:[%s4224_s28 + $0x19e8] sm:$0xff] }
  0x7c   : > { %591 = vst [vmem:[%s4229_s29 + $0x670] sm:$0xff] %v590_v14  ;;  %v596_v17 = vld [vmem:[%s4224_s28 + $0x19f0] sm:$0xff]  ;;  %593 = vst [vmem:[%s4229_s29 + $0x678] sm:$0xff] %v592_v15  ;;  %v598_v18 = vld [vmem:[%s4224_s28 + $0x1a40] sm:$0xff] }
  0x7d   : > { %595 = vst [vmem:[%s4229_s29 + $0x680] sm:$0xff] %v594_v16  ;;  %597 = vst [vmem:[%s4229_s29 + $0x688] sm:$0xff] %v596_v17  ;;  %v600_v19 = vld [vmem:[%s4224_s28 + $0x1a48] sm:$0xff]  ;;  %v602_v20 = vld [vmem:[%s4224_s28 + $0x1a50] sm:$0xff] }
  0x7e   : > { %599 = vst [vmem:[%s4229_s29 + $0x690] sm:$0xff] %v598_v18  ;;  %601 = vst [vmem:[%s4229_s29 + $0x698] sm:$0xff] %v600_v19  ;;  %v604_v21 = vld [vmem:[%s4224_s28 + $0x1aa0] sm:$0xff]  ;;  %v606_v22 = vld [vmem:[%s4224_s28 + $0x1aa8] sm:$0xff] }
  0x7f   : > { %603 = vst [vmem:[%s4229_s29 + $0x6a0] sm:$0xff] %v602_v20  ;;  %v608_v23 = vld [vmem:[%s4224_s28 + $0x1ab0] sm:$0xff]  ;;  %605 = vst [vmem:[%s4229_s29 + $0x6a8] sm:$0xff] %v604_v21  ;;  %v610_v24 = vld [vmem:[%s4224_s28 + $0x1b00] sm:$0xff] }
  0x80   : > { %607 = vst [vmem:[%s4229_s29 + $0x6b0] sm:$0xff] %v606_v22  ;;  %609 = vst [vmem:[%s4229_s29 + $0x6b8] sm:$0xff] %v608_v23  ;;  %v612_v25 = vld [vmem:[%s4224_s28 + $0x1b08] sm:$0xff]  ;;  %v614_v26 = vld [vmem:[%s4224_s28 + $0x1b10] sm:$0xff] }
  0x81   : > { %611 = vst [vmem:[%s4229_s29 + $0x6c0] sm:$0xff] %v610_v24  ;;  %613 = vst [vmem:[%s4229_s29 + $0x6c8] sm:$0xff] %v612_v25  ;;  %v616_v27 = vld [vmem:[%s4224_s28 + $0x1b60] sm:$0xff]  ;;  %v618_v28 = vld [vmem:[%s4224_s28 + $0x1b68] sm:$0xff] }
  0x82   : > { %615 = vst [vmem:[%s4229_s29 + $0x6d0] sm:$0xff] %v614_v26  ;;  %v620_v29 = vld [vmem:[%s4224_s28 + $0x1b70] sm:$0xff]  ;;  %617 = vst [vmem:[%s4229_s29 + $0x6d8] sm:$0xff] %v616_v27  ;;  %v622_v30 = vld [vmem:[%s4224_s28 + $0x1bc0] sm:$0xff] }
  0x83   : > { %619 = vst [vmem:[%s4229_s29 + $0x6e0] sm:$0xff] %v618_v28  ;;  %621 = vst [vmem:[%s4229_s29 + $0x6e8] sm:$0xff] %v620_v29  ;;  %v624_v31 = vld [vmem:[%s4224_s28 + $0x1bc8] sm:$0xff]  ;;  %v626_v32 = vld [vmem:[%s4224_s28 + $0x1bd0] sm:$0xff] }
  0x84   : > { %623 = vst [vmem:[%s4229_s29 + $0x6f0] sm:$0xff] %v622_v30  ;;  %625 = vst [vmem:[%s4229_s29 + $0x6f8] sm:$0xff] %v624_v31  ;;  %v628_v33 = vld [vmem:[%s4224_s28 + $0x1c20] sm:$0xff]  ;;  %v630_v34 = vld [vmem:[%s4224_s28 + $0x1c28] sm:$0xff] }
  0x85   : > { %627 = vst [vmem:[%s4229_s29 + $0x700] sm:$0xff] %v626_v32  ;;  %v632_v35 = vld [vmem:[%s4224_s28 + $0x1c30] sm:$0xff]  ;;  %629 = vst [vmem:[%s4229_s29 + $0x708] sm:$0xff] %v628_v33  ;;  %v634_v36 = vld [vmem:[%s4224_s28 + $0x1c80] sm:$0xff] }
  0x86   : > { %631 = vst [vmem:[%s4229_s29 + $0x710] sm:$0xff] %v630_v34  ;;  %633 = vst [vmem:[%s4229_s29 + $0x718] sm:$0xff] %v632_v35  ;;  %v636_v37 = vld [vmem:[%s4224_s28 + $0x1c88] sm:$0xff]  ;;  %v638_v38 = vld [vmem:[%s4224_s28 + $0x1c90] sm:$0xff] }
  0x87   : > { %635 = vst [vmem:[%s4229_s29 + $0x720] sm:$0xff] %v634_v36  ;;  %637 = vst [vmem:[%s4229_s29 + $0x728] sm:$0xff] %v636_v37  ;;  %v640_v39 = vld [vmem:[%s4224_s28 + $0x1ce0] sm:$0xff]  ;;  %v642_v40 = vld [vmem:[%s4224_s28 + $0x1ce8] sm:$0xff] }
  0x88   : > { %639 = vst [vmem:[%s4229_s29 + $0x730] sm:$0xff] %v638_v38  ;;  %v644_v41 = vld [vmem:[%s4224_s28 + $0x1cf0] sm:$0xff]  ;;  %641 = vst [vmem:[%s4229_s29 + $0x738] sm:$0xff] %v640_v39  ;;  %v646_v42 = vld [vmem:[%s4224_s28 + $0x1d40] sm:$0xff] }
  0x89   : > { %643 = vst [vmem:[%s4229_s29 + $0x740] sm:$0xff] %v642_v40  ;;  %645 = vst [vmem:[%s4229_s29 + $0x748] sm:$0xff] %v644_v41  ;;  %v648_v43 = vld [vmem:[%s4224_s28 + $0x1d48] sm:$0xff]  ;;  %v650_v44 = vld [vmem:[%s4224_s28 + $0x1d50] sm:$0xff] }
  0x8a   : > { %647 = vst [vmem:[%s4229_s29 + $0x750] sm:$0xff] %v646_v42  ;;  %649 = vst [vmem:[%s4229_s29 + $0x758] sm:$0xff] %v648_v43  ;;  %v652_v45 = vld [vmem:[%s4224_s28 + $0x1da0] sm:$0xff]  ;;  %v654_v46 = vld [vmem:[%s4224_s28 + $0x1da8] sm:$0xff] }
  0x8b   : > { %651 = vst [vmem:[%s4229_s29 + $0x760] sm:$0xff] %v650_v44  ;;  %v656_v47 = vld [vmem:[%s4224_s28 + $0x1db0] sm:$0xff]  ;;  %653 = vst [vmem:[%s4229_s29 + $0x768] sm:$0xff] %v652_v45  ;;  %v658_v48 = vld [vmem:[%s4224_s28 + $0x1e00] sm:$0xff] }
  0x8c   : > { %655 = vst [vmem:[%s4229_s29 + $0x770] sm:$0xff] %v654_v46  ;;  %657 = vst [vmem:[%s4229_s29 + $0x778] sm:$0xff] %v656_v47  ;;  %v660_v49 = vld [vmem:[%s4224_s28 + $0x1e08] sm:$0xff]  ;;  %v662_v50 = vld [vmem:[%s4224_s28 + $0x1e10] sm:$0xff] }
  0x8d   : > { %659 = vst [vmem:[%s4229_s29 + $0x780] sm:$0xff] %v658_v48  ;;  %661 = vst [vmem:[%s4229_s29 + $0x788] sm:$0xff] %v660_v49  ;;  %v664_v51 = vld [vmem:[%s4224_s28 + $0x1e60] sm:$0xff]  ;;  %v666_v52 = vld [vmem:[%s4224_s28 + $0x1e68] sm:$0xff] }
  0x8e   : > { %663 = vst [vmem:[%s4229_s29 + $0x790] sm:$0xff] %v662_v50  ;;  %v668_v53 = vld [vmem:[%s4224_s28 + $0x1e70] sm:$0xff]  ;;  %665 = vst [vmem:[%s4229_s29 + $0x798] sm:$0xff] %v664_v51  ;;  %v670_v54 = vld [vmem:[%s4224_s28 + $0x1ec0] sm:$0xff] }
  0x8f   : > { %667 = vst [vmem:[%s4229_s29 + $0x7a0] sm:$0xff] %v666_v52  ;;  %669 = vst [vmem:[%s4229_s29 + $0x7a8] sm:$0xff] %v668_v53  ;;  %v672_v55 = vld [vmem:[%s4224_s28 + $0x1ec8] sm:$0xff]  ;;  %v674_v56 = vld [vmem:[%s4224_s28 + $0x1ed0] sm:$0xff] }
  0x90   : > { %671 = vst [vmem:[%s4229_s29 + $0x7b0] sm:$0xff] %v670_v54  ;;  %673 = vst [vmem:[%s4229_s29 + $0x7b8] sm:$0xff] %v672_v55  ;;  %v676_v57 = vld [vmem:[%s4224_s28 + $0x1f20] sm:$0xff]  ;;  %v678_v58 = vld [vmem:[%s4224_s28 + $0x1f28] sm:$0xff] }
  0x91   : > { %675 = vst [vmem:[%s4229_s29 + $0x7c0] sm:$0xff] %v674_v56  ;;  %v680_v59 = vld [vmem:[%s4224_s28 + $0x1f30] sm:$0xff]  ;;  %677 = vst [vmem:[%s4229_s29 + $0x7c8] sm:$0xff] %v676_v57  ;;  %v682_v60 = vld [vmem:[%s4224_s28 + $0x1f80] sm:$0xff] }
  0x92   : > { %679 = vst [vmem:[%s4229_s29 + $0x7d0] sm:$0xff] %v678_v58  ;;  %681 = vst [vmem:[%s4229_s29 + $0x7d8] sm:$0xff] %v680_v59  ;;  %v684_v61 = vld [vmem:[%s4224_s28 + $0x1f88] sm:$0xff]  ;;  %v686_v62 = vld [vmem:[%s4224_s28 + $0x1f90] sm:$0xff] }
  0x93   : > { %683 = vst [vmem:[%s4229_s29 + $0x7e0] sm:$0xff] %v682_v60  ;;  %685 = vst [vmem:[%s4229_s29 + $0x7e8] sm:$0xff] %v684_v61  ;;  %v688_v63 = vld [vmem:[%s4224_s28 + $0x1fe0] sm:$0xff]  ;;  %v690_v0 = vld [vmem:[%s4224_s28 + $0x1fe8] sm:$0xff] }
  0x94   : > { %687 = vst [vmem:[%s4229_s29 + $0x7f0] sm:$0xff] %v686_v62  ;;  %v692_v1 = vld [vmem:[%s4224_s28 + $0x1ff0] sm:$0xff]  ;;  %689 = vst [vmem:[%s4229_s29 + $0x7f8] sm:$0xff] %v688_v63  ;;  %v694_v2 = vld [vmem:[%s4224_s28 + $0x2040] sm:$0xff] }
  0x95   : > { %691 = vst [vmem:[%s4229_s29 + $0x800] sm:$0xff] %v690_v0  ;;  %693 = vst [vmem:[%s4229_s29 + $0x808] sm:$0xff] %v692_v1  ;;  %v696_v3 = vld [vmem:[%s4224_s28 + $0x2048] sm:$0xff]  ;;  %v698_v4 = vld [vmem:[%s4224_s28 + $0x2050] sm:$0xff] }
  0x96   : > { %695 = vst [vmem:[%s4229_s29 + $0x810] sm:$0xff] %v694_v2  ;;  %697 = vst [vmem:[%s4229_s29 + $0x818] sm:$0xff] %v696_v3  ;;  %v700_v5 = vld [vmem:[%s4224_s28 + $0x20a0] sm:$0xff]  ;;  %v702_v6 = vld [vmem:[%s4224_s28 + $0x20a8] sm:$0xff] }
  0x97   : > { %699 = vst [vmem:[%s4229_s29 + $0x820] sm:$0xff] %v698_v4  ;;  %v704_v7 = vld [vmem:[%s4224_s28 + $0x20b0] sm:$0xff]  ;;  %701 = vst [vmem:[%s4229_s29 + $0x828] sm:$0xff] %v700_v5  ;;  %v706_v8 = vld [vmem:[%s4224_s28 + $0x2100] sm:$0xff] }
  0x98   : > { %703 = vst [vmem:[%s4229_s29 + $0x830] sm:$0xff] %v702_v6  ;;  %705 = vst [vmem:[%s4229_s29 + $0x838] sm:$0xff] %v704_v7  ;;  %v708_v9 = vld [vmem:[%s4224_s28 + $0x2108] sm:$0xff]  ;;  %v710_v10 = vld [vmem:[%s4224_s28 + $0x2110] sm:$0xff] }
  0x99   : > { %707 = vst [vmem:[%s4229_s29 + $0x840] sm:$0xff] %v706_v8  ;;  %709 = vst [vmem:[%s4229_s29 + $0x848] sm:$0xff] %v708_v9  ;;  %v712_v11 = vld [vmem:[%s4224_s28 + $0x2160] sm:$0xff]  ;;  %v714_v12 = vld [vmem:[%s4224_s28 + $0x2168] sm:$0xff] }
  0x9a   : > { %711 = vst [vmem:[%s4229_s29 + $0x850] sm:$0xff] %v710_v10  ;;  %v716_v13 = vld [vmem:[%s4224_s28 + $0x2170] sm:$0xff]  ;;  %713 = vst [vmem:[%s4229_s29 + $0x858] sm:$0xff] %v712_v11  ;;  %v718_v14 = vld [vmem:[%s4224_s28 + $0x21c0] sm:$0xff] }
  0x9b   : > { %715 = vst [vmem:[%s4229_s29 + $0x860] sm:$0xff] %v714_v12  ;;  %717 = vst [vmem:[%s4229_s29 + $0x868] sm:$0xff] %v716_v13  ;;  %v720_v15 = vld [vmem:[%s4224_s28 + $0x21c8] sm:$0xff]  ;;  %v722_v16 = vld [vmem:[%s4224_s28 + $0x21d0] sm:$0xff] }
  0x9c   : > { %719 = vst [vmem:[%s4229_s29 + $0x870] sm:$0xff] %v718_v14  ;;  %721 = vst [vmem:[%s4229_s29 + $0x878] sm:$0xff] %v720_v15  ;;  %v724_v17 = vld [vmem:[%s4224_s28 + $0x2220] sm:$0xff]  ;;  %v726_v18 = vld [vmem:[%s4224_s28 + $0x2228] sm:$0xff] }
  0x9d   : > { %723 = vst [vmem:[%s4229_s29 + $0x880] sm:$0xff] %v722_v16  ;;  %v728_v19 = vld [vmem:[%s4224_s28 + $0x2230] sm:$0xff]  ;;  %725 = vst [vmem:[%s4229_s29 + $0x888] sm:$0xff] %v724_v17  ;;  %v730_v20 = vld [vmem:[%s4224_s28 + $0x2280] sm:$0xff] }
  0x9e   : > { %727 = vst [vmem:[%s4229_s29 + $0x890] sm:$0xff] %v726_v18  ;;  %729 = vst [vmem:[%s4229_s29 + $0x898] sm:$0xff] %v728_v19  ;;  %v732_v21 = vld [vmem:[%s4224_s28 + $0x2288] sm:$0xff]  ;;  %v734_v22 = vld [vmem:[%s4224_s28 + $0x2290] sm:$0xff] }
  0x9f   : > { %731 = vst [vmem:[%s4229_s29 + $0x8a0] sm:$0xff] %v730_v20  ;;  %733 = vst [vmem:[%s4229_s29 + $0x8a8] sm:$0xff] %v732_v21  ;;  %v736_v23 = vld [vmem:[%s4224_s28 + $0x22e0] sm:$0xff]  ;;  %v738_v24 = vld [vmem:[%s4224_s28 + $0x22e8] sm:$0xff] }
  0xa0   : > { %735 = vst [vmem:[%s4229_s29 + $0x8b0] sm:$0xff] %v734_v22  ;;  %v740_v25 = vld [vmem:[%s4224_s28 + $0x22f0] sm:$0xff]  ;;  %737 = vst [vmem:[%s4229_s29 + $0x8b8] sm:$0xff] %v736_v23  ;;  %v742_v26 = vld [vmem:[%s4224_s28 + $0x2340] sm:$0xff] }
  0xa1   : > { %739 = vst [vmem:[%s4229_s29 + $0x8c0] sm:$0xff] %v738_v24  ;;  %741 = vst [vmem:[%s4229_s29 + $0x8c8] sm:$0xff] %v740_v25  ;;  %v744_v27 = vld [vmem:[%s4224_s28 + $0x2348] sm:$0xff]  ;;  %v746_v28 = vld [vmem:[%s4224_s28 + $0x2350] sm:$0xff] }
  0xa2   : > { %743 = vst [vmem:[%s4229_s29 + $0x8d0] sm:$0xff] %v742_v26  ;;  %745 = vst [vmem:[%s4229_s29 + $0x8d8] sm:$0xff] %v744_v27  ;;  %v748_v29 = vld [vmem:[%s4224_s28 + $0x23a0] sm:$0xff]  ;;  %v750_v30 = vld [vmem:[%s4224_s28 + $0x23a8] sm:$0xff] }
  0xa3   : > { %747 = vst [vmem:[%s4229_s29 + $0x8e0] sm:$0xff] %v746_v28  ;;  %v752_v31 = vld [vmem:[%s4224_s28 + $0x23b0] sm:$0xff]  ;;  %749 = vst [vmem:[%s4229_s29 + $0x8e8] sm:$0xff] %v748_v29 }
  0xa4   : > { %751 = vst [vmem:[%s4229_s29 + $0x8f0] sm:$0xff] %v750_v30  ;;  %753 = vst [vmem:[%s4229_s29 + $0x8f8] sm:$0xff] %v752_v31 }
  0xa5 PF: > { %p3291_p8 = scmp.ge.s32.totalorder %s4154_s16, 1  ;;  %p766_p9 = scmp.lt.s32.totalorder %s4154_s16, 5 }
  0xa7   : > { %p767_p10 = pnand %p3291_p8, %p766_p9 }
  0xa8   : > { %s773_s30 = sand.u32 (!%p767_p10), 1, %s4138_s12   ;;  %s813_s11 = smul.u32 (!%p767_p10), 6, %s4146_s14 }
  0xa9   : > { %770 = sbr.rel (%p767_p10) target bundleno = 735 (0x2df), region = 51 }
  0xaa   : > { %s3604_s6 = smul.u32 (!%p767_p10), 2304, %s773_s30  ;;  %p814_p11 = scmp.lt.s32.totalorder (!%p767_p10), %s813_s11, 23 }
  0xac   : > { %s4820_s9 = scalar_lea.vmem (!%p767_p10), [#allocation2], %s3604_s6 }
  0xae   : > { %v4810_v32 = vld [vmem:[%s5214_s0 + $0x4] ss:$24 sps:$4 sm:$0xff]   ;;  %v3646_v34 = vld [vmem:[%s4820_s9 + $0x154] ss:$24 sps:$4 sm:$0xff]   ;;  %v3648_v35 = vld [vmem:[%s4820_s9 + $0x150] ss:$24 sps:$4 sm:$0xff]  }
  0xaf   : > { %2648 = vmatprep.mubr.bf16.mxu0 %v4810_v32  ;;  %v4818_v33 = vld [vmem:[%s5214_s0 + $0xc] ss:$24 sps:$4 sm:$0xff]   ;;  %2616 = vmatprep.subr.bf16.mxu0 %v3646_v34  ;;  %v3651_v37 = vld [vmem:[%s4820_s9 + $0x450] ss:$24 sps:$4 sm:$0xff]   ;;  %v3654_v39 = vld [vmem:[%s4820_s9 + $0x120] ss:$24 sps:$4 sm:$0xff]  }
  0xb0   : > { %2691 = vmatprep.mubr.bf16.mxu1 %v4818_v33  ;;  %v3649_v36 = vld [vmem:[%s4820_s9 + $0x454] ss:$24 sps:$4 sm:$0xff]   ;;  %2617 = vmatpush1.bf16.msra.mxu0 %v3648_v35  ;;  %v3652_v38 = vld [vmem:[%s4820_s9 + $0x124] ss:$24 sps:$4 sm:$0xff]   ;;  %v3657_v41 = vld [vmem:[%s4820_s9 + $0x420] ss:$24 sps:$4 sm:$0xff]  }
  0xb1   : > { %2659 = vmatprep.subr.bf16.mxu1 %v3649_v36  ;;  %v3655_v40 = vld [vmem:[%s4820_s9 + $0x424] ss:$24 sps:$4 sm:$0xff]   ;;  %2618 = vmatprep.subr.bf16.mxu0 %v3652_v38  ;;  %v3658_v42 = vld [vmem:[%s4820_s9 + $0xf4] ss:$24 sps:$4 sm:$0xff]   ;;  %v3660_v43 = vld [vmem:[%s4820_s9 + $0xf0] ss:$24 sps:$4 sm:$0xff]  }
  0xb2   : > { %2660 = vmatpush1.bf16.msra.mxu1 %v3651_v37  ;;  %v3661_v44 = vld [vmem:[%s4820_s9 + $0x3f4] ss:$24 sps:$4 sm:$0xff]   ;;  %v3664_v45 = vld [vmem:[%s4820_s9 + $0xc4] ss:$24 sps:$4 sm:$0xff]   ;;  %v3663_v46 = vld [vmem:[%s4820_s9 + $0x3f0] ss:$24 sps:$4 sm:$0xff]  }
  0xb3   : > { %2661 = vmatprep.subr.bf16.mxu1 %v3655_v40  ;;  %v3667_v47 = vld [vmem:[%s4820_s9 + $0x3c4] ss:$24 sps:$4 sm:$0xff]   ;;  %v3666_v48 = vld [vmem:[%s4820_s9 + $0xc0] ss:$24 sps:$4 sm:$0xff]   ;;  %v3670_v49 = vld [vmem:[%s4820_s9 + $0x94] ss:$24 sps:$4 sm:$0xff]  }
  0xb4   : > { %2619 = vmatpush1.bf16.msra.mxu0 %v3654_v39  ;;  %v3669_v50 = vld [vmem:[%s4820_s9 + $0x3c0] ss:$24 sps:$4 sm:$0xff]   ;;  %v3673_v51 = vld [vmem:[%s4820_s9 + $0x394] ss:$24 sps:$4 sm:$0xff]   ;;  %v3672_v52 = vld [vmem:[%s4820_s9 + $0x90] ss:$24 sps:$4 sm:$0xff]  }
  0xb5   : > { %2620 = vmatprep.subr.bf16.mxu0 %v3658_v42  ;;  %v3676_v53 = vld [vmem:[%s4820_s9 + $0x64] ss:$24 sps:$4 sm:$0xff]   ;;  %v3675_v54 = vld [vmem:[%s4820_s9 + $0x390] ss:$24 sps:$4 sm:$0xff]   ;;  %v3678_v56 = vld [vmem:[%s4820_s9 + $0x60] ss:$24 sps:$4 sm:$0xff]  }
  0xb6   : > { %2662 = vmatpush1.bf16.msra.mxu1 %v3657_v41  ;;  %v3679_v55 = vld [vmem:[%s4820_s9 + $0x364] ss:$24 sps:$4 sm:$0xff]   ;;  %v3682_v57 = vld [vmem:[%s4820_s9 + $0x34] ss:$24 sps:$4 sm:$0xff]   ;;  %v3681_v58 = vld [vmem:[%s4820_s9 + $0x360] ss:$24 sps:$4 sm:$0xff]  }
  0xb7   : > { %2663 = vmatprep.subr.bf16.mxu1 %v3661_v44  ;;  %v3685_v59 = vld [vmem:[%s4820_s9 + $0x334] ss:$24 sps:$4 sm:$0xff]   ;;  %v3684_v60 = vld [vmem:[%s4820_s9 + $0x30] ss:$24 sps:$4 sm:$0xff]   ;;  %v3688_v61 = vld [vmem:[%s4820_s9 + $0x4] ss:$24 sps:$4 sm:$0xff]  }
  0xb8   : > { %2621 = vmatpush1.bf16.msra.mxu0 %v3660_v43  ;;  %v3687_v62 = vld [vmem:[%s4820_s9 + $0x330] ss:$24 sps:$4 sm:$0xff]   ;;  %v3691_v63 = vld [vmem:[%s4820_s9 + $0x304] ss:$24 sps:$4 sm:$0xff]   ;;  %v3690_v0 = vld [vmem:[%s4820_s9] ss:$24 sps:$4 sm:$0xff]  }
  0xb9   : > { %2622 = vmatprep.subr.bf16.mxu0 %v3664_v45  ;;  %v3694_v1 = vld [vmem:[%s4820_s9 + $0x2d4] ss:$24 sps:$4 sm:$0xff]   ;;  %v3693_v2 = vld [vmem:[%s4820_s9 + $0x300] ss:$24 sps:$4 sm:$0xff]   ;;  %v3696_v4 = vld [vmem:[%s4820_s9 + $0x2d0] ss:$24 sps:$4 sm:$0xff]  }
  0xba   : > { %2664 = vmatpush1.bf16.msra.mxu1 %v3663_v46  ;;  %v3697_v3 = vld [vmem:[%s4820_s9 + $0x5d4] ss:$24 sps:$4 sm:$0xff]   ;;  %v3700_v5 = vld [vmem:[%s4820_s9 + $0x2a4] ss:$24 sps:$4 sm:$0xff]   ;;  %v3699_v6 = vld [vmem:[%s4820_s9 + $0x5d0] ss:$24 sps:$4 sm:$0xff]  }
  0xbb   : > { %2665 = vmatprep.subr.bf16.mxu1 %v3667_v47  ;;  %v3703_v7 = vld [vmem:[%s4820_s9 + $0x5a4] ss:$24 sps:$4 sm:$0xff]   ;;  %v3702_v8 = vld [vmem:[%s4820_s9 + $0x2a0] ss:$24 sps:$4 sm:$0xff]   ;;  %v3706_v9 = vld [vmem:[%s4820_s9 + $0x274] ss:$24 sps:$4 sm:$0xff]  }
  0xbc   : > { %2623 = vmatpush1.bf16.msra.mxu0 %v3666_v48  ;;  %v3705_v10 = vld [vmem:[%s4820_s9 + $0x5a0] ss:$24 sps:$4 sm:$0xff]   ;;  %v3709_v11 = vld [vmem:[%s4820_s9 + $0x574] ss:$24 sps:$4 sm:$0xff]   ;;  %v3708_v12 = vld [vmem:[%s4820_s9 + $0x270] ss:$24 sps:$4 sm:$0xff]  }
  0xbd   : > { %2624 = vmatprep.subr.bf16.mxu0 %v3670_v49  ;;  %v3712_v13 = vld [vmem:[%s4820_s9 + $0x244] ss:$24 sps:$4 sm:$0xff]   ;;  %v3711_v14 = vld [vmem:[%s4820_s9 + $0x570] ss:$24 sps:$4 sm:$0xff]   ;;  %v3714_v16 = vld [vmem:[%s4820_s9 + $0x240] ss:$24 sps:$4 sm:$0xff]  }
  0xbe   : > { %2666 = vmatpush1.bf16.msra.mxu1 %v3669_v50  ;;  %v3715_v15 = vld [vmem:[%s4820_s9 + $0x544] ss:$24 sps:$4 sm:$0xff]   ;;  %v3718_v17 = vld [vmem:[%s4820_s9 + $0x214] ss:$24 sps:$4 sm:$0xff]   ;;  %v3717_v18 = vld [vmem:[%s4820_s9 + $0x540] ss:$24 sps:$4 sm:$0xff]  }
  0xbf   : > { %2667 = vmatprep.subr.bf16.mxu1 %v3673_v51  ;;  %v3721_v19 = vld [vmem:[%s4820_s9 + $0x514] ss:$24 sps:$4 sm:$0xff]   ;;  %v3720_v20 = vld [vmem:[%s4820_s9 + $0x210] ss:$24 sps:$4 sm:$0xff]   ;;  %v3724_v21 = vld [vmem:[%s4820_s9 + $0x1e4] ss:$24 sps:$4 sm:$0xff]  }
  0xc0   : > { %2625 = vmatpush1.bf16.msra.mxu0 %v3672_v52  ;;  %v3723_v22 = vld [vmem:[%s4820_s9 + $0x510] ss:$24 sps:$4 sm:$0xff]   ;;  %v3727_v23 = vld [vmem:[%s4820_s9 + $0x4e4] ss:$24 sps:$4 sm:$0xff]   ;;  %v3726_v24 = vld [vmem:[%s4820_s9 + $0x1e0] ss:$24 sps:$4 sm:$0xff]  }
  0xc1   : > { %2626 = vmatprep.subr.bf16.mxu0 %v3676_v53  ;;  %v3730_v25 = vld [vmem:[%s4820_s9 + $0x1b4] ss:$24 sps:$4 sm:$0xff]   ;;  %v3729_v26 = vld [vmem:[%s4820_s9 + $0x4e0] ss:$24 sps:$4 sm:$0xff]   ;;  %v3732_v28 = vld [vmem:[%s4820_s9 + $0x1b0] ss:$24 sps:$4 sm:$0xff]  }
  0xc2   : > { %2668 = vmatpush1.bf16.msra.mxu1 %v3675_v54  ;;  %v3733_v27 = vld [vmem:[%s4820_s9 + $0x4b4] ss:$24 sps:$4 sm:$0xff]   ;;  %v3736_v29 = vld [vmem:[%s4820_s9 + $0x184] ss:$24 sps:$4 sm:$0xff]   ;;  %v3735_v30 = vld [vmem:[%s4820_s9 + $0x4b0] ss:$24 sps:$4 sm:$0xff]  }
  0xc3   : > { %2669 = vmatprep.subr.bf16.mxu1 %v3679_v55  ;;  %v3739_v31 = vld [vmem:[%s4820_s9 + $0x484] ss:$24 sps:$4 sm:$0xff]   ;;  %v3738_v34 = vld [vmem:[%s4820_s9 + $0x180] ss:$24 sps:$4 sm:$0xff]   ;;  %v3747_v36 = vld [vmem:[%s4820_s9 + $0x754] ss:$24 sps:$4 sm:$0xff]  }
  0xc4   : > { %2627 = vmatpush1.bf16.msra.mxu0 %v3678_v56  ;;  %v4889_v35 = vld [vmem:[%s5214_s0] ss:$24 sps:$4 sm:$0xff]   ;;  %v3753_v39 = vld [vmem:[%s4820_s9 + $0x15c] ss:$24 sps:$4 sm:$0xff]   ;;  %v3745_v40 = vld [vmem:[%s4820_s9 + $0x750] ss:$24 sps:$4 sm:$0xff]  }
  0xc5   : > { %2628 = vmatprep.subr.bf16.mxu0 %v3682_v57  ;;  %v3743_v37 = vld [vmem:[%s4820_s9 + $0x480] ss:$24 sps:$4 sm:$0xff]   ;;  %v4903_v41 = vld [vmem:[%s5214_s0 + $0x14] ss:$24 sps:$4 sm:$0xff]   ;;  %v3756_v42 = vld [vmem:[%s4820_s9 + $0x724] ss:$24 sps:$4 sm:$0xff]  }
  0xc6   : > { %2670 = vmatpush1.bf16.msra.mxu1 %v3681_v58  ;;  %v4896_v38 = vld [vmem:[%s5214_s0 + $0x8] ss:$24 sps:$4 sm:$0xff]   ;;  %v3751_v43 = vld [vmem:[%s4820_s9 + $0x158] ss:$24 sps:$4 sm:$0xff]   ;;  %v3759_v44 = vld [vmem:[%s4820_s9 + $0x12c] ss:$24 sps:$4 sm:$0xff]  }
  0xc7   : > { %2671 = vmatprep.subr.bf16.mxu1 %v3685_v59  ;;  %v3754_v45 = vld [vmem:[%s4820_s9 + $0x720] ss:$24 sps:$4 sm:$0xff]   ;;  %v3762_v46 = vld [vmem:[%s4820_s9 + $0x6f4] ss:$24 sps:$4 sm:$0xff]   ;;  %v3760_v49 = vld [vmem:[%s4820_s9 + $0x6f0] ss:$24 sps:$4 sm:$0xff]  }
  0xc8   : > { %2629 = vmatpush1.bf16.msra.mxu0 %v3684_v60  ;;  %v3757_v47 = vld [vmem:[%s4820_s9 + $0x128] ss:$24 sps:$4 sm:$0xff]   ;;  %v3765_v48 = vld [vmem:[%s4820_s9 + $0xfc] ss:$24 sps:$4 sm:$0xff]   ;;  %v3763_v51 = vld [vmem:[%s4820_s9 + $0xf8] ss:$24 sps:$4 sm:$0xff]  }
  0xc9   : > { %2630 = vmatprep.subr.bf16.mxu0 %v3688_v61  ;;  %v3768_v50 = vld [vmem:[%s4820_s9 + $0x6c4] ss:$24 sps:$4 sm:$0xff]   ;;  %v3766_v53 = vld [vmem:[%s4820_s9 + $0x6c0] ss:$24 sps:$4 sm:$0xff]   ;;  %v3772_v56 = vld [vmem:[%s4820_s9 + $0x690] ss:$24 sps:$4 sm:$0xff]  }
  0xca   : > { %2672 = vmatpush1.bf16.msra.mxu1 %v3687_v62  ;;  %v3771_v52 = vld [vmem:[%s4820_s9 + $0xcc] ss:$24 sps:$4 sm:$0xff]   ;;  %v3769_v54 = vld [vmem:[%s4820_s9 + $0xc8] ss:$24 sps:$4 sm:$0xff]   ;;  %v3777_v55 = vld [vmem:[%s4820_s9 + $0x9c] ss:$24 sps:$4 sm:$0xff]  }
  0xcb   : > { %2673 = vmatprep.subr.bf16.mxu1 %v3691_v63  ;;  %v3780_v57 = vld [vmem:[%s4820_s9 + $0x664] ss:$24 sps:$4 sm:$0xff]   ;;  %v3775_v58 = vld [vmem:[%s4820_s9 + $0x98] ss:$24 sps:$4 sm:$0xff]   ;;  %v3786_v61 = vld [vmem:[%s4820_s9 + $0x634] ss:$24 sps:$4 sm:$0xff]  }
  0xcc   : > { %2631 = vmatpush1.bf16.msra.mxu0 %v3690_v0  ;;  %v3783_v59 = vld [vmem:[%s4820_s9 + $0x6c] ss:$24 sps:$4 sm:$0xff]   ;;  %v3778_v60 = vld [vmem:[%s4820_s9 + $0x660] ss:$24 sps:$4 sm:$0xff]   ;;  %v3789_v63 = vld [vmem:[%s4820_s9 + $0x3c] ss:$24 sps:$4 sm:$0xff]  }
  0xcd   : > { %2632 = vmatprep.subr.bf16.mxu0 %v3694_v1  ;;  %v3781_v62 = vld [vmem:[%s4820_s9 + $0x68] ss:$24 sps:$4 sm:$0xff]   ;;  %v3792_v1 = vld [vmem:[%s4820_s9 + $0x604] ss:$24 sps:$4 sm:$0xff]   ;;  %s5226_s11 = smov (!%p814_p11, %s813_s11), 23  ;;  %s3602_s12 = smul.u32 (%p4211_p6), 24, %s4146_s14 }
  0xce   : > { %2674 = vmatpush1.bf16.msra.mxu1 %v3693_v2  ;;  %v3784_v0 = vld [vmem:[%s4820_s9 + $0x630] ss:$24 sps:$4 sm:$0xff]   ;;  %s816_s20 = scalar_lea.vmem %s5216_s2, %s5226_s11 }
  0xcf   : > { %2675 = vmatprep.subr.bf16.mxu1 %v3697_v3  ;;  %v3787_v2 = vld [vmem:[%s4820_s9 + $0x38] ss:$24 sps:$4 sm:$0xff]   ;;  %v3795_v3 = vld [vmem:[%s4820_s9 + $0xc] ss:$24 sps:$4 sm:$0xff]   ;;  %s3165_s25 = scalar_lea.vmem (%p4211_p6), %s5217_s3, %s3602_s12 }
  0xd0   : > { %2633 = vmatpush2.bf16.msra.mxu0 %v3696_v4  ;;  %v3790_v4 = vld [vmem:[%s4820_s9 + $0x600] ss:$24 sps:$4 sm:$0xff]  }
  0xd1   : > { %2634 = vmatprep.subr.bf16.mxu0 %v3700_v5  ;;  %v3798_v5 = vld [vmem:[%s4820_s9 + $0x8d4] ss:$24 sps:$4 sm:$0xff]  }
  0xd2   : > { %2676 = vmatpush2.bf16.msra.mxu1 %v3699_v6  ;;  %v3793_v6 = vld [vmem:[%s4820_s9 + $0x8] ss:$24 sps:$4 sm:$0xff]  }
  0xd3   : > { %2677 = vmatprep.subr.bf16.mxu1 %v3703_v7  ;;  %v3801_v7 = vld [vmem:[%s4820_s9 + $0x2dc] ss:$24 sps:$4 sm:$0xff]  }
  0xd4   : > { %2635 = vmatpush2.bf16.msra.mxu0 %v3702_v8  ;;  %v3796_v8 = vld [vmem:[%s4820_s9 + $0x8d0] ss:$24 sps:$4 sm:$0xff]  }
  0xd5   : > { %2636 = vmatprep.subr.bf16.mxu0 %v3706_v9  ;;  %v3804_v9 = vld [vmem:[%s4820_s9 + $0x8a4] ss:$24 sps:$4 sm:$0xff]  }
  0xd6   : > { %2678 = vmatpush2.bf16.msra.mxu1 %v3705_v10  ;;  %v3799_v10 = vld [vmem:[%s4820_s9 + $0x2d8] ss:$24 sps:$4 sm:$0xff]  }
  0xd7   : > { %2679 = vmatprep.subr.bf16.mxu1 %v3709_v11  ;;  %v3807_v11 = vld [vmem:[%s4820_s9 + $0x2ac] ss:$24 sps:$4 sm:$0xff]  }
  0xd8   : > { %2637 = vmatpush2.bf16.msra.mxu0 %v3708_v12  ;;  %v3802_v12 = vld [vmem:[%s4820_s9 + $0x8a0] ss:$24 sps:$4 sm:$0xff]  }
  0xd9   : > { %2638 = vmatprep.subr.bf16.mxu0 %v3712_v13  ;;  %v3810_v13 = vld [vmem:[%s4820_s9 + $0x874] ss:$24 sps:$4 sm:$0xff]  }
  0xda   : > { %2680 = vmatpush2.bf16.msra.mxu1 %v3711_v14  ;;  %v3805_v14 = vld [vmem:[%s4820_s9 + $0x2a8] ss:$24 sps:$4 sm:$0xff]  }
  0xdb   : > { %2681 = vmatprep.subr.bf16.mxu1 %v3715_v15  ;;  %v3813_v15 = vld [vmem:[%s4820_s9 + $0x27c] ss:$24 sps:$4 sm:$0xff]  }
  0xdc   : > { %2639 = vmatpush2.bf16.msra.mxu0 %v3714_v16  ;;  %v3808_v16 = vld [vmem:[%s4820_s9 + $0x870] ss:$24 sps:$4 sm:$0xff]  }
  0xdd   : > { %2640 = vmatprep.subr.bf16.mxu0 %v3718_v17  ;;  %v3816_v17 = vld [vmem:[%s4820_s9 + $0x844] ss:$24 sps:$4 sm:$0xff]  }
  0xde   : > { %2682 = vmatpush2.bf16.msra.mxu1 %v3717_v18  ;;  %v3811_v18 = vld [vmem:[%s4820_s9 + $0x278] ss:$24 sps:$4 sm:$0xff]  }
  0xdf   : > { %2683 = vmatprep.subr.bf16.mxu1 %v3721_v19  ;;  %v3819_v19 = vld [vmem:[%s4820_s9 + $0x24c] ss:$24 sps:$4 sm:$0xff]  }
  0xe0   : > { %2641 = vmatpush2.bf16.msra.mxu0 %v3720_v20  ;;  %v3814_v20 = vld [vmem:[%s4820_s9 + $0x840] ss:$24 sps:$4 sm:$0xff]  }
  0xe1   : > { %2642 = vmatprep.subr.bf16.mxu0 %v3724_v21  ;;  %v3822_v21 = vld [vmem:[%s4820_s9 + $0x814] ss:$24 sps:$4 sm:$0xff]  }
  0xe2   : > { %2684 = vmatpush2.bf16.msra.mxu1 %v3723_v22  ;;  %v3817_v22 = vld [vmem:[%s4820_s9 + $0x248] ss:$24 sps:$4 sm:$0xff]  }
  0xe3   : > { %2685 = vmatprep.subr.bf16.mxu1 %v3727_v23  ;;  %v3825_v23 = vld [vmem:[%s4820_s9 + $0x21c] ss:$24 sps:$4 sm:$0xff]  }
  0xe4   : > { %2643 = vmatpush2.bf16.msra.mxu0 %v3726_v24  ;;  %v3820_v24 = vld [vmem:[%s4820_s9 + $0x810] ss:$24 sps:$4 sm:$0xff]  }
  0xe5   : > { %2644 = vmatprep.subr.bf16.mxu0 %v3730_v25  ;;  %v3828_v25 = vld [vmem:[%s4820_s9 + $0x7e4] ss:$24 sps:$4 sm:$0xff]  }
  0xe6   : > { %2686 = vmatpush2.bf16.msra.mxu1 %v3729_v26  ;;  %v3823_v26 = vld [vmem:[%s4820_s9 + $0x218] ss:$24 sps:$4 sm:$0xff]  }
  0xe7   : > { %2687 = vmatprep.subr.bf16.mxu1 %v3733_v27  ;;  %v3831_v27 = vld [vmem:[%s4820_s9 + $0x1ec] ss:$24 sps:$4 sm:$0xff]  }
  0xe8   : > { %2645 = vmatpush2.bf16.msra.mxu0 %v3732_v28  ;;  %v3826_v28 = vld [vmem:[%s4820_s9 + $0x7e0] ss:$24 sps:$4 sm:$0xff]  }
  0xe9   : > { %2646 = vmatprep.subr.bf16.mxu0 %v3736_v29  ;;  %v3834_v29 = vld [vmem:[%s4820_s9 + $0x7b4] ss:$24 sps:$4 sm:$0xff]  }
  0xea   : > { %2688 = vmatpush2.bf16.msra.mxu1 %v3735_v30  ;;  %v3829_v30 = vld [vmem:[%s4820_s9 + $0x1e8] ss:$24 sps:$4 sm:$0xff]  }
  0xeb   : > { %2689 = vmatprep.subr.bf16.mxu1 %v3739_v31  ;;  %v3837_v31 = vld [vmem:[%s4820_s9 + $0x1bc] ss:$24 sps:$4 sm:$0xff]  }
  0xec   : > { %2647 = vmatpush2.bf16.msra.mxu0 %v3738_v34  ;;  %v3832_v34 = vld [vmem:[%s4820_s9 + $0x7b0] ss:$24 sps:$4 sm:$0xff]  }
  0xed   : > { %2702 = vmatprep.subr.bf16.mxu0 %v3747_v36  ;;  %v3840_v36 = vld [vmem:[%s4820_s9 + $0x784] ss:$24 sps:$4 sm:$0xff]  }
  0xee   : > { %2690 = vmatpush2.bf16.msra.mxu1 %v3743_v37  ;;  %v3835_v37 = vld [vmem:[%s4820_s9 + $0x1b8] ss:$24 sps:$4 sm:$0xff]  }
  0xef   : > { %2649 = vmatmul.mubr.bf16.vlgmr.msra.gmra.mxu0 %v4889_v35  ;;  %2745 = vmatprep.subr.bf16.mxu1 %v3753_v39  ;;  %v3843_v39 = vld [vmem:[%s4820_s9 + $0x18c] ss:$24 sps:$4 sm:$0xff]  }
  0xf0   : > { %2703 = vmatpush1.bf16.msra.mxu0 %v3745_v40  ;;  %2734 = vmatprep.mubr.bf16.mxu0 %v4903_v41  ;;  %v3838_v40 = vld [vmem:[%s4820_s9 + $0x780] ss:$24 sps:$4 sm:$0xff]  }
  0xf1   : > { %2692 = vmatmul.mubr.bf16.vlgmr.msra.gmra.mxu1 %v4896_v38  ;;  %2704 = vmatprep.subr.bf16.mxu0 %v3756_v42  ;;  %v3849_v42 = vld [vmem:[%s4820_s9 + $0x45c] ss:$24 sps:$4 sm:$0xff]  }
  0xf2   : > { %2746 = vmatpush1.bf16.msra.mxu1 %v3751_v43  ;;  %2777 = vmatprep.mubr.bf16.mxu1 %v4810_v32  ;;  %v3774_v32 = vld [vmem:[%s4820_s9 + $0x694] ss:$24 sps:$4 sm:$0xff]   ;;  %v3841_v43 = vld [vmem:[%s4820_s9 + $0x188] ss:$24 sps:$4 sm:$0xff]  }
  0xf3   : > { %2747 = vmatprep.subr.bf16.mxu1 %v3759_v44  ;;  %v4974_v44 = vld [vmem:[%s5214_s0 + $0x10] ss:$24 sps:$4 sm:$0xff]  }
  0xf4   : > { %2705 = vmatpush1.bf16.msra.mxu0 %v3754_v45  ;;  %v3852_v45 = vld [vmem:[%s4820_s9 + $0x75c] ss:$24 sps:$4 sm:$0xff]  }
  0xf5   : > { %2706 = vmatprep.subr.bf16.mxu0 %v3762_v46  ;;  %v3847_v46 = vld [vmem:[%s4820_s9 + $0x458] ss:$24 sps:$4 sm:$0xff]  }
  0xf6   : > { %2748 = vmatpush1.bf16.msra.mxu1 %v3757_v47  ;;  %v3855_v47 = vld [vmem:[%s4820_s9 + $0x42c] ss:$24 sps:$4 sm:$0xff]  }
  0xf7   : > { %2749 = vmatprep.subr.bf16.mxu1 %v3765_v48  ;;  %v3850_v48 = vld [vmem:[%s4820_s9 + $0x758] ss:$24 sps:$4 sm:$0xff]  }
  0xf8   : > { %2707 = vmatpush1.bf16.msra.mxu0 %v3760_v49  ;;  %v3858_v49 = vld [vmem:[%s4820_s9 + $0x72c] ss:$24 sps:$4 sm:$0xff]  }
  0xf9   : > { %2708 = vmatprep.subr.bf16.mxu0 %v3768_v50  ;;  %v3853_v50 = vld [vmem:[%s4820_s9 + $0x428] ss:$24 sps:$4 sm:$0xff]  }
  0xfa   : > { %2750 = vmatpush1.bf16.msra.mxu1 %v3763_v51  ;;  %v3861_v51 = vld [vmem:[%s4820_s9 + $0x3fc] ss:$24 sps:$4 sm:$0xff]  }
  0xfb   : > { %2751 = vmatprep.subr.bf16.mxu1 %v3771_v52  ;;  %v3856_v52 = vld [vmem:[%s4820_s9 + $0x728] ss:$24 sps:$4 sm:$0xff]  }
  0xfc   : > { %2709 = vmatpush1.bf16.msra.mxu0 %v3766_v53  ;;  %v3864_v53 = vld [vmem:[%s4820_s9 + $0x6fc] ss:$24 sps:$4 sm:$0xff]  }
  0xfd   : > { %2710 = vmatprep.subr.bf16.mxu0 %v3774_v32  ;;  %v3859_v32 = vld [vmem:[%s4820_s9 + $0x3f8] ss:$24 sps:$4 sm:$0xff]  }
  0xfe   : > { %2752 = vmatpush1.bf16.msra.mxu1 %v3769_v54  ;;  %v3870_v54 = vld [vmem:[%s4820_s9 + $0x6cc] ss:$24 sps:$4 sm:$0xff]  }
  0xff   : > { %2753 = vmatprep.subr.bf16.mxu1 %v3777_v55  ;;  %v3865_v55 = vld [vmem:[%s4820_s9 + $0x3c8] ss:$24 sps:$4 sm:$0xff]  }
 0x100   : > { %2711 = vmatpush1.bf16.msra.mxu0 %v3772_v56  ;;  %v3868_v56 = vld [vmem:[%s4820_s9 + $0x6c8] ss:$24 sps:$4 sm:$0xff]  }
 0x101   : > { %2712 = vmatprep.subr.bf16.mxu0 %v3780_v57  ;;  %v3876_v57 = vld [vmem:[%s4820_s9 + $0x69c] ss:$24 sps:$4 sm:$0xff]  }
 0x102   : > { %2754 = vmatpush1.bf16.msra.mxu1 %v3775_v58  ;;  %v3871_v58 = vld [vmem:[%s4820_s9 + $0x398] ss:$24 sps:$4 sm:$0xff]  }
 0x103   : > { %2755 = vmatprep.subr.bf16.mxu1 %v3783_v59  ;;  %v3879_v59 = vld [vmem:[%s4820_s9 + $0x36c] ss:$24 sps:$4 sm:$0xff]  }
 0x104   : > { %2713 = vmatpush1.bf16.msra.mxu0 %v3778_v60  ;;  %v3874_v60 = vld [vmem:[%s4820_s9 + $0x698] ss:$24 sps:$4 sm:$0xff]  }
 0x105   : > { %2714 = vmatprep.subr.bf16.mxu0 %v3786_v61  ;;  %v3882_v61 = vld [vmem:[%s4820_s9 + $0x66c] ss:$24 sps:$4 sm:$0xff]  }
 0x106   : > { %2756 = vmatpush1.bf16.msra.mxu1 %v3781_v62  ;;  %v3877_v62 = vld [vmem:[%s4820_s9 + $0x368] ss:$24 sps:$4 sm:$0xff]  }
 0x107   : > { %2757 = vmatprep.subr.bf16.mxu1 %v3789_v63  ;;  %v3885_v63 = vld [vmem:[%s4820_s9 + $0x33c] ss:$24 sps:$4 sm:$0xff]  }
 0x108   : > { %2715 = vmatpush1.bf16.msra.mxu0 %v3784_v0  ;;  %v3880_v0 = vld [vmem:[%s4820_s9 + $0x668] ss:$24 sps:$4 sm:$0xff]  }
 0x109   : > { %2716 = vmatprep.subr.bf16.mxu0 %v3792_v1  ;;  %v3888_v1 = vld [vmem:[%s4820_s9 + $0x63c] ss:$24 sps:$4 sm:$0xff]  }
 0x10a   : > { %2758 = vmatpush1.bf16.msra.mxu1 %v3787_v2  ;;  %v3883_v2 = vld [vmem:[%s4820_s9 + $0x338] ss:$24 sps:$4 sm:$0xff]  }
 0x10b   : > { %2759 = vmatprep.subr.bf16.mxu1 %v3795_v3  ;;  %v3891_v3 = vld [vmem:[%s4820_s9 + $0x30c] ss:$24 sps:$4 sm:$0xff]  }
 0x10c   : > { %2717 = vmatpush1.bf16.msra.mxu0 %v3790_v4  ;;  %v3886_v4 = vld [vmem:[%s4820_s9 + $0x638] ss:$24 sps:$4 sm:$0xff]  }
 0x10d   : > { %2718 = vmatprep.subr.bf16.mxu0 %v3798_v5  ;;  %v3894_v5 = vld [vmem:[%s4820_s9 + $0x60c] ss:$24 sps:$4 sm:$0xff]  }
 0x10e   : > { %2760 = vmatpush1.bf16.msra.mxu1 %v3793_v6  ;;  %v3889_v6 = vld [vmem:[%s4820_s9 + $0x308] ss:$24 sps:$4 sm:$0xff]  }
 0x10f   : > { %2761 = vmatprep.subr.bf16.mxu1 %v3801_v7  ;;  %v3897_v7 = vld [vmem:[%s4820_s9 + $0x5dc] ss:$24 sps:$4 sm:$0xff]  }
 0x110   : > { %2719 = vmatpush2.bf16.msra.mxu0 %v3796_v8  ;;  %v3892_v8 = vld [vmem:[%s4820_s9 + $0x608] ss:$24 sps:$4 sm:$0xff]  }
 0x111   : > { %2720 = vmatprep.subr.bf16.mxu0 %v3804_v9  ;;  %v3900_v9 = vld [vmem:[%s4820_s9 + $0x8dc] ss:$24 sps:$4 sm:$0xff]  }
 0x112   : > { %2762 = vmatpush2.bf16.msra.mxu1 %v3799_v10  ;;  %v3895_v10 = vld [vmem:[%s4820_s9 + $0x5d8] ss:$24 sps:$4 sm:$0xff]  }
 0x113   : > { %2763 = vmatprep.subr.bf16.mxu1 %v3807_v11  ;;  %v3903_v11 = vld [vmem:[%s4820_s9 + $0x5ac] ss:$24 sps:$4 sm:$0xff]  }
 0x114   : > { %2721 = vmatpush2.bf16.msra.mxu0 %v3802_v12  ;;  %v3898_v12 = vld [vmem:[%s4820_s9 + $0x8d8] ss:$24 sps:$4 sm:$0xff]  }
 0x115   : > { %2722 = vmatprep.subr.bf16.mxu0 %v3810_v13  ;;  %v3906_v13 = vld [vmem:[%s4820_s9 + $0x8ac] ss:$24 sps:$4 sm:$0xff]  }
 0x116   : > { %2764 = vmatpush2.bf16.msra.mxu1 %v3805_v14  ;;  %v3901_v14 = vld [vmem:[%s4820_s9 + $0x5a8] ss:$24 sps:$4 sm:$0xff]  }
 0x117   : > { %2765 = vmatprep.subr.bf16.mxu1 %v3813_v15  ;;  %v3909_v15 = vld [vmem:[%s4820_s9 + $0x57c] ss:$24 sps:$4 sm:$0xff]  }
 0x118   : > { %2723 = vmatpush2.bf16.msra.mxu0 %v3808_v16  ;;  %v3904_v16 = vld [vmem:[%s4820_s9 + $0x8a8] ss:$24 sps:$4 sm:$0xff]  }
 0x119   : > { %2724 = vmatprep.subr.bf16.mxu0 %v3816_v17  ;;  %v3912_v17 = vld [vmem:[%s4820_s9 + $0x87c] ss:$24 sps:$4 sm:$0xff]  }
 0x11a   : > { %2766 = vmatpush2.bf16.msra.mxu1 %v3811_v18  ;;  %v3907_v18 = vld [vmem:[%s4820_s9 + $0x578] ss:$24 sps:$4 sm:$0xff]  }
 0x11b   : > { %2767 = vmatprep.subr.bf16.mxu1 %v3819_v19  ;;  %v3915_v19 = vld [vmem:[%s4820_s9 + $0x54c] ss:$24 sps:$4 sm:$0xff]  }
 0x11c   : > { %2725 = vmatpush2.bf16.msra.mxu0 %v3814_v20  ;;  %v3910_v20 = vld [vmem:[%s4820_s9 + $0x878] ss:$24 sps:$4 sm:$0xff]  }
 0x11d   : > { %2726 = vmatprep.subr.bf16.mxu0 %v3822_v21  ;;  %v3918_v21 = vld [vmem:[%s4820_s9 + $0x84c] ss:$24 sps:$4 sm:$0xff]  }
 0x11e   : > { %2768 = vmatpush2.bf16.msra.mxu1 %v3817_v22  ;;  %v3913_v22 = vld [vmem:[%s4820_s9 + $0x548] ss:$24 sps:$4 sm:$0xff]  }
 0x11f   : > { %2769 = vmatprep.subr.bf16.mxu1 %v3825_v23  ;;  %v3921_v23 = vld [vmem:[%s4820_s9 + $0x51c] ss:$24 sps:$4 sm:$0xff]  }
 0x120   : > { %2727 = vmatpush2.bf16.msra.mxu0 %v3820_v24  ;;  %v3916_v24 = vld [vmem:[%s4820_s9 + $0x848] ss:$24 sps:$4 sm:$0xff]  }
 0x121   : > { %2728 = vmatprep.subr.bf16.mxu0 %v3828_v25  ;;  %v3924_v25 = vld [vmem:[%s4820_s9 + $0x81c] ss:$24 sps:$4 sm:$0xff]  }
 0x122   : > { %2770 = vmatpush2.bf16.msra.mxu1 %v3823_v26  ;;  %v3919_v26 = vld [vmem:[%s4820_s9 + $0x518] ss:$24 sps:$4 sm:$0xff]  }
 0x123   : > { %2771 = vmatprep.subr.bf16.mxu1 %v3831_v27  ;;  %v3927_v27 = vld [vmem:[%s4820_s9 + $0x4ec] ss:$24 sps:$4 sm:$0xff]  }
 0x124   : > { %2729 = vmatpush2.bf16.msra.mxu0 %v3826_v28  ;;  %v3922_v28 = vld [vmem:[%s4820_s9 + $0x818] ss:$24 sps:$4 sm:$0xff]  }
 0x125   : > { %2730 = vmatprep.subr.bf16.mxu0 %v3834_v29  ;;  %v3930_v29 = vld [vmem:[%s4820_s9 + $0x7ec] ss:$24 sps:$4 sm:$0xff]  }
 0x126   : > { %2772 = vmatpush2.bf16.msra.mxu1 %v3829_v30  ;;  %v3925_v30 = vld [vmem:[%s4820_s9 + $0x4e8] ss:$24 sps:$4 sm:$0xff]  }
 0x127   : > { %2773 = vmatprep.subr.bf16.mxu1 %v3837_v31  ;;  %v3933_v31 = vld [vmem:[%s4820_s9 + $0x4bc] ss:$24 sps:$4 sm:$0xff]  }
 0x128   : > { %2731 = vmatpush2.bf16.msra.mxu0 %v3832_v34  ;;  %v3928_v34 = vld [vmem:[%s4820_s9 + $0x7e8] ss:$24 sps:$4 sm:$0xff]  }
 0x129   : > { %2732 = vmatprep.subr.bf16.mxu0 %v3840_v36  ;;  %v3936_v36 = vld [vmem:[%s4820_s9 + $0x7bc] ss:$24 sps:$4 sm:$0xff]  }
 0x12a   : > { %2774 = vmatpush2.bf16.msra.mxu1 %v3835_v37  ;;  %v3931_v37 = vld [vmem:[%s4820_s9 + $0x4b8] ss:$24 sps:$4 sm:$0xff]  }
 0x12b   : > { %2775 = vmatprep.subr.bf16.mxu1 %v3843_v39  ;;  %v3939_v39 = vld [vmem:[%s4820_s9 + $0x48c] ss:$24 sps:$4 sm:$0xff]  }
 0x12c   : > { %2733 = vmatpush2.bf16.msra.mxu0 %v3838_v40  ;;  %v3934_v40 = vld [vmem:[%s4820_s9 + $0x7b8] ss:$24 sps:$4 sm:$0xff]  }
 0x12d   : > { %2788 = vmatprep.subr.bf16.mxu0 %v3849_v42  ;;  %v3942_v42 = vld [vmem:[%s4820_s9 + $0x78c] ss:$24 sps:$4 sm:$0xff]  }
 0x12e   : > { %2776 = vmatpush2.bf16.msra.mxu1 %v3841_v43  ;;  %v3937_v43 = vld [vmem:[%s4820_s9 + $0x488] ss:$24 sps:$4 sm:$0xff]  }
 0x12f   : > { %2735 = vmatmul.mubr.bf16.vlgmr.msra.gmra.mxu0 %v4974_v44  ;;  %2831 = vmatprep.subr.bf16.mxu1 %v3852_v45  ;;  %v3945_v45 = vld [vmem:[%s4820_s9 + $0x164] ss:$24 sps:$4 sm:$0xff]  }
 0x130   : > { %2789 = vmatpush1.bf16.msra.mxu0 %v3847_v46  ;;  %2820 = vmatprep.mubr.bf16.mxu0 %v4818_v33  ;;  %v3867_v33 = vld [vmem:[%s4820_s9 + $0x3cc] ss:$24 sps:$4 sm:$0xff]   ;;  %v3940_v46 = vld [vmem:[%s4820_s9 + $0x788] ss:$24 sps:$4 sm:$0xff]  }
 0x131   : > { %2778 = vmatmul.mubr.bf16.vlgmr.msra.gmra.mxu1 %v4889_v35  ;;  %2790 = vmatprep.subr.bf16.mxu0 %v3855_v47  ;;  %v3862_v35 = vld [vmem:[%s4820_s9 + $0x6f8] ss:$24 sps:$4 sm:$0xff]   ;;  %v3948_v47 = vld [vmem:[%s4820_s9 + $0x464] ss:$24 sps:$4 sm:$0xff]  }
 0x132   : > { %2832 = vmatpush1.bf16.msra.mxu1 %v3850_v48  ;;  %2863 = vmatprep.mubr.bf16.mxu1 %v4903_v41  ;;  %v3873_v41 = vld [vmem:[%s4820_s9 + $0x39c] ss:$24 sps:$4 sm:$0xff]   ;;  %v3943_v48 = vld [vmem:[%s4820_s9 + $0x160] ss:$24 sps:$4 sm:$0xff]  }
 0x133   : > { %2833 = vmatprep.subr.bf16.mxu1 %v3858_v49  ;;  %v3951_v49 = vld [vmem:[%s4820_s9 + $0x134] ss:$24 sps:$4 sm:$0xff]  }
 0x134   : > { %2791 = vmatpush1.bf16.msra.mxu0 %v3853_v50  ;;  %v3946_v50 = vld [vmem:[%s4820_s9 + $0x460] ss:$24 sps:$4 sm:$0xff]  }
 0x135   : > { %2792 = vmatprep.subr.bf16.mxu0 %v3861_v51  ;;  %v3954_v51 = vld [vmem:[%s4820_s9 + $0x434] ss:$24 sps:$4 sm:$0xff]  }
 0x136   : > { %2834 = vmatpush1.bf16.msra.mxu1 %v3856_v52  ;;  %v3949_v52 = vld [vmem:[%s4820_s9 + $0x130] ss:$24 sps:$4 sm:$0xff]  }
 0x137   : > { %2835 = vmatprep.subr.bf16.mxu1 %v3864_v53  ;;  %v4111_v53 = vld [vmem:[%s5214_s0 + $0x4] ss:$24 sps:$4 sm:$0xff]  }
 0x138   : > { %2793 = vmatpush1.bf16.msra.mxu0 %v3859_v32  ;;  %v3957_v32 = vld [vmem:[%s4820_s9 + $0x104] ss:$24 sps:$4 sm:$0xff]  }
 0x139   : > { %2794 = vmatprep.subr.bf16.mxu0 %v3867_v33  ;;  %v4112_v33 = vld [vmem:[%s5214_s0 + $0xc] ss:$24 sps:$4 sm:$0xff]  }
 0x13a   : > { %2836 = vmatpush1.bf16.msra.mxu1 %v3862_v35  ;;  %v3960_v35 = vld [vmem:[%s4820_s9 + $0x404] ss:$24 sps:$4 sm:$0xff]  }
 0x13b   : > { %2837 = vmatprep.subr.bf16.mxu1 %v3870_v54  ;;  %v3955_v54 = vld [vmem:[%s4820_s9 + $0x100] ss:$24 sps:$4 sm:$0xff]  }
 0x13c   : > { %2795 = vmatpush1.bf16.msra.mxu0 %v3865_v55  ;;  %v3963_v55 = vld [vmem:[%s4820_s9 + $0xd4] ss:$24 sps:$4 sm:$0xff]  }
 0x13d   : > { %2796 = vmatprep.subr.bf16.mxu0 %v3873_v41  ;;  %v3958_v41 = vld [vmem:[%s4820_s9 + $0x400] ss:$24 sps:$4 sm:$0xff]  }
 0x13e   : > { %2838 = vmatpush1.bf16.msra.mxu1 %v3868_v56  ;;  %v3966_v56 = vld [vmem:[%s4820_s9 + $0x3d4] ss:$24 sps:$4 sm:$0xff]  }
 0x13f   : > { %2839 = vmatprep.subr.bf16.mxu1 %v3876_v57  ;;  %v3961_v57 = vld [vmem:[%s4820_s9 + $0xd0] ss:$24 sps:$4 sm:$0xff]  }
 0x140   : > { %2797 = vmatpush1.bf16.msra.mxu0 %v3871_v58  ;;  %v3969_v58 = vld [vmem:[%s4820_s9 + $0xa4] ss:$24 sps:$4 sm:$0xff]  }
 0x141   : > { %2798 = vmatprep.subr.bf16.mxu0 %v3879_v59  ;;  %v3964_v59 = vld [vmem:[%s4820_s9 + $0x3d0] ss:$24 sps:$4 sm:$0xff]  }
 0x142   : > { %2840 = vmatpush1.bf16.msra.mxu1 %v3874_v60  ;;  %v3972_v60 = vld [vmem:[%s4820_s9 + $0x3a4] ss:$24 sps:$4 sm:$0xff]  }
 0x143   : > { %2841 = vmatprep.subr.bf16.mxu1 %v3882_v61  ;;  %v3967_v61 = vld [vmem:[%s4820_s9 + $0xa0] ss:$24 sps:$4 sm:$0xff]  }
 0x144   : > { %2799 = vmatpush1.bf16.msra.mxu0 %v3877_v62  ;;  %v3975_v62 = vld [vmem:[%s4820_s9 + $0x74] ss:$24 sps:$4 sm:$0xff]  }
 0x145   : > { %2800 = vmatprep.subr.bf16.mxu0 %v3885_v63  ;;  %v3970_v63 = vld [vmem:[%s4820_s9 + $0x3a0] ss:$24 sps:$4 sm:$0xff]  }
 0x146   : > { %2842 = vmatpush1.bf16.msra.mxu1 %v3880_v0  ;;  %v3978_v0 = vld [vmem:[%s4820_s9 + $0x374] ss:$24 sps:$4 sm:$0xff]  }
 0x147   : > { %2843 = vmatprep.subr.bf16.mxu1 %v3888_v1  ;;  %v3973_v1 = vld [vmem:[%s4820_s9 + $0x70] ss:$24 sps:$4 sm:$0xff]  }
 0x148   : > { %2801 = vmatpush1.bf16.msra.mxu0 %v3883_v2  ;;  %v3981_v2 = vld [vmem:[%s4820_s9 + $0x44] ss:$24 sps:$4 sm:$0xff]  }
 0x149   : > { %2802 = vmatprep.subr.bf16.mxu0 %v3891_v3  ;;  %v3976_v3 = vld [vmem:[%s4820_s9 + $0x370] ss:$24 sps:$4 sm:$0xff]  }
 0x14a   : > { %2844 = vmatpush1.bf16.msra.mxu1 %v3886_v4  ;;  %v3984_v4 = vld [vmem:[%s4820_s9 + $0x344] ss:$24 sps:$4 sm:$0xff]  }
 0x14b   : > { %2845 = vmatprep.subr.bf16.mxu1 %v3894_v5  ;;  %v3979_v5 = vld [vmem:[%s4820_s9 + $0x40] ss:$24 sps:$4 sm:$0xff]  }
 0x14c   : > { %2803 = vmatpush1.bf16.msra.mxu0 %v3889_v6  ;;  %v3987_v6 = vld [vmem:[%s4820_s9 + $0x14] ss:$24 sps:$4 sm:$0xff]  }
 0x14d   : > { %2804 = vmatprep.subr.bf16.mxu0 %v3897_v7  ;;  %v3982_v7 = vld [vmem:[%s4820_s9 + $0x340] ss:$24 sps:$4 sm:$0xff]  }
 0x14e   : > { %2846 = vmatpush1.bf16.msra.mxu1 %v3892_v8  ;;  %v3990_v8 = vld [vmem:[%s4820_s9 + $0x314] ss:$24 sps:$4 sm:$0xff]  }
 0x14f   : > { %2847 = vmatprep.subr.bf16.mxu1 %v3900_v9  ;;  %v3985_v9 = vld [vmem:[%s4820_s9 + $0x10] ss:$24 sps:$4 sm:$0xff]  }
 0x150   : > { %2805 = vmatpush2.bf16.msra.mxu0 %v3895_v10  ;;  %v3993_v10 = vld [vmem:[%s4820_s9 + $0x2e4] ss:$24 sps:$4 sm:$0xff]  }
 0x151   : > { %2806 = vmatprep.subr.bf16.mxu0 %v3903_v11  ;;  %v3988_v11 = vld [vmem:[%s4820_s9 + $0x310] ss:$24 sps:$4 sm:$0xff]  }
 0x152   : > { %2848 = vmatpush2.bf16.msra.mxu1 %v3898_v12  ;;  %v3996_v12 = vld [vmem:[%s4820_s9 + $0x5e4] ss:$24 sps:$4 sm:$0xff]  }
 0x153   : > { %2849 = vmatprep.subr.bf16.mxu1 %v3906_v13  ;;  %v3991_v13 = vld [vmem:[%s4820_s9 + $0x2e0] ss:$24 sps:$4 sm:$0xff]  }
 0x154   : > { %2807 = vmatpush2.bf16.msra.mxu0 %v3901_v14  ;;  %v3999_v14 = vld [vmem:[%s4820_s9 + $0x2b4] ss:$24 sps:$4 sm:$0xff]  }
 0x155   : > { %2808 = vmatprep.subr.bf16.mxu0 %v3909_v15  ;;  %v3994_v15 = vld [vmem:[%s4820_s9 + $0x5e0] ss:$24 sps:$4 sm:$0xff]  }
 0x156   : > { %2850 = vmatpush2.bf16.msra.mxu1 %v3904_v16  ;;  %v4002_v16 = vld [vmem:[%s4820_s9 + $0x5b4] ss:$24 sps:$4 sm:$0xff]  }
 0x157   : > { %2851 = vmatprep.subr.bf16.mxu1 %v3912_v17  ;;  %v3997_v17 = vld [vmem:[%s4820_s9 + $0x2b0] ss:$24 sps:$4 sm:$0xff]  }
 0x158   : > { %2809 = vmatpush2.bf16.msra.mxu0 %v3907_v18  ;;  %v4005_v18 = vld [vmem:[%s4820_s9 + $0x284] ss:$24 sps:$4 sm:$0xff]  }
 0x159   : > { %2810 = vmatprep.subr.bf16.mxu0 %v3915_v19  ;;  %v4000_v19 = vld [vmem:[%s4820_s9 + $0x5b0] ss:$24 sps:$4 sm:$0xff]  }
 0x15a   : > { %2852 = vmatpush2.bf16.msra.mxu1 %v3910_v20  ;;  %v4008_v20 = vld [vmem:[%s4820_s9 + $0x584] ss:$24 sps:$4 sm:$0xff]  }
 0x15b   : > { %2853 = vmatprep.subr.bf16.mxu1 %v3918_v21  ;;  %v4003_v21 = vld [vmem:[%s4820_s9 + $0x280] ss:$24 sps:$4 sm:$0xff]  }
 0x15c   : > { %2811 = vmatpush2.bf16.msra.mxu0 %v3913_v22  ;;  %v4011_v22 = vld [vmem:[%s4820_s9 + $0x254] ss:$24 sps:$4 sm:$0xff]  }
 0x15d   : > { %2812 = vmatprep.subr.bf16.mxu0 %v3921_v23  ;;  %v4006_v23 = vld [vmem:[%s4820_s9 + $0x580] ss:$24 sps:$4 sm:$0xff]  }
 0x15e   : > { %2854 = vmatpush2.bf16.msra.mxu1 %v3916_v24  ;;  %v4014_v24 = vld [vmem:[%s4820_s9 + $0x554] ss:$24 sps:$4 sm:$0xff]  }
 0x15f   : > { %2855 = vmatprep.subr.bf16.mxu1 %v3924_v25  ;;  %v4009_v25 = vld [vmem:[%s4820_s9 + $0x250] ss:$24 sps:$4 sm:$0xff]  }
 0x160   : > { %2813 = vmatpush2.bf16.msra.mxu0 %v3919_v26  ;;  %v4017_v26 = vld [vmem:[%s4820_s9 + $0x224] ss:$24 sps:$4 sm:$0xff]  }
 0x161   : > { %2814 = vmatprep.subr.bf16.mxu0 %v3927_v27  ;;  %v4012_v27 = vld [vmem:[%s4820_s9 + $0x550] ss:$24 sps:$4 sm:$0xff]  }
 0x162   : > { %2856 = vmatpush2.bf16.msra.mxu1 %v3922_v28  ;;  %v4020_v28 = vld [vmem:[%s4820_s9 + $0x524] ss:$24 sps:$4 sm:$0xff]  }
 0x163   : > { %2857 = vmatprep.subr.bf16.mxu1 %v3930_v29  ;;  %v4015_v29 = vld [vmem:[%s4820_s9 + $0x220] ss:$24 sps:$4 sm:$0xff]  }
 0x164   : > { %2815 = vmatpush2.bf16.msra.mxu0 %v3925_v30  ;;  %v4023_v30 = vld [vmem:[%s4820_s9 + $0x1f4] ss:$24 sps:$4 sm:$0xff]  }
 0x165   : > { %2816 = vmatprep.subr.bf16.mxu0 %v3933_v31  ;;  %v4018_v31 = vld [vmem:[%s4820_s9 + $0x520] ss:$24 sps:$4 sm:$0xff]  }
 0x166   : > { %2858 = vmatpush2.bf16.msra.mxu1 %v3928_v34  ;;  %v4026_v34 = vld [vmem:[%s4820_s9 + $0x4f4] ss:$24 sps:$4 sm:$0xff]  }
 0x167   : > { %2859 = vmatprep.subr.bf16.mxu1 %v3936_v36  ;;  %v4021_v36 = vld [vmem:[%s4820_s9 + $0x1f0] ss:$24 sps:$4 sm:$0xff]  }
 0x168   : > { %2817 = vmatpush2.bf16.msra.mxu0 %v3931_v37  ;;  %v4029_v37 = vld [vmem:[%s4820_s9 + $0x1c4] ss:$24 sps:$4 sm:$0xff]  }
 0x169   : > { %2818 = vmatprep.subr.bf16.mxu0 %v3939_v39  ;;  %v4024_v39 = vld [vmem:[%s4820_s9 + $0x4f0] ss:$24 sps:$4 sm:$0xff]  }
 0x16a   : > { %2860 = vmatpush2.bf16.msra.mxu1 %v3934_v40  ;;  %v4032_v40 = vld [vmem:[%s4820_s9 + $0x4c4] ss:$24 sps:$4 sm:$0xff]  }
 0x16b   : > { %2861 = vmatprep.subr.bf16.mxu1 %v3942_v42  ;;  %v4027_v42 = vld [vmem:[%s4820_s9 + $0x1c0] ss:$24 sps:$4 sm:$0xff]  }
 0x16c   : > { %2819 = vmatpush2.bf16.msra.mxu0 %v3937_v43  ;;  %v4035_v43 = vld [vmem:[%s4820_s9 + $0x194] ss:$24 sps:$4 sm:$0xff]  }
 0x16d   : > { %2874 = vmatprep.subr.bf16.mxu0 %v3945_v45  ;;  %v4030_v45 = vld [vmem:[%s4820_s9 + $0x4c0] ss:$24 sps:$4 sm:$0xff]  }
 0x16e   : > { %2862 = vmatpush2.bf16.msra.mxu1 %v3940_v46  ;;  %v4038_v46 = vld [vmem:[%s4820_s9 + $0x494] ss:$24 sps:$4 sm:$0xff]  }
 0x16f   : > { %2821 = vmatmul.mubr.bf16.vlgmr.msra.gmra.mxu0 %v4896_v38  ;;  %2917 = vmatprep.subr.bf16.mxu1 %v3948_v47  ;;  %v3952_v38 = vld [vmem:[%s4820_s9 + $0x430] ss:$24 sps:$4 sm:$0xff]  }
 0x170   : > { %2875 = vmatpush1.bf16.msra.mxu0 %v3943_v48  ;;  %2906 = vmatprep.mubr.bf16.mxu0 %v4111_v53  ;;  %v4033_v47 = vld [vmem:[%s4820_s9 + $0x190] ss:$24 sps:$4 sm:$0xff]   ;;  %v4041_v48 = vld [vmem:[%s4820_s9 + $0x764] ss:$24 sps:$4 sm:$0xff]  }
 0x171   : > { %2864 = vmatmul.mubr.bf16.vlgmr.msra.gmra.mxu1 %v4974_v44  ;;  %2876 = vmatprep.subr.bf16.mxu0 %v3951_v49  ;;  %v4036_v49 = vld [vmem:[%s4820_s9 + $0x490] ss:$24 sps:$4 sm:$0xff]  }
 0x172   : > { %2918 = vmatpush1.bf16.msra.mxu1 %v3946_v50  ;;  %2949 = vmatprep.mubr.bf16.mxu1 %v4112_v33  ;;  %v4039_v50 = vld [vmem:[%s4820_s9 + $0x760] ss:$24 sps:$4 sm:$0xff]   ;;  %v4042_v53 = vld [vmem:[%s4820_s9 + $0x730] ss:$24 sps:$4 sm:$0xff]   ;;  %v4047_v33 = vld [vmem:[%s4820_s9 + $0x704] ss:$24 sps:$4 sm:$0xff]  }
 0x173   : > { %2919 = vmatprep.subr.bf16.mxu1 %v3954_v51  ;;  %v4044_v51 = vld [vmem:[%s4820_s9 + $0x734] ss:$24 sps:$4 sm:$0xff]  }
 0x174   : > { %2877 = vmatpush1.bf16.msra.mxu0 %v3949_v52  ;;  %v4113_v52 = vld [vmem:[%s5214_s0] ss:$24 sps:$4 sm:$0xff]  }
 0x175   : > { %2878 = vmatprep.subr.bf16.mxu0 %v3957_v32  ;;  %v4114_v32 = vld [vmem:[%s5214_s0 + $0x14] ss:$24 sps:$4 sm:$0xff]  }
 0x176   : > { %2920 = vmatpush1.bf16.msra.mxu1 %v3952_v38  ;;  %v4115_v38 = vld [vmem:[%s5214_s0 + $0x8] ss:$24 sps:$4 sm:$0xff]  }
 0x177   : > { %2921 = vmatprep.subr.bf16.mxu1 %v3960_v35  ;;  %v4045_v35 = vld [vmem:[%s4820_s9 + $0x700] ss:$24 sps:$4 sm:$0xff]  }
 0x178   : > { %2879 = vmatpush1.bf16.msra.mxu0 %v3955_v54  ;;  %v4050_v54 = vld [vmem:[%s4820_s9 + $0x6d4] ss:$24 sps:$4 sm:$0xff]  }
 0x179   : > { %2880 = vmatprep.subr.bf16.mxu0 %v3963_v55  ;;  %v4048_v55 = vld [vmem:[%s4820_s9 + $0x6d0] ss:$24 sps:$4 sm:$0xff]  }
 0x17a   : > { %2922 = vmatpush1.bf16.msra.mxu1 %v3958_v41  ;;  %v4053_v41 = vld [vmem:[%s4820_s9 + $0x6a4] ss:$24 sps:$4 sm:$0xff]  }
 0x17b   : > { %2923 = vmatprep.subr.bf16.mxu1 %v3966_v56  ;;  %v4051_v56 = vld [vmem:[%s4820_s9 + $0x6a0] ss:$24 sps:$4 sm:$0xff]  }
 0x17c   : > { %2881 = vmatpush1.bf16.msra.mxu0 %v3961_v57  ;;  %v4056_v57 = vld [vmem:[%s4820_s9 + $0x674] ss:$24 sps:$4 sm:$0xff]  }
 0x17d   : > { %2882 = vmatprep.subr.bf16.mxu0 %v3969_v58  ;;  %v4054_v58 = vld [vmem:[%s4820_s9 + $0x670] ss:$24 sps:$4 sm:$0xff]  }
 0x17e   : > { %2924 = vmatpush1.bf16.msra.mxu1 %v3964_v59  ;;  %v4059_v59 = vld [vmem:[%s4820_s9 + $0x644] ss:$24 sps:$4 sm:$0xff]  }
 0x17f   : > { %2925 = vmatprep.subr.bf16.mxu1 %v3972_v60  ;;  %v4057_v60 = vld [vmem:[%s4820_s9 + $0x640] ss:$24 sps:$4 sm:$0xff]  }
 0x180   : > { %2883 = vmatpush1.bf16.msra.mxu0 %v3967_v61  ;;  %v4062_v61 = vld [vmem:[%s4820_s9 + $0x614] ss:$24 sps:$4 sm:$0xff]  }
 0x181   : > { %2884 = vmatprep.subr.bf16.mxu0 %v3975_v62  ;;  %v4060_v62 = vld [vmem:[%s4820_s9 + $0x610] ss:$24 sps:$4 sm:$0xff]  }
 0x182   : > { %2926 = vmatpush1.bf16.msra.mxu1 %v3970_v63  ;;  %v4065_v63 = vld [vmem:[%s4820_s9 + $0x8e4] ss:$24 sps:$4 sm:$0xff]  }
 0x183   : > { %2927 = vmatprep.subr.bf16.mxu1 %v3978_v0  ;;  %v4063_v0 = vld [vmem:[%s4820_s9 + $0x8e0] ss:$24 sps:$4 sm:$0xff]  }
 0x184   : > { %2885 = vmatpush1.bf16.msra.mxu0 %v3973_v1  ;;  %v4068_v1 = vld [vmem:[%s4820_s9 + $0x8b4] ss:$24 sps:$4 sm:$0xff]  }
 0x185   : > { %2886 = vmatprep.subr.bf16.mxu0 %v3981_v2  ;;  %v4066_v2 = vld [vmem:[%s4820_s9 + $0x8b0] ss:$24 sps:$4 sm:$0xff]  }
 0x186   : > { %2928 = vmatpush1.bf16.msra.mxu1 %v3976_v3  ;;  %v4071_v3 = vld [vmem:[%s4820_s9 + $0x884] ss:$24 sps:$4 sm:$0xff]  }
 0x187   : > { %2929 = vmatprep.subr.bf16.mxu1 %v3984_v4  ;;  %v4069_v4 = vld [vmem:[%s4820_s9 + $0x880] ss:$24 sps:$4 sm:$0xff]  }
 0x188   : > { %2887 = vmatpush1.bf16.msra.mxu0 %v3979_v5  ;;  %v4074_v5 = vld [vmem:[%s4820_s9 + $0x854] ss:$24 sps:$4 sm:$0xff]  }
 0x189   : > { %2888 = vmatprep.subr.bf16.mxu0 %v3987_v6  ;;  %v4072_v6 = vld [vmem:[%s4820_s9 + $0x850] ss:$24 sps:$4 sm:$0xff]  }
 0x18a   : > { %2930 = vmatpush1.bf16.msra.mxu1 %v3982_v7  ;;  %v4077_v7 = vld [vmem:[%s4820_s9 + $0x824] ss:$24 sps:$4 sm:$0xff]  }
 0x18b   : > { %2931 = vmatprep.subr.bf16.mxu1 %v3990_v8  ;;  %v1116_v8 = vlaneseq }
 0x18c   : > { %2889 = vmatpush1.bf16.msra.mxu0 %v3985_v9  ;;  %v4075_v9 = vld [vmem:[%s4820_s9 + $0x820] ss:$24 sps:$4 sm:$0xff]  }
 0x18d   : > { %2890 = vmatprep.subr.bf16.mxu0 %v3993_v10  ;;  %v4080_v10 = vld [vmem:[%s4820_s9 + $0x7f4] ss:$24 sps:$4 sm:$0xff]  }
 0x18e   : > { %2932 = vmatpush1.bf16.msra.mxu1 %v3988_v11  ;;  %v5152_v11 = vshrl.u32 %v1116_v8, 7 }
 0x18f   : > { %2933 = vmatprep.subr.bf16.mxu1 %v3996_v12  ;;  %v4078_v12 = vld [vmem:[%s4820_s9 + $0x7f0] ss:$24 sps:$4 sm:$0xff]  }
 0x190   : > { %2891 = vmatpush2.bf16.msra.mxu0 %v3991_v13 }
 0x191   : > { %2892 = vmatprep.subr.bf16.mxu0 %v3999_v14  ;;  %v4083_v14 = vld [vmem:[%s4820_s9 + $0x7c4] ss:$24 sps:$4 sm:$0xff]  }
 0x192   : > { %2934 = vmatpush2.bf16.msra.mxu1 %v3994_v15  ;;  %v1118_v15 = vsub.s32 0, %v5152_v11 }
 0x193   : > { %2935 = vmatprep.subr.bf16.mxu1 %v4002_v16  ;;  %v5160_v16 = vld [vmem:[%s816_s20] sm:$0x3f] }
 0x194   : > { %2893 = vmatpush2.bf16.msra.mxu0 %v3997_v17  ;;  %v1122_v17 = vsub.s32 1, %v5152_v11 }
 0x195   : > { %2894 = vmatprep.subr.bf16.mxu0 %v4005_v18  ;;  %v4081_v18 = vld [vmem:[%s4820_s9 + $0x7c0] ss:$24 sps:$4 sm:$0xff]  }
 0x196   : > { %2936 = vmatpush2.bf16.msra.mxu1 %v4000_v19 }
 0x197   : > { %2937 = vmatprep.subr.bf16.mxu1 %v4008_v20  ;;  %v4086_v20 = vld [vmem:[%s4820_s9 + $0x794] ss:$24 sps:$4 sm:$0xff]  }
 0x198   : > { %2895 = vmatpush2.bf16.msra.mxu0 %v4003_v21  ;;  %v1119_v21 = vrot.slane %v5160_v16, %v1118_v15 }
 0x199   : > { %2896 = vmatprep.subr.bf16.mxu0 %v4011_v22 }
 0x19a   : > { %2938 = vmatpush2.bf16.msra.mxu1 %v4006_v23  ;;  %v1123_v23 = vrot.slane %v5160_v16, %v1122_v17 }
 0x19b   : > { %2939 = vmatprep.subr.bf16.mxu1 %v4014_v24  ;;  %v4084_v24 = vld [vmem:[%s4820_s9 + $0x790] ss:$24 sps:$4 sm:$0xff]   ;;  %s3605_s9 = smul.u32 48, %s773_s30 }
 0x19c   : > { %2897 = vmatpush2.bf16.msra.mxu0 %v4009_v25 }
 0x19d   : > { %2898 = vmatprep.subr.bf16.mxu0 %v4017_v26  ;;  %s5171_s23 = scalar_lea.vmem [#allocation3], %s3605_s9 }
 0x19e   : > { %2940 = vmatpush2.bf16.msra.mxu1 %v4012_v27 }
 0x19f   : > { %2941 = vmatprep.subr.bf16.mxu1 %v4020_v28 }
 0x1a0   : > { %2899 = vmatpush2.bf16.msra.mxu0 %v4015_v29 }
 0x1a1   : > { %2900 = vmatprep.subr.bf16.mxu0 %v4023_v30 }
 0x1a2   : > { %2942 = vmatpush2.bf16.msra.mxu1 %v4018_v31 }
 0x1a3   : > { %2943 = vmatprep.subr.bf16.mxu1 %v4026_v34 }
 0x1a4   : > { %2901 = vmatpush2.bf16.msra.mxu0 %v4021_v36 }
 0x1a5   : > { %2902 = vmatprep.subr.bf16.mxu0 %v4029_v37 }
 0x1a6   : > { %2944 = vmatpush2.bf16.msra.mxu1 %v4024_v39 }
 0x1a7   : > { %2945 = vmatprep.subr.bf16.mxu1 %v4032_v40 }
 0x1a8   : > { %2903 = vmatpush2.bf16.msra.mxu0 %v4027_v42 }
 0x1a9   : > { %2904 = vmatprep.subr.bf16.mxu0 %v4035_v43 }
 0x1aa   : > { %2946 = vmatpush2.bf16.msra.mxu1 %v4030_v45 }
 0x1ab   : > { %2947 = vmatprep.subr.bf16.mxu1 %v4038_v46 }
 0x1ac   : > { %2905 = vmatpush2.bf16.msra.mxu0 %v4033_v47 }
 0x1ad   : > { %2960 = vmatprep.subr.bf16.mxu0 %v4041_v48 }
 0x1ae   : > { %2948 = vmatpush2.bf16.msra.mxu1 %v4036_v49 }
 0x1af   : > { %2907 = vmatmul.mubr.bf16.vlgmr.msra.gmra.mxu0 %v4113_v52  ;;  %v2650_v13 = vpop.f32.mrf.mxu0 }
 0x1b0   : > { %2961 = vmatpush1.bf16.msra.mxu0 %v4039_v50  ;;  %2992 = vmatprep.mubr.bf16.mxu0 %v4114_v32  ;;  %v2651_v26 = vadd.f32 %v2650_v13, %v1119_v21 }
 0x1b1   : > { %2950 = vmatmul.mubr.bf16.vlgmr.msra.gmra.mxu1 %v4115_v38  ;;  %2962 = vmatprep.subr.bf16.mxu0 %v4044_v51  ;;  %v2652_v19 = vpop.f32.mrf.mxu0  ;;  %v2693_v22 = vpop.f32.mrf.mxu1 }
 0x1b2   : > { %v2653_v28 = vadd.f32 %v2652_v19, %v1123_v23  ;;  %v2694_v30 = vadd.f32 %v2693_v22, %v2651_v26 }
 0x1b3   : > { %v2654_v25 = vpop.f32.mrf.mxu0  ;;  %v2695_v27 = vpop.f32.mrf.mxu1 }
 0x1b4   : > { %2963 = vmatpush1.bf16.msra.mxu0 %v4042_v53  ;;  %v2655_v31 = vadd.f32 %v2654_v25, %v1119_v21  ;;  %v2696_v37 = vadd.f32 %v2695_v27, %v2653_v28  ;;  %v1130_v25 = vsub.s32 3, %v5152_v11 }
 0x1b5   : > { %2964 = vmatprep.subr.bf16.mxu0 %v4047_v33  ;;  %v2656_v29 = vpop.f32.mrf.mxu0  ;;  %v2697_v34 = vpop.f32.mrf.mxu1 }
 0x1b6   : > { %v2657_v40 = vadd.f32 %v2656_v29, %v1123_v23  ;;  %v2698_v43 = vadd.f32 %v2697_v34, %v2655_v31  ;;  %v1126_v23 = vsub.s32 2, %v5152_v11  ;;  %v1131_v28 = vrot.slane %v5160_v16, %v1130_v25 }
 0x1b7   : > { %v2699_v45 = vpop.f32.mrf.mxu1 }
 0x1b8   : > { %2965 = vmatpush1.bf16.msra.mxu0 %v4045_v35  ;;  %v2700_v52 = vadd.f32 %v2699_v45, %v2657_v40  ;;  %v1127_v26 = vrot.slane %v5160_v16, %v1126_v23 }
 0x1b9   : > { %2966 = vmatprep.subr.bf16.mxu0 %v4050_v54 }
 0x1bc   : > { %2967 = vmatpush1.bf16.msra.mxu0 %v4048_v55 }
 0x1bd   : > { %2968 = vmatprep.subr.bf16.mxu0 %v4053_v41 }
 0x1c0   : > { %2969 = vmatpush1.bf16.msra.mxu0 %v4051_v56 }
 0x1c1   : > { %2970 = vmatprep.subr.bf16.mxu0 %v4056_v57 }
 0x1c4   : > { %2971 = vmatpush1.bf16.msra.mxu0 %v4054_v58 }
 0x1c5   : > { %2972 = vmatprep.subr.bf16.mxu0 %v4059_v59 }
 0x1c8   : > { %2973 = vmatpush1.bf16.msra.mxu0 %v4057_v60 }
 0x1c9   : > { %2974 = vmatprep.subr.bf16.mxu0 %v4062_v61 }
 0x1cc   : > { %2975 = vmatpush1.bf16.msra.mxu0 %v4060_v62 }
 0x1cd   : > { %2976 = vmatprep.subr.bf16.mxu0 %v4065_v63 }
 0x1d0   : > { %2977 = vmatpush2.bf16.msra.mxu0 %v4063_v0 }
 0x1d1   : > { %2978 = vmatprep.subr.bf16.mxu0 %v4068_v1 }
 0x1d4   : > { %2979 = vmatpush2.bf16.msra.mxu0 %v4066_v2 }
 0x1d5   : > { %2980 = vmatprep.subr.bf16.mxu0 %v4071_v3 }
 0x1d8   : > { %2981 = vmatpush2.bf16.msra.mxu0 %v4069_v4 }
 0x1d9   : > { %2982 = vmatprep.subr.bf16.mxu0 %v4074_v5 }
 0x1dc   : > { %2983 = vmatpush2.bf16.msra.mxu0 %v4072_v6 }
 0x1dd   : > { %2984 = vmatprep.subr.bf16.mxu0 %v4077_v7 }
 0x1e0   : > { %2985 = vmatpush2.bf16.msra.mxu0 %v4075_v9 }
 0x1e1   : > { %2986 = vmatprep.subr.bf16.mxu0 %v4080_v10 }
 0x1e4   : > { %2987 = vmatpush2.bf16.msra.mxu0 %v4078_v12 }
 0x1e5   : > { %2988 = vmatprep.subr.bf16.mxu0 %v4083_v14 }
 0x1e8   : > { %2989 = vmatpush2.bf16.msra.mxu0 %v4081_v18 }
 0x1e9   : > { %2990 = vmatprep.subr.bf16.mxu0 %v4086_v20 }
 0x1ec   : > { %2991 = vmatpush2.bf16.msra.mxu0 %v4084_v24 }
 0x1ef   : > { %v2736_v36 = vpop.f32.mrf.mxu0  ;;  %2993 = vmatmul.mubr.bf16.vlgmr.msra.gmra.mxu0 %v4974_v44 }
 0x1f0   : > { %v2737_v39 = vadd.f32 %v2736_v36, %v2694_v30 }
 0x1f1   : > { %v2738_v42 = vpop.f32.mrf.mxu0  ;;  %v2779_v22 = vpop.f32.mrf.mxu1 }
 0x1f2   : > { %v3015_v46 = vmul.f32 0.044715, %v2737_v39  ;;  %v2739_v47 = vadd.f32 %v2738_v42, %v2696_v37  ;;  %v3003_v5 = vmul.f32 0.5, %v2737_v39  ;;  %v2780_v29 = vadd.f32 %v2779_v22, %v1127_v26 }
 0x1f3   : > { %v2740_v48 = vpop.f32.mrf.mxu0  ;;  %v2781_v24 = vpop.f32.mrf.mxu1 }
 0x1f4   : > { %v3027_v49 = vmul.f32 %v3015_v46, %v2737_v39  ;;  %v3016_v50 = vmul.f32 0.044715, %v2739_v47  ;;  %v2741_v51 = vadd.f32 %v2740_v48, %v2698_v43  ;;  %v3004_v6 = vmul.f32 0.5, %v2739_v47 }
 0x1f5   : > { %v2742_v53 = vpop.f32.mrf.mxu0  ;;  %v2783_v27 = vpop.f32.mrf.mxu1  ;;  %v2782_v31 = vadd.f32 %v2781_v24, %v1131_v28 }
 0x1f6   : > { %v3039_v32 = vmul.f32 %v3027_v49, %v2737_v39  ;;  %v3028_v38 = vmul.f32 %v3016_v50, %v2739_v47  ;;  %v3021_v33 = vmul.f32 0.044715, %v2741_v51  ;;  %v2743_v35 = vadd.f32 %v2742_v53, %v2700_v52 }
 0x1f7   : > { %v3009_v15 = vmul.f32 0.5, %v2741_v51  ;;  %v2785_v30 = vpop.f32.mrf.mxu1  ;;  %v2784_v40 = vadd.f32 %v2783_v27, %v1127_v26  ;;  %v1134_v27 = vsub.s32 4, %v5152_v11 }
 0x1f8   : > { %v3051_v54 = vadd.f32 %v3039_v32, %v2737_v39  ;;  %v3040_v44 = vmul.f32 %v3028_v38, %v2739_v47  ;;  %v3033_v55 = vmul.f32 %v3021_v33, %v2741_v51  ;;  %v3022_v41 = vmul.f32 0.044715, %v2743_v35 }
 0x1f9   : > { %v3010_v17 = vmul.f32 0.5, %v2743_v35 }
 0x1fa   : > { %v3063_v56 = vmul.f32 0.7978846, %v3051_v54  ;;  %v3052_v57 = vadd.f32 %v3040_v44, %v2739_v47  ;;  %v3045_v58 = vmul.f32 %v3033_v55, %v2741_v51  ;;  %v3034_v59 = vmul.f32 %v3022_v41, %v2743_v35 }
 0x1fb   : > { %v2786_v47 = vadd.f32 %v2785_v30, %v1131_v28  ;;  %v1138_v28 = vsub.s32 5, %v5152_v11  ;;  %v1135_v30 = vrot.slane %v5160_v16, %v1134_v27 }
 0x1fc   : > { %4087 = vtanh.f32 %v3063_v56  ;;  %v3064_v60 = vmul.f32 0.7978846, %v3052_v57  ;;  %v3057_v61 = vadd.f32 %v3045_v58, %v2741_v51  ;;  %v3046_v62 = vmul.f32 %v3034_v59, %v2743_v35 }
 0x1fe   : > { %4089 = vtanh.f32 %v3064_v60  ;;  %v3069_v63 = vmul.f32 0.7978846, %v3057_v61  ;;  %v3058_v0 = vadd.f32 %v3046_v62, %v2743_v35 }
 0x200   : > { %4091 = vtanh.f32 %v3069_v63  ;;  %v3070_v1 = vmul.f32 0.7978846, %v3058_v0 }
 0x202   : > { %4093 = vtanh.f32 %v3070_v1 }
 0x209   : > { %v4088_v2 = vpop.eup %4087 }
 0x20a   : > { %v3087_v3 = vadd.f32 1.0, %v4088_v2 }
 0x20b   : > { %v4090_v4 = vpop.eup %4089 }
 0x20c   : > { %v3088_v7 = vadd.f32 1.0, %v4090_v4  ;;  %v3099_v9 = vmul.f32 %v3087_v3, %v3003_v5 }
 0x20d   : > { %v4092_v8 = vpop.eup %4091 }
 0x20e   : > { %v3100_v10 = vmul.f32 %v3088_v7, %v3004_v6  ;;  %v3093_v12 = vadd.f32 1.0, %v4092_v8 }
 0x20f   : > { %v4094_v13 = vpop.eup %4093 }
 0x210   : > { %v3596_v14 = vpack.c.bf16 %v3100_v10, %v3099_v9  ;;  %v3094_v18 = vadd.f32 1.0, %v4094_v13  ;;  %v3105_v19 = vmul.f32 %v3093_v12, %v3009_v15 }
 0x212   : > { %3147 = vst [vmem:[%s5171_s23] sm:$0xff] %v3596_v14  ;;  %v3106_v20 = vmul.f32 %v3094_v18, %v3010_v17 }
 0x214   : > { %v3599_v21 = vpack.c.bf16 %v3106_v20, %v3105_v19 }
 0x216   : > { %3150 = vst [vmem:[%s5171_s23 + $0x18] sm:$0xff] %v3599_v21 }
 0x22f   : > { %v2822_v34 = vpop.f32.mrf.mxu0 }
 0x230   : > { %v2823_v36 = vadd.f32 %v2822_v34, %v2780_v29  ;;  %v1139_v34 = vrot.slane %v5160_v16, %v1138_v28  ;;  %v3178_v28 = vld [vmem:[%s5171_s23] sm:$0xff] (%p4211_p6) }
 0x231   : > { %v2824_v37 = vpop.f32.mrf.mxu0  ;;  %v2865_v39 = vpop.f32.mrf.mxu1  ;;  %3179 = vst [vmem:[%s3165_s25] sm:$0xff] (%p4211_p6), %v3178_v28 }
 0x232   : > { %v2825_v42 = vadd.f32 %v2824_v37, %v2782_v31  ;;  %v2866_v43 = vadd.f32 %v2865_v39, %v2823_v36 }
 0x233   : > { %v2826_v45 = vpop.f32.mrf.mxu0  ;;  %v2867_v46 = vpop.f32.mrf.mxu1 }
 0x234   : > { %v3017_v48 = vmul.f32 0.044715, %v2866_v43  ;;  %v2827_v49 = vadd.f32 %v2826_v45, %v2784_v40  ;;  %v2868_v50 = vadd.f32 %v2867_v46, %v2825_v42  ;;  %v3005_v9 = vmul.f32 0.5, %v2866_v43 }
 0x235   : > { %v2828_v51 = vpop.f32.mrf.mxu0  ;;  %v2869_v52 = vpop.f32.mrf.mxu1 }
 0x236   : > { %v3029_v53 = vmul.f32 %v3017_v48, %v2866_v43  ;;  %v3018_v32 = vmul.f32 0.044715, %v2868_v50  ;;  %v2829_v38 = vadd.f32 %v2828_v51, %v2786_v47  ;;  %v2870_v33 = vadd.f32 %v2869_v52, %v2827_v49 }
 0x237   : > { %v2871_v35 = vpop.f32.mrf.mxu1  ;;  %v3006_v10 = vmul.f32 0.5, %v2868_v50 }
 0x238   : > { %v3041_v54 = vmul.f32 %v3029_v53, %v2866_v43  ;;  %v3030_v44 = vmul.f32 %v3018_v32, %v2868_v50  ;;  %v2872_v55 = vadd.f32 %v2871_v35, %v2829_v38  ;;  %v3023_v41 = vmul.f32 0.044715, %v2870_v33 }
 0x239   : > { %v3011_v20 = vmul.f32 0.5, %v2870_v33 }
 0x23a   : > { %v3053_v56 = vadd.f32 %v3041_v54, %v2866_v43  ;;  %v3042_v57 = vmul.f32 %v3030_v44, %v2868_v50  ;;  %v3024_v58 = vmul.f32 0.044715, %v2872_v55  ;;  %v3035_v59 = vmul.f32 %v3023_v41, %v2870_v33 }
 0x23b   : > { %v3012_v21 = vmul.f32 0.5, %v2872_v55 }
 0x23c   : > { %v3065_v60 = vmul.f32 0.7978846, %v3053_v56  ;;  %v3054_v61 = vadd.f32 %v3042_v57, %v2868_v50  ;;  %v3036_v62 = vmul.f32 %v3024_v58, %v2872_v55  ;;  %v3047_v63 = vmul.f32 %v3035_v59, %v2870_v33 }
 0x23e   : > { %4095 = vtanh.f32 %v3065_v60  ;;  %v3066_v0 = vmul.f32 0.7978846, %v3054_v61  ;;  %v3048_v1 = vmul.f32 %v3036_v62, %v2872_v55  ;;  %v3059_v2 = vadd.f32 %v3047_v63, %v2870_v33 }
 0x240   : > { %4097 = vtanh.f32 %v3066_v0  ;;  %v3060_v3 = vadd.f32 %v3048_v1, %v2872_v55  ;;  %v3071_v4 = vmul.f32 0.7978846, %v3059_v2 }
 0x242   : > { %v3072_v5 = vmul.f32 0.7978846, %v3060_v3  ;;  %4099 = vtanh.f32 %v3071_v4 }
 0x244   : > { %4101 = vtanh.f32 %v3072_v5 }
 0x24b   : > { %v4096_v6 = vpop.eup %4095 }
 0x24c   : > { %v3089_v7 = vadd.f32 1.0, %v4096_v6 }
 0x24d   : > { %v4098_v8 = vpop.eup %4097 }
 0x24e   : > { %v3090_v12 = vadd.f32 1.0, %v4098_v8  ;;  %v3101_v14 = vmul.f32 %v3089_v7, %v3005_v9 }
 0x24f   : > { %v4100_v13 = vpop.eup %4099 }
 0x250   : > { %v3102_v15 = vmul.f32 %v3090_v12, %v3006_v10  ;;  %v3095_v18 = vadd.f32 1.0, %v4100_v13 }
 0x251   : > { %v4102_v17 = vpop.eup %4101 }
 0x252   : > { %v3597_v19 = vpack.c.bf16 %v3102_v15, %v3101_v14  ;;  %v3096_v22 = vadd.f32 1.0, %v4102_v17  ;;  %v3107_v23 = vmul.f32 %v3095_v18, %v3011_v20 }
 0x254   : > { %3148 = vst [vmem:[%s5171_s23 + $0x8] sm:$0xff] %v3597_v19  ;;  %v3108_v24 = vmul.f32 %v3096_v22, %v3012_v21 }
 0x256   : > { %v3600_v25 = vpack.c.bf16 %v3108_v24, %v3107_v23 }
 0x258   : > { %3151 = vst [vmem:[%s5171_s23 + $0x20] sm:$0xff] %v3600_v25 }
 0x26f   : > { %v2908_v26 = vpop.f32.mrf.mxu0 }
 0x270   : > { %v2909_v37 = vadd.f32 %v2908_v26, %v1135_v30 }
 0x271   : > { %v2910_v29 = vpop.f32.mrf.mxu0  ;;  %v2951_v31 = vpop.f32.mrf.mxu1 }
 0x272   : > { %v2911_v40 = vadd.f32 %v2910_v29, %v1139_v34  ;;  %v2952_v43 = vadd.f32 %v2951_v31, %v2909_v37  ;;  %v3180_v29 = vld [vmem:[%s5171_s23 + $0x8] sm:$0xff] (%p4211_p6)  ;;  %v3184_v31 = vld [vmem:[%s5171_s23 + $0x18] sm:$0xff] (%p4211_p6) }
 0x273   : > { %v2912_v36 = vpop.f32.mrf.mxu0  ;;  %v2953_v39 = vpop.f32.mrf.mxu1  ;;  %3181 = vst [vmem:[%s3165_s25 + $0x8] sm:$0xff] (%p4211_p6), %v3180_v29  ;;  %3185 = vst [vmem:[%s3165_s25 + $0x60] sm:$0xff] (%p4211_p6), %v3184_v31 }
 0x274   : > { %v2913_v45 = vadd.f32 %v2912_v36, %v1135_v30  ;;  %v2954_v48 = vadd.f32 %v2953_v39, %v2911_v40 }
 0x275   : > { %v2914_v42 = vpop.f32.mrf.mxu0  ;;  %v2955_v46 = vpop.f32.mrf.mxu1 }
 0x276   : > { %v2915_v50 = vadd.f32 %v2914_v42, %v1139_v34  ;;  %v2956_v11 = vadd.f32 %v2955_v46, %v2913_v45  ;;  %v3186_v34 = vld [vmem:[%s5171_s23 + $0x20] sm:$0xff] (%p4211_p6) }
 0x277   : > { %v2957_v52 = vpop.f32.mrf.mxu1  ;;  %3187 = vst [vmem:[%s3165_s25 + $0x68] sm:$0xff] (%p4211_p6), %v3186_v34 }
 0x278   : > { %v2958_v54 = vadd.f32 %v2957_v52, %v2915_v50 }
 0x2af   : > { %v2994_v47 = vpop.f32.mrf.mxu0 }
 0x2b0   : > { %v2995_v49 = vadd.f32 %v2994_v47, %v2952_v43 }
 0x2b1   : > { %v2996_v51 = vpop.f32.mrf.mxu0 }
 0x2b2   : > { %v3019_v53 = vmul.f32 0.044715, %v2995_v49  ;;  %v2997_v32 = vadd.f32 %v2996_v51, %v2954_v48  ;;  %v3007_v12 = vmul.f32 0.5, %v2995_v49 }
 0x2b3   : > { %v2998_v38 = vpop.f32.mrf.mxu0 }
 0x2b4   : > { %v3031_v33 = vmul.f32 %v3019_v53, %v2995_v49  ;;  %v3020_v16 = vmul.f32 0.044715, %v2997_v32  ;;  %v2999_v35 = vadd.f32 %v2998_v38, %v2956_v11  ;;  %v3008_v13 = vmul.f32 0.5, %v2997_v32 }
 0x2b5   : > { %v3000_v44 = vpop.f32.mrf.mxu0 }
 0x2b6   : > { %v3043_v55 = vmul.f32 %v3031_v33, %v2995_v49  ;;  %v3032_v41 = vmul.f32 %v3020_v16, %v2997_v32  ;;  %v3025_v56 = vmul.f32 0.044715, %v2999_v35  ;;  %v3001_v57 = vadd.f32 %v3000_v44, %v2958_v54 }
 0x2b7   : > { %v3013_v22 = vmul.f32 0.5, %v2999_v35 }
 0x2b8   : > { %v3055_v58 = vadd.f32 %v3043_v55, %v2995_v49  ;;  %v3044_v59 = vmul.f32 %v3032_v41, %v2997_v32  ;;  %v3037_v60 = vmul.f32 %v3025_v56, %v2999_v35  ;;  %v3026_v61 = vmul.f32 0.044715, %v3001_v57 }
 0x2b9   : > { %v3014_v23 = vmul.f32 0.5, %v3001_v57 }
 0x2ba   : > { %v3067_v62 = vmul.f32 0.7978846, %v3055_v58  ;;  %v3056_v63 = vadd.f32 %v3044_v59, %v2997_v32  ;;  %v3049_v0 = vmul.f32 %v3037_v60, %v2999_v35  ;;  %v3038_v1 = vmul.f32 %v3026_v61, %v3001_v57 }
 0x2bc   : > { %4103 = vtanh.f32 %v3067_v62  ;;  %v3068_v2 = vmul.f32 0.7978846, %v3056_v63  ;;  %v3061_v3 = vadd.f32 %v3049_v0, %v2999_v35  ;;  %v3050_v4 = vmul.f32 %v3038_v1, %v3001_v57 }
 0x2be   : > { %4105 = vtanh.f32 %v3068_v2  ;;  %v3073_v5 = vmul.f32 0.7978846, %v3061_v3  ;;  %v3062_v6 = vadd.f32 %v3050_v4, %v3001_v57 }
 0x2c0   : > { %4107 = vtanh.f32 %v3073_v5  ;;  %v3074_v7 = vmul.f32 0.7978846, %v3062_v6 }
 0x2c2   : > { %4109 = vtanh.f32 %v3074_v7 }
 0x2c9   : > { %v4104_v8 = vpop.eup %4103 }
 0x2ca   : > { %v3091_v9 = vadd.f32 1.0, %v4104_v8 }
 0x2cb   : > { %v4106_v10 = vpop.eup %4105 }
 0x2cc   : > { %v3092_v14 = vadd.f32 1.0, %v4106_v10  ;;  %v3103_v17 = vmul.f32 %v3091_v9, %v3007_v12 }
 0x2cd   : > { %v4108_v15 = vpop.eup %4107 }
 0x2ce   : > { %v3104_v18 = vmul.f32 %v3092_v14, %v3008_v13  ;;  %v3097_v19 = vadd.f32 1.0, %v4108_v15 }
 0x2cf   : > { %v4110_v20 = vpop.eup %4109 }
 0x2d0   : > { %v3598_v21 = vpack.c.bf16 %v3104_v18, %v3103_v17  ;;  %v3098_v24 = vadd.f32 1.0, %v4110_v20  ;;  %v3109_v25 = vmul.f32 %v3097_v19, %v3013_v22 }
 0x2d2   : > { %3149 = vst [vmem:[%s5171_s23 + $0x10] sm:$0xff] %v3598_v21  ;;  %v3110_v26 = vmul.f32 %v3098_v24, %v3014_v23  ;;  %3159 = sbr.rel (!%p4211_p6) target bundleno = 735 (0x2df), region = 59 }
 0x2d4   : > { %v3601_v27 = vpack.c.bf16 %v3110_v26, %v3109_v25 }
 0x2d6   : > { %3152 = vst [vmem:[%s5171_s23 + $0x28] sm:$0xff] %v3601_v27 }
 0x2d9   : > { %v3182_v30 = vld [vmem:[%s5171_s23 + $0x10] sm:$0xff] }
 0x2da   : > { %3183 = vst [vmem:[%s3165_s25 + $0x10] sm:$0xff] %v3182_v30 }
 0x2dd   : > { %v3188_v36 = vld [vmem:[%s5171_s23 + $0x28] sm:$0xff] }
 0x2de   : > { %3189 = vst [vmem:[%s3165_s25 + $0x70] sm:$0xff] %v3188_v36 }
 0x2df PF: > { %s13_s16 = sadd.s32 1, %s4154_s16   ;;  %s5219_s12 = smov %s4142_s13 }
 0x2e0   : > { %p10_p12 = scmp.ge.s32.totalorder %s13_s16, 6   ;;  %s5220_s13 = smov %s4216_s22 }
 0x2e1   : > { %s5221_s14 = smov %s4150_s15  ;;  %s5222_s15 = smov %s5224_s17 }
 0x2e2   :  { %12 = sbr.rel (!%p10_p12) target bundleno = 3 (0x3), region = 119 }

// kernel: metaphor_forward.16
= control target key start
LH: loop header
LB: loop body
LE: loop exit
PB: predicated region body
PF: predicated region fallthrough
CT: control target
= control target key end

     0   :  { %s3839_s21 = smov 0   ;;  %s3841_s22 = smov 0   ;;  %s4330_s0 = inlined_call_operand.vmem [shape: bf16[16,3072], index: 0, kind: input, shape index: {}]   ;;  %s4331_s1 = inlined_call_operand.vmem [shape: bf16[3072,768], index: 1, kind: input, shape index: {}]   ;;  %s4332_s2 = inlined_call_operand.vmem [shape: f32[1,768], index: 2, kind: input, shape index: {}]   ;;  %s4333_s3 = inlined_call_operand.vmem [shape: bf16[16,768], index: 3, kind: input, shape index: {}]   ;;  %s4334_s4 = inlined_call_operand.vmem [shape: f32[1,768], index: 4, kind: input, shape index: {}]   ;;  %s4335_s5 = inlined_call_operand.vmem [shape: f32[1,768], index: 5, kind: input, shape index: {}]   ;;  %s4336_s6 = inlined_call_operand.vmem [shape: bf16[16,768], index: 6, kind: output, shape index: {}]  }
   0x1   :  { %s3843_s23 = smov 0   ;;  %s3845_s24 = smov 0  }
   0x2   :  { %s3847_s25 = smov 0  }
   0x3 LB: > { %s25_s26 = sadd.s32 1, %s3797_s24  ;;  %p44_p1 = scmp.ne.s32.totalorder %s3789_s22, %s3785_s21  ;;  %s3801_s25 = sphi %s3847_s25, %s16_s25   ;;  %s3797_s24 = sphi %s3845_s24, %s4340_s24   ;;  %s3793_s23 = sphi %s3843_s23, %s4339_s23   ;;  %s3789_s22 = sphi %s3841_s22, %s4338_s22   ;;  %s3785_s21 = sphi %s3839_s21, %s4337_s21  }
   0x4   : > { %p26_p0 = scmp.ge.s32.totalorder %s25_s26, 4  ;;  %p45_p2 = scmp.eq.s32.totalorder %s3801_s25, 0 }
   0x5   : > { %s37_s28 = sadd.s32 1, %s3789_s22  ;;  %p2953_p5 = scmp.ge.s32.totalorder %s3801_s25, 4 }
   0x6   : > { %s4342_s26 = smov (%p26_p0, %s25_s26), 0  ;;  %p46_p3 = por %p45_p2, %p44_p1 }
   0x7   : > { %s33_s27 = ssub.s32 %s3797_s24, %s4342_s26  ;;  %230 = sbr.rel (%p2953_p5) target bundleno = 20 (0x14), region = 32 }
   0x8   : > { %p35_p4 = scmp.eq.s32.totalorder %s33_s27, 0 }
   0xa   : > { %s3874_s29 = scalar_select %p35_p4, %s3789_s22, %s37_s28  }
   0xc   : > { %233 = sbr.rel (!%p46_p3) target bundleno = 20 (0x14), region = 36  ;;  %s235_s30 = sand.u32 (%p46_p3), 1, %s3789_s22  }
   0xd   : > { %s3263_s7 = smul.u32 (%p46_p3), 24, %s3797_s24 }
   0xe   : > { %s3270_s8 = smul.u32 (%p46_p3), 48, %s235_s30 }
   0xf   : > { %s243_s11 = scalar_lea.vmem (%p46_p3), %s4330_s0, %s3263_s7 }
  0x10   : > { %v256_v0 = vld [vmem:[%s243_s11] sm:$0xff] (%p46_p3)  ;;  %v258_v1 = vld [vmem:[%s243_s11 + $0x8] sm:$0xff] (%p46_p3)  ;;  %v260_v2 = vld [vmem:[%s243_s11 + $0x10] sm:$0xff] (%p46_p3)  ;;  %s237_s12 = scalar_lea.vmem (%p46_p3), [#allocation3], %s3270_s8 }
  0x11   : > { %257 = vst [vmem:[%s237_s12] sm:$0xff] %v256_v0  ;;  %259 = vst [vmem:[%s237_s12 + $0x8] sm:$0xff] %v258_v1  ;;  %v262_v3 = vld [vmem:[%s243_s11 + $0x60] sm:$0xff]  ;;  %v264_v4 = vld [vmem:[%s243_s11 + $0x68] sm:$0xff] }
  0x12   : > { %261 = vst [vmem:[%s237_s12 + $0x10] sm:$0xff] %v260_v2  ;;  %v266_v5 = vld [vmem:[%s243_s11 + $0x70] sm:$0xff]  ;;  %263 = vst [vmem:[%s237_s12 + $0x18] sm:$0xff] %v262_v3 }
  0x13   : > { %265 = vst [vmem:[%s237_s12 + $0x20] sm:$0xff] %v264_v4  ;;  %267 = vst [vmem:[%s237_s12 + $0x28] sm:$0xff] %v266_v5 }
  0x14 PF: > { %p2955_p6 = scmp.ge.s32.totalorder %s3801_s25, 1  ;;  %p282_p7 = scmp.lt.s32.totalorder %s3801_s25, 5 }
  0x16   : > { %p283_p8 = pnand %p2955_p6, %p282_p7 }
  0x17   : > { %s289_s13 = sand.u32 (!%p283_p8), 1, %s3785_s21   ;;  %s333_s14 = smul.u32 (!%p283_p8), 96, %s3793_s23 }
  0x18   : > { %286 = sbr.rel (%p283_p8) target bundleno = 914 (0x392), region = 63  ;;  %p2957_p10 = scmp.ne.s32.totalorder (!%p283_p8), %s3793_s23, 0 }
  0x19   : > { %s3271_s15 = smul.u32 (!%p283_p8), 48, %s289_s13  ;;  %p334_p9 = scmp.lt.s32.totalorder (!%p283_p8), %s333_s14, 383 }
  0x1b   : > { %s3891_s20 = scalar_lea.vmem (!%p283_p8), [#allocation3], %s3271_s15 }
  0x1d   : > { %s4344_s14 = smov (!%p334_p9, %s333_s14), 383  ;;  %357 = sbr.rel (%p2957_p10) target bundleno = 41 (0x29), region = 71 }
  0x1e   : > { %s3272_s16 = smul.u32 24, %s4344_s14 }
  0x20   : > { %s3889_s19 = scalar_lea.vmem %s4331_s1, %s3272_s16 }
  0x22   : > { %v3803_v6 = vmov 0.0  }
  0x23   : > { %358 = vst [vmem:[#allocation2 + $0x30] sm:$0xff] %v3803_v6  ;;  %359 = vst [vmem:[#allocation2] sm:$0xff] %v3803_v6 }
  0x24   : > { %360 = vst [vmem:[#allocation2 + $0x58] sm:$0xff] %v3803_v6  ;;  %361 = vst [vmem:[#allocation2 + $0x18] sm:$0xff] %v3803_v6 }
  0x25   : > { %362 = vst [vmem:[#allocation2 + $0x50] sm:$0xff] %v3803_v6  ;;  %363 = vst [vmem:[#allocation2 + $0x20] sm:$0xff] %v3803_v6 }
  0x26   : > { %364 = vst [vmem:[#allocation2 + $0x8] sm:$0xff] %v3803_v6  ;;  %365 = vst [vmem:[#allocation2 + $0x38] sm:$0xff] %v3803_v6 }
  0x27   : > { %366 = vst [vmem:[#allocation2 + $0x28] sm:$0xff] %v3803_v6  ;;  %367 = vst [vmem:[#allocation2 + $0x48] sm:$0xff] %v3803_v6 }
  0x28   : > { %368 = vst [vmem:[#allocation2 + $0x10] sm:$0xff] %v3803_v6  ;;  %369 = vst [vmem:[#allocation2 + $0x40] sm:$0xff] %v3803_v6 }
  0x29 PF: > { %v3314_v7 = vld [vmem:[%s3889_s19 + $0x154] ss:$24 sps:$4 sm:$0xff]   ;;  %v3318_v9 = vld [vmem:[%s3889_s19 + $0x150] ss:$24 sps:$4 sm:$0xff]   ;;  %v3320_v11 = vld [vmem:[%s3889_s19 + $0x124] ss:$24 sps:$4 sm:$0xff]  }
  0x2a   : > { %v3316_v8 = vld [vmem:[%s3889_s19 + $0x454] ss:$24 sps:$4 sm:$0xff]   ;;  %2146 = vmatprep.subr.bf16.mxu0 %v3314_v7  ;;  %v3319_v10 = vld [vmem:[%s3889_s19 + $0x450] ss:$24 sps:$4 sm:$0xff]   ;;  %v3322_v12 = vld [vmem:[%s3889_s19 + $0x424] ss:$24 sps:$4 sm:$0xff]  }
  0x2b   : > { %2189 = vmatprep.subr.bf16.mxu1 %v3316_v8  ;;  %2147 = vmatpush1.bf16.msra.mxu0 %v3318_v9  ;;  %v3324_v13 = vld [vmem:[%s3889_s19 + $0x120] ss:$24 sps:$4 sm:$0xff]   ;;  %v3326_v15 = vld [vmem:[%s3889_s19 + $0xf4] ss:$24 sps:$4 sm:$0xff]   ;;  %v3330_v17 = vld [vmem:[%s3889_s19 + $0xf0] ss:$24 sps:$4 sm:$0xff]  }
  0x2c   : > { %2190 = vmatpush1.bf16.msra.mxu1 %v3319_v10  ;;  %2148 = vmatprep.subr.bf16.mxu0 %v3320_v11  ;;  %v3325_v14 = vld [vmem:[%s3889_s19 + $0x420] ss:$24 sps:$4 sm:$0xff]   ;;  %v3328_v16 = vld [vmem:[%s3889_s19 + $0x3f4] ss:$24 sps:$4 sm:$0xff]   ;;  %v3331_v18 = vld [vmem:[%s3889_s19 + $0x3f0] ss:$24 sps:$4 sm:$0xff]  }
  0x2d   : > { %2191 = vmatprep.subr.bf16.mxu1 %v3322_v12  ;;  %v3332_v19 = vld [vmem:[%s3889_s19 + $0xc4] ss:$24 sps:$4 sm:$0xff]   ;;  %v3336_v21 = vld [vmem:[%s3889_s19 + $0xc0] ss:$24 sps:$4 sm:$0xff]   ;;  %v3338_v23 = vld [vmem:[%s3889_s19 + $0x94] ss:$24 sps:$4 sm:$0xff]  }
  0x2e   : > { %v3334_v20 = vld [vmem:[%s3889_s19 + $0x3c4] ss:$24 sps:$4 sm:$0xff]   ;;  %v3337_v22 = vld [vmem:[%s3889_s19 + $0x3c0] ss:$24 sps:$4 sm:$0xff]   ;;  %v3340_v24 = vld [vmem:[%s3889_s19 + $0x394] ss:$24 sps:$4 sm:$0xff]  }
  0x2f   : > { %2149 = vmatpush1.bf16.msra.mxu0 %v3324_v13  ;;  %v3342_v25 = vld [vmem:[%s3889_s19 + $0x90] ss:$24 sps:$4 sm:$0xff]   ;;  %v3344_v27 = vld [vmem:[%s3889_s19 + $0x64] ss:$24 sps:$4 sm:$0xff]   ;;  %v3348_v29 = vld [vmem:[%s3889_s19 + $0x60] ss:$24 sps:$4 sm:$0xff]  }
  0x30   : > { %2192 = vmatpush1.bf16.msra.mxu1 %v3325_v14  ;;  %2150 = vmatprep.subr.bf16.mxu0 %v3326_v15  ;;  %v3343_v26 = vld [vmem:[%s3889_s19 + $0x390] ss:$24 sps:$4 sm:$0xff]   ;;  %v3346_v28 = vld [vmem:[%s3889_s19 + $0x364] ss:$24 sps:$4 sm:$0xff]   ;;  %v3349_v30 = vld [vmem:[%s3889_s19 + $0x360] ss:$24 sps:$4 sm:$0xff]  }
  0x31   : > { %2193 = vmatprep.subr.bf16.mxu1 %v3328_v16  ;;  %v3350_v31 = vld [vmem:[%s3889_s19 + $0x34] ss:$24 sps:$4 sm:$0xff]   ;;  %v3354_v33 = vld [vmem:[%s3889_s19 + $0x30] ss:$24 sps:$4 sm:$0xff]   ;;  %v3356_v35 = vld [vmem:[%s3889_s19 + $0x4] ss:$24 sps:$4 sm:$0xff]  }
  0x32   : > { %v3352_v32 = vld [vmem:[%s3889_s19 + $0x334] ss:$24 sps:$4 sm:$0xff]   ;;  %v3355_v34 = vld [vmem:[%s3889_s19 + $0x330] ss:$24 sps:$4 sm:$0xff]   ;;  %v3358_v36 = vld [vmem:[%s3889_s19 + $0x304] ss:$24 sps:$4 sm:$0xff]  }
  0x33   : > { %2151 = vmatpush1.bf16.msra.mxu0 %v3330_v17  ;;  %v3360_v37 = vld [vmem:[%s3889_s19] ss:$24 sps:$4 sm:$0xff]   ;;  %v3362_v39 = vld [vmem:[%s3889_s19 + $0x2d4] ss:$24 sps:$4 sm:$0xff]   ;;  %v3366_v41 = vld [vmem:[%s3889_s19 + $0x2d0] ss:$24 sps:$4 sm:$0xff]  }
  0x34   : > { %2194 = vmatpush1.bf16.msra.mxu1 %v3331_v18  ;;  %2152 = vmatprep.subr.bf16.mxu0 %v3332_v19  ;;  %v3361_v38 = vld [vmem:[%s3889_s19 + $0x300] ss:$24 sps:$4 sm:$0xff]   ;;  %v3364_v40 = vld [vmem:[%s3889_s19 + $0x5d4] ss:$24 sps:$4 sm:$0xff]   ;;  %v3367_v42 = vld [vmem:[%s3889_s19 + $0x5d0] ss:$24 sps:$4 sm:$0xff]  }
  0x35   : > { %2195 = vmatprep.subr.bf16.mxu1 %v3334_v20  ;;  %v3368_v43 = vld [vmem:[%s3889_s19 + $0x2a4] ss:$24 sps:$4 sm:$0xff]   ;;  %v3372_v45 = vld [vmem:[%s3889_s19 + $0x2a0] ss:$24 sps:$4 sm:$0xff]   ;;  %v3374_v47 = vld [vmem:[%s3889_s19 + $0x274] ss:$24 sps:$4 sm:$0xff]  }
  0x36   : > { %v3370_v44 = vld [vmem:[%s3889_s19 + $0x5a4] ss:$24 sps:$4 sm:$0xff]   ;;  %v3373_v46 = vld [vmem:[%s3889_s19 + $0x5a0] ss:$24 sps:$4 sm:$0xff]   ;;  %v3376_v48 = vld [vmem:[%s3889_s19 + $0x574] ss:$24 sps:$4 sm:$0xff]  }
  0x37   : > { %2153 = vmatpush1.bf16.msra.mxu0 %v3336_v21  ;;  %v3378_v49 = vld [vmem:[%s3889_s19 + $0x270] ss:$24 sps:$4 sm:$0xff]   ;;  %v3380_v51 = vld [vmem:[%s3889_s19 + $0x244] ss:$24 sps:$4 sm:$0xff]   ;;  %v3384_v53 = vld [vmem:[%s3889_s19 + $0x240] ss:$24 sps:$4 sm:$0xff]  }
  0x38   : > { %2196 = vmatpush1.bf16.msra.mxu1 %v3337_v22  ;;  %2154 = vmatprep.subr.bf16.mxu0 %v3338_v23  ;;  %v3379_v50 = vld [vmem:[%s3889_s19 + $0x570] ss:$24 sps:$4 sm:$0xff]   ;;  %v3382_v52 = vld [vmem:[%s3889_s19 + $0x544] ss:$24 sps:$4 sm:$0xff]   ;;  %v3385_v54 = vld [vmem:[%s3889_s19 + $0x540] ss:$24 sps:$4 sm:$0xff]  }
  0x39   : > { %2197 = vmatprep.subr.bf16.mxu1 %v3340_v24  ;;  %v3410_v55 = vld [vmem:[%s3891_s20 + $0x4] ss:$24 sps:$4 sm:$0xff]   ;;  %v3390_v59 = vld [vmem:[%s3889_s19 + $0x210] ss:$24 sps:$4 sm:$0xff]   ;;  %v3396_v63 = vld [vmem:[%s3889_s19 + $0x1e0] ss:$24 sps:$4 sm:$0xff]  }
  0x3a   : > { %v3386_v56 = vld [vmem:[%s3889_s19 + $0x214] ss:$24 sps:$4 sm:$0xff]   ;;  %2178 = vmatprep.mubr.bf16.mxu0 %v3410_v55  ;;  %v3391_v60 = vld [vmem:[%s3889_s19 + $0x510] ss:$24 sps:$4 sm:$0xff]   ;;  %v3392_v61 = vld [vmem:[%s3889_s19 + $0x1e4] ss:$24 sps:$4 sm:$0xff]  }
  0x3b   : > { %2155 = vmatpush1.bf16.msra.mxu0 %v3342_v25  ;;  %v3945_v57 = vld [vmem:[%s3891_s20 + $0xc] ss:$24 sps:$4 sm:$0xff]   ;;  %v3397_v0 = vld [vmem:[%s3889_s19 + $0x4e0] ss:$24 sps:$4 sm:$0xff]   ;;  %v3402_v3 = vld [vmem:[%s3889_s19 + $0x1b0] ss:$24 sps:$4 sm:$0xff]  }
  0x3c   : > { %2198 = vmatpush1.bf16.msra.mxu1 %v3343_v26  ;;  %2156 = vmatprep.subr.bf16.mxu0 %v3344_v27  ;;  %v3388_v58 = vld [vmem:[%s3889_s19 + $0x514] ss:$24 sps:$4 sm:$0xff]   ;;  %v3394_v62 = vld [vmem:[%s3889_s19 + $0x4e4] ss:$24 sps:$4 sm:$0xff]   ;;  %v3403_v4 = vld [vmem:[%s3889_s19 + $0x4b0] ss:$24 sps:$4 sm:$0xff]  }
  0x3d   : > { %2199 = vmatprep.subr.bf16.mxu1 %v3346_v28  ;;  %2221 = vmatprep.mubr.bf16.mxu1 %v3945_v57  ;;  %v3398_v1 = vld [vmem:[%s3889_s19 + $0x1b4] ss:$24 sps:$4 sm:$0xff]   ;;  %v3404_v5 = vld [vmem:[%s3889_s19 + $0x184] ss:$24 sps:$4 sm:$0xff]   ;;  %v3408_v7 = vld [vmem:[%s3889_s19 + $0x180] ss:$24 sps:$4 sm:$0xff]  }
  0x3e   : > { %v3400_v2 = vld [vmem:[%s3889_s19 + $0x4b4] ss:$24 sps:$4 sm:$0xff]   ;;  %v3406_v6 = vld [vmem:[%s3889_s19 + $0x484] ss:$24 sps:$4 sm:$0xff]   ;;  %v3409_v8 = vld [vmem:[%s3889_s19 + $0x480] ss:$24 sps:$4 sm:$0xff]  }
  0x3f   : > { %2157 = vmatpush1.bf16.msra.mxu0 %v3348_v29  ;;  %v3418_v9 = vld [vmem:[%s3889_s19 + $0x754] ss:$24 sps:$4 sm:$0xff]   ;;  %v3966_v11 = vld [vmem:[%s3891_s20] ss:$24 sps:$4 sm:$0xff]   ;;  %v3424_v15 = vld [vmem:[%s3889_s19 + $0x724] ss:$24 sps:$4 sm:$0xff]  }
  0x40   : > { %2200 = vmatpush1.bf16.msra.mxu1 %v3349_v30  ;;  %2158 = vmatprep.subr.bf16.mxu0 %v3350_v31  ;;  %v3421_v10 = vld [vmem:[%s3889_s19 + $0x15c] ss:$24 sps:$4 sm:$0xff]   ;;  %v3969_v12 = vld [vmem:[%s3891_s20 + $0x8] ss:$24 sps:$4 sm:$0xff]   ;;  %v3427_v16 = vld [vmem:[%s3889_s19 + $0x12c] ss:$24 sps:$4 sm:$0xff]  }
  0x41   : > { %2201 = vmatprep.subr.bf16.mxu1 %v3352_v32  ;;  %v3416_v13 = vld [vmem:[%s3889_s19 + $0x750] ss:$24 sps:$4 sm:$0xff]   ;;  %v3422_v17 = vld [vmem:[%s3889_s19 + $0x720] ss:$24 sps:$4 sm:$0xff]   ;;  %v3430_v19 = vld [vmem:[%s3889_s19 + $0x6f4] ss:$24 sps:$4 sm:$0xff]  }
  0x42   : > { %v3419_v14 = vld [vmem:[%s3889_s19 + $0x158] ss:$24 sps:$4 sm:$0xff]   ;;  %v3425_v18 = vld [vmem:[%s3889_s19 + $0x128] ss:$24 sps:$4 sm:$0xff]   ;;  %v3433_v20 = vld [vmem:[%s3889_s19 + $0xfc] ss:$24 sps:$4 sm:$0xff]  }
  0x43   : > { %2159 = vmatpush1.bf16.msra.mxu0 %v3354_v33  ;;  %v3428_v21 = vld [vmem:[%s3889_s19 + $0x6f0] ss:$24 sps:$4 sm:$0xff]   ;;  %v3436_v23 = vld [vmem:[%s3889_s19 + $0x6c4] ss:$24 sps:$4 sm:$0xff]   ;;  %v3434_v25 = vld [vmem:[%s3889_s19 + $0x6c0] ss:$24 sps:$4 sm:$0xff]  }
  0x44   : > { %2202 = vmatpush1.bf16.msra.mxu1 %v3355_v34  ;;  %2160 = vmatprep.subr.bf16.mxu0 %v3356_v35  ;;  %v3431_v22 = vld [vmem:[%s3889_s19 + $0xf8] ss:$24 sps:$4 sm:$0xff]   ;;  %v3439_v24 = vld [vmem:[%s3889_s19 + $0xcc] ss:$24 sps:$4 sm:$0xff]   ;;  %v3437_v26 = vld [vmem:[%s3889_s19 + $0xc8] ss:$24 sps:$4 sm:$0xff]  }
  0x45   : > { %2203 = vmatprep.subr.bf16.mxu1 %v3358_v36  ;;  %v3442_v27 = vld [vmem:[%s3889_s19 + $0x694] ss:$24 sps:$4 sm:$0xff]   ;;  %v3440_v29 = vld [vmem:[%s3889_s19 + $0x690] ss:$24 sps:$4 sm:$0xff]   ;;  %v3448_v31 = vld [vmem:[%s3889_s19 + $0x664] ss:$24 sps:$4 sm:$0xff]  }
  0x46   : > { %v3445_v28 = vld [vmem:[%s3889_s19 + $0x9c] ss:$24 sps:$4 sm:$0xff]   ;;  %v3443_v30 = vld [vmem:[%s3889_s19 + $0x98] ss:$24 sps:$4 sm:$0xff]   ;;  %v3451_v32 = vld [vmem:[%s3889_s19 + $0x6c] ss:$24 sps:$4 sm:$0xff]  }
  0x47   : > { %2161 = vmatpush1.bf16.msra.mxu0 %v3360_v37  ;;  %v3446_v33 = vld [vmem:[%s3889_s19 + $0x660] ss:$24 sps:$4 sm:$0xff]   ;;  %v3454_v35 = vld [vmem:[%s3889_s19 + $0x634] ss:$24 sps:$4 sm:$0xff]   ;;  %v3452_v37 = vld [vmem:[%s3889_s19 + $0x630] ss:$24 sps:$4 sm:$0xff]  }
  0x48   : > { %2204 = vmatpush1.bf16.msra.mxu1 %v3361_v38  ;;  %2162 = vmatprep.subr.bf16.mxu0 %v3362_v39  ;;  %v3449_v34 = vld [vmem:[%s3889_s19 + $0x68] ss:$24 sps:$4 sm:$0xff]   ;;  %v3457_v36 = vld [vmem:[%s3889_s19 + $0x3c] ss:$24 sps:$4 sm:$0xff]   ;;  %v3455_v38 = vld [vmem:[%s3889_s19 + $0x38] ss:$24 sps:$4 sm:$0xff]  }
  0x49   : > { %2205 = vmatprep.subr.bf16.mxu1 %v3364_v40  ;;  %v3460_v39 = vld [vmem:[%s3889_s19 + $0x604] ss:$24 sps:$4 sm:$0xff]   ;;  %p3252_p11 = scmp.ne.s32.totalorder %s3793_s23, 3 }
  0x4a   : > { %v3463_v40 = vld [vmem:[%s3889_s19 + $0xc] ss:$24 sps:$4 sm:$0xff]  }
  0x4b   : > { %2163 = vmatpush2.bf16.msra.mxu0 %v3366_v41  ;;  %v4002_v41 = vld [vmem:[%s3891_s20 + $0x14] ss:$24 sps:$4 sm:$0xff]  }
  0x4c   : > { %2206 = vmatpush2.bf16.msra.mxu1 %v3367_v42  ;;  %2164 = vmatprep.subr.bf16.mxu0 %v3368_v43  ;;  %v3458_v42 = vld [vmem:[%s3889_s19 + $0x600] ss:$24 sps:$4 sm:$0xff]  }
  0x4d   : > { %2207 = vmatprep.subr.bf16.mxu1 %v3370_v44  ;;  %v3461_v43 = vld [vmem:[%s3889_s19 + $0x8] ss:$24 sps:$4 sm:$0xff]   ;;  %v3466_v44 = vld [vmem:[%s3889_s19 + $0x8d4] ss:$24 sps:$4 sm:$0xff]  }
  0x4f   : > { %2165 = vmatpush2.bf16.msra.mxu0 %v3372_v45  ;;  %v3469_v45 = vld [vmem:[%s3889_s19 + $0x2dc] ss:$24 sps:$4 sm:$0xff]  }
  0x50   : > { %2208 = vmatpush2.bf16.msra.mxu1 %v3373_v46  ;;  %2166 = vmatprep.subr.bf16.mxu0 %v3374_v47  ;;  %v3464_v46 = vld [vmem:[%s3889_s19 + $0x8d0] ss:$24 sps:$4 sm:$0xff]  }
  0x51   : > { %2209 = vmatprep.subr.bf16.mxu1 %v3376_v48  ;;  %v3467_v47 = vld [vmem:[%s3889_s19 + $0x2d8] ss:$24 sps:$4 sm:$0xff]   ;;  %v3472_v48 = vld [vmem:[%s3889_s19 + $0x8a4] ss:$24 sps:$4 sm:$0xff]  }
  0x53   : > { %2167 = vmatpush2.bf16.msra.mxu0 %v3378_v49  ;;  %v3475_v49 = vld [vmem:[%s3889_s19 + $0x2ac] ss:$24 sps:$4 sm:$0xff]  }
  0x54   : > { %2210 = vmatpush2.bf16.msra.mxu1 %v3379_v50  ;;  %2168 = vmatprep.subr.bf16.mxu0 %v3380_v51  ;;  %v3470_v50 = vld [vmem:[%s3889_s19 + $0x8a0] ss:$24 sps:$4 sm:$0xff]  }
  0x55   : > { %2211 = vmatprep.subr.bf16.mxu1 %v3382_v52  ;;  %v3473_v51 = vld [vmem:[%s3889_s19 + $0x2a8] ss:$24 sps:$4 sm:$0xff]   ;;  %v3478_v52 = vld [vmem:[%s3889_s19 + $0x874] ss:$24 sps:$4 sm:$0xff]  }
  0x57   : > { %2169 = vmatpush2.bf16.msra.mxu0 %v3384_v53  ;;  %v3481_v53 = vld [vmem:[%s3889_s19 + $0x27c] ss:$24 sps:$4 sm:$0xff]  }
  0x58   : > { %2212 = vmatpush2.bf16.msra.mxu1 %v3385_v54  ;;  %2170 = vmatprep.subr.bf16.mxu0 %v3386_v56  ;;  %v3476_v54 = vld [vmem:[%s3889_s19 + $0x870] ss:$24 sps:$4 sm:$0xff]   ;;  %v3484_v56 = vld [vmem:[%s3889_s19 + $0x844] ss:$24 sps:$4 sm:$0xff]  }
  0x59   : > { %2213 = vmatprep.subr.bf16.mxu1 %v3388_v58  ;;  %v3487_v58 = vld [vmem:[%s3889_s19 + $0x24c] ss:$24 sps:$4 sm:$0xff]  }
  0x5b   : > { %2171 = vmatpush2.bf16.msra.mxu0 %v3390_v59  ;;  %v3482_v59 = vld [vmem:[%s3889_s19 + $0x840] ss:$24 sps:$4 sm:$0xff]  }
  0x5c   : > { %2214 = vmatpush2.bf16.msra.mxu1 %v3391_v60  ;;  %2172 = vmatprep.subr.bf16.mxu0 %v3392_v61  ;;  %v3485_v60 = vld [vmem:[%s3889_s19 + $0x248] ss:$24 sps:$4 sm:$0xff]   ;;  %v3490_v61 = vld [vmem:[%s3889_s19 + $0x814] ss:$24 sps:$4 sm:$0xff]  }
  0x5d   : > { %2215 = vmatprep.subr.bf16.mxu1 %v3394_v62  ;;  %v3493_v62 = vld [vmem:[%s3889_s19 + $0x21c] ss:$24 sps:$4 sm:$0xff]  }
  0x5f   : > { %2173 = vmatpush2.bf16.msra.mxu0 %v3396_v63  ;;  %v3488_v63 = vld [vmem:[%s3889_s19 + $0x810] ss:$24 sps:$4 sm:$0xff]  }
  0x60   : > { %2216 = vmatpush2.bf16.msra.mxu1 %v3397_v0  ;;  %2174 = vmatprep.subr.bf16.mxu0 %v3398_v1  ;;  %v3491_v0 = vld [vmem:[%s3889_s19 + $0x218] ss:$24 sps:$4 sm:$0xff]   ;;  %v3496_v1 = vld [vmem:[%s3889_s19 + $0x7e4] ss:$24 sps:$4 sm:$0xff]  }
  0x61   : > { %2217 = vmatprep.subr.bf16.mxu1 %v3400_v2  ;;  %v3499_v2 = vld [vmem:[%s3889_s19 + $0x1ec] ss:$24 sps:$4 sm:$0xff]  }
  0x63   : > { %2175 = vmatpush2.bf16.msra.mxu0 %v3402_v3  ;;  %v3494_v3 = vld [vmem:[%s3889_s19 + $0x7e0] ss:$24 sps:$4 sm:$0xff]  }
  0x64   : > { %2218 = vmatpush2.bf16.msra.mxu1 %v3403_v4  ;;  %2176 = vmatprep.subr.bf16.mxu0 %v3404_v5  ;;  %v3497_v4 = vld [vmem:[%s3889_s19 + $0x1e8] ss:$24 sps:$4 sm:$0xff]   ;;  %v3502_v5 = vld [vmem:[%s3889_s19 + $0x7b4] ss:$24 sps:$4 sm:$0xff]  }
  0x65   : > { %2219 = vmatprep.subr.bf16.mxu1 %v3406_v6  ;;  %v3505_v6 = vld [vmem:[%s3889_s19 + $0x1bc] ss:$24 sps:$4 sm:$0xff]  }
  0x67   : > { %2177 = vmatpush2.bf16.msra.mxu0 %v3408_v7  ;;  %v3500_v7 = vld [vmem:[%s3889_s19 + $0x7b0] ss:$24 sps:$4 sm:$0xff]  }
  0x68   : > { %2220 = vmatpush2.bf16.msra.mxu1 %v3409_v8  ;;  %2232 = vmatprep.subr.bf16.mxu0 %v3418_v9  ;;  %v3503_v8 = vld [vmem:[%s3889_s19 + $0x1b8] ss:$24 sps:$4 sm:$0xff]   ;;  %v3508_v9 = vld [vmem:[%s3889_s19 + $0x784] ss:$24 sps:$4 sm:$0xff]  }
  0x69   : > { %2275 = vmatprep.subr.bf16.mxu1 %v3421_v10  ;;  %v3511_v10 = vld [vmem:[%s3889_s19 + $0x18c] ss:$24 sps:$4 sm:$0xff]  }
  0x6a   : > { %2179 = vmatmul.mubr.bf16.vlgmr.msra.gmra.mxu0 %v3966_v11 }
  0x6b   : > { %2222 = vmatmul.mubr.bf16.vlgmr.msra.gmra.mxu1 %v3969_v12  ;;  %2233 = vmatpush1.bf16.msra.mxu0 %v3416_v13  ;;  %v3506_v13 = vld [vmem:[%s3889_s19 + $0x780] ss:$24 sps:$4 sm:$0xff]  }
  0x6c   : > { %2276 = vmatpush1.bf16.msra.mxu1 %v3419_v14  ;;  %2234 = vmatprep.subr.bf16.mxu0 %v3424_v15  ;;  %v3509_v14 = vld [vmem:[%s3889_s19 + $0x188] ss:$24 sps:$4 sm:$0xff]   ;;  %v3517_v15 = vld [vmem:[%s3889_s19 + $0x45c] ss:$24 sps:$4 sm:$0xff]  }
  0x6d   : > { %2277 = vmatprep.subr.bf16.mxu1 %v3427_v16  ;;  %2307 = vmatprep.mubr.bf16.mxu1 %v3410_v55  ;;  %v3479_v55 = vld [vmem:[%s3889_s19 + $0x278] ss:$24 sps:$4 sm:$0xff]   ;;  %v3520_v16 = vld [vmem:[%s3889_s19 + $0x75c] ss:$24 sps:$4 sm:$0xff]  }
  0x6e   : > { %2264 = vmatprep.mubr.bf16.mxu0 %v4002_v41 }
  0x6f   : > { %2235 = vmatpush1.bf16.msra.mxu0 %v3422_v17  ;;  %v4042_v17 = vld [vmem:[%s3891_s20 + $0x10] ss:$24 sps:$4 sm:$0xff]  }
  0x70   : > { %2278 = vmatpush1.bf16.msra.mxu1 %v3425_v18  ;;  %2236 = vmatprep.subr.bf16.mxu0 %v3430_v19  ;;  %v3515_v18 = vld [vmem:[%s3889_s19 + $0x458] ss:$24 sps:$4 sm:$0xff]  }
  0x71   : > { %2279 = vmatprep.subr.bf16.mxu1 %v3433_v20  ;;  %v3518_v19 = vld [vmem:[%s3889_s19 + $0x758] ss:$24 sps:$4 sm:$0xff]   ;;  %v3523_v20 = vld [vmem:[%s3889_s19 + $0x42c] ss:$24 sps:$4 sm:$0xff]  }
  0x73   : > { %2237 = vmatpush1.bf16.msra.mxu0 %v3428_v21  ;;  %v3526_v21 = vld [vmem:[%s3889_s19 + $0x72c] ss:$24 sps:$4 sm:$0xff]  }
  0x74   : > { %2280 = vmatpush1.bf16.msra.mxu1 %v3431_v22  ;;  %2238 = vmatprep.subr.bf16.mxu0 %v3436_v23  ;;  %v3521_v22 = vld [vmem:[%s3889_s19 + $0x428] ss:$24 sps:$4 sm:$0xff]  }
  0x75   : > { %2281 = vmatprep.subr.bf16.mxu1 %v3439_v24  ;;  %v3524_v23 = vld [vmem:[%s3889_s19 + $0x728] ss:$24 sps:$4 sm:$0xff]   ;;  %v3529_v24 = vld [vmem:[%s3889_s19 + $0x3fc] ss:$24 sps:$4 sm:$0xff]  }
  0x77   : > { %2239 = vmatpush1.bf16.msra.mxu0 %v3434_v25  ;;  %v3532_v25 = vld [vmem:[%s3889_s19 + $0x6fc] ss:$24 sps:$4 sm:$0xff]  }
  0x78   : > { %2282 = vmatpush1.bf16.msra.mxu1 %v3437_v26  ;;  %2240 = vmatprep.subr.bf16.mxu0 %v3442_v27  ;;  %v3527_v26 = vld [vmem:[%s3889_s19 + $0x3f8] ss:$24 sps:$4 sm:$0xff]   ;;  %v3535_v27 = vld [vmem:[%s3889_s19 + $0x3cc] ss:$24 sps:$4 sm:$0xff]  }
  0x79   : > { %2283 = vmatprep.subr.bf16.mxu1 %v3445_v28  ;;  %v3538_v28 = vld [vmem:[%s3889_s19 + $0x6cc] ss:$24 sps:$4 sm:$0xff]  }
  0x7b   : > { %2241 = vmatpush1.bf16.msra.mxu0 %v3440_v29  ;;  %v3533_v29 = vld [vmem:[%s3889_s19 + $0x3c8] ss:$24 sps:$4 sm:$0xff]  }
  0x7c   : > { %2284 = vmatpush1.bf16.msra.mxu1 %v3443_v30  ;;  %2242 = vmatprep.subr.bf16.mxu0 %v3448_v31  ;;  %v3536_v30 = vld [vmem:[%s3889_s19 + $0x6c8] ss:$24 sps:$4 sm:$0xff]   ;;  %v3544_v31 = vld [vmem:[%s3889_s19 + $0x69c] ss:$24 sps:$4 sm:$0xff]  }
  0x7d   : > { %2285 = vmatprep.subr.bf16.mxu1 %v3451_v32  ;;  %v3539_v32 = vld [vmem:[%s3889_s19 + $0x398] ss:$24 sps:$4 sm:$0xff]  }
  0x7f   : > { %2243 = vmatpush1.bf16.msra.mxu0 %v3446_v33  ;;  %v3542_v33 = vld [vmem:[%s3889_s19 + $0x698] ss:$24 sps:$4 sm:$0xff]  }
  0x80   : > { %2286 = vmatpush1.bf16.msra.mxu1 %v3449_v34  ;;  %2244 = vmatprep.subr.bf16.mxu0 %v3454_v35  ;;  %v3547_v34 = vld [vmem:[%s3889_s19 + $0x36c] ss:$24 sps:$4 sm:$0xff]  }
  0x81   : > { %2287 = vmatprep.subr.bf16.mxu1 %v3457_v36  ;;  %v3550_v35 = vld [vmem:[%s3889_s19 + $0x66c] ss:$24 sps:$4 sm:$0xff]   ;;  %v3545_v36 = vld [vmem:[%s3889_s19 + $0x368] ss:$24 sps:$4 sm:$0xff]  }
  0x83   : > { %2245 = vmatpush1.bf16.msra.mxu0 %v3452_v37  ;;  %v3548_v37 = vld [vmem:[%s3889_s19 + $0x668] ss:$24 sps:$4 sm:$0xff]  }
  0x84   : > { %2288 = vmatpush1.bf16.msra.mxu1 %v3455_v38  ;;  %2246 = vmatprep.subr.bf16.mxu0 %v3460_v39  ;;  %v3553_v38 = vld [vmem:[%s3889_s19 + $0x33c] ss:$24 sps:$4 sm:$0xff]  }
  0x85   : > { %2289 = vmatprep.subr.bf16.mxu1 %v3463_v40  ;;  %v3556_v39 = vld [vmem:[%s3889_s19 + $0x63c] ss:$24 sps:$4 sm:$0xff]   ;;  %v3551_v40 = vld [vmem:[%s3889_s19 + $0x338] ss:$24 sps:$4 sm:$0xff]  }
  0x87   : > { %2247 = vmatpush1.bf16.msra.mxu0 %v3458_v42  ;;  %v3554_v42 = vld [vmem:[%s3889_s19 + $0x638] ss:$24 sps:$4 sm:$0xff]  }
  0x88   : > { %2290 = vmatpush1.bf16.msra.mxu1 %v3461_v43  ;;  %2248 = vmatprep.subr.bf16.mxu0 %v3466_v44  ;;  %v3559_v43 = vld [vmem:[%s3889_s19 + $0x30c] ss:$24 sps:$4 sm:$0xff]  }
  0x89   : > { %2291 = vmatprep.subr.bf16.mxu1 %v3469_v45  ;;  %v3562_v44 = vld [vmem:[%s3889_s19 + $0x60c] ss:$24 sps:$4 sm:$0xff]   ;;  %v3557_v45 = vld [vmem:[%s3889_s19 + $0x308] ss:$24 sps:$4 sm:$0xff]  }
  0x8b   : > { %2249 = vmatpush2.bf16.msra.mxu0 %v3464_v46  ;;  %v3560_v46 = vld [vmem:[%s3889_s19 + $0x608] ss:$24 sps:$4 sm:$0xff]  }
  0x8c   : > { %2292 = vmatpush2.bf16.msra.mxu1 %v3467_v47  ;;  %2250 = vmatprep.subr.bf16.mxu0 %v3472_v48  ;;  %v3565_v47 = vld [vmem:[%s3889_s19 + $0x5dc] ss:$24 sps:$4 sm:$0xff]  }
  0x8d   : > { %2293 = vmatprep.subr.bf16.mxu1 %v3475_v49  ;;  %v3568_v48 = vld [vmem:[%s3889_s19 + $0x8dc] ss:$24 sps:$4 sm:$0xff]   ;;  %v3563_v49 = vld [vmem:[%s3889_s19 + $0x5d8] ss:$24 sps:$4 sm:$0xff]  }
  0x8f   : > { %2251 = vmatpush2.bf16.msra.mxu0 %v3470_v50  ;;  %v3566_v50 = vld [vmem:[%s3889_s19 + $0x8d8] ss:$24 sps:$4 sm:$0xff]  }
  0x90   : > { %2294 = vmatpush2.bf16.msra.mxu1 %v3473_v51  ;;  %2252 = vmatprep.subr.bf16.mxu0 %v3478_v52  ;;  %v3571_v51 = vld [vmem:[%s3889_s19 + $0x5ac] ss:$24 sps:$4 sm:$0xff]  }
  0x91   : > { %2295 = vmatprep.subr.bf16.mxu1 %v3481_v53  ;;  %v3574_v52 = vld [vmem:[%s3889_s19 + $0x8ac] ss:$24 sps:$4 sm:$0xff]   ;;  %v3569_v53 = vld [vmem:[%s3889_s19 + $0x5a8] ss:$24 sps:$4 sm:$0xff]  }
  0x93   : > { %2253 = vmatpush2.bf16.msra.mxu0 %v3476_v54  ;;  %v3572_v54 = vld [vmem:[%s3889_s19 + $0x8a8] ss:$24 sps:$4 sm:$0xff]  }
  0x94   : > { %2296 = vmatpush2.bf16.msra.mxu1 %v3479_v55  ;;  %2254 = vmatprep.subr.bf16.mxu0 %v3484_v56  ;;  %v3577_v55 = vld [vmem:[%s3889_s19 + $0x57c] ss:$24 sps:$4 sm:$0xff]  }
  0x95   : > { %2297 = vmatprep.subr.bf16.mxu1 %v3487_v58  ;;  %v3580_v56 = vld [vmem:[%s3889_s19 + $0x87c] ss:$24 sps:$4 sm:$0xff]   ;;  %v3575_v58 = vld [vmem:[%s3889_s19 + $0x578] ss:$24 sps:$4 sm:$0xff]  }
  0x97   : > { %2255 = vmatpush2.bf16.msra.mxu0 %v3482_v59  ;;  %v3578_v59 = vld [vmem:[%s3889_s19 + $0x878] ss:$24 sps:$4 sm:$0xff]  }
  0x98   : > { %2298 = vmatpush2.bf16.msra.mxu1 %v3485_v60  ;;  %2256 = vmatprep.subr.bf16.mxu0 %v3490_v61  ;;  %v3583_v60 = vld [vmem:[%s3889_s19 + $0x54c] ss:$24 sps:$4 sm:$0xff]  }
  0x99   : > { %2299 = vmatprep.subr.bf16.mxu1 %v3493_v62  ;;  %v3586_v61 = vld [vmem:[%s3889_s19 + $0x84c] ss:$24 sps:$4 sm:$0xff]   ;;  %v3581_v62 = vld [vmem:[%s3889_s19 + $0x548] ss:$24 sps:$4 sm:$0xff]  }
  0x9b   : > { %2257 = vmatpush2.bf16.msra.mxu0 %v3488_v63  ;;  %v3584_v63 = vld [vmem:[%s3889_s19 + $0x848] ss:$24 sps:$4 sm:$0xff]  }
  0x9c   : > { %2300 = vmatpush2.bf16.msra.mxu1 %v3491_v0  ;;  %2258 = vmatprep.subr.bf16.mxu0 %v3496_v1  ;;  %v3589_v0 = vld [vmem:[%s3889_s19 + $0x51c] ss:$24 sps:$4 sm:$0xff]  }
  0x9d   : > { %2301 = vmatprep.subr.bf16.mxu1 %v3499_v2  ;;  %v3592_v1 = vld [vmem:[%s3889_s19 + $0x81c] ss:$24 sps:$4 sm:$0xff]   ;;  %v3587_v2 = vld [vmem:[%s3889_s19 + $0x518] ss:$24 sps:$4 sm:$0xff]  }
  0x9f   : > { %2259 = vmatpush2.bf16.msra.mxu0 %v3494_v3  ;;  %v3590_v3 = vld [vmem:[%s3889_s19 + $0x818] ss:$24 sps:$4 sm:$0xff]  }
  0xa0   : > { %2302 = vmatpush2.bf16.msra.mxu1 %v3497_v4  ;;  %2260 = vmatprep.subr.bf16.mxu0 %v3502_v5  ;;  %v3595_v4 = vld [vmem:[%s3889_s19 + $0x4ec] ss:$24 sps:$4 sm:$0xff]  }
  0xa1   : > { %2303 = vmatprep.subr.bf16.mxu1 %v3505_v6  ;;  %v3598_v5 = vld [vmem:[%s3889_s19 + $0x7ec] ss:$24 sps:$4 sm:$0xff]   ;;  %v3593_v6 = vld [vmem:[%s3889_s19 + $0x4e8] ss:$24 sps:$4 sm:$0xff]  }
  0xa3   : > { %2261 = vmatpush2.bf16.msra.mxu0 %v3500_v7  ;;  %v3596_v7 = vld [vmem:[%s3889_s19 + $0x7e8] ss:$24 sps:$4 sm:$0xff]  }
  0xa4   : > { %2304 = vmatpush2.bf16.msra.mxu1 %v3503_v8  ;;  %2262 = vmatprep.subr.bf16.mxu0 %v3508_v9  ;;  %v3601_v8 = vld [vmem:[%s3889_s19 + $0x4bc] ss:$24 sps:$4 sm:$0xff]  }
  0xa5   : > { %2305 = vmatprep.subr.bf16.mxu1 %v3511_v10  ;;  %v3604_v9 = vld [vmem:[%s3889_s19 + $0x7bc] ss:$24 sps:$4 sm:$0xff]   ;;  %v3599_v10 = vld [vmem:[%s3889_s19 + $0x4b8] ss:$24 sps:$4 sm:$0xff]  }
  0xa7   : > { %2263 = vmatpush2.bf16.msra.mxu0 %v3506_v13  ;;  %v3602_v13 = vld [vmem:[%s3889_s19 + $0x7b8] ss:$24 sps:$4 sm:$0xff]  }
  0xa8   : > { %2306 = vmatpush2.bf16.msra.mxu1 %v3509_v14  ;;  %2318 = vmatprep.subr.bf16.mxu0 %v3517_v15  ;;  %v3607_v14 = vld [vmem:[%s3889_s19 + $0x48c] ss:$24 sps:$4 sm:$0xff]  }
  0xa9   : > { %2361 = vmatprep.subr.bf16.mxu1 %v3520_v16  ;;  %v3610_v15 = vld [vmem:[%s3889_s19 + $0x78c] ss:$24 sps:$4 sm:$0xff]   ;;  %v3605_v16 = vld [vmem:[%s3889_s19 + $0x488] ss:$24 sps:$4 sm:$0xff]  }
  0xaa   : > { %2265 = vmatmul.mubr.bf16.vlgmr.msra.gmra.mxu0 %v4042_v17 }
  0xab   : > { %2308 = vmatmul.mubr.bf16.vlgmr.msra.gmra.mxu1 %v3966_v11  ;;  %2319 = vmatpush1.bf16.msra.mxu0 %v3515_v18  ;;  %v3530_v11 = vld [vmem:[%s3889_s19 + $0x6f8] ss:$24 sps:$4 sm:$0xff]   ;;  %v3608_v18 = vld [vmem:[%s3889_s19 + $0x788] ss:$24 sps:$4 sm:$0xff]  }
  0xac   : > { %2362 = vmatpush1.bf16.msra.mxu1 %v3518_v19  ;;  %2320 = vmatprep.subr.bf16.mxu0 %v3523_v20  ;;  %v3613_v19 = vld [vmem:[%s3889_s19 + $0x164] ss:$24 sps:$4 sm:$0xff]  }
  0xad   : > { %2363 = vmatprep.subr.bf16.mxu1 %v3526_v21  ;;  %2350 = vmatprep.mubr.bf16.mxu0 %v3945_v57  ;;  %v3541_v57 = vld [vmem:[%s3889_s19 + $0x39c] ss:$24 sps:$4 sm:$0xff]   ;;  %v3611_v21 = vld [vmem:[%s3889_s19 + $0x160] ss:$24 sps:$4 sm:$0xff]  }
  0xae   : > { %2393 = vmatprep.mubr.bf16.mxu1 %v4002_v41  ;;  %v3616_v20 = vld [vmem:[%s3889_s19 + $0x464] ss:$24 sps:$4 sm:$0xff]  }
  0xaf   : > { %2321 = vmatpush1.bf16.msra.mxu0 %v3521_v22  ;;  %v3614_v22 = vld [vmem:[%s3889_s19 + $0x460] ss:$24 sps:$4 sm:$0xff]  }
  0xb0   : > { %2364 = vmatpush1.bf16.msra.mxu1 %v3524_v23  ;;  %2322 = vmatprep.subr.bf16.mxu0 %v3529_v24  ;;  %v3619_v23 = vld [vmem:[%s3889_s19 + $0x134] ss:$24 sps:$4 sm:$0xff]  }
  0xb1   : > { %2365 = vmatprep.subr.bf16.mxu1 %v3532_v25  ;;  %v3622_v24 = vld [vmem:[%s3889_s19 + $0x434] ss:$24 sps:$4 sm:$0xff]   ;;  %v3617_v25 = vld [vmem:[%s3889_s19 + $0x130] ss:$24 sps:$4 sm:$0xff]  }
  0xb3   : > { %2323 = vmatpush1.bf16.msra.mxu0 %v3527_v26  ;;  %v3620_v26 = vld [vmem:[%s3889_s19 + $0x430] ss:$24 sps:$4 sm:$0xff]  }
  0xb4   : > { %2366 = vmatpush1.bf16.msra.mxu1 %v3530_v11  ;;  %2324 = vmatprep.subr.bf16.mxu0 %v3535_v27  ;;  %v3625_v11 = vld [vmem:[%s3889_s19 + $0x104] ss:$24 sps:$4 sm:$0xff]  }
  0xb5   : > { %2367 = vmatprep.subr.bf16.mxu1 %v3538_v28  ;;  %v3628_v27 = vld [vmem:[%s3889_s19 + $0x404] ss:$24 sps:$4 sm:$0xff]  }
  0xb6   : > { %v3755_v28 = vld [vmem:[%s3891_s20 + $0x4] ss:$24 sps:$4 sm:$0xff]  }
  0xb7   : > { %2325 = vmatpush1.bf16.msra.mxu0 %v3533_v29  ;;  %v3756_v29 = vld [vmem:[%s3891_s20 + $0xc] ss:$24 sps:$4 sm:$0xff]  }
  0xb8   : > { %2368 = vmatpush1.bf16.msra.mxu1 %v3536_v30  ;;  %2326 = vmatprep.subr.bf16.mxu0 %v3541_v57  ;;  %v3626_v30 = vld [vmem:[%s3889_s19 + $0x400] ss:$24 sps:$4 sm:$0xff]   ;;  %v3631_v57 = vld [vmem:[%s3889_s19 + $0xd4] ss:$24 sps:$4 sm:$0xff]  }
  0xb9   : > { %2369 = vmatprep.subr.bf16.mxu1 %v3544_v31  ;;  %v3634_v31 = vld [vmem:[%s3889_s19 + $0x3d4] ss:$24 sps:$4 sm:$0xff]  }
  0xbb   : > { %2327 = vmatpush1.bf16.msra.mxu0 %v3539_v32  ;;  %v3629_v32 = vld [vmem:[%s3889_s19 + $0xd0] ss:$24 sps:$4 sm:$0xff]  }
  0xbc   : > { %2370 = vmatpush1.bf16.msra.mxu1 %v3542_v33  ;;  %2328 = vmatprep.subr.bf16.mxu0 %v3547_v34  ;;  %v3632_v33 = vld [vmem:[%s3889_s19 + $0x3d0] ss:$24 sps:$4 sm:$0xff]   ;;  %v3637_v34 = vld [vmem:[%s3889_s19 + $0xa4] ss:$24 sps:$4 sm:$0xff]  }
  0xbd   : > { %2371 = vmatprep.subr.bf16.mxu1 %v3550_v35  ;;  %v3640_v35 = vld [vmem:[%s3889_s19 + $0x3a4] ss:$24 sps:$4 sm:$0xff]  }
  0xbf   : > { %2329 = vmatpush1.bf16.msra.mxu0 %v3545_v36  ;;  %v3635_v36 = vld [vmem:[%s3889_s19 + $0xa0] ss:$24 sps:$4 sm:$0xff]  }
  0xc0   : > { %2372 = vmatpush1.bf16.msra.mxu1 %v3548_v37  ;;  %2330 = vmatprep.subr.bf16.mxu0 %v3553_v38  ;;  %v3638_v37 = vld [vmem:[%s3889_s19 + $0x3a0] ss:$24 sps:$4 sm:$0xff]   ;;  %v3643_v38 = vld [vmem:[%s3889_s19 + $0x74] ss:$24 sps:$4 sm:$0xff]  }
  0xc1   : > { %2373 = vmatprep.subr.bf16.mxu1 %v3556_v39  ;;  %v3646_v39 = vld [vmem:[%s3889_s19 + $0x374] ss:$24 sps:$4 sm:$0xff]  }
  0xc3   : > { %2331 = vmatpush1.bf16.msra.mxu0 %v3551_v40  ;;  %v3641_v40 = vld [vmem:[%s3889_s19 + $0x70] ss:$24 sps:$4 sm:$0xff]  }
  0xc4   : > { %2374 = vmatpush1.bf16.msra.mxu1 %v3554_v42  ;;  %2332 = vmatprep.subr.bf16.mxu0 %v3559_v43  ;;  %v3644_v42 = vld [vmem:[%s3889_s19 + $0x370] ss:$24 sps:$4 sm:$0xff]   ;;  %v3649_v43 = vld [vmem:[%s3889_s19 + $0x44] ss:$24 sps:$4 sm:$0xff]  }
  0xc5   : > { %2375 = vmatprep.subr.bf16.mxu1 %v3562_v44  ;;  %v3652_v44 = vld [vmem:[%s3889_s19 + $0x344] ss:$24 sps:$4 sm:$0xff]  }
  0xc7   : > { %2333 = vmatpush1.bf16.msra.mxu0 %v3557_v45  ;;  %v3647_v45 = vld [vmem:[%s3889_s19 + $0x40] ss:$24 sps:$4 sm:$0xff]  }
  0xc8   : > { %2376 = vmatpush1.bf16.msra.mxu1 %v3560_v46  ;;  %2334 = vmatprep.subr.bf16.mxu0 %v3565_v47  ;;  %v3650_v46 = vld [vmem:[%s3889_s19 + $0x340] ss:$24 sps:$4 sm:$0xff]   ;;  %v3655_v47 = vld [vmem:[%s3889_s19 + $0x14] ss:$24 sps:$4 sm:$0xff]  }
  0xc9   : > { %2377 = vmatprep.subr.bf16.mxu1 %v3568_v48  ;;  %v3658_v48 = vld [vmem:[%s3889_s19 + $0x314] ss:$24 sps:$4 sm:$0xff]  }
  0xcb   : > { %2335 = vmatpush2.bf16.msra.mxu0 %v3563_v49  ;;  %v3653_v49 = vld [vmem:[%s3889_s19 + $0x10] ss:$24 sps:$4 sm:$0xff]  }
  0xcc   : > { %2378 = vmatpush2.bf16.msra.mxu1 %v3566_v50  ;;  %2336 = vmatprep.subr.bf16.mxu0 %v3571_v51  ;;  %v3656_v50 = vld [vmem:[%s3889_s19 + $0x310] ss:$24 sps:$4 sm:$0xff]   ;;  %v3661_v51 = vld [vmem:[%s3889_s19 + $0x2e4] ss:$24 sps:$4 sm:$0xff]  }
  0xcd   : > { %2379 = vmatprep.subr.bf16.mxu1 %v3574_v52  ;;  %v3664_v52 = vld [vmem:[%s3889_s19 + $0x5e4] ss:$24 sps:$4 sm:$0xff]  }
  0xcf   : > { %2337 = vmatpush2.bf16.msra.mxu0 %v3569_v53  ;;  %v3659_v53 = vld [vmem:[%s3889_s19 + $0x2e0] ss:$24 sps:$4 sm:$0xff]  }
  0xd0   : > { %2380 = vmatpush2.bf16.msra.mxu1 %v3572_v54  ;;  %2338 = vmatprep.subr.bf16.mxu0 %v3577_v55  ;;  %v3662_v54 = vld [vmem:[%s3889_s19 + $0x5e0] ss:$24 sps:$4 sm:$0xff]   ;;  %v3667_v55 = vld [vmem:[%s3889_s19 + $0x2b4] ss:$24 sps:$4 sm:$0xff]  }
  0xd1   : > { %2381 = vmatprep.subr.bf16.mxu1 %v3580_v56  ;;  %v3670_v56 = vld [vmem:[%s3889_s19 + $0x5b4] ss:$24 sps:$4 sm:$0xff]  }
  0xd3   : > { %2339 = vmatpush2.bf16.msra.mxu0 %v3575_v58  ;;  %v3665_v58 = vld [vmem:[%s3889_s19 + $0x2b0] ss:$24 sps:$4 sm:$0xff]  }
  0xd4   : > { %2382 = vmatpush2.bf16.msra.mxu1 %v3578_v59  ;;  %2340 = vmatprep.subr.bf16.mxu0 %v3583_v60  ;;  %v3668_v59 = vld [vmem:[%s3889_s19 + $0x5b0] ss:$24 sps:$4 sm:$0xff]   ;;  %v3673_v60 = vld [vmem:[%s3889_s19 + $0x284] ss:$24 sps:$4 sm:$0xff]  }
  0xd5   : > { %2383 = vmatprep.subr.bf16.mxu1 %v3586_v61  ;;  %v3676_v61 = vld [vmem:[%s3889_s19 + $0x584] ss:$24 sps:$4 sm:$0xff]  }
  0xd7   : > { %2341 = vmatpush2.bf16.msra.mxu0 %v3581_v62  ;;  %v3671_v62 = vld [vmem:[%s3889_s19 + $0x280] ss:$24 sps:$4 sm:$0xff]  }
  0xd8   : > { %2384 = vmatpush2.bf16.msra.mxu1 %v3584_v63  ;;  %2342 = vmatprep.subr.bf16.mxu0 %v3589_v0  ;;  %v3674_v63 = vld [vmem:[%s3889_s19 + $0x580] ss:$24 sps:$4 sm:$0xff]   ;;  %v3679_v0 = vld [vmem:[%s3889_s19 + $0x254] ss:$24 sps:$4 sm:$0xff]  }
  0xd9   : > { %2385 = vmatprep.subr.bf16.mxu1 %v3592_v1  ;;  %v3682_v1 = vld [vmem:[%s3889_s19 + $0x554] ss:$24 sps:$4 sm:$0xff]  }
  0xdb   : > { %2343 = vmatpush2.bf16.msra.mxu0 %v3587_v2  ;;  %v3677_v2 = vld [vmem:[%s3889_s19 + $0x250] ss:$24 sps:$4 sm:$0xff]  }
  0xdc   : > { %2386 = vmatpush2.bf16.msra.mxu1 %v3590_v3  ;;  %2344 = vmatprep.subr.bf16.mxu0 %v3595_v4  ;;  %v3680_v3 = vld [vmem:[%s3889_s19 + $0x550] ss:$24 sps:$4 sm:$0xff]   ;;  %v3685_v4 = vld [vmem:[%s3889_s19 + $0x224] ss:$24 sps:$4 sm:$0xff]  }
  0xdd   : > { %2387 = vmatprep.subr.bf16.mxu1 %v3598_v5  ;;  %v3688_v5 = vld [vmem:[%s3889_s19 + $0x524] ss:$24 sps:$4 sm:$0xff]  }
  0xdf   : > { %2345 = vmatpush2.bf16.msra.mxu0 %v3593_v6  ;;  %v3683_v6 = vld [vmem:[%s3889_s19 + $0x220] ss:$24 sps:$4 sm:$0xff]  }
  0xe0   : > { %2388 = vmatpush2.bf16.msra.mxu1 %v3596_v7  ;;  %2346 = vmatprep.subr.bf16.mxu0 %v3601_v8  ;;  %v3686_v7 = vld [vmem:[%s3889_s19 + $0x520] ss:$24 sps:$4 sm:$0xff]   ;;  %v3691_v8 = vld [vmem:[%s3889_s19 + $0x1f4] ss:$24 sps:$4 sm:$0xff]  }
  0xe1   : > { %2389 = vmatprep.subr.bf16.mxu1 %v3604_v9  ;;  %v3694_v9 = vld [vmem:[%s3889_s19 + $0x4f4] ss:$24 sps:$4 sm:$0xff]  }
  0xe3   : > { %2347 = vmatpush2.bf16.msra.mxu0 %v3599_v10  ;;  %v3689_v10 = vld [vmem:[%s3889_s19 + $0x1f0] ss:$24 sps:$4 sm:$0xff]  }
  0xe4   : > { %2390 = vmatpush2.bf16.msra.mxu1 %v3602_v13  ;;  %2348 = vmatprep.subr.bf16.mxu0 %v3607_v14  ;;  %v3692_v13 = vld [vmem:[%s3889_s19 + $0x4f0] ss:$24 sps:$4 sm:$0xff]   ;;  %v3697_v14 = vld [vmem:[%s3889_s19 + $0x1c4] ss:$24 sps:$4 sm:$0xff]  }
  0xe5   : > { %2391 = vmatprep.subr.bf16.mxu1 %v3610_v15  ;;  %v3700_v15 = vld [vmem:[%s3889_s19 + $0x4c4] ss:$24 sps:$4 sm:$0xff]  }
  0xe7   : > { %2349 = vmatpush2.bf16.msra.mxu0 %v3605_v16  ;;  %v3695_v16 = vld [vmem:[%s3889_s19 + $0x1c0] ss:$24 sps:$4 sm:$0xff]  }
  0xe8   : > { %2392 = vmatpush2.bf16.msra.mxu1 %v3608_v18  ;;  %2404 = vmatprep.subr.bf16.mxu0 %v3613_v19  ;;  %v3698_v18 = vld [vmem:[%s3889_s19 + $0x4c0] ss:$24 sps:$4 sm:$0xff]   ;;  %v3703_v19 = vld [vmem:[%s3889_s19 + $0x194] ss:$24 sps:$4 sm:$0xff]  }
  0xe9   : > { %2447 = vmatprep.subr.bf16.mxu1 %v3616_v20  ;;  %v3706_v20 = vld [vmem:[%s3889_s19 + $0x494] ss:$24 sps:$4 sm:$0xff]  }
  0xea   : > { %2351 = vmatmul.mubr.bf16.vlgmr.msra.gmra.mxu0 %v3969_v12  ;;  %v3623_v12 = vld [vmem:[%s3889_s19 + $0x100] ss:$24 sps:$4 sm:$0xff]  }
  0xeb   : > { %2394 = vmatmul.mubr.bf16.vlgmr.msra.gmra.mxu1 %v4042_v17  ;;  %2405 = vmatpush1.bf16.msra.mxu0 %v3611_v21  ;;  %v3701_v21 = vld [vmem:[%s3889_s19 + $0x190] ss:$24 sps:$4 sm:$0xff]  }
  0xec   : > { %2448 = vmatpush1.bf16.msra.mxu1 %v3614_v22  ;;  %2406 = vmatprep.subr.bf16.mxu0 %v3619_v23  ;;  %v3704_v22 = vld [vmem:[%s3889_s19 + $0x490] ss:$24 sps:$4 sm:$0xff]   ;;  %v3709_v23 = vld [vmem:[%s3889_s19 + $0x764] ss:$24 sps:$4 sm:$0xff]  }
  0xed   : > { %2449 = vmatprep.subr.bf16.mxu1 %v3622_v24  ;;  %2436 = vmatprep.mubr.bf16.mxu0 %v3755_v28  ;;  %v3707_v24 = vld [vmem:[%s3889_s19 + $0x760] ss:$24 sps:$4 sm:$0xff]   ;;  %v3715_v28 = vld [vmem:[%s3889_s19 + $0x704] ss:$24 sps:$4 sm:$0xff]  }
  0xee   : > { %2479 = vmatprep.mubr.bf16.mxu1 %v3756_v29  ;;  %v3713_v29 = vld [vmem:[%s3889_s19 + $0x700] ss:$24 sps:$4 sm:$0xff]  }
  0xef   : > { %2407 = vmatpush1.bf16.msra.mxu0 %v3617_v25  ;;  %v3712_v25 = vld [vmem:[%s3889_s19 + $0x734] ss:$24 sps:$4 sm:$0xff]  }
  0xf0   : > { %2450 = vmatpush1.bf16.msra.mxu1 %v3620_v26  ;;  %2408 = vmatprep.subr.bf16.mxu0 %v3625_v11  ;;  %v3757_v26 = vld [vmem:[%s3891_s20] ss:$24 sps:$4 sm:$0xff]  }
  0xf1   : > { %2451 = vmatprep.subr.bf16.mxu1 %v3628_v27  ;;  %v3758_v11 = vld [vmem:[%s3891_s20 + $0x8] ss:$24 sps:$4 sm:$0xff]  }
  0xf2   : > { %v3710_v27 = vld [vmem:[%s3889_s19 + $0x730] ss:$24 sps:$4 sm:$0xff]  }
  0xf3   : > { %2409 = vmatpush1.bf16.msra.mxu0 %v3623_v12  ;;  %v3718_v12 = vld [vmem:[%s3889_s19 + $0x6d4] ss:$24 sps:$4 sm:$0xff]  }
  0xf4   : > { %2452 = vmatpush1.bf16.msra.mxu1 %v3626_v30  ;;  %2410 = vmatprep.subr.bf16.mxu0 %v3631_v57  ;;  %v3716_v30 = vld [vmem:[%s3889_s19 + $0x6d0] ss:$24 sps:$4 sm:$0xff]   ;;  %v3721_v57 = vld [vmem:[%s3889_s19 + $0x6a4] ss:$24 sps:$4 sm:$0xff]  }
  0xf5   : > { %2453 = vmatprep.subr.bf16.mxu1 %v3634_v31  ;;  %v3719_v31 = vld [vmem:[%s3889_s19 + $0x6a0] ss:$24 sps:$4 sm:$0xff]  }
  0xf7   : > { %2411 = vmatpush1.bf16.msra.mxu0 %v3629_v32  ;;  %v3722_v32 = vld [vmem:[%s3889_s19 + $0x670] ss:$24 sps:$4 sm:$0xff]  }
  0xf8   : > { %2454 = vmatpush1.bf16.msra.mxu1 %v3632_v33  ;;  %2412 = vmatprep.subr.bf16.mxu0 %v3637_v34  ;;  %v3727_v33 = vld [vmem:[%s3889_s19 + $0x644] ss:$24 sps:$4 sm:$0xff]   ;;  %v3725_v34 = vld [vmem:[%s3889_s19 + $0x640] ss:$24 sps:$4 sm:$0xff]  }
  0xf9   : > { %2455 = vmatprep.subr.bf16.mxu1 %v3640_v35  ;;  %v3730_v35 = vld [vmem:[%s3889_s19 + $0x614] ss:$24 sps:$4 sm:$0xff]  }
  0xfb   : > { %2413 = vmatpush1.bf16.msra.mxu0 %v3635_v36  ;;  %v3728_v36 = vld [vmem:[%s3889_s19 + $0x610] ss:$24 sps:$4 sm:$0xff]  }
  0xfc   : > { %2456 = vmatpush1.bf16.msra.mxu1 %v3638_v37  ;;  %2414 = vmatprep.subr.bf16.mxu0 %v3643_v38  ;;  %v3733_v37 = vld [vmem:[%s3889_s19 + $0x8e4] ss:$24 sps:$4 sm:$0xff]   ;;  %v3731_v38 = vld [vmem:[%s3889_s19 + $0x8e0] ss:$24 sps:$4 sm:$0xff]  }
  0xfd   : > { %2457 = vmatprep.subr.bf16.mxu1 %v3646_v39  ;;  %v3736_v39 = vld [vmem:[%s3889_s19 + $0x8b4] ss:$24 sps:$4 sm:$0xff]  }
  0xff   : > { %2415 = vmatpush1.bf16.msra.mxu0 %v3641_v40  ;;  %v3734_v40 = vld [vmem:[%s3889_s19 + $0x8b0] ss:$24 sps:$4 sm:$0xff]  }
 0x100   : > { %2458 = vmatpush1.bf16.msra.mxu1 %v3644_v42  ;;  %2416 = vmatprep.subr.bf16.mxu0 %v3649_v43  ;;  %v3739_v42 = vld [vmem:[%s3889_s19 + $0x884] ss:$24 sps:$4 sm:$0xff]   ;;  %v3737_v43 = vld [vmem:[%s3889_s19 + $0x880] ss:$24 sps:$4 sm:$0xff]  }
 0x101   : > { %2459 = vmatprep.subr.bf16.mxu1 %v3652_v44  ;;  %v3742_v44 = vld [vmem:[%s3889_s19 + $0x854] ss:$24 sps:$4 sm:$0xff]  }
 0x103   : > { %2417 = vmatpush1.bf16.msra.mxu0 %v3647_v45  ;;  %v3740_v45 = vld [vmem:[%s3889_s19 + $0x850] ss:$24 sps:$4 sm:$0xff]  }
 0x104   : > { %2460 = vmatpush1.bf16.msra.mxu1 %v3650_v46  ;;  %2418 = vmatprep.subr.bf16.mxu0 %v3655_v47  ;;  %v3745_v46 = vld [vmem:[%s3889_s19 + $0x824] ss:$24 sps:$4 sm:$0xff]   ;;  %v3743_v47 = vld [vmem:[%s3889_s19 + $0x820] ss:$24 sps:$4 sm:$0xff]  }
 0x105   : > { %2461 = vmatprep.subr.bf16.mxu1 %v3658_v48  ;;  %v3748_v48 = vld [vmem:[%s3889_s19 + $0x7f4] ss:$24 sps:$4 sm:$0xff]  }
 0x107   : > { %2419 = vmatpush1.bf16.msra.mxu0 %v3653_v49  ;;  %v3746_v49 = vld [vmem:[%s3889_s19 + $0x7f0] ss:$24 sps:$4 sm:$0xff]  }
 0x108   : > { %2462 = vmatpush1.bf16.msra.mxu1 %v3656_v50  ;;  %2420 = vmatprep.subr.bf16.mxu0 %v3661_v51  ;;  %v3751_v51 = vld [vmem:[%s3889_s19 + $0x7c4] ss:$24 sps:$4 sm:$0xff]  }
 0x109   : > { %2463 = vmatprep.subr.bf16.mxu1 %v3664_v52  ;;  %v3749_v52 = vld [vmem:[%s3889_s19 + $0x7c0] ss:$24 sps:$4 sm:$0xff]  }
 0x10b   : > { %2421 = vmatpush2.bf16.msra.mxu0 %v3659_v53 }
 0x10c   : > { %2464 = vmatpush2.bf16.msra.mxu1 %v3662_v54  ;;  %2422 = vmatprep.subr.bf16.mxu0 %v3667_v55  ;;  %v3754_v55 = vld [vmem:[%s3889_s19 + $0x794] ss:$24 sps:$4 sm:$0xff]  }
 0x10d   : > { %2465 = vmatprep.subr.bf16.mxu1 %v3670_v56  ;;  %v3752_v56 = vld [vmem:[%s3889_s19 + $0x790] ss:$24 sps:$4 sm:$0xff]  }
 0x10f   : > { %2423 = vmatpush2.bf16.msra.mxu0 %v3665_v58 }
 0x110   : > { %2466 = vmatpush2.bf16.msra.mxu1 %v3668_v59  ;;  %2424 = vmatprep.subr.bf16.mxu0 %v3673_v60 }
 0x111   : > { %2467 = vmatprep.subr.bf16.mxu1 %v3676_v61 }
 0x113   : > { %2425 = vmatpush2.bf16.msra.mxu0 %v3671_v62 }
 0x114   : > { %2468 = vmatpush2.bf16.msra.mxu1 %v3674_v63  ;;  %2426 = vmatprep.subr.bf16.mxu0 %v3679_v0  ;;  %v370_v63 = vld [vmem:[#allocation2 + $0x30] sm:$0xff] }
 0x115   : > { %2469 = vmatprep.subr.bf16.mxu1 %v3682_v1 }
 0x117   : > { %2427 = vmatpush2.bf16.msra.mxu0 %v3677_v2 }
 0x118   : > { %2470 = vmatpush2.bf16.msra.mxu1 %v3680_v3  ;;  %2428 = vmatprep.subr.bf16.mxu0 %v3685_v4  ;;  %v371_v4 = vld [vmem:[#allocation2] sm:$0xff] }
 0x119   : > { %2471 = vmatprep.subr.bf16.mxu1 %v3688_v5 }
 0x11b   : > { %2429 = vmatpush2.bf16.msra.mxu0 %v3683_v6 }
 0x11c   : > { %2472 = vmatpush2.bf16.msra.mxu1 %v3686_v7  ;;  %2430 = vmatprep.subr.bf16.mxu0 %v3691_v8 }
 0x11d   : > { %2473 = vmatprep.subr.bf16.mxu1 %v3694_v9  ;;  %v376_v9 = vld [vmem:[#allocation2 + $0x8] sm:$0xff] }
 0x11f   : > { %2431 = vmatpush2.bf16.msra.mxu0 %v3689_v10 }
 0x120   : > { %2474 = vmatpush2.bf16.msra.mxu1 %v3692_v13  ;;  %2432 = vmatprep.subr.bf16.mxu0 %v3697_v14 }
 0x121   : > { %2475 = vmatprep.subr.bf16.mxu1 %v3700_v15 }
 0x123   : > { %2433 = vmatpush2.bf16.msra.mxu0 %v3695_v16  ;;  %v377_v16 = vld [vmem:[#allocation2 + $0x38] sm:$0xff] }
 0x124   : > { %2476 = vmatpush2.bf16.msra.mxu1 %v3698_v18  ;;  %2434 = vmatprep.subr.bf16.mxu0 %v3703_v19 }
 0x125   : > { %2477 = vmatprep.subr.bf16.mxu1 %v3706_v20 }
 0x127   : > { %2435 = vmatpush2.bf16.msra.mxu0 %v3701_v21 }
 0x128   : > { %2478 = vmatpush2.bf16.msra.mxu1 %v3704_v22  ;;  %2490 = vmatprep.subr.bf16.mxu0 %v3709_v23 }
 0x12a   : > { %2437 = vmatmul.mubr.bf16.vlgmr.msra.gmra.mxu0 %v3757_v26  ;;  %v2180_v50 = vpop.f32.mrf.mxu0 }
 0x12b   : > { %2480 = vmatmul.mubr.bf16.vlgmr.msra.gmra.mxu1 %v3758_v11  ;;  %2491 = vmatpush1.bf16.msra.mxu0 %v3707_v24  ;;  %v2223_v53 = vpop.f32.mrf.mxu1 }
 0x12c   : > { %2522 = vmatprep.mubr.bf16.mxu0 %v4002_v41  ;;  %2492 = vmatprep.subr.bf16.mxu0 %v3712_v25  ;;  %v3724_v41 = vld [vmem:[%s3889_s19 + $0x674] ss:$24 sps:$4 sm:$0xff]   ;;  %v2182_v54 = vpop.f32.mrf.mxu0  ;;  %v2224_v62 = vadd.f32 %v2223_v53, %v2180_v50 }
 0x12d   : > { %v2225_v58 = vpop.f32.mrf.mxu1 }
 0x12e   : > { %v2184_v59 = vpop.f32.mrf.mxu0  ;;  %v2226_v1 = vadd.f32 %v2225_v58, %v2182_v54  ;;  %v374_v54 = vld [vmem:[#allocation2 + $0x50] sm:$0xff] }
 0x12f   : > { %2493 = vmatpush1.bf16.msra.mxu0 %v3710_v27  ;;  %v2227_v60 = vpop.f32.mrf.mxu1 }
 0x130   : > { %2494 = vmatprep.subr.bf16.mxu0 %v3715_v28  ;;  %v2186_v61 = vpop.f32.mrf.mxu0  ;;  %v2228_v6 = vadd.f32 %v2227_v60, %v2184_v59  ;;  %v372_v28 = vld [vmem:[#allocation2 + $0x58] sm:$0xff]  ;;  %v375_v60 = vld [vmem:[#allocation2 + $0x20] sm:$0xff] }
 0x131   : > { %v2229_v3 = vpop.f32.mrf.mxu1 }
 0x132   : > { %v2230_v13 = vadd.f32 %v2229_v3, %v2186_v61 }
 0x133   : > { %2495 = vmatpush1.bf16.msra.mxu0 %v3713_v29 }
 0x134   : > { %2496 = vmatprep.subr.bf16.mxu0 %v3718_v12 }
 0x137   : > { %2497 = vmatpush1.bf16.msra.mxu0 %v3716_v30 }
 0x138   : > { %2498 = vmatprep.subr.bf16.mxu0 %v3721_v57 }
 0x13b   : > { %2499 = vmatpush1.bf16.msra.mxu0 %v3719_v31  ;;  %v373_v31 = vld [vmem:[#allocation2 + $0x18] sm:$0xff] }
 0x13c   : > { %2500 = vmatprep.subr.bf16.mxu0 %v3724_v41 }
 0x13f   : > { %2501 = vmatpush1.bf16.msra.mxu0 %v3722_v32 }
 0x140   : > { %2502 = vmatprep.subr.bf16.mxu0 %v3727_v33 }
 0x143   : > { %2503 = vmatpush1.bf16.msra.mxu0 %v3725_v34 }
 0x144   : > { %2504 = vmatprep.subr.bf16.mxu0 %v3730_v35 }
 0x147   : > { %2505 = vmatpush1.bf16.msra.mxu0 %v3728_v36  ;;  %v378_v36 = vld [vmem:[#allocation2 + $0x28] sm:$0xff] }
 0x148   : > { %2506 = vmatprep.subr.bf16.mxu0 %v3733_v37 }
 0x14b   : > { %2507 = vmatpush2.bf16.msra.mxu0 %v3731_v38 }
 0x14c   : > { %2508 = vmatprep.subr.bf16.mxu0 %v3736_v39 }
 0x14f   : > { %2509 = vmatpush2.bf16.msra.mxu0 %v3734_v40 }
 0x150   : > { %2510 = vmatprep.subr.bf16.mxu0 %v3739_v42  ;;  %v379_v42 = vld [vmem:[#allocation2 + $0x48] sm:$0xff] }
 0x153   : > { %2511 = vmatpush2.bf16.msra.mxu0 %v3737_v43 }
 0x154   : > { %2512 = vmatprep.subr.bf16.mxu0 %v3742_v44 }
 0x157   : > { %2513 = vmatpush2.bf16.msra.mxu0 %v3740_v45 }
 0x158   : > { %2514 = vmatprep.subr.bf16.mxu0 %v3745_v46 }
 0x15b   : > { %2515 = vmatpush2.bf16.msra.mxu0 %v3743_v47 }
 0x15c   : > { %2516 = vmatprep.subr.bf16.mxu0 %v3748_v48 }
 0x15f   : > { %2517 = vmatpush2.bf16.msra.mxu0 %v3746_v49 }
 0x160   : > { %2518 = vmatprep.subr.bf16.mxu0 %v3751_v51 }
 0x163   : > { %2519 = vmatpush2.bf16.msra.mxu0 %v3749_v52 }
 0x164   : > { %2520 = vmatprep.subr.bf16.mxu0 %v3754_v55 }
 0x167   : > { %2521 = vmatpush2.bf16.msra.mxu0 %v3752_v56 }
 0x16a   : > { %v2266_v0 = vpop.f32.mrf.mxu0  ;;  %2523 = vmatmul.mubr.bf16.vlgmr.msra.gmra.mxu0 %v4042_v17 }
 0x16b   : > { %v2267_v2 = vadd.f32 %v2266_v0, %v2224_v62  ;;  %v2309_v21 = vpop.f32.mrf.mxu1 }
 0x16c   : > { %v2268_v5 = vpop.f32.mrf.mxu0 }
 0x16d   : > { %v2533_v7 = vadd.f32 %v2267_v2, %v370_v63  ;;  %v2269_v8 = vadd.f32 %v2268_v5, %v2226_v1  ;;  %v2311_v22 = vpop.f32.mrf.mxu1  ;;  %v380_v1 = vld [vmem:[#allocation2 + $0x10] sm:$0xff] }
 0x16e   : > { %v2270_v10 = vpop.f32.mrf.mxu0 }
 0x16f   : > { %2545 = vst [vmem:[#allocation2 + $0x30] sm:$0xff] %v2533_v7  ;;  %v2534_v14 = vadd.f32 %v2269_v8, %v371_v4  ;;  %v2271_v15 = vadd.f32 %v2270_v10, %v2228_v6  ;;  %v2313_v23 = vpop.f32.mrf.mxu1  ;;  %v381_v6 = vld [vmem:[#allocation2 + $0x40] sm:$0xff] }
 0x170   : > { %v2272_v18 = vpop.f32.mrf.mxu0 }
 0x171   : > { %2546 = vst [vmem:[#allocation2] sm:$0xff] %v2534_v14  ;;  %v2539_v19 = vadd.f32 %v2271_v15, %v376_v9  ;;  %v2273_v20 = vadd.f32 %v2272_v18, %v2230_v13  ;;  %v2315_v24 = vpop.f32.mrf.mxu1 }
 0x173   : > { %2551 = vst [vmem:[#allocation2 + $0x8] sm:$0xff] %v2539_v19  ;;  %v2540_v17 = vadd.f32 %v2273_v20, %v377_v16 }
 0x175   : > { %2552 = vst [vmem:[#allocation2 + $0x38] sm:$0xff] %v2540_v17 }
 0x1aa   : > { %v2352_v25 = vpop.f32.mrf.mxu0 }
 0x1ab   : > { %v2395_v26 = vpop.f32.mrf.mxu1  ;;  %v2353_v11 = vadd.f32 %v2352_v25, %v2309_v21 }
 0x1ac   : > { %v2354_v27 = vpop.f32.mrf.mxu0 }
 0x1ad   : > { %v2397_v29 = vpop.f32.mrf.mxu1  ;;  %v2355_v12 = vadd.f32 %v2354_v27, %v2311_v22  ;;  %v2396_v30 = vadd.f32 %v2395_v26, %v2353_v11 }
 0x1ae   : > { %v2356_v57 = vpop.f32.mrf.mxu0 }
 0x1af   : > { %v2399_v41 = vpop.f32.mrf.mxu1  ;;  %v2535_v32 = vadd.f32 %v2396_v30, %v372_v28  ;;  %v2357_v33 = vadd.f32 %v2356_v57, %v2313_v23  ;;  %v2398_v34 = vadd.f32 %v2397_v29, %v2355_v12 }
 0x1b0   : > { %v2358_v35 = vpop.f32.mrf.mxu0 }
 0x1b1   : > { %v2401_v37 = vpop.f32.mrf.mxu1  ;;  %2547 = vst [vmem:[#allocation2 + $0x58] sm:$0xff] %v2535_v32  ;;  %v2536_v38 = vadd.f32 %v2398_v34, %v373_v31  ;;  %v2359_v39 = vadd.f32 %v2358_v35, %v2315_v24  ;;  %v2400_v40 = vadd.f32 %v2399_v41, %v2357_v33 }
 0x1b3   : > { %2548 = vst [vmem:[#allocation2 + $0x18] sm:$0xff] %v2536_v38  ;;  %v2541_v43 = vadd.f32 %v2400_v40, %v378_v36  ;;  %v2402_v44 = vadd.f32 %v2401_v37, %v2359_v39 }
 0x1b5   : > { %2553 = vst [vmem:[#allocation2 + $0x28] sm:$0xff] %v2541_v43  ;;  %v2542_v45 = vadd.f32 %v2402_v44, %v379_v42 }
 0x1b7   : > { %2554 = vst [vmem:[#allocation2 + $0x48] sm:$0xff] %v2542_v45 }
 0x1ea   : > { %v2438_v46 = vpop.f32.mrf.mxu0 }
 0x1eb   : > { %v2481_v47 = vpop.f32.mrf.mxu1 }
 0x1ec   : > { %v2440_v48 = vpop.f32.mrf.mxu0  ;;  %v2482_v53 = vadd.f32 %v2481_v47, %v2438_v46 }
 0x1ed   : > { %v2483_v49 = vpop.f32.mrf.mxu1 }
 0x1ee   : > { %v2442_v50 = vpop.f32.mrf.mxu0  ;;  %v2484_v56 = vadd.f32 %v2483_v49, %v2440_v48 }
 0x1ef   : > { %v2485_v51 = vpop.f32.mrf.mxu1 }
 0x1f0   : > { %v2444_v52 = vpop.f32.mrf.mxu0  ;;  %v2486_v62 = vadd.f32 %v2485_v51, %v2442_v50 }
 0x1f1   : > { %v2487_v59 = vpop.f32.mrf.mxu1 }
 0x1f2   : > { %v2488_v3 = vadd.f32 %v2487_v59, %v2444_v52 }
 0x22a   : > { %v2524_v55 = vpop.f32.mrf.mxu0 }
 0x22b   : > { %v2525_v58 = vadd.f32 %v2524_v55, %v2482_v53 }
 0x22c   : > { %v2526_v61 = vpop.f32.mrf.mxu0 }
 0x22d   : > { %v2537_v63 = vadd.f32 %v2525_v58, %v374_v54  ;;  %v2527_v0 = vadd.f32 %v2526_v61, %v2484_v56 }
 0x22e   : > { %v2528_v2 = vpop.f32.mrf.mxu0 }
 0x22f   : > { %2549 = vst [vmem:[#allocation2 + $0x50] sm:$0xff] %v2537_v63  ;;  %v2538_v4 = vadd.f32 %v2527_v0, %v375_v60  ;;  %v2529_v5 = vadd.f32 %v2528_v2, %v2486_v62 }
 0x230   : > { %v2530_v7 = vpop.f32.mrf.mxu0 }
 0x231   : > { %2550 = vst [vmem:[#allocation2 + $0x20] sm:$0xff] %v2538_v4  ;;  %v2543_v8 = vadd.f32 %v2529_v5, %v380_v1  ;;  %v2531_v9 = vadd.f32 %v2530_v7, %v2488_v3  ;;  %2560 = sbr.rel (%p3252_p11) target bundleno = 914 (0x392), region = 75 }
 0x233   : > { %2555 = vst [vmem:[#allocation2 + $0x10] sm:$0xff] %v2543_v8  ;;  %v2544_v10 = vadd.f32 %v2531_v9, %v381_v6 }
 0x235   : > { %2556 = vst [vmem:[#allocation2 + $0x40] sm:$0xff] %v2544_v10 }
 0x236   : > { %v2583_v13 = vlaneseq  ;;  %v2574_v14 = vld [vmem:[%s4333_s3] sm:$0xff]  ;;  %v2575_v15 = vld [vmem:[%s4333_s3 + $0x8] sm:$0xff]  ;;  %v2561_v20 = vld [vmem:[#allocation2 + $0x30] sm:$0xff] }
 0x237   : > { %v2573_v18 = vld [vmem:[%s4332_s2] sm:$0x3f]  ;;  %v2625_v19 = vunpack.c.l.bf16 %v2574_v14  ;;  %v2563_v25 = vld [vmem:[#allocation2 + $0x58] sm:$0xff]  ;;  %v2626_v28 = vunpack.c.h.bf16 %v2574_v14  ;;  %v2627_v29 = vunpack.c.l.bf16 %v2575_v15  ;;  %v2576_v12 = vld [vmem:[%s4333_s3 + $0x10] sm:$0xff]  ;;  %v2628_v35 = vunpack.c.h.bf16 %v2575_v15 }
 0x238   : > { %v2584_v16 = vshrl.u32 %v2583_v13, 7  ;;  %v2562_v24 = vld [vmem:[#allocation2] sm:$0xff]  ;;  %v2564_v26 = vld [vmem:[#allocation2 + $0x18] sm:$0xff]  ;;  %v2565_v32 = vld [vmem:[#allocation2 + $0x50] sm:$0xff]  ;;  %v2629_v42 = vunpack.c.l.bf16 %v2576_v12  ;;  %v2630_v51 = vunpack.c.h.bf16 %v2576_v12 }
 0x239   : > { %v2566_v40 = vld [vmem:[#allocation2 + $0x20] sm:$0xff]  ;;  %v2567_v47 = vld [vmem:[#allocation2 + $0x8] sm:$0xff]  ;;  %v2568_v48 = vld [vmem:[#allocation2 + $0x38] sm:$0xff] }
 0x23a   : > { %v4224_v17 = vsub.s32 0, %v2584_v16  ;;  %v4226_v21 = vsub.s32 1, %v2584_v16  ;;  %v4228_v22 = vsub.s32 2, %v2584_v16  ;;  %v4230_v23 = vsub.s32 3, %v2584_v16  ;;  %v2569_v49 = vld [vmem:[#allocation2 + $0x28] sm:$0xff]  ;;  %v2577_v55 = vld [vmem:[%s4333_s3 + $0x18] sm:$0xff] }
 0x23b   : > { %v4232_v11 = vsub.s32 4, %v2584_v16  ;;  %v4234_v27 = vsub.s32 5, %v2584_v16  ;;  %v2570_v54 = vld [vmem:[#allocation2 + $0x48] sm:$0xff]  ;;  %v2578_v56 = vld [vmem:[%s4333_s3 + $0x20] sm:$0xff]  ;;  %v2571_v61 = vld [vmem:[#allocation2 + $0x10] sm:$0xff]  ;;  %v2631_v2 = vunpack.c.l.bf16 %v2577_v55  ;;  %v2632_v3 = vunpack.c.h.bf16 %v2577_v55 }
 0x23c   : > { %v2586_v30 = vrot.slane %v2573_v18, %v4224_v17  ;;  %v2590_v57 = vrot.slane %v2573_v18, %v4226_v21  ;;  %v2594_v31 = vrot.slane %v2573_v18, %v4228_v22  ;;  %v2598_v41 = vrot.slane %v2573_v18, %v4230_v23  ;;  %v2579_v62 = vld [vmem:[%s4333_s3 + $0x28] sm:$0xff]  ;;  %v2572_v6 = vld [vmem:[#allocation2 + $0x40] sm:$0xff] }
 0x23d   : > { %v2602_v33 = vrot.slane %v2573_v18, %v4232_v11  ;;  %v2606_v34 = vrot.slane %v2573_v18, %v4234_v27  ;;  %v2633_v7 = vunpack.c.l.bf16 %v2578_v56  ;;  %v2634_v8 = vunpack.c.h.bf16 %v2578_v56 }
 0x23e   : > { %v2613_v36 = vadd.f32 %v2586_v30, %v2561_v20  ;;  %v2614_v37 = vadd.f32 %v2590_v57, %v2562_v24  ;;  %v2615_v38 = vadd.f32 %v2594_v31, %v2563_v25  ;;  %v2616_v39 = vadd.f32 %v2598_v41, %v2564_v26 }
 0x23f   : > { %v2617_v43 = vadd.f32 %v2602_v33, %v2565_v32  ;;  %v2618_v50 = vadd.f32 %v2606_v34, %v2566_v40  ;;  %v2619_v58 = vadd.f32 %v2586_v30, %v2567_v47  ;;  %v2620_v63 = vadd.f32 %v2590_v57, %v2568_v48 }
 0x240   : > { %v2637_v44 = vadd.f32 %v2625_v19, %v2613_v36  ;;  %v2638_v45 = vadd.f32 %v2626_v28, %v2614_v37  ;;  %v2639_v46 = vadd.f32 %v2627_v29, %v2615_v38  ;;  %v2640_v52 = vadd.f32 %v2628_v35, %v2616_v39 }
 0x241   : > { %v2641_v59 = vadd.f32 %v2629_v42, %v2617_v43  ;;  %v2621_v0 = vadd.f32 %v2594_v31, %v2569_v49  ;;  %v2622_v1 = vadd.f32 %v2598_v41, %v2570_v54  ;;  %v2642_v4 = vadd.f32 %v2630_v51, %v2618_v50 }
 0x242   : > { %v2649_v53 = vadd.f32 %v2638_v45, %v2637_v44  ;;  %v2623_v9 = vadd.f32 %v2602_v33, %v2571_v61  ;;  %v2635_v10 = vunpack.c.l.bf16 %v2579_v62  ;;  %v2643_v13 = vadd.f32 %v2631_v2, %v2619_v58 }
 0x243   : > { %v2644_v14 = vadd.f32 %v2632_v3, %v2620_v63  ;;  %v2645_v16 = vadd.f32 %v2633_v7, %v2621_v0  ;;  %v2624_v18 = vadd.f32 %v2606_v34, %v2572_v6  ;;  %v2636_v19 = vunpack.c.h.bf16 %v2579_v62 }
 0x244   : > { %v2650_v60 = vadd.f32 %v2649_v53, %v2639_v46  ;;  %v2646_v20 = vadd.f32 %v2634_v8, %v2622_v1  ;;  %v2647_v26 = vadd.f32 %v2635_v10, %v2623_v9 }
 0x245   : > { %v2656_v24 = vadd.f32 %v2644_v14, %v2643_v13  ;;  %v2648_v29 = vadd.f32 %v2636_v19, %v2624_v18 }
 0x246   : > { %v2651_v5 = vadd.f32 %v2650_v60, %v2640_v52 }
 0x247   : > { %v2657_v28 = vadd.f32 %v2656_v24, %v2645_v16 }
 0x248   : > { %v2652_v15 = vadd.f32 %v2651_v5, %v2641_v59 }
 0x249   : > { %v2658_v12 = vadd.f32 %v2657_v28, %v2646_v20 }
 0x24a   : > { %v2653_v25 = vadd.f32 %v2652_v15, %v2642_v4  ;;  %v2581_v15 = vld [vmem:[%s4335_s5] sm:$0x3f] }
 0x24b   : > { %v2659_v30 = vadd.f32 %v2658_v12, %v2647_v26  ;;  %v2769_v28 = vrot.slane %v2581_v15, %v4224_v17  ;;  %v2777_v12 = vrot.slane %v2581_v15, %v4228_v22 }
 0x24c   : > { %2654 = vadd.xlane.f32.xlu0 %v2653_v25 }
 0x24d   : > { %v2660_v57 = vadd.f32 %v2659_v30, %v2648_v29  ;;  %v2781_v30 = vrot.slane %v2581_v15, %v4230_v23 }
 0x250   : > { %2661 = vadd.xlane.f32.xlu0 %v2660_v57 }
 0x2d5   : > { %v2655_v31 = vpop.xlane.xlu0 %2654 }
 0x2d6   : > { %v2664_v41 = vmul.f32 0.0013020834, %v2655_v31 }
 0x2d8   : > { %v2666_v32 = vsub.f32 %v2637_v44, %v2664_v41  ;;  %v2667_v33 = vsub.f32 %v2638_v45, %v2664_v41  ;;  %v2668_v35 = vsub.f32 %v2639_v46, %v2664_v41  ;;  %v2669_v36 = vsub.f32 %v2640_v52, %v2664_v41 }
 0x2d9   : > { %v2662_v38 = vpop.xlane.xlu0 %2661  ;;  %v2670_v39 = vsub.f32 %v2641_v59, %v2664_v41  ;;  %v2671_v47 = vsub.f32 %v2642_v4, %v2664_v41 }
 0x2da   : > { %v2678_v37 = vmul.f32 %v2666_v32, %v2666_v32  ;;  %v2679_v34 = vmul.f32 %v2667_v33, %v2667_v33  ;;  %v2680_v40 = vmul.f32 %v2668_v35, %v2668_v35  ;;  %v2665_v43 = vmul.f32 0.0013020834, %v2662_v38 }
 0x2db   : > { %v2681_v48 = vmul.f32 %v2669_v36, %v2669_v36  ;;  %v2682_v44 = vmul.f32 %v2670_v39, %v2670_v39  ;;  %v2683_v55 = vmul.f32 %v2671_v47, %v2671_v47  ;;  %v2789_v38 = vrot.slane %v2581_v15, %v4234_v27 }
 0x2dc   : > { %v2690_v42 = vadd.f32 %v2679_v34, %v2678_v37  ;;  %v4254_v50 = vsub.f32 %v2643_v13, %v2665_v43  ;;  %v4256_v51 = vsub.f32 %v2644_v14, %v2665_v43  ;;  %v4258_v53 = vsub.f32 %v2645_v16, %v2665_v43  ;;  %v2580_v14 = vld [vmem:[%s4334_s4] sm:$0x3f] }
 0x2dd   : > { %v4260_v46 = vsub.f32 %v2646_v20, %v2665_v43  ;;  %v4266_v58 = vsub.f32 %v2647_v26, %v2665_v43  ;;  %v2677_v62 = vsub.f32 %v2648_v29, %v2665_v43  ;;  %v2726_v16 = vrot.slane %v2580_v14, %v4224_v17 }
 0x2de   : > { %v2691_v49 = vadd.f32 %v2690_v42, %v2680_v40  ;;  %v2684_v52 = vmul.f32 %v4254_v50, %v4254_v50  ;;  %v2685_v54 = vmul.f32 %v4256_v51, %v4256_v51  ;;  %v2686_v59 = vmul.f32 %v4258_v53, %v4258_v53 }
 0x2df   : > { %v2687_v63 = vmul.f32 %v4260_v46, %v4260_v46  ;;  %v2688_v1 = vmul.f32 %v4266_v58, %v4266_v58  ;;  %v2689_v3 = vmul.f32 %v2677_v62, %v2677_v62  ;;  %v2730_v18 = vrot.slane %v2580_v14, %v4226_v21 }
 0x2e0   : > { %v2692_v45 = vadd.f32 %v2691_v49, %v2681_v48  ;;  %v2697_v60 = vadd.f32 %v2685_v54, %v2684_v52  ;;  %v2734_v19 = vrot.slane %v2580_v14, %v4228_v22  ;;  %v2738_v20 = vrot.slane %v2580_v14, %v4230_v23 }
 0x2e1   : > { %v2742_v24 = vrot.slane %v2580_v14, %v4232_v11  ;;  %v2746_v25 = vrot.slane %v2580_v14, %v4234_v27  ;;  %v2773_v29 = vrot.slane %v2581_v15, %v4226_v21  ;;  %v2785_v34 = vrot.slane %v2581_v15, %v4232_v11 }
 0x2e2   : > { %v2693_v56 = vadd.f32 %v2692_v45, %v2682_v44  ;;  %v2698_v0 = vadd.f32 %v2697_v60, %v2686_v59 }
 0x2e4   : > { %v2694_v61 = vadd.f32 %v2693_v56, %v2683_v55  ;;  %v2699_v2 = vadd.f32 %v2698_v0, %v2687_v63 }
 0x2e6   : > { %2695 = vadd.xlane.f32.xlu1 %v2694_v61  ;;  %v2700_v4 = vadd.f32 %v2699_v2, %v2688_v1 }
 0x2e8   : > { %v2701_v5 = vadd.f32 %v2700_v4, %v2689_v3 }
 0x2ea   : > { %2702 = vadd.xlane.f32.xlu1 %v2701_v5 }
 0x36f   : > { %v2696_v6 = vpop.xlane.xlu1 %2695 }
 0x370   : > { %v2704_v7 = vmul.f32 0.0013020834, %v2696_v6 }
 0x372   : > { %v2706_v8 = vadd.f32 1e-12, %v2704_v7 }
 0x373   : > { %v2703_v9 = vpop.xlane.xlu1 %2702 }
 0x374   : > { %3759 = vrsqrt.f32 %v2706_v8  ;;  %v2705_v10 = vmul.f32 0.0013020834, %v2703_v9 }
 0x376   : > { %v2707_v13 = vadd.f32 1e-12, %v2705_v10 }
 0x378   : > { %3761 = vrsqrt.f32 %v2707_v13 }
 0x381   : > { %v3760_v26 = vpop.eup %3759 }
 0x382   : > { %v2710_v57 = vmul.f32 %v3760_v26, %v2666_v32  ;;  %v2711_v31 = vmul.f32 %v3760_v26, %v2667_v33  ;;  %v2712_v41 = vmul.f32 %v3760_v26, %v2668_v35  ;;  %v2713_v37 = vmul.f32 %v3760_v26, %v2669_v36 }
 0x383   : > { %v2714_v40 = vmul.f32 %v3760_v26, %v2670_v39  ;;  %v2715_v42 = vmul.f32 %v3760_v26, %v2671_v47 }
 0x384   : > { %v2753_v43 = vmul.f32 %v2726_v16, %v2710_v57  ;;  %v2754_v48 = vmul.f32 %v2730_v18, %v2711_v31  ;;  %v2755_v49 = vmul.f32 %v2734_v19, %v2712_v41  ;;  %v2756_v17 = vmul.f32 %v2738_v20, %v2713_v37 }
 0x385   : > { %v2757_v44 = vmul.f32 %v2742_v24, %v2714_v40  ;;  %v2758_v21 = vmul.f32 %v2746_v25, %v2715_v42  ;;  %v3762_v35 = vpop.eup %3761 }
 0x386   : > { %v2796_v45 = vadd.f32 %v2769_v28, %v2753_v43  ;;  %v2797_v22 = vadd.f32 %v2773_v29, %v2754_v48  ;;  %v2798_v52 = vadd.f32 %v2777_v12, %v2755_v49  ;;  %v2799_v23 = vadd.f32 %v2781_v30, %v2756_v17 }
 0x387   : > { %v2800_v32 = vadd.f32 %v2785_v34, %v2757_v44  ;;  %v2801_v33 = vadd.f32 %v2789_v38, %v2758_v21  ;;  %v2716_v27 = vmul.f32 %v3762_v35, %v4254_v50  ;;  %v2717_v39 = vmul.f32 %v3762_v35, %v4256_v51 }
 0x388   : > { %v3264_v36 = vpack.c.bf16 %v2797_v22, %v2796_v45  ;;  %v3265_v54 = vpack.c.bf16 %v2799_v23, %v2798_v52  ;;  %v2718_v47 = vmul.f32 %v3762_v35, %v4258_v53  ;;  %v2719_v55 = vmul.f32 %v3762_v35, %v4260_v46 }
 0x389   : > { %v3266_v11 = vpack.c.bf16 %v2801_v33, %v2800_v32  ;;  %v2720_v56 = vmul.f32 %v3762_v35, %v4266_v58  ;;  %v2721_v59 = vmul.f32 %v3762_v35, %v2677_v62  ;;  %v2759_v50 = vmul.f32 %v2726_v16, %v2716_v27 }
 0x38a   : > { %2844 = vst [vmem:[%s4336_s6] sm:$0xff] %v3264_v36  ;;  %2845 = vst [vmem:[%s4336_s6 + $0x8] sm:$0xff] %v3265_v54  ;;  %v2760_v51 = vmul.f32 %v2730_v18, %v2717_v39  ;;  %v2761_v53 = vmul.f32 %v2734_v19, %v2718_v47  ;;  %v2762_v60 = vmul.f32 %v2738_v20, %v2719_v55 }
 0x38b   : > { %2846 = vst [vmem:[%s4336_s6 + $0x10] sm:$0xff] %v3266_v11  ;;  %v2763_v61 = vmul.f32 %v2742_v24, %v2720_v56  ;;  %v2764_v63 = vmul.f32 %v2746_v25, %v2721_v59  ;;  %v2802_v0 = vadd.f32 %v2769_v28, %v2759_v50 }
 0x38c   : > { %v2803_v1 = vadd.f32 %v2773_v29, %v2760_v51  ;;  %v2804_v2 = vadd.f32 %v2777_v12, %v2761_v53  ;;  %v2805_v3 = vadd.f32 %v2781_v30, %v2762_v60 }
 0x38d   : > { %v2806_v4 = vadd.f32 %v2785_v34, %v2763_v61  ;;  %v2807_v5 = vadd.f32 %v2789_v38, %v2764_v63 }
 0x38e   : > { %v3267_v46 = vpack.c.bf16 %v2803_v1, %v2802_v0  ;;  %v3268_v6 = vpack.c.bf16 %v2805_v3, %v2804_v2 }
 0x38f   : > { %v3269_v58 = vpack.c.bf16 %v2807_v5, %v2806_v4 }
 0x390   : > { %2847 = vst [vmem:[%s4336_s6 + $0x18] sm:$0xff] %v3267_v46  ;;  %2848 = vst [vmem:[%s4336_s6 + $0x20] sm:$0xff] %v3268_v6 }
 0x391   : > { %2849 = vst [vmem:[%s4336_s6 + $0x28] sm:$0xff] %v3269_v58 }
 0x392 PF: > { %s16_s25 = sadd.s32 1, %s3801_s25   ;;  %s4337_s21 = smov %s3789_s22 }
 0x393   : > { %p13_p12 = scmp.ge.s32.totalorder %s16_s25, 6   ;;  %s4338_s22 = smov %s3874_s29 }
 0x394   : > { %s4339_s23 = smov %s3797_s24  ;;  %s4340_s24 = smov %s4342_s26 }
 0x395   :  { %15 = sbr.rel (!%p13_p12) target bundleno = 3 (0x3), region = 116 }

// kernel: metaphor_forward.21
= control target key start
LH: loop header
LB: loop body
LE: loop exit
PB: predicated region body
PF: predicated region fallthrough
CT: control target
= control target key end

     0   :  { %s4567_s27 = smov 0   ;;  %s4569_s28 = smov 0   ;;  %s5254_s0 = inlined_call_operand.vmem [shape: bf16[16,3072], index: 0, kind: input, shape index: {}]   ;;  %s5255_s1 = inlined_call_operand.vmem [shape: bf16[3072,768], index: 1, kind: input, shape index: {}]   ;;  %s5256_s2 = inlined_call_operand.vmem [shape: f32[1,768], index: 2, kind: input, shape index: {}]   ;;  %s5257_s3 = inlined_call_operand.vmem [shape: bf16[16,768], index: 3, kind: input, shape index: {}]   ;;  %s5258_s4 = inlined_call_operand.vmem [shape: f32[1,768], index: 4, kind: input, shape index: {}]   ;;  %s5259_s5 = inlined_call_operand.vmem [shape: f32[1,768], index: 5, kind: input, shape index: {}]   ;;  %s5260_s6 = inlined_call_operand.vmem [shape: bf16[768,128], index: 6, kind: input, shape index: {}]   ;;  %s5261_s7 = inlined_call_operand.vmem [shape: f32[1,128], index: 7, kind: input, shape index: {}]   ;;  %s5262_s8 = inlined_call_operand.vmem [shape: f32[16,128], index: 8, kind: output, shape index: {}]  }
   0x1   :  { %s4571_s29 = smov 0   ;;  %s4573_s30 = smov 0  }
   0x2   :  { %s4575_s9 = smov 0  }
   0x3 LB: > { %s27_s10 = sadd.s32 1, %s4515_s30  ;;  %p46_p1 = scmp.ne.s32.totalorder %s4507_s28, %s4503_s27  ;;  %s4519_s9 = sphi %s4575_s9, %s18_s9   ;;  %s4515_s30 = sphi %s4573_s30, %s5266_s30   ;;  %s4511_s29 = sphi %s4571_s29, %s5265_s29   ;;  %s4507_s28 = sphi %s4569_s28, %s5264_s28   ;;  %s4503_s27 = sphi %s4567_s27, %s5263_s27  }
   0x4   : > { %p28_p0 = scmp.ge.s32.totalorder %s27_s10, 4  ;;  %p47_p2 = scmp.eq.s32.totalorder %s4519_s9, 0 }
   0x5   : > { %s39_s12 = sadd.s32 1, %s4507_s28  ;;  %p3506_p5 = scmp.ge.s32.totalorder %s4519_s9, 4 }
   0x6   : > { %s5268_s10 = smov (%p28_p0, %s27_s10), 0  ;;  %p48_p3 = por %p47_p2, %p46_p1 }
   0x7   : > { %s35_s11 = ssub.s32 %s4515_s30, %s5268_s10  ;;  %280 = sbr.rel (%p3506_p5) target bundleno = 20 (0x14), region = 40 }
   0x8   : > { %p37_p4 = scmp.eq.s32.totalorder %s35_s11, 0 }
   0xa   : > { %s4602_s13 = scalar_select %p37_p4, %s4507_s28, %s39_s12  }
   0xc   : > { %283 = sbr.rel (!%p48_p3) target bundleno = 20 (0x14), region = 44  ;;  %s285_s14 = sand.u32 (%p48_p3), 1, %s4507_s28  }
   0xd   : > { %s3861_s15 = smul.u32 (%p48_p3), 24, %s4515_s30 }
   0xe   : > { %s3928_s16 = smul.u32 (%p48_p3), 48, %s285_s14 }
   0xf   : > { %s293_s19 = scalar_lea.vmem (%p48_p3), %s5254_s0, %s3861_s15 }
  0x10   : > { %v306_v0 = vld [vmem:[%s293_s19] sm:$0xff] (%p48_p3)  ;;  %v308_v1 = vld [vmem:[%s293_s19 + $0x8] sm:$0xff] (%p48_p3)  ;;  %v310_v2 = vld [vmem:[%s293_s19 + $0x10] sm:$0xff] (%p48_p3)  ;;  %s287_s20 = scalar_lea.vmem (%p48_p3), [#allocation3], %s3928_s16 }
  0x11   : > { %307 = vst [vmem:[%s287_s20] sm:$0xff] %v306_v0  ;;  %309 = vst [vmem:[%s287_s20 + $0x8] sm:$0xff] %v308_v1  ;;  %v312_v3 = vld [vmem:[%s293_s19 + $0x60] sm:$0xff]  ;;  %v314_v4 = vld [vmem:[%s293_s19 + $0x68] sm:$0xff] }
  0x12   : > { %311 = vst [vmem:[%s287_s20 + $0x10] sm:$0xff] %v310_v2  ;;  %v316_v5 = vld [vmem:[%s293_s19 + $0x70] sm:$0xff]  ;;  %313 = vst [vmem:[%s287_s20 + $0x18] sm:$0xff] %v312_v3 }
  0x13   : > { %315 = vst [vmem:[%s287_s20 + $0x20] sm:$0xff] %v314_v4  ;;  %317 = vst [vmem:[%s287_s20 + $0x28] sm:$0xff] %v316_v5 }
  0x14 PF: > { %p3508_p6 = scmp.ge.s32.totalorder %s4519_s9, 1  ;;  %p332_p7 = scmp.lt.s32.totalorder %s4519_s9, 5 }
  0x16   : > { %p333_p8 = pnand %p3508_p6, %p332_p7 }
  0x17   : > { %s339_s21 = sand.u32 (!%p333_p8), 1, %s4503_s27   ;;  %s386_s22 = smul.u32 (!%p333_p8), 96, %s4511_s29 }
  0x18   : > { %336 = sbr.rel (%p333_p8) target bundleno = 1180 (0x49c), region = 71  ;;  %p3510_p10 = scmp.ne.s32.totalorder (!%p333_p8), %s4511_s29, 0 }
  0x19   : > { %s3929_s23 = smul.u32 (!%p333_p8), 48, %s339_s21  ;;  %p387_p9 = scmp.lt.s32.totalorder (!%p333_p8), %s386_s22, 383 }
  0x1b   : > { %s4619_s12 = scalar_lea.vmem (!%p333_p8), [#allocation3], %s3929_s23 }
  0x1d   : > { %s5270_s22 = smov (!%p387_p9, %s386_s22), 383  ;;  %410 = sbr.rel (%p3510_p10) target bundleno = 41 (0x29), region = 79 }
  0x1e   : > { %s3930_s24 = smul.u32 24, %s5270_s22 }
  0x20   : > { %s4617_s11 = scalar_lea.vmem %s5255_s1, %s3930_s24 }
  0x22   : > { %v4521_v6 = vmov 0.0  }
  0x23   : > { %411 = vst [vmem:[#allocation2 + $0x30] sm:$0xff] %v4521_v6  ;;  %412 = vst [vmem:[#allocation2] sm:$0xff] %v4521_v6 }
  0x24   : > { %413 = vst [vmem:[#allocation2 + $0x58] sm:$0xff] %v4521_v6  ;;  %414 = vst [vmem:[#allocation2 + $0x18] sm:$0xff] %v4521_v6 }
  0x25   : > { %415 = vst [vmem:[#allocation2 + $0x50] sm:$0xff] %v4521_v6  ;;  %416 = vst [vmem:[#allocation2 + $0x20] sm:$0xff] %v4521_v6 }
  0x26   : > { %417 = vst [vmem:[#allocation2 + $0x8] sm:$0xff] %v4521_v6  ;;  %418 = vst [vmem:[#allocation2 + $0x38] sm:$0xff] %v4521_v6 }
  0x27   : > { %419 = vst [vmem:[#allocation2 + $0x28] sm:$0xff] %v4521_v6  ;;  %420 = vst [vmem:[#allocation2 + $0x48] sm:$0xff] %v4521_v6 }
  0x28   : > { %421 = vst [vmem:[#allocation2 + $0x10] sm:$0xff] %v4521_v6  ;;  %422 = vst [vmem:[#allocation2 + $0x40] sm:$0xff] %v4521_v6 }
  0x29 PF: > { %v3972_v7 = vld [vmem:[%s4617_s11 + $0x154] ss:$24 sps:$4 sm:$0xff]   ;;  %v3976_v9 = vld [vmem:[%s4617_s11 + $0x150] ss:$24 sps:$4 sm:$0xff]   ;;  %v3978_v11 = vld [vmem:[%s4617_s11 + $0x124] ss:$24 sps:$4 sm:$0xff]  }
  0x2a   : > { %v3974_v8 = vld [vmem:[%s4617_s11 + $0x454] ss:$24 sps:$4 sm:$0xff]   ;;  %2199 = vmatprep.subr.bf16.mxu0 %v3972_v7  ;;  %v3977_v10 = vld [vmem:[%s4617_s11 + $0x450] ss:$24 sps:$4 sm:$0xff]   ;;  %v3980_v12 = vld [vmem:[%s4617_s11 + $0x424] ss:$24 sps:$4 sm:$0xff]  }
  0x2b   : > { %2242 = vmatprep.subr.bf16.mxu1 %v3974_v8  ;;  %2200 = vmatpush1.bf16.msra.mxu0 %v3976_v9  ;;  %v3982_v13 = vld [vmem:[%s4617_s11 + $0x120] ss:$24 sps:$4 sm:$0xff]   ;;  %v3984_v15 = vld [vmem:[%s4617_s11 + $0xf4] ss:$24 sps:$4 sm:$0xff]   ;;  %v3988_v17 = vld [vmem:[%s4617_s11 + $0xf0] ss:$24 sps:$4 sm:$0xff]  }
  0x2c   : > { %2243 = vmatpush1.bf16.msra.mxu1 %v3977_v10  ;;  %2201 = vmatprep.subr.bf16.mxu0 %v3978_v11  ;;  %v3983_v14 = vld [vmem:[%s4617_s11 + $0x420] ss:$24 sps:$4 sm:$0xff]   ;;  %v3986_v16 = vld [vmem:[%s4617_s11 + $0x3f4] ss:$24 sps:$4 sm:$0xff]   ;;  %v3989_v18 = vld [vmem:[%s4617_s11 + $0x3f0] ss:$24 sps:$4 sm:$0xff]  }
  0x2d   : > { %2244 = vmatprep.subr.bf16.mxu1 %v3980_v12  ;;  %v3990_v19 = vld [vmem:[%s4617_s11 + $0xc4] ss:$24 sps:$4 sm:$0xff]   ;;  %v3994_v21 = vld [vmem:[%s4617_s11 + $0xc0] ss:$24 sps:$4 sm:$0xff]   ;;  %v3996_v23 = vld [vmem:[%s4617_s11 + $0x94] ss:$24 sps:$4 sm:$0xff]  }
  0x2e   : > { %v3992_v20 = vld [vmem:[%s4617_s11 + $0x3c4] ss:$24 sps:$4 sm:$0xff]   ;;  %v3995_v22 = vld [vmem:[%s4617_s11 + $0x3c0] ss:$24 sps:$4 sm:$0xff]   ;;  %v3998_v24 = vld [vmem:[%s4617_s11 + $0x394] ss:$24 sps:$4 sm:$0xff]  }
  0x2f   : > { %2202 = vmatpush1.bf16.msra.mxu0 %v3982_v13  ;;  %v4000_v25 = vld [vmem:[%s4617_s11 + $0x90] ss:$24 sps:$4 sm:$0xff]   ;;  %v4002_v27 = vld [vmem:[%s4617_s11 + $0x64] ss:$24 sps:$4 sm:$0xff]   ;;  %v4006_v29 = vld [vmem:[%s4617_s11 + $0x60] ss:$24 sps:$4 sm:$0xff]  }
  0x30   : > { %2245 = vmatpush1.bf16.msra.mxu1 %v3983_v14  ;;  %2203 = vmatprep.subr.bf16.mxu0 %v3984_v15  ;;  %v4001_v26 = vld [vmem:[%s4617_s11 + $0x390] ss:$24 sps:$4 sm:$0xff]   ;;  %v4004_v28 = vld [vmem:[%s4617_s11 + $0x364] ss:$24 sps:$4 sm:$0xff]   ;;  %v4007_v30 = vld [vmem:[%s4617_s11 + $0x360] ss:$24 sps:$4 sm:$0xff]  }
  0x31   : > { %2246 = vmatprep.subr.bf16.mxu1 %v3986_v16  ;;  %v4008_v31 = vld [vmem:[%s4617_s11 + $0x34] ss:$24 sps:$4 sm:$0xff]   ;;  %v4012_v33 = vld [vmem:[%s4617_s11 + $0x30] ss:$24 sps:$4 sm:$0xff]   ;;  %v4014_v35 = vld [vmem:[%s4617_s11 + $0x4] ss:$24 sps:$4 sm:$0xff]  }
  0x32   : > { %v4010_v32 = vld [vmem:[%s4617_s11 + $0x334] ss:$24 sps:$4 sm:$0xff]   ;;  %v4013_v34 = vld [vmem:[%s4617_s11 + $0x330] ss:$24 sps:$4 sm:$0xff]   ;;  %v4016_v36 = vld [vmem:[%s4617_s11 + $0x304] ss:$24 sps:$4 sm:$0xff]  }
  0x33   : > { %2204 = vmatpush1.bf16.msra.mxu0 %v3988_v17  ;;  %v4018_v37 = vld [vmem:[%s4617_s11] ss:$24 sps:$4 sm:$0xff]   ;;  %v4020_v39 = vld [vmem:[%s4617_s11 + $0x2d4] ss:$24 sps:$4 sm:$0xff]   ;;  %v4024_v41 = vld [vmem:[%s4617_s11 + $0x2d0] ss:$24 sps:$4 sm:$0xff]  }
  0x34   : > { %2247 = vmatpush1.bf16.msra.mxu1 %v3989_v18  ;;  %2205 = vmatprep.subr.bf16.mxu0 %v3990_v19  ;;  %v4019_v38 = vld [vmem:[%s4617_s11 + $0x300] ss:$24 sps:$4 sm:$0xff]   ;;  %v4022_v40 = vld [vmem:[%s4617_s11 + $0x5d4] ss:$24 sps:$4 sm:$0xff]   ;;  %v4025_v42 = vld [vmem:[%s4617_s11 + $0x5d0] ss:$24 sps:$4 sm:$0xff]  }
  0x35   : > { %2248 = vmatprep.subr.bf16.mxu1 %v3992_v20  ;;  %v4026_v43 = vld [vmem:[%s4617_s11 + $0x2a4] ss:$24 sps:$4 sm:$0xff]   ;;  %v4030_v45 = vld [vmem:[%s4617_s11 + $0x2a0] ss:$24 sps:$4 sm:$0xff]   ;;  %v4032_v47 = vld [vmem:[%s4617_s11 + $0x274] ss:$24 sps:$4 sm:$0xff]  }
  0x36   : > { %v4028_v44 = vld [vmem:[%s4617_s11 + $0x5a4] ss:$24 sps:$4 sm:$0xff]   ;;  %v4031_v46 = vld [vmem:[%s4617_s11 + $0x5a0] ss:$24 sps:$4 sm:$0xff]   ;;  %v4034_v48 = vld [vmem:[%s4617_s11 + $0x574] ss:$24 sps:$4 sm:$0xff]  }
  0x37   : > { %2206 = vmatpush1.bf16.msra.mxu0 %v3994_v21  ;;  %v4036_v49 = vld [vmem:[%s4617_s11 + $0x270] ss:$24 sps:$4 sm:$0xff]   ;;  %v4038_v51 = vld [vmem:[%s4617_s11 + $0x244] ss:$24 sps:$4 sm:$0xff]   ;;  %v4042_v53 = vld [vmem:[%s4617_s11 + $0x240] ss:$24 sps:$4 sm:$0xff]  }
  0x38   : > { %2249 = vmatpush1.bf16.msra.mxu1 %v3995_v22  ;;  %2207 = vmatprep.subr.bf16.mxu0 %v3996_v23  ;;  %v4037_v50 = vld [vmem:[%s4617_s11 + $0x570] ss:$24 sps:$4 sm:$0xff]   ;;  %v4040_v52 = vld [vmem:[%s4617_s11 + $0x544] ss:$24 sps:$4 sm:$0xff]   ;;  %v4043_v54 = vld [vmem:[%s4617_s11 + $0x540] ss:$24 sps:$4 sm:$0xff]  }
  0x39   : > { %2250 = vmatprep.subr.bf16.mxu1 %v3998_v24  ;;  %v4068_v55 = vld [vmem:[%s4619_s12 + $0x4] ss:$24 sps:$4 sm:$0xff]   ;;  %v4048_v59 = vld [vmem:[%s4617_s11 + $0x210] ss:$24 sps:$4 sm:$0xff]   ;;  %v4054_v63 = vld [vmem:[%s4617_s11 + $0x1e0] ss:$24 sps:$4 sm:$0xff]  }
  0x3a   : > { %v4044_v56 = vld [vmem:[%s4617_s11 + $0x214] ss:$24 sps:$4 sm:$0xff]   ;;  %2231 = vmatprep.mubr.bf16.mxu0 %v4068_v55  ;;  %v4049_v60 = vld [vmem:[%s4617_s11 + $0x510] ss:$24 sps:$4 sm:$0xff]   ;;  %v4050_v61 = vld [vmem:[%s4617_s11 + $0x1e4] ss:$24 sps:$4 sm:$0xff]  }
  0x3b   : > { %2208 = vmatpush1.bf16.msra.mxu0 %v4000_v25  ;;  %v4673_v57 = vld [vmem:[%s4619_s12 + $0xc] ss:$24 sps:$4 sm:$0xff]   ;;  %v4055_v0 = vld [vmem:[%s4617_s11 + $0x4e0] ss:$24 sps:$4 sm:$0xff]   ;;  %v4060_v3 = vld [vmem:[%s4617_s11 + $0x1b0] ss:$24 sps:$4 sm:$0xff]  }
  0x3c   : > { %2251 = vmatpush1.bf16.msra.mxu1 %v4001_v26  ;;  %2209 = vmatprep.subr.bf16.mxu0 %v4002_v27  ;;  %v4046_v58 = vld [vmem:[%s4617_s11 + $0x514] ss:$24 sps:$4 sm:$0xff]   ;;  %v4052_v62 = vld [vmem:[%s4617_s11 + $0x4e4] ss:$24 sps:$4 sm:$0xff]   ;;  %v4061_v4 = vld [vmem:[%s4617_s11 + $0x4b0] ss:$24 sps:$4 sm:$0xff]  }
  0x3d   : > { %2252 = vmatprep.subr.bf16.mxu1 %v4004_v28  ;;  %2274 = vmatprep.mubr.bf16.mxu1 %v4673_v57  ;;  %v4056_v1 = vld [vmem:[%s4617_s11 + $0x1b4] ss:$24 sps:$4 sm:$0xff]   ;;  %v4062_v5 = vld [vmem:[%s4617_s11 + $0x184] ss:$24 sps:$4 sm:$0xff]   ;;  %v4066_v7 = vld [vmem:[%s4617_s11 + $0x180] ss:$24 sps:$4 sm:$0xff]  }
  0x3e   : > { %v4058_v2 = vld [vmem:[%s4617_s11 + $0x4b4] ss:$24 sps:$4 sm:$0xff]   ;;  %v4064_v6 = vld [vmem:[%s4617_s11 + $0x484] ss:$24 sps:$4 sm:$0xff]   ;;  %v4067_v8 = vld [vmem:[%s4617_s11 + $0x480] ss:$24 sps:$4 sm:$0xff]  }
  0x3f   : > { %2210 = vmatpush1.bf16.msra.mxu0 %v4006_v29  ;;  %v4076_v9 = vld [vmem:[%s4617_s11 + $0x754] ss:$24 sps:$4 sm:$0xff]   ;;  %v4694_v11 = vld [vmem:[%s4619_s12] ss:$24 sps:$4 sm:$0xff]   ;;  %v4082_v15 = vld [vmem:[%s4617_s11 + $0x724] ss:$24 sps:$4 sm:$0xff]  }
  0x40   : > { %2253 = vmatpush1.bf16.msra.mxu1 %v4007_v30  ;;  %2211 = vmatprep.subr.bf16.mxu0 %v4008_v31  ;;  %v4079_v10 = vld [vmem:[%s4617_s11 + $0x15c] ss:$24 sps:$4 sm:$0xff]   ;;  %v4697_v12 = vld [vmem:[%s4619_s12 + $0x8] ss:$24 sps:$4 sm:$0xff]   ;;  %v4085_v16 = vld [vmem:[%s4617_s11 + $0x12c] ss:$24 sps:$4 sm:$0xff]  }
  0x41   : > { %2254 = vmatprep.subr.bf16.mxu1 %v4010_v32  ;;  %v4074_v13 = vld [vmem:[%s4617_s11 + $0x750] ss:$24 sps:$4 sm:$0xff]   ;;  %v4080_v17 = vld [vmem:[%s4617_s11 + $0x720] ss:$24 sps:$4 sm:$0xff]   ;;  %v4088_v19 = vld [vmem:[%s4617_s11 + $0x6f4] ss:$24 sps:$4 sm:$0xff]  }
  0x42   : > { %v4077_v14 = vld [vmem:[%s4617_s11 + $0x158] ss:$24 sps:$4 sm:$0xff]   ;;  %v4083_v18 = vld [vmem:[%s4617_s11 + $0x128] ss:$24 sps:$4 sm:$0xff]   ;;  %v4091_v20 = vld [vmem:[%s4617_s11 + $0xfc] ss:$24 sps:$4 sm:$0xff]  }
  0x43   : > { %2212 = vmatpush1.bf16.msra.mxu0 %v4012_v33  ;;  %v4086_v21 = vld [vmem:[%s4617_s11 + $0x6f0] ss:$24 sps:$4 sm:$0xff]   ;;  %v4094_v23 = vld [vmem:[%s4617_s11 + $0x6c4] ss:$24 sps:$4 sm:$0xff]   ;;  %v4092_v25 = vld [vmem:[%s4617_s11 + $0x6c0] ss:$24 sps:$4 sm:$0xff]  }
  0x44   : > { %2255 = vmatpush1.bf16.msra.mxu1 %v4013_v34  ;;  %2213 = vmatprep.subr.bf16.mxu0 %v4014_v35  ;;  %v4089_v22 = vld [vmem:[%s4617_s11 + $0xf8] ss:$24 sps:$4 sm:$0xff]   ;;  %v4097_v24 = vld [vmem:[%s4617_s11 + $0xcc] ss:$24 sps:$4 sm:$0xff]   ;;  %v4095_v26 = vld [vmem:[%s4617_s11 + $0xc8] ss:$24 sps:$4 sm:$0xff]  }
  0x45   : > { %2256 = vmatprep.subr.bf16.mxu1 %v4016_v36  ;;  %v4100_v27 = vld [vmem:[%s4617_s11 + $0x694] ss:$24 sps:$4 sm:$0xff]   ;;  %v4098_v29 = vld [vmem:[%s4617_s11 + $0x690] ss:$24 sps:$4 sm:$0xff]   ;;  %v4106_v31 = vld [vmem:[%s4617_s11 + $0x664] ss:$24 sps:$4 sm:$0xff]  }
  0x46   : > { %v4103_v28 = vld [vmem:[%s4617_s11 + $0x9c] ss:$24 sps:$4 sm:$0xff]   ;;  %v4101_v30 = vld [vmem:[%s4617_s11 + $0x98] ss:$24 sps:$4 sm:$0xff]   ;;  %v4109_v32 = vld [vmem:[%s4617_s11 + $0x6c] ss:$24 sps:$4 sm:$0xff]  }
  0x47   : > { %2214 = vmatpush1.bf16.msra.mxu0 %v4018_v37  ;;  %v4104_v33 = vld [vmem:[%s4617_s11 + $0x660] ss:$24 sps:$4 sm:$0xff]   ;;  %v4112_v35 = vld [vmem:[%s4617_s11 + $0x634] ss:$24 sps:$4 sm:$0xff]   ;;  %v4110_v37 = vld [vmem:[%s4617_s11 + $0x630] ss:$24 sps:$4 sm:$0xff]  }
  0x48   : > { %2257 = vmatpush1.bf16.msra.mxu1 %v4019_v38  ;;  %2215 = vmatprep.subr.bf16.mxu0 %v4020_v39  ;;  %v4107_v34 = vld [vmem:[%s4617_s11 + $0x68] ss:$24 sps:$4 sm:$0xff]   ;;  %v4115_v36 = vld [vmem:[%s4617_s11 + $0x3c] ss:$24 sps:$4 sm:$0xff]   ;;  %v4113_v38 = vld [vmem:[%s4617_s11 + $0x38] ss:$24 sps:$4 sm:$0xff]  }
  0x49   : > { %2258 = vmatprep.subr.bf16.mxu1 %v4022_v40  ;;  %v4118_v39 = vld [vmem:[%s4617_s11 + $0x604] ss:$24 sps:$4 sm:$0xff]   ;;  %p3805_p11 = scmp.ne.s32.totalorder %s4511_s29, 3 }
  0x4a   : > { %v4121_v40 = vld [vmem:[%s4617_s11 + $0xc] ss:$24 sps:$4 sm:$0xff]  }
  0x4b   : > { %2216 = vmatpush2.bf16.msra.mxu0 %v4024_v41  ;;  %v4730_v41 = vld [vmem:[%s4619_s12 + $0x14] ss:$24 sps:$4 sm:$0xff]  }
  0x4c   : > { %2259 = vmatpush2.bf16.msra.mxu1 %v4025_v42  ;;  %2217 = vmatprep.subr.bf16.mxu0 %v4026_v43  ;;  %v4116_v42 = vld [vmem:[%s4617_s11 + $0x600] ss:$24 sps:$4 sm:$0xff]  }
  0x4d   : > { %2260 = vmatprep.subr.bf16.mxu1 %v4028_v44  ;;  %v4119_v43 = vld [vmem:[%s4617_s11 + $0x8] ss:$24 sps:$4 sm:$0xff]   ;;  %v4124_v44 = vld [vmem:[%s4617_s11 + $0x8d4] ss:$24 sps:$4 sm:$0xff]  }
  0x4f   : > { %2218 = vmatpush2.bf16.msra.mxu0 %v4030_v45  ;;  %v4127_v45 = vld [vmem:[%s4617_s11 + $0x2dc] ss:$24 sps:$4 sm:$0xff]  }
  0x50   : > { %2261 = vmatpush2.bf16.msra.mxu1 %v4031_v46  ;;  %2219 = vmatprep.subr.bf16.mxu0 %v4032_v47  ;;  %v4122_v46 = vld [vmem:[%s4617_s11 + $0x8d0] ss:$24 sps:$4 sm:$0xff]  }
  0x51   : > { %2262 = vmatprep.subr.bf16.mxu1 %v4034_v48  ;;  %v4125_v47 = vld [vmem:[%s4617_s11 + $0x2d8] ss:$24 sps:$4 sm:$0xff]   ;;  %v4130_v48 = vld [vmem:[%s4617_s11 + $0x8a4] ss:$24 sps:$4 sm:$0xff]  }
  0x53   : > { %2220 = vmatpush2.bf16.msra.mxu0 %v4036_v49  ;;  %v4133_v49 = vld [vmem:[%s4617_s11 + $0x2ac] ss:$24 sps:$4 sm:$0xff]  }
  0x54   : > { %2263 = vmatpush2.bf16.msra.mxu1 %v4037_v50  ;;  %2221 = vmatprep.subr.bf16.mxu0 %v4038_v51  ;;  %v4128_v50 = vld [vmem:[%s4617_s11 + $0x8a0] ss:$24 sps:$4 sm:$0xff]  }
  0x55   : > { %2264 = vmatprep.subr.bf16.mxu1 %v4040_v52  ;;  %v4131_v51 = vld [vmem:[%s4617_s11 + $0x2a8] ss:$24 sps:$4 sm:$0xff]   ;;  %v4136_v52 = vld [vmem:[%s4617_s11 + $0x874] ss:$24 sps:$4 sm:$0xff]  }
  0x57   : > { %2222 = vmatpush2.bf16.msra.mxu0 %v4042_v53  ;;  %v4139_v53 = vld [vmem:[%s4617_s11 + $0x27c] ss:$24 sps:$4 sm:$0xff]  }
  0x58   : > { %2265 = vmatpush2.bf16.msra.mxu1 %v4043_v54  ;;  %2223 = vmatprep.subr.bf16.mxu0 %v4044_v56  ;;  %v4134_v54 = vld [vmem:[%s4617_s11 + $0x870] ss:$24 sps:$4 sm:$0xff]   ;;  %v4142_v56 = vld [vmem:[%s4617_s11 + $0x844] ss:$24 sps:$4 sm:$0xff]  }
  0x59   : > { %2266 = vmatprep.subr.bf16.mxu1 %v4046_v58  ;;  %v4145_v58 = vld [vmem:[%s4617_s11 + $0x24c] ss:$24 sps:$4 sm:$0xff]  }
  0x5b   : > { %2224 = vmatpush2.bf16.msra.mxu0 %v4048_v59  ;;  %v4140_v59 = vld [vmem:[%s4617_s11 + $0x840] ss:$24 sps:$4 sm:$0xff]  }
  0x5c   : > { %2267 = vmatpush2.bf16.msra.mxu1 %v4049_v60  ;;  %2225 = vmatprep.subr.bf16.mxu0 %v4050_v61  ;;  %v4143_v60 = vld [vmem:[%s4617_s11 + $0x248] ss:$24 sps:$4 sm:$0xff]   ;;  %v4148_v61 = vld [vmem:[%s4617_s11 + $0x814] ss:$24 sps:$4 sm:$0xff]  }
  0x5d   : > { %2268 = vmatprep.subr.bf16.mxu1 %v4052_v62  ;;  %v4151_v62 = vld [vmem:[%s4617_s11 + $0x21c] ss:$24 sps:$4 sm:$0xff]  }
  0x5f   : > { %2226 = vmatpush2.bf16.msra.mxu0 %v4054_v63  ;;  %v4146_v63 = vld [vmem:[%s4617_s11 + $0x810] ss:$24 sps:$4 sm:$0xff]  }
  0x60   : > { %2269 = vmatpush2.bf16.msra.mxu1 %v4055_v0  ;;  %2227 = vmatprep.subr.bf16.mxu0 %v4056_v1  ;;  %v4149_v0 = vld [vmem:[%s4617_s11 + $0x218] ss:$24 sps:$4 sm:$0xff]   ;;  %v4154_v1 = vld [vmem:[%s4617_s11 + $0x7e4] ss:$24 sps:$4 sm:$0xff]  }
  0x61   : > { %2270 = vmatprep.subr.bf16.mxu1 %v4058_v2  ;;  %v4157_v2 = vld [vmem:[%s4617_s11 + $0x1ec] ss:$24 sps:$4 sm:$0xff]  }
  0x63   : > { %2228 = vmatpush2.bf16.msra.mxu0 %v4060_v3  ;;  %v4152_v3 = vld [vmem:[%s4617_s11 + $0x7e0] ss:$24 sps:$4 sm:$0xff]  }
  0x64   : > { %2271 = vmatpush2.bf16.msra.mxu1 %v4061_v4  ;;  %2229 = vmatprep.subr.bf16.mxu0 %v4062_v5  ;;  %v4155_v4 = vld [vmem:[%s4617_s11 + $0x1e8] ss:$24 sps:$4 sm:$0xff]   ;;  %v4160_v5 = vld [vmem:[%s4617_s11 + $0x7b4] ss:$24 sps:$4 sm:$0xff]  }
  0x65   : > { %2272 = vmatprep.subr.bf16.mxu1 %v4064_v6  ;;  %v4163_v6 = vld [vmem:[%s4617_s11 + $0x1bc] ss:$24 sps:$4 sm:$0xff]  }
  0x67   : > { %2230 = vmatpush2.bf16.msra.mxu0 %v4066_v7  ;;  %v4158_v7 = vld [vmem:[%s4617_s11 + $0x7b0] ss:$24 sps:$4 sm:$0xff]  }
  0x68   : > { %2273 = vmatpush2.bf16.msra.mxu1 %v4067_v8  ;;  %2285 = vmatprep.subr.bf16.mxu0 %v4076_v9  ;;  %v4161_v8 = vld [vmem:[%s4617_s11 + $0x1b8] ss:$24 sps:$4 sm:$0xff]   ;;  %v4166_v9 = vld [vmem:[%s4617_s11 + $0x784] ss:$24 sps:$4 sm:$0xff]  }
  0x69   : > { %2328 = vmatprep.subr.bf16.mxu1 %v4079_v10  ;;  %v4169_v10 = vld [vmem:[%s4617_s11 + $0x18c] ss:$24 sps:$4 sm:$0xff]  }
  0x6a   : > { %2232 = vmatmul.mubr.bf16.vlgmr.msra.gmra.mxu0 %v4694_v11 }
  0x6b   : > { %2275 = vmatmul.mubr.bf16.vlgmr.msra.gmra.mxu1 %v4697_v12  ;;  %2286 = vmatpush1.bf16.msra.mxu0 %v4074_v13  ;;  %v4164_v13 = vld [vmem:[%s4617_s11 + $0x780] ss:$24 sps:$4 sm:$0xff]  }
  0x6c   : > { %2329 = vmatpush1.bf16.msra.mxu1 %v4077_v14  ;;  %2287 = vmatprep.subr.bf16.mxu0 %v4082_v15  ;;  %v4167_v14 = vld [vmem:[%s4617_s11 + $0x188] ss:$24 sps:$4 sm:$0xff]   ;;  %v4175_v15 = vld [vmem:[%s4617_s11 + $0x45c] ss:$24 sps:$4 sm:$0xff]  }
  0x6d   : > { %2330 = vmatprep.subr.bf16.mxu1 %v4085_v16  ;;  %2360 = vmatprep.mubr.bf16.mxu1 %v4068_v55  ;;  %v4137_v55 = vld [vmem:[%s4617_s11 + $0x278] ss:$24 sps:$4 sm:$0xff]   ;;  %v4178_v16 = vld [vmem:[%s4617_s11 + $0x75c] ss:$24 sps:$4 sm:$0xff]  }
  0x6e   : > { %2317 = vmatprep.mubr.bf16.mxu0 %v4730_v41 }
  0x6f   : > { %2288 = vmatpush1.bf16.msra.mxu0 %v4080_v17  ;;  %v4770_v17 = vld [vmem:[%s4619_s12 + $0x10] ss:$24 sps:$4 sm:$0xff]  }
  0x70   : > { %2331 = vmatpush1.bf16.msra.mxu1 %v4083_v18  ;;  %2289 = vmatprep.subr.bf16.mxu0 %v4088_v19  ;;  %v4173_v18 = vld [vmem:[%s4617_s11 + $0x458] ss:$24 sps:$4 sm:$0xff]  }
  0x71   : > { %2332 = vmatprep.subr.bf16.mxu1 %v4091_v20  ;;  %v4176_v19 = vld [vmem:[%s4617_s11 + $0x758] ss:$24 sps:$4 sm:$0xff]   ;;  %v4181_v20 = vld [vmem:[%s4617_s11 + $0x42c] ss:$24 sps:$4 sm:$0xff]  }
  0x73   : > { %2290 = vmatpush1.bf16.msra.mxu0 %v4086_v21  ;;  %v4184_v21 = vld [vmem:[%s4617_s11 + $0x72c] ss:$24 sps:$4 sm:$0xff]  }
  0x74   : > { %2333 = vmatpush1.bf16.msra.mxu1 %v4089_v22  ;;  %2291 = vmatprep.subr.bf16.mxu0 %v4094_v23  ;;  %v4179_v22 = vld [vmem:[%s4617_s11 + $0x428] ss:$24 sps:$4 sm:$0xff]  }
  0x75   : > { %2334 = vmatprep.subr.bf16.mxu1 %v4097_v24  ;;  %v4182_v23 = vld [vmem:[%s4617_s11 + $0x728] ss:$24 sps:$4 sm:$0xff]   ;;  %v4187_v24 = vld [vmem:[%s4617_s11 + $0x3fc] ss:$24 sps:$4 sm:$0xff]  }
  0x77   : > { %2292 = vmatpush1.bf16.msra.mxu0 %v4092_v25  ;;  %v4190_v25 = vld [vmem:[%s4617_s11 + $0x6fc] ss:$24 sps:$4 sm:$0xff]  }
  0x78   : > { %2335 = vmatpush1.bf16.msra.mxu1 %v4095_v26  ;;  %2293 = vmatprep.subr.bf16.mxu0 %v4100_v27  ;;  %v4185_v26 = vld [vmem:[%s4617_s11 + $0x3f8] ss:$24 sps:$4 sm:$0xff]   ;;  %v4193_v27 = vld [vmem:[%s4617_s11 + $0x3cc] ss:$24 sps:$4 sm:$0xff]  }
  0x79   : > { %2336 = vmatprep.subr.bf16.mxu1 %v4103_v28  ;;  %v4196_v28 = vld [vmem:[%s4617_s11 + $0x6cc] ss:$24 sps:$4 sm:$0xff]  }
  0x7b   : > { %2294 = vmatpush1.bf16.msra.mxu0 %v4098_v29  ;;  %v4191_v29 = vld [vmem:[%s4617_s11 + $0x3c8] ss:$24 sps:$4 sm:$0xff]  }
  0x7c   : > { %2337 = vmatpush1.bf16.msra.mxu1 %v4101_v30  ;;  %2295 = vmatprep.subr.bf16.mxu0 %v4106_v31  ;;  %v4194_v30 = vld [vmem:[%s4617_s11 + $0x6c8] ss:$24 sps:$4 sm:$0xff]   ;;  %v4202_v31 = vld [vmem:[%s4617_s11 + $0x69c] ss:$24 sps:$4 sm:$0xff]  }
  0x7d   : > { %2338 = vmatprep.subr.bf16.mxu1 %v4109_v32  ;;  %v4197_v32 = vld [vmem:[%s4617_s11 + $0x398] ss:$24 sps:$4 sm:$0xff]  }
  0x7f   : > { %2296 = vmatpush1.bf16.msra.mxu0 %v4104_v33  ;;  %v4200_v33 = vld [vmem:[%s4617_s11 + $0x698] ss:$24 sps:$4 sm:$0xff]  }
  0x80   : > { %2339 = vmatpush1.bf16.msra.mxu1 %v4107_v34  ;;  %2297 = vmatprep.subr.bf16.mxu0 %v4112_v35  ;;  %v4205_v34 = vld [vmem:[%s4617_s11 + $0x36c] ss:$24 sps:$4 sm:$0xff]  }
  0x81   : > { %2340 = vmatprep.subr.bf16.mxu1 %v4115_v36  ;;  %v4208_v35 = vld [vmem:[%s4617_s11 + $0x66c] ss:$24 sps:$4 sm:$0xff]   ;;  %v4203_v36 = vld [vmem:[%s4617_s11 + $0x368] ss:$24 sps:$4 sm:$0xff]  }
  0x83   : > { %2298 = vmatpush1.bf16.msra.mxu0 %v4110_v37  ;;  %v4206_v37 = vld [vmem:[%s4617_s11 + $0x668] ss:$24 sps:$4 sm:$0xff]  }
  0x84   : > { %2341 = vmatpush1.bf16.msra.mxu1 %v4113_v38  ;;  %2299 = vmatprep.subr.bf16.mxu0 %v4118_v39  ;;  %v4211_v38 = vld [vmem:[%s4617_s11 + $0x33c] ss:$24 sps:$4 sm:$0xff]  }
  0x85   : > { %2342 = vmatprep.subr.bf16.mxu1 %v4121_v40  ;;  %v4214_v39 = vld [vmem:[%s4617_s11 + $0x63c] ss:$24 sps:$4 sm:$0xff]   ;;  %v4209_v40 = vld [vmem:[%s4617_s11 + $0x338] ss:$24 sps:$4 sm:$0xff]  }
  0x87   : > { %2300 = vmatpush1.bf16.msra.mxu0 %v4116_v42  ;;  %v4212_v42 = vld [vmem:[%s4617_s11 + $0x638] ss:$24 sps:$4 sm:$0xff]  }
  0x88   : > { %2343 = vmatpush1.bf16.msra.mxu1 %v4119_v43  ;;  %2301 = vmatprep.subr.bf16.mxu0 %v4124_v44  ;;  %v4217_v43 = vld [vmem:[%s4617_s11 + $0x30c] ss:$24 sps:$4 sm:$0xff]  }
  0x89   : > { %2344 = vmatprep.subr.bf16.mxu1 %v4127_v45  ;;  %v4220_v44 = vld [vmem:[%s4617_s11 + $0x60c] ss:$24 sps:$4 sm:$0xff]   ;;  %v4215_v45 = vld [vmem:[%s4617_s11 + $0x308] ss:$24 sps:$4 sm:$0xff]  }
  0x8b   : > { %2302 = vmatpush2.bf16.msra.mxu0 %v4122_v46  ;;  %v4218_v46 = vld [vmem:[%s4617_s11 + $0x608] ss:$24 sps:$4 sm:$0xff]  }
  0x8c   : > { %2345 = vmatpush2.bf16.msra.mxu1 %v4125_v47  ;;  %2303 = vmatprep.subr.bf16.mxu0 %v4130_v48  ;;  %v4223_v47 = vld [vmem:[%s4617_s11 + $0x5dc] ss:$24 sps:$4 sm:$0xff]  }
  0x8d   : > { %2346 = vmatprep.subr.bf16.mxu1 %v4133_v49  ;;  %v4226_v48 = vld [vmem:[%s4617_s11 + $0x8dc] ss:$24 sps:$4 sm:$0xff]   ;;  %v4221_v49 = vld [vmem:[%s4617_s11 + $0x5d8] ss:$24 sps:$4 sm:$0xff]  }
  0x8f   : > { %2304 = vmatpush2.bf16.msra.mxu0 %v4128_v50  ;;  %v4224_v50 = vld [vmem:[%s4617_s11 + $0x8d8] ss:$24 sps:$4 sm:$0xff]  }
  0x90   : > { %2347 = vmatpush2.bf16.msra.mxu1 %v4131_v51  ;;  %2305 = vmatprep.subr.bf16.mxu0 %v4136_v52  ;;  %v4229_v51 = vld [vmem:[%s4617_s11 + $0x5ac] ss:$24 sps:$4 sm:$0xff]  }
  0x91   : > { %2348 = vmatprep.subr.bf16.mxu1 %v4139_v53  ;;  %v4232_v52 = vld [vmem:[%s4617_s11 + $0x8ac] ss:$24 sps:$4 sm:$0xff]   ;;  %v4227_v53 = vld [vmem:[%s4617_s11 + $0x5a8] ss:$24 sps:$4 sm:$0xff]  }
  0x93   : > { %2306 = vmatpush2.bf16.msra.mxu0 %v4134_v54  ;;  %v4230_v54 = vld [vmem:[%s4617_s11 + $0x8a8] ss:$24 sps:$4 sm:$0xff]  }
  0x94   : > { %2349 = vmatpush2.bf16.msra.mxu1 %v4137_v55  ;;  %2307 = vmatprep.subr.bf16.mxu0 %v4142_v56  ;;  %v4235_v55 = vld [vmem:[%s4617_s11 + $0x57c] ss:$24 sps:$4 sm:$0xff]  }
  0x95   : > { %2350 = vmatprep.subr.bf16.mxu1 %v4145_v58  ;;  %v4238_v56 = vld [vmem:[%s4617_s11 + $0x87c] ss:$24 sps:$4 sm:$0xff]   ;;  %v4233_v58 = vld [vmem:[%s4617_s11 + $0x578] ss:$24 sps:$4 sm:$0xff]  }
  0x97   : > { %2308 = vmatpush2.bf16.msra.mxu0 %v4140_v59  ;;  %v4236_v59 = vld [vmem:[%s4617_s11 + $0x878] ss:$24 sps:$4 sm:$0xff]  }
  0x98   : > { %2351 = vmatpush2.bf16.msra.mxu1 %v4143_v60  ;;  %2309 = vmatprep.subr.bf16.mxu0 %v4148_v61  ;;  %v4241_v60 = vld [vmem:[%s4617_s11 + $0x54c] ss:$24 sps:$4 sm:$0xff]  }
  0x99   : > { %2352 = vmatprep.subr.bf16.mxu1 %v4151_v62  ;;  %v4244_v61 = vld [vmem:[%s4617_s11 + $0x84c] ss:$24 sps:$4 sm:$0xff]   ;;  %v4239_v62 = vld [vmem:[%s4617_s11 + $0x548] ss:$24 sps:$4 sm:$0xff]  }
  0x9b   : > { %2310 = vmatpush2.bf16.msra.mxu0 %v4146_v63  ;;  %v4242_v63 = vld [vmem:[%s4617_s11 + $0x848] ss:$24 sps:$4 sm:$0xff]  }
  0x9c   : > { %2353 = vmatpush2.bf16.msra.mxu1 %v4149_v0  ;;  %2311 = vmatprep.subr.bf16.mxu0 %v4154_v1  ;;  %v4247_v0 = vld [vmem:[%s4617_s11 + $0x51c] ss:$24 sps:$4 sm:$0xff]  }
  0x9d   : > { %2354 = vmatprep.subr.bf16.mxu1 %v4157_v2  ;;  %v4250_v1 = vld [vmem:[%s4617_s11 + $0x81c] ss:$24 sps:$4 sm:$0xff]   ;;  %v4245_v2 = vld [vmem:[%s4617_s11 + $0x518] ss:$24 sps:$4 sm:$0xff]  }
  0x9f   : > { %2312 = vmatpush2.bf16.msra.mxu0 %v4152_v3  ;;  %v4248_v3 = vld [vmem:[%s4617_s11 + $0x818] ss:$24 sps:$4 sm:$0xff]  }
  0xa0   : > { %2355 = vmatpush2.bf16.msra.mxu1 %v4155_v4  ;;  %2313 = vmatprep.subr.bf16.mxu0 %v4160_v5  ;;  %v4253_v4 = vld [vmem:[%s4617_s11 + $0x4ec] ss:$24 sps:$4 sm:$0xff]  }
  0xa1   : > { %2356 = vmatprep.subr.bf16.mxu1 %v4163_v6  ;;  %v4256_v5 = vld [vmem:[%s4617_s11 + $0x7ec] ss:$24 sps:$4 sm:$0xff]   ;;  %v4251_v6 = vld [vmem:[%s4617_s11 + $0x4e8] ss:$24 sps:$4 sm:$0xff]  }
  0xa3   : > { %2314 = vmatpush2.bf16.msra.mxu0 %v4158_v7  ;;  %v4254_v7 = vld [vmem:[%s4617_s11 + $0x7e8] ss:$24 sps:$4 sm:$0xff]  }
  0xa4   : > { %2357 = vmatpush2.bf16.msra.mxu1 %v4161_v8  ;;  %2315 = vmatprep.subr.bf16.mxu0 %v4166_v9  ;;  %v4259_v8 = vld [vmem:[%s4617_s11 + $0x4bc] ss:$24 sps:$4 sm:$0xff]  }
  0xa5   : > { %2358 = vmatprep.subr.bf16.mxu1 %v4169_v10  ;;  %v4262_v9 = vld [vmem:[%s4617_s11 + $0x7bc] ss:$24 sps:$4 sm:$0xff]   ;;  %v4257_v10 = vld [vmem:[%s4617_s11 + $0x4b8] ss:$24 sps:$4 sm:$0xff]  }
  0xa7   : > { %2316 = vmatpush2.bf16.msra.mxu0 %v4164_v13  ;;  %v4260_v13 = vld [vmem:[%s4617_s11 + $0x7b8] ss:$24 sps:$4 sm:$0xff]  }
  0xa8   : > { %2359 = vmatpush2.bf16.msra.mxu1 %v4167_v14  ;;  %2371 = vmatprep.subr.bf16.mxu0 %v4175_v15  ;;  %v4265_v14 = vld [vmem:[%s4617_s11 + $0x48c] ss:$24 sps:$4 sm:$0xff]  }
  0xa9   : > { %2414 = vmatprep.subr.bf16.mxu1 %v4178_v16  ;;  %v4268_v15 = vld [vmem:[%s4617_s11 + $0x78c] ss:$24 sps:$4 sm:$0xff]   ;;  %v4263_v16 = vld [vmem:[%s4617_s11 + $0x488] ss:$24 sps:$4 sm:$0xff]  }
  0xaa   : > { %2318 = vmatmul.mubr.bf16.vlgmr.msra.gmra.mxu0 %v4770_v17 }
  0xab   : > { %2361 = vmatmul.mubr.bf16.vlgmr.msra.gmra.mxu1 %v4694_v11  ;;  %2372 = vmatpush1.bf16.msra.mxu0 %v4173_v18  ;;  %v4188_v11 = vld [vmem:[%s4617_s11 + $0x6f8] ss:$24 sps:$4 sm:$0xff]   ;;  %v4266_v18 = vld [vmem:[%s4617_s11 + $0x788] ss:$24 sps:$4 sm:$0xff]  }
  0xac   : > { %2415 = vmatpush1.bf16.msra.mxu1 %v4176_v19  ;;  %2373 = vmatprep.subr.bf16.mxu0 %v4181_v20  ;;  %v4271_v19 = vld [vmem:[%s4617_s11 + $0x164] ss:$24 sps:$4 sm:$0xff]  }
  0xad   : > { %2416 = vmatprep.subr.bf16.mxu1 %v4184_v21  ;;  %2403 = vmatprep.mubr.bf16.mxu0 %v4673_v57  ;;  %v4199_v57 = vld [vmem:[%s4617_s11 + $0x39c] ss:$24 sps:$4 sm:$0xff]   ;;  %v4269_v21 = vld [vmem:[%s4617_s11 + $0x160] ss:$24 sps:$4 sm:$0xff]  }
  0xae   : > { %2446 = vmatprep.mubr.bf16.mxu1 %v4730_v41  ;;  %v4274_v20 = vld [vmem:[%s4617_s11 + $0x464] ss:$24 sps:$4 sm:$0xff]  }
  0xaf   : > { %2374 = vmatpush1.bf16.msra.mxu0 %v4179_v22  ;;  %v4272_v22 = vld [vmem:[%s4617_s11 + $0x460] ss:$24 sps:$4 sm:$0xff]  }
  0xb0   : > { %2417 = vmatpush1.bf16.msra.mxu1 %v4182_v23  ;;  %2375 = vmatprep.subr.bf16.mxu0 %v4187_v24  ;;  %v4277_v23 = vld [vmem:[%s4617_s11 + $0x134] ss:$24 sps:$4 sm:$0xff]  }
  0xb1   : > { %2418 = vmatprep.subr.bf16.mxu1 %v4190_v25  ;;  %v4280_v24 = vld [vmem:[%s4617_s11 + $0x434] ss:$24 sps:$4 sm:$0xff]   ;;  %v4275_v25 = vld [vmem:[%s4617_s11 + $0x130] ss:$24 sps:$4 sm:$0xff]  }
  0xb3   : > { %2376 = vmatpush1.bf16.msra.mxu0 %v4185_v26  ;;  %v4278_v26 = vld [vmem:[%s4617_s11 + $0x430] ss:$24 sps:$4 sm:$0xff]  }
  0xb4   : > { %2419 = vmatpush1.bf16.msra.mxu1 %v4188_v11  ;;  %2377 = vmatprep.subr.bf16.mxu0 %v4193_v27  ;;  %v4283_v11 = vld [vmem:[%s4617_s11 + $0x104] ss:$24 sps:$4 sm:$0xff]  }
  0xb5   : > { %2420 = vmatprep.subr.bf16.mxu1 %v4196_v28  ;;  %v4286_v27 = vld [vmem:[%s4617_s11 + $0x404] ss:$24 sps:$4 sm:$0xff]  }
  0xb6   : > { %v4413_v28 = vld [vmem:[%s4619_s12 + $0x4] ss:$24 sps:$4 sm:$0xff]  }
  0xb7   : > { %2378 = vmatpush1.bf16.msra.mxu0 %v4191_v29  ;;  %v4414_v29 = vld [vmem:[%s4619_s12 + $0xc] ss:$24 sps:$4 sm:$0xff]  }
  0xb8   : > { %2421 = vmatpush1.bf16.msra.mxu1 %v4194_v30  ;;  %2379 = vmatprep.subr.bf16.mxu0 %v4199_v57  ;;  %v4284_v30 = vld [vmem:[%s4617_s11 + $0x400] ss:$24 sps:$4 sm:$0xff]   ;;  %v4289_v57 = vld [vmem:[%s4617_s11 + $0xd4] ss:$24 sps:$4 sm:$0xff]  }
  0xb9   : > { %2422 = vmatprep.subr.bf16.mxu1 %v4202_v31  ;;  %v4292_v31 = vld [vmem:[%s4617_s11 + $0x3d4] ss:$24 sps:$4 sm:$0xff]  }
  0xbb   : > { %2380 = vmatpush1.bf16.msra.mxu0 %v4197_v32  ;;  %v4287_v32 = vld [vmem:[%s4617_s11 + $0xd0] ss:$24 sps:$4 sm:$0xff]  }
  0xbc   : > { %2423 = vmatpush1.bf16.msra.mxu1 %v4200_v33  ;;  %2381 = vmatprep.subr.bf16.mxu0 %v4205_v34  ;;  %v4290_v33 = vld [vmem:[%s4617_s11 + $0x3d0] ss:$24 sps:$4 sm:$0xff]   ;;  %v4295_v34 = vld [vmem:[%s4617_s11 + $0xa4] ss:$24 sps:$4 sm:$0xff]  }
  0xbd   : > { %2424 = vmatprep.subr.bf16.mxu1 %v4208_v35  ;;  %v4298_v35 = vld [vmem:[%s4617_s11 + $0x3a4] ss:$24 sps:$4 sm:$0xff]  }
  0xbf   : > { %2382 = vmatpush1.bf16.msra.mxu0 %v4203_v36  ;;  %v4293_v36 = vld [vmem:[%s4617_s11 + $0xa0] ss:$24 sps:$4 sm:$0xff]  }
  0xc0   : > { %2425 = vmatpush1.bf16.msra.mxu1 %v4206_v37  ;;  %2383 = vmatprep.subr.bf16.mxu0 %v4211_v38  ;;  %v4296_v37 = vld [vmem:[%s4617_s11 + $0x3a0] ss:$24 sps:$4 sm:$0xff]   ;;  %v4301_v38 = vld [vmem:[%s4617_s11 + $0x74] ss:$24 sps:$4 sm:$0xff]  }
  0xc1   : > { %2426 = vmatprep.subr.bf16.mxu1 %v4214_v39  ;;  %v4304_v39 = vld [vmem:[%s4617_s11 + $0x374] ss:$24 sps:$4 sm:$0xff]  }
  0xc3   : > { %2384 = vmatpush1.bf16.msra.mxu0 %v4209_v40  ;;  %v4299_v40 = vld [vmem:[%s4617_s11 + $0x70] ss:$24 sps:$4 sm:$0xff]  }
  0xc4   : > { %2427 = vmatpush1.bf16.msra.mxu1 %v4212_v42  ;;  %2385 = vmatprep.subr.bf16.mxu0 %v4217_v43  ;;  %v4302_v42 = vld [vmem:[%s4617_s11 + $0x370] ss:$24 sps:$4 sm:$0xff]   ;;  %v4307_v43 = vld [vmem:[%s4617_s11 + $0x44] ss:$24 sps:$4 sm:$0xff]  }
  0xc5   : > { %2428 = vmatprep.subr.bf16.mxu1 %v4220_v44  ;;  %v4310_v44 = vld [vmem:[%s4617_s11 + $0x344] ss:$24 sps:$4 sm:$0xff]  }
  0xc7   : > { %2386 = vmatpush1.bf16.msra.mxu0 %v4215_v45  ;;  %v4305_v45 = vld [vmem:[%s4617_s11 + $0x40] ss:$24 sps:$4 sm:$0xff]  }
  0xc8   : > { %2429 = vmatpush1.bf16.msra.mxu1 %v4218_v46  ;;  %2387 = vmatprep.subr.bf16.mxu0 %v4223_v47  ;;  %v4308_v46 = vld [vmem:[%s4617_s11 + $0x340] ss:$24 sps:$4 sm:$0xff]   ;;  %v4313_v47 = vld [vmem:[%s4617_s11 + $0x14] ss:$24 sps:$4 sm:$0xff]  }
  0xc9   : > { %2430 = vmatprep.subr.bf16.mxu1 %v4226_v48  ;;  %v4316_v48 = vld [vmem:[%s4617_s11 + $0x314] ss:$24 sps:$4 sm:$0xff]  }
  0xcb   : > { %2388 = vmatpush2.bf16.msra.mxu0 %v4221_v49  ;;  %v4311_v49 = vld [vmem:[%s4617_s11 + $0x10] ss:$24 sps:$4 sm:$0xff]  }
  0xcc   : > { %2431 = vmatpush2.bf16.msra.mxu1 %v4224_v50  ;;  %2389 = vmatprep.subr.bf16.mxu0 %v4229_v51  ;;  %v4314_v50 = vld [vmem:[%s4617_s11 + $0x310] ss:$24 sps:$4 sm:$0xff]   ;;  %v4319_v51 = vld [vmem:[%s4617_s11 + $0x2e4] ss:$24 sps:$4 sm:$0xff]  }
  0xcd   : > { %2432 = vmatprep.subr.bf16.mxu1 %v4232_v52  ;;  %v4322_v52 = vld [vmem:[%s4617_s11 + $0x5e4] ss:$24 sps:$4 sm:$0xff]  }
  0xcf   : > { %2390 = vmatpush2.bf16.msra.mxu0 %v4227_v53  ;;  %v4317_v53 = vld [vmem:[%s4617_s11 + $0x2e0] ss:$24 sps:$4 sm:$0xff]  }
  0xd0   : > { %2433 = vmatpush2.bf16.msra.mxu1 %v4230_v54  ;;  %2391 = vmatprep.subr.bf16.mxu0 %v4235_v55  ;;  %v4320_v54 = vld [vmem:[%s4617_s11 + $0x5e0] ss:$24 sps:$4 sm:$0xff]   ;;  %v4325_v55 = vld [vmem:[%s4617_s11 + $0x2b4] ss:$24 sps:$4 sm:$0xff]  }
  0xd1   : > { %2434 = vmatprep.subr.bf16.mxu1 %v4238_v56  ;;  %v4328_v56 = vld [vmem:[%s4617_s11 + $0x5b4] ss:$24 sps:$4 sm:$0xff]  }
  0xd3   : > { %2392 = vmatpush2.bf16.msra.mxu0 %v4233_v58  ;;  %v4323_v58 = vld [vmem:[%s4617_s11 + $0x2b0] ss:$24 sps:$4 sm:$0xff]  }
  0xd4   : > { %2435 = vmatpush2.bf16.msra.mxu1 %v4236_v59  ;;  %2393 = vmatprep.subr.bf16.mxu0 %v4241_v60  ;;  %v4326_v59 = vld [vmem:[%s4617_s11 + $0x5b0] ss:$24 sps:$4 sm:$0xff]   ;;  %v4331_v60 = vld [vmem:[%s4617_s11 + $0x284] ss:$24 sps:$4 sm:$0xff]  }
  0xd5   : > { %2436 = vmatprep.subr.bf16.mxu1 %v4244_v61  ;;  %v4334_v61 = vld [vmem:[%s4617_s11 + $0x584] ss:$24 sps:$4 sm:$0xff]  }
  0xd7   : > { %2394 = vmatpush2.bf16.msra.mxu0 %v4239_v62  ;;  %v4329_v62 = vld [vmem:[%s4617_s11 + $0x280] ss:$24 sps:$4 sm:$0xff]  }
  0xd8   : > { %2437 = vmatpush2.bf16.msra.mxu1 %v4242_v63  ;;  %2395 = vmatprep.subr.bf16.mxu0 %v4247_v0  ;;  %v4332_v63 = vld [vmem:[%s4617_s11 + $0x580] ss:$24 sps:$4 sm:$0xff]   ;;  %v4337_v0 = vld [vmem:[%s4617_s11 + $0x254] ss:$24 sps:$4 sm:$0xff]  }
  0xd9   : > { %2438 = vmatprep.subr.bf16.mxu1 %v4250_v1  ;;  %v4340_v1 = vld [vmem:[%s4617_s11 + $0x554] ss:$24 sps:$4 sm:$0xff]  }
  0xdb   : > { %2396 = vmatpush2.bf16.msra.mxu0 %v4245_v2  ;;  %v4335_v2 = vld [vmem:[%s4617_s11 + $0x250] ss:$24 sps:$4 sm:$0xff]  }
  0xdc   : > { %2439 = vmatpush2.bf16.msra.mxu1 %v4248_v3  ;;  %2397 = vmatprep.subr.bf16.mxu0 %v4253_v4  ;;  %v4338_v3 = vld [vmem:[%s4617_s11 + $0x550] ss:$24 sps:$4 sm:$0xff]   ;;  %v4343_v4 = vld [vmem:[%s4617_s11 + $0x224] ss:$24 sps:$4 sm:$0xff]  }
  0xdd   : > { %2440 = vmatprep.subr.bf16.mxu1 %v4256_v5  ;;  %v4346_v5 = vld [vmem:[%s4617_s11 + $0x524] ss:$24 sps:$4 sm:$0xff]  }
  0xdf   : > { %2398 = vmatpush2.bf16.msra.mxu0 %v4251_v6  ;;  %v4341_v6 = vld [vmem:[%s4617_s11 + $0x220] ss:$24 sps:$4 sm:$0xff]  }
  0xe0   : > { %2441 = vmatpush2.bf16.msra.mxu1 %v4254_v7  ;;  %2399 = vmatprep.subr.bf16.mxu0 %v4259_v8  ;;  %v4344_v7 = vld [vmem:[%s4617_s11 + $0x520] ss:$24 sps:$4 sm:$0xff]   ;;  %v4349_v8 = vld [vmem:[%s4617_s11 + $0x1f4] ss:$24 sps:$4 sm:$0xff]  }
  0xe1   : > { %2442 = vmatprep.subr.bf16.mxu1 %v4262_v9  ;;  %v4352_v9 = vld [vmem:[%s4617_s11 + $0x4f4] ss:$24 sps:$4 sm:$0xff]  }
  0xe3   : > { %2400 = vmatpush2.bf16.msra.mxu0 %v4257_v10  ;;  %v4347_v10 = vld [vmem:[%s4617_s11 + $0x1f0] ss:$24 sps:$4 sm:$0xff]  }
  0xe4   : > { %2443 = vmatpush2.bf16.msra.mxu1 %v4260_v13  ;;  %2401 = vmatprep.subr.bf16.mxu0 %v4265_v14  ;;  %v4350_v13 = vld [vmem:[%s4617_s11 + $0x4f0] ss:$24 sps:$4 sm:$0xff]   ;;  %v4355_v14 = vld [vmem:[%s4617_s11 + $0x1c4] ss:$24 sps:$4 sm:$0xff]  }
  0xe5   : > { %2444 = vmatprep.subr.bf16.mxu1 %v4268_v15  ;;  %v4358_v15 = vld [vmem:[%s4617_s11 + $0x4c4] ss:$24 sps:$4 sm:$0xff]  }
  0xe7   : > { %2402 = vmatpush2.bf16.msra.mxu0 %v4263_v16  ;;  %v4353_v16 = vld [vmem:[%s4617_s11 + $0x1c0] ss:$24 sps:$4 sm:$0xff]  }
  0xe8   : > { %2445 = vmatpush2.bf16.msra.mxu1 %v4266_v18  ;;  %2457 = vmatprep.subr.bf16.mxu0 %v4271_v19  ;;  %v4356_v18 = vld [vmem:[%s4617_s11 + $0x4c0] ss:$24 sps:$4 sm:$0xff]   ;;  %v4361_v19 = vld [vmem:[%s4617_s11 + $0x194] ss:$24 sps:$4 sm:$0xff]  }
  0xe9   : > { %2500 = vmatprep.subr.bf16.mxu1 %v4274_v20  ;;  %v4364_v20 = vld [vmem:[%s4617_s11 + $0x494] ss:$24 sps:$4 sm:$0xff]  }
  0xea   : > { %2404 = vmatmul.mubr.bf16.vlgmr.msra.gmra.mxu0 %v4697_v12  ;;  %v4281_v12 = vld [vmem:[%s4617_s11 + $0x100] ss:$24 sps:$4 sm:$0xff]  }
  0xeb   : > { %2447 = vmatmul.mubr.bf16.vlgmr.msra.gmra.mxu1 %v4770_v17  ;;  %2458 = vmatpush1.bf16.msra.mxu0 %v4269_v21  ;;  %v4359_v21 = vld [vmem:[%s4617_s11 + $0x190] ss:$24 sps:$4 sm:$0xff]  }
  0xec   : > { %2501 = vmatpush1.bf16.msra.mxu1 %v4272_v22  ;;  %2459 = vmatprep.subr.bf16.mxu0 %v4277_v23  ;;  %v4362_v22 = vld [vmem:[%s4617_s11 + $0x490] ss:$24 sps:$4 sm:$0xff]   ;;  %v4367_v23 = vld [vmem:[%s4617_s11 + $0x764] ss:$24 sps:$4 sm:$0xff]  }
  0xed   : > { %2502 = vmatprep.subr.bf16.mxu1 %v4280_v24  ;;  %2489 = vmatprep.mubr.bf16.mxu0 %v4413_v28  ;;  %v4365_v24 = vld [vmem:[%s4617_s11 + $0x760] ss:$24 sps:$4 sm:$0xff]   ;;  %v4373_v28 = vld [vmem:[%s4617_s11 + $0x704] ss:$24 sps:$4 sm:$0xff]  }
  0xee   : > { %2532 = vmatprep.mubr.bf16.mxu1 %v4414_v29  ;;  %v4371_v29 = vld [vmem:[%s4617_s11 + $0x700] ss:$24 sps:$4 sm:$0xff]  }
  0xef   : > { %2460 = vmatpush1.bf16.msra.mxu0 %v4275_v25  ;;  %v4370_v25 = vld [vmem:[%s4617_s11 + $0x734] ss:$24 sps:$4 sm:$0xff]  }
  0xf0   : > { %2503 = vmatpush1.bf16.msra.mxu1 %v4278_v26  ;;  %2461 = vmatprep.subr.bf16.mxu0 %v4283_v11  ;;  %v4415_v26 = vld [vmem:[%s4619_s12] ss:$24 sps:$4 sm:$0xff]  }
  0xf1   : > { %2504 = vmatprep.subr.bf16.mxu1 %v4286_v27  ;;  %v4416_v11 = vld [vmem:[%s4619_s12 + $0x8] ss:$24 sps:$4 sm:$0xff]  }
  0xf2   : > { %v4368_v27 = vld [vmem:[%s4617_s11 + $0x730] ss:$24 sps:$4 sm:$0xff]  }
  0xf3   : > { %2462 = vmatpush1.bf16.msra.mxu0 %v4281_v12  ;;  %v4376_v12 = vld [vmem:[%s4617_s11 + $0x6d4] ss:$24 sps:$4 sm:$0xff]  }
  0xf4   : > { %2505 = vmatpush1.bf16.msra.mxu1 %v4284_v30  ;;  %2463 = vmatprep.subr.bf16.mxu0 %v4289_v57  ;;  %v4374_v30 = vld [vmem:[%s4617_s11 + $0x6d0] ss:$24 sps:$4 sm:$0xff]   ;;  %v4379_v57 = vld [vmem:[%s4617_s11 + $0x6a4] ss:$24 sps:$4 sm:$0xff]  }
  0xf5   : > { %2506 = vmatprep.subr.bf16.mxu1 %v4292_v31  ;;  %v4377_v31 = vld [vmem:[%s4617_s11 + $0x6a0] ss:$24 sps:$4 sm:$0xff]  }
  0xf7   : > { %2464 = vmatpush1.bf16.msra.mxu0 %v4287_v32  ;;  %v4380_v32 = vld [vmem:[%s4617_s11 + $0x670] ss:$24 sps:$4 sm:$0xff]  }
  0xf8   : > { %2507 = vmatpush1.bf16.msra.mxu1 %v4290_v33  ;;  %2465 = vmatprep.subr.bf16.mxu0 %v4295_v34  ;;  %v4385_v33 = vld [vmem:[%s4617_s11 + $0x644] ss:$24 sps:$4 sm:$0xff]   ;;  %v4383_v34 = vld [vmem:[%s4617_s11 + $0x640] ss:$24 sps:$4 sm:$0xff]  }
  0xf9   : > { %2508 = vmatprep.subr.bf16.mxu1 %v4298_v35  ;;  %v4388_v35 = vld [vmem:[%s4617_s11 + $0x614] ss:$24 sps:$4 sm:$0xff]  }
  0xfb   : > { %2466 = vmatpush1.bf16.msra.mxu0 %v4293_v36  ;;  %v4386_v36 = vld [vmem:[%s4617_s11 + $0x610] ss:$24 sps:$4 sm:$0xff]  }
  0xfc   : > { %2509 = vmatpush1.bf16.msra.mxu1 %v4296_v37  ;;  %2467 = vmatprep.subr.bf16.mxu0 %v4301_v38  ;;  %v4391_v37 = vld [vmem:[%s4617_s11 + $0x8e4] ss:$24 sps:$4 sm:$0xff]   ;;  %v4389_v38 = vld [vmem:[%s4617_s11 + $0x8e0] ss:$24 sps:$4 sm:$0xff]  }
  0xfd   : > { %2510 = vmatprep.subr.bf16.mxu1 %v4304_v39  ;;  %v4394_v39 = vld [vmem:[%s4617_s11 + $0x8b4] ss:$24 sps:$4 sm:$0xff]  }
  0xff   : > { %2468 = vmatpush1.bf16.msra.mxu0 %v4299_v40  ;;  %v4392_v40 = vld [vmem:[%s4617_s11 + $0x8b0] ss:$24 sps:$4 sm:$0xff]  }
 0x100   : > { %2511 = vmatpush1.bf16.msra.mxu1 %v4302_v42  ;;  %2469 = vmatprep.subr.bf16.mxu0 %v4307_v43  ;;  %v4397_v42 = vld [vmem:[%s4617_s11 + $0x884] ss:$24 sps:$4 sm:$0xff]   ;;  %v4395_v43 = vld [vmem:[%s4617_s11 + $0x880] ss:$24 sps:$4 sm:$0xff]  }
 0x101   : > { %2512 = vmatprep.subr.bf16.mxu1 %v4310_v44  ;;  %v4400_v44 = vld [vmem:[%s4617_s11 + $0x854] ss:$24 sps:$4 sm:$0xff]  }
 0x103   : > { %2470 = vmatpush1.bf16.msra.mxu0 %v4305_v45  ;;  %v4398_v45 = vld [vmem:[%s4617_s11 + $0x850] ss:$24 sps:$4 sm:$0xff]  }
 0x104   : > { %2513 = vmatpush1.bf16.msra.mxu1 %v4308_v46  ;;  %2471 = vmatprep.subr.bf16.mxu0 %v4313_v47  ;;  %v4403_v46 = vld [vmem:[%s4617_s11 + $0x824] ss:$24 sps:$4 sm:$0xff]   ;;  %v4401_v47 = vld [vmem:[%s4617_s11 + $0x820] ss:$24 sps:$4 sm:$0xff]  }
 0x105   : > { %2514 = vmatprep.subr.bf16.mxu1 %v4316_v48  ;;  %v4406_v48 = vld [vmem:[%s4617_s11 + $0x7f4] ss:$24 sps:$4 sm:$0xff]  }
 0x107   : > { %2472 = vmatpush1.bf16.msra.mxu0 %v4311_v49  ;;  %v4404_v49 = vld [vmem:[%s4617_s11 + $0x7f0] ss:$24 sps:$4 sm:$0xff]  }
 0x108   : > { %2515 = vmatpush1.bf16.msra.mxu1 %v4314_v50  ;;  %2473 = vmatprep.subr.bf16.mxu0 %v4319_v51  ;;  %v4409_v51 = vld [vmem:[%s4617_s11 + $0x7c4] ss:$24 sps:$4 sm:$0xff]  }
 0x109   : > { %2516 = vmatprep.subr.bf16.mxu1 %v4322_v52  ;;  %v4407_v52 = vld [vmem:[%s4617_s11 + $0x7c0] ss:$24 sps:$4 sm:$0xff]  }
 0x10b   : > { %2474 = vmatpush2.bf16.msra.mxu0 %v4317_v53 }
 0x10c   : > { %2517 = vmatpush2.bf16.msra.mxu1 %v4320_v54  ;;  %2475 = vmatprep.subr.bf16.mxu0 %v4325_v55  ;;  %v4412_v55 = vld [vmem:[%s4617_s11 + $0x794] ss:$24 sps:$4 sm:$0xff]  }
 0x10d   : > { %2518 = vmatprep.subr.bf16.mxu1 %v4328_v56  ;;  %v4410_v56 = vld [vmem:[%s4617_s11 + $0x790] ss:$24 sps:$4 sm:$0xff]  }
 0x10f   : > { %2476 = vmatpush2.bf16.msra.mxu0 %v4323_v58 }
 0x110   : > { %2519 = vmatpush2.bf16.msra.mxu1 %v4326_v59  ;;  %2477 = vmatprep.subr.bf16.mxu0 %v4331_v60 }
 0x111   : > { %2520 = vmatprep.subr.bf16.mxu1 %v4334_v61 }
 0x113   : > { %2478 = vmatpush2.bf16.msra.mxu0 %v4329_v62 }
 0x114   : > { %2521 = vmatpush2.bf16.msra.mxu1 %v4332_v63  ;;  %2479 = vmatprep.subr.bf16.mxu0 %v4337_v0  ;;  %v423_v63 = vld [vmem:[#allocation2 + $0x30] sm:$0xff] }
 0x115   : > { %2522 = vmatprep.subr.bf16.mxu1 %v4340_v1 }
 0x117   : > { %2480 = vmatpush2.bf16.msra.mxu0 %v4335_v2 }
 0x118   : > { %2523 = vmatpush2.bf16.msra.mxu1 %v4338_v3  ;;  %2481 = vmatprep.subr.bf16.mxu0 %v4343_v4  ;;  %v424_v4 = vld [vmem:[#allocation2] sm:$0xff] }
 0x119   : > { %2524 = vmatprep.subr.bf16.mxu1 %v4346_v5 }
 0x11b   : > { %2482 = vmatpush2.bf16.msra.mxu0 %v4341_v6 }
 0x11c   : > { %2525 = vmatpush2.bf16.msra.mxu1 %v4344_v7  ;;  %2483 = vmatprep.subr.bf16.mxu0 %v4349_v8 }
 0x11d   : > { %2526 = vmatprep.subr.bf16.mxu1 %v4352_v9  ;;  %v429_v9 = vld [vmem:[#allocation2 + $0x8] sm:$0xff] }
 0x11f   : > { %2484 = vmatpush2.bf16.msra.mxu0 %v4347_v10 }
 0x120   : > { %2527 = vmatpush2.bf16.msra.mxu1 %v4350_v13  ;;  %2485 = vmatprep.subr.bf16.mxu0 %v4355_v14 }
 0x121   : > { %2528 = vmatprep.subr.bf16.mxu1 %v4358_v15 }
 0x123   : > { %2486 = vmatpush2.bf16.msra.mxu0 %v4353_v16  ;;  %v430_v16 = vld [vmem:[#allocation2 + $0x38] sm:$0xff] }
 0x124   : > { %2529 = vmatpush2.bf16.msra.mxu1 %v4356_v18  ;;  %2487 = vmatprep.subr.bf16.mxu0 %v4361_v19 }
 0x125   : > { %2530 = vmatprep.subr.bf16.mxu1 %v4364_v20 }
 0x127   : > { %2488 = vmatpush2.bf16.msra.mxu0 %v4359_v21 }
 0x128   : > { %2531 = vmatpush2.bf16.msra.mxu1 %v4362_v22  ;;  %2543 = vmatprep.subr.bf16.mxu0 %v4367_v23 }
 0x12a   : > { %2490 = vmatmul.mubr.bf16.vlgmr.msra.gmra.mxu0 %v4415_v26  ;;  %v2233_v50 = vpop.f32.mrf.mxu0 }
 0x12b   : > { %2533 = vmatmul.mubr.bf16.vlgmr.msra.gmra.mxu1 %v4416_v11  ;;  %2544 = vmatpush1.bf16.msra.mxu0 %v4365_v24  ;;  %v2276_v53 = vpop.f32.mrf.mxu1 }
 0x12c   : > { %2575 = vmatprep.mubr.bf16.mxu0 %v4730_v41  ;;  %2545 = vmatprep.subr.bf16.mxu0 %v4370_v25  ;;  %v4382_v41 = vld [vmem:[%s4617_s11 + $0x674] ss:$24 sps:$4 sm:$0xff]   ;;  %v2235_v54 = vpop.f32.mrf.mxu0  ;;  %v2277_v62 = vadd.f32 %v2276_v53, %v2233_v50 }
 0x12d   : > { %v2278_v58 = vpop.f32.mrf.mxu1 }
 0x12e   : > { %v2237_v59 = vpop.f32.mrf.mxu0  ;;  %v2279_v1 = vadd.f32 %v2278_v58, %v2235_v54  ;;  %v427_v54 = vld [vmem:[#allocation2 + $0x50] sm:$0xff] }
 0x12f   : > { %2546 = vmatpush1.bf16.msra.mxu0 %v4368_v27  ;;  %v2280_v60 = vpop.f32.mrf.mxu1 }
 0x130   : > { %2547 = vmatprep.subr.bf16.mxu0 %v4373_v28  ;;  %v2239_v61 = vpop.f32.mrf.mxu0  ;;  %v2281_v6 = vadd.f32 %v2280_v60, %v2237_v59  ;;  %v425_v28 = vld [vmem:[#allocation2 + $0x58] sm:$0xff]  ;;  %v428_v60 = vld [vmem:[#allocation2 + $0x20] sm:$0xff] }
 0x131   : > { %v2282_v3 = vpop.f32.mrf.mxu1 }
 0x132   : > { %v2283_v13 = vadd.f32 %v2282_v3, %v2239_v61 }
 0x133   : > { %2548 = vmatpush1.bf16.msra.mxu0 %v4371_v29 }
 0x134   : > { %2549 = vmatprep.subr.bf16.mxu0 %v4376_v12 }
 0x137   : > { %2550 = vmatpush1.bf16.msra.mxu0 %v4374_v30 }
 0x138   : > { %2551 = vmatprep.subr.bf16.mxu0 %v4379_v57 }
 0x13b   : > { %2552 = vmatpush1.bf16.msra.mxu0 %v4377_v31  ;;  %v426_v31 = vld [vmem:[#allocation2 + $0x18] sm:$0xff] }
 0x13c   : > { %2553 = vmatprep.subr.bf16.mxu0 %v4382_v41 }
 0x13f   : > { %2554 = vmatpush1.bf16.msra.mxu0 %v4380_v32 }
 0x140   : > { %2555 = vmatprep.subr.bf16.mxu0 %v4385_v33 }
 0x143   : > { %2556 = vmatpush1.bf16.msra.mxu0 %v4383_v34 }
 0x144   : > { %2557 = vmatprep.subr.bf16.mxu0 %v4388_v35 }
 0x147   : > { %2558 = vmatpush1.bf16.msra.mxu0 %v4386_v36  ;;  %v431_v36 = vld [vmem:[#allocation2 + $0x28] sm:$0xff] }
 0x148   : > { %2559 = vmatprep.subr.bf16.mxu0 %v4391_v37 }
 0x14b   : > { %2560 = vmatpush2.bf16.msra.mxu0 %v4389_v38 }
 0x14c   : > { %2561 = vmatprep.subr.bf16.mxu0 %v4394_v39 }
 0x14f   : > { %2562 = vmatpush2.bf16.msra.mxu0 %v4392_v40 }
 0x150   : > { %2563 = vmatprep.subr.bf16.mxu0 %v4397_v42  ;;  %v432_v42 = vld [vmem:[#allocation2 + $0x48] sm:$0xff] }
 0x153   : > { %2564 = vmatpush2.bf16.msra.mxu0 %v4395_v43 }
 0x154   : > { %2565 = vmatprep.subr.bf16.mxu0 %v4400_v44 }
 0x157   : > { %2566 = vmatpush2.bf16.msra.mxu0 %v4398_v45 }
 0x158   : > { %2567 = vmatprep.subr.bf16.mxu0 %v4403_v46 }
 0x15b   : > { %2568 = vmatpush2.bf16.msra.mxu0 %v4401_v47 }
 0x15c   : > { %2569 = vmatprep.subr.bf16.mxu0 %v4406_v48 }
 0x15f   : > { %2570 = vmatpush2.bf16.msra.mxu0 %v4404_v49 }
 0x160   : > { %2571 = vmatprep.subr.bf16.mxu0 %v4409_v51 }
 0x163   : > { %2572 = vmatpush2.bf16.msra.mxu0 %v4407_v52 }
 0x164   : > { %2573 = vmatprep.subr.bf16.mxu0 %v4412_v55 }
 0x167   : > { %2574 = vmatpush2.bf16.msra.mxu0 %v4410_v56 }
 0x16a   : > { %v2319_v0 = vpop.f32.mrf.mxu0  ;;  %2576 = vmatmul.mubr.bf16.vlgmr.msra.gmra.mxu0 %v4770_v17 }
 0x16b   : > { %v2320_v2 = vadd.f32 %v2319_v0, %v2277_v62  ;;  %v2362_v21 = vpop.f32.mrf.mxu1 }
 0x16c   : > { %v2321_v5 = vpop.f32.mrf.mxu0 }
 0x16d   : > { %v2586_v7 = vadd.f32 %v2320_v2, %v423_v63  ;;  %v2322_v8 = vadd.f32 %v2321_v5, %v2279_v1  ;;  %v2364_v22 = vpop.f32.mrf.mxu1  ;;  %v433_v1 = vld [vmem:[#allocation2 + $0x10] sm:$0xff] }
 0x16e   : > { %v2323_v10 = vpop.f32.mrf.mxu0 }
 0x16f   : > { %2598 = vst [vmem:[#allocation2 + $0x30] sm:$0xff] %v2586_v7  ;;  %v2587_v14 = vadd.f32 %v2322_v8, %v424_v4  ;;  %v2324_v15 = vadd.f32 %v2323_v10, %v2281_v6  ;;  %v2366_v23 = vpop.f32.mrf.mxu1  ;;  %v434_v6 = vld [vmem:[#allocation2 + $0x40] sm:$0xff] }
 0x170   : > { %v2325_v18 = vpop.f32.mrf.mxu0 }
 0x171   : > { %2599 = vst [vmem:[#allocation2] sm:$0xff] %v2587_v14  ;;  %v2592_v19 = vadd.f32 %v2324_v15, %v429_v9  ;;  %v2326_v20 = vadd.f32 %v2325_v18, %v2283_v13  ;;  %v2368_v24 = vpop.f32.mrf.mxu1 }
 0x173   : > { %2604 = vst [vmem:[#allocation2 + $0x8] sm:$0xff] %v2592_v19  ;;  %v2593_v17 = vadd.f32 %v2326_v20, %v430_v16 }
 0x175   : > { %2605 = vst [vmem:[#allocation2 + $0x38] sm:$0xff] %v2593_v17 }
 0x1aa   : > { %v2405_v25 = vpop.f32.mrf.mxu0 }
 0x1ab   : > { %v2448_v26 = vpop.f32.mrf.mxu1  ;;  %v2406_v11 = vadd.f32 %v2405_v25, %v2362_v21 }
 0x1ac   : > { %v2407_v27 = vpop.f32.mrf.mxu0 }
 0x1ad   : > { %v2450_v29 = vpop.f32.mrf.mxu1  ;;  %v2408_v12 = vadd.f32 %v2407_v27, %v2364_v22  ;;  %v2449_v30 = vadd.f32 %v2448_v26, %v2406_v11 }
 0x1ae   : > { %v2409_v57 = vpop.f32.mrf.mxu0 }
 0x1af   : > { %v2452_v41 = vpop.f32.mrf.mxu1  ;;  %v2588_v32 = vadd.f32 %v2449_v30, %v425_v28  ;;  %v2410_v33 = vadd.f32 %v2409_v57, %v2366_v23  ;;  %v2451_v34 = vadd.f32 %v2450_v29, %v2408_v12 }
 0x1b0   : > { %v2411_v35 = vpop.f32.mrf.mxu0 }
 0x1b1   : > { %v2454_v37 = vpop.f32.mrf.mxu1  ;;  %2600 = vst [vmem:[#allocation2 + $0x58] sm:$0xff] %v2588_v32  ;;  %v2589_v38 = vadd.f32 %v2451_v34, %v426_v31  ;;  %v2412_v39 = vadd.f32 %v2411_v35, %v2368_v24  ;;  %v2453_v40 = vadd.f32 %v2452_v41, %v2410_v33 }
 0x1b3   : > { %2601 = vst [vmem:[#allocation2 + $0x18] sm:$0xff] %v2589_v38  ;;  %v2594_v43 = vadd.f32 %v2453_v40, %v431_v36  ;;  %v2455_v44 = vadd.f32 %v2454_v37, %v2412_v39 }
 0x1b5   : > { %2606 = vst [vmem:[#allocation2 + $0x28] sm:$0xff] %v2594_v43  ;;  %v2595_v45 = vadd.f32 %v2455_v44, %v432_v42 }
 0x1b7   : > { %2607 = vst [vmem:[#allocation2 + $0x48] sm:$0xff] %v2595_v45 }
 0x1ea   : > { %v2491_v46 = vpop.f32.mrf.mxu0 }
 0x1eb   : > { %v2534_v47 = vpop.f32.mrf.mxu1 }
 0x1ec   : > { %v2493_v48 = vpop.f32.mrf.mxu0  ;;  %v2535_v53 = vadd.f32 %v2534_v47, %v2491_v46 }
 0x1ed   : > { %v2536_v49 = vpop.f32.mrf.mxu1 }
 0x1ee   : > { %v2495_v50 = vpop.f32.mrf.mxu0  ;;  %v2537_v56 = vadd.f32 %v2536_v49, %v2493_v48 }
 0x1ef   : > { %v2538_v51 = vpop.f32.mrf.mxu1 }
 0x1f0   : > { %v2497_v52 = vpop.f32.mrf.mxu0  ;;  %v2539_v62 = vadd.f32 %v2538_v51, %v2495_v50 }
 0x1f1   : > { %v2540_v59 = vpop.f32.mrf.mxu1 }
 0x1f2   : > { %v2541_v3 = vadd.f32 %v2540_v59, %v2497_v52 }
 0x22a   : > { %v2577_v55 = vpop.f32.mrf.mxu0 }
 0x22b   : > { %v2578_v58 = vadd.f32 %v2577_v55, %v2535_v53 }
 0x22c   : > { %v2579_v61 = vpop.f32.mrf.mxu0 }
 0x22d   : > { %v2590_v63 = vadd.f32 %v2578_v58, %v427_v54  ;;  %v2580_v0 = vadd.f32 %v2579_v61, %v2537_v56 }
 0x22e   : > { %v2581_v2 = vpop.f32.mrf.mxu0 }
 0x22f   : > { %2602 = vst [vmem:[#allocation2 + $0x50] sm:$0xff] %v2590_v63  ;;  %v2591_v4 = vadd.f32 %v2580_v0, %v428_v60  ;;  %v2582_v5 = vadd.f32 %v2581_v2, %v2539_v62 }
 0x230   : > { %v2583_v7 = vpop.f32.mrf.mxu0 }
 0x231   : > { %2603 = vst [vmem:[#allocation2 + $0x20] sm:$0xff] %v2591_v4  ;;  %v2596_v8 = vadd.f32 %v2582_v5, %v433_v1  ;;  %v2584_v9 = vadd.f32 %v2583_v7, %v2541_v3  ;;  %2613 = sbr.rel (%p3805_p11) target bundleno = 1180 (0x49c), region = 83 }
 0x233   : > { %2608 = vst [vmem:[#allocation2 + $0x10] sm:$0xff] %v2596_v8  ;;  %v2597_v10 = vadd.f32 %v2584_v9, %v434_v6 }
 0x235   : > { %2609 = vst [vmem:[#allocation2 + $0x40] sm:$0xff] %v2597_v10 }
 0x236   : > { %v2636_v13 = vlaneseq  ;;  %v2627_v14 = vld [vmem:[%s5257_s3] sm:$0xff]  ;;  %v2628_v15 = vld [vmem:[%s5257_s3 + $0x8] sm:$0xff]  ;;  %v2614_v18 = vld [vmem:[#allocation2 + $0x30] sm:$0xff] }
 0x237   : > { %v2615_v19 = vld [vmem:[#allocation2] sm:$0xff]  ;;  %v2616_v20 = vld [vmem:[#allocation2 + $0x58] sm:$0xff]  ;;  %v2678_v21 = vunpack.c.l.bf16 %v2627_v14  ;;  %v2629_v23 = vld [vmem:[%s5257_s3 + $0x10] sm:$0xff]  ;;  %v2679_v12 = vunpack.c.h.bf16 %v2627_v14  ;;  %v2680_v30 = vunpack.c.l.bf16 %v2628_v15  ;;  %v2681_v40 = vunpack.c.h.bf16 %v2628_v15 }
 0x238   : > { %v2637_v16 = vshrl.u32 %v2636_v13, 7  ;;  %v2626_v17 = vld [vmem:[%s5256_s2] sm:$0x3f]  ;;  %v2617_v22 = vld [vmem:[#allocation2 + $0x18] sm:$0xff]  ;;  %v2618_v27 = vld [vmem:[#allocation2 + $0x50] sm:$0xff]  ;;  %v2682_v42 = vunpack.c.l.bf16 %v2629_v23  ;;  %v2683_v62 = vunpack.c.h.bf16 %v2629_v23 }
 0x239   : > { %v2620_v57 = vld [vmem:[#allocation2 + $0x8] sm:$0xff]  ;;  %v2621_v31 = vld [vmem:[#allocation2 + $0x38] sm:$0xff]  ;;  %v2619_v41 = vld [vmem:[#allocation2 + $0x20] sm:$0xff] }
 0x23a   : > { %v4956_v24 = vsub.s32 0, %v2637_v16  ;;  %v4958_v25 = vsub.s32 1, %v2637_v16  ;;  %v4960_v26 = vsub.s32 2, %v2637_v16  ;;  %v4962_v11 = vsub.s32 3, %v2637_v16  ;;  %v2622_v36 = vld [vmem:[#allocation2 + $0x28] sm:$0xff]  ;;  %v2630_v37 = vld [vmem:[%s5257_s3 + $0x18] sm:$0xff] }
 0x23b   : > { %v4964_v28 = vsub.s32 4, %v2637_v16  ;;  %v4966_v29 = vsub.s32 5, %v2637_v16  ;;  %v2623_v43 = vld [vmem:[#allocation2 + $0x48] sm:$0xff]  ;;  %v2631_v44 = vld [vmem:[%s5257_s3 + $0x20] sm:$0xff]  ;;  %v2624_v49 = vld [vmem:[#allocation2 + $0x10] sm:$0xff]  ;;  %v2684_v53 = vunpack.c.l.bf16 %v2630_v37  ;;  %v2685_v54 = vunpack.c.h.bf16 %v2630_v37 }
 0x23c   : > { %v2639_v32 = vrot.slane %v2626_v17, %v4956_v24  ;;  %v2643_v33 = vrot.slane %v2626_v17, %v4958_v25  ;;  %v2647_v34 = vrot.slane %v2626_v17, %v4960_v26  ;;  %v2651_v35 = vrot.slane %v2626_v17, %v4962_v11  ;;  %v2632_v51 = vld [vmem:[%s5257_s3 + $0x28] sm:$0xff]  ;;  %v2625_v59 = vld [vmem:[#allocation2 + $0x40] sm:$0xff] }
 0x23d   : > { %v2655_v38 = vrot.slane %v2626_v17, %v4964_v28  ;;  %v2659_v39 = vrot.slane %v2626_v17, %v4966_v29  ;;  %v2686_v3 = vunpack.c.l.bf16 %v2631_v44  ;;  %v2687_v6 = vunpack.c.h.bf16 %v2631_v44 }
 0x23e   : > { %v2666_v45 = vadd.f32 %v2639_v32, %v2614_v18  ;;  %v2667_v46 = vadd.f32 %v2643_v33, %v2615_v19  ;;  %v2668_v47 = vadd.f32 %v2647_v34, %v2616_v20  ;;  %v2669_v48 = vadd.f32 %v2651_v35, %v2617_v22 }
 0x23f   : > { %v2670_v50 = vadd.f32 %v2655_v38, %v2618_v27  ;;  %v2672_v52 = vadd.f32 %v2639_v32, %v2620_v57  ;;  %v2673_v60 = vadd.f32 %v2643_v33, %v2621_v31  ;;  %v2671_v61 = vadd.f32 %v2659_v39, %v2619_v41  ;;  %v4417_v41 = vld [vmem:[%s5260_s6 + $0x78] sm:$0xff]  }
 0x240   : > { %v2690_v55 = vadd.f32 %v2678_v21, %v2666_v45  ;;  %v2691_v56 = vadd.f32 %v2679_v12, %v2667_v46  ;;  %v2692_v58 = vadd.f32 %v2680_v30, %v2668_v47  ;;  %v2674_v63 = vadd.f32 %v2647_v34, %v2622_v36  ;;  %v4418_v32 = vld [vmem:[%s5260_s6 + $0x38] sm:$0xff]   ;;  %3862 = vmatprep.subr.bf16.mxu0 %v4417_v41 }
 0x241   : > { %v2693_v0 = vadd.f32 %v2681_v40, %v2669_v48  ;;  %v2675_v2 = vadd.f32 %v2651_v35, %v2623_v43  ;;  %v2694_v4 = vadd.f32 %v2682_v42, %v2670_v50  ;;  %v2676_v5 = vadd.f32 %v2655_v38, %v2624_v49  ;;  %v4419_v33 = vld [vmem:[%s5260_s6 + $0xf8] sm:$0xff]   ;;  %3863 = vmatpush3.bf16.msra.mxu0 %v4418_v32  ;;  %v4437_v32 = vld [vmem:[%s5260_s6 + $0x50] sm:$0xff]  }
 0x242   : > { %v2702_v1 = vadd.f32 %v2691_v56, %v2690_v55  ;;  %v2696_v7 = vadd.f32 %v2684_v53, %v2672_v52  ;;  %v2688_v9 = vunpack.c.l.bf16 %v2632_v51  ;;  %v2697_v10 = vadd.f32 %v2685_v54, %v2673_v60  ;;  %3884 = vmatprep.subr.bf16.mxu1 %v4419_v33  ;;  %v4436_v41 = vld [vmem:[%s5260_s6 + $0x98] sm:$0xff]   ;;  %v4439_v33 = vld [vmem:[%s5260_s6 + $0xd0] sm:$0xff]  }
 0x243   : > { %v2698_v14 = vadd.f32 %v2686_v3, %v2674_v63  ;;  %v2695_v15 = vadd.f32 %v2683_v62, %v2671_v61  ;;  %v2677_v16 = vadd.f32 %v2659_v39, %v2625_v59  ;;  %v2689_v19 = vunpack.c.h.bf16 %v2632_v51 }
 0x244   : > { %v2703_v8 = vadd.f32 %v2702_v1, %v2692_v58  ;;  %v2699_v20 = vadd.f32 %v2687_v6, %v2675_v2  ;;  %v2709_v17 = vadd.f32 %v2697_v10, %v2696_v7  ;;  %v2700_v22 = vadd.f32 %v2688_v9, %v2676_v5 }
 0x245   : > { %v2701_v12 = vadd.f32 %v2689_v19, %v2677_v16  ;;  %v4423_v16 = vld [vmem:[%s5260_s6 + $0xf0] sm:$0xff]   ;;  %v4425_v19 = vld [vmem:[%s5260_s6 + $0x68] sm:$0xff]  }
 0x246   : > { %v2704_v18 = vadd.f32 %v2703_v8, %v2693_v0  ;;  %v2710_v23 = vadd.f32 %v2709_v17, %v2698_v14  ;;  %v4427_v17 = vld [vmem:[%s5260_s6 + $0xe8] sm:$0xff]  }
 0x248   : > { %v2705_v21 = vadd.f32 %v2704_v18, %v2694_v4  ;;  %v2711_v30 = vadd.f32 %v2710_v23, %v2699_v20  ;;  %v4424_v18 = vld [vmem:[%s5260_s6 + $0xb0] sm:$0xff]   ;;  %v4430_v23 = vld [vmem:[%s5260_s6 + $0x20] sm:$0xff]  }
 0x24a   : > { %v2706_v27 = vadd.f32 %v2705_v21, %v2695_v15  ;;  %v2712_v57 = vadd.f32 %v2711_v30, %v2700_v22  ;;  %v4428_v21 = vld [vmem:[%s5260_s6 + $0xa8] sm:$0xff]   ;;  %v4433_v30 = vld [vmem:[%s5260_s6 + $0x58] sm:$0xff]  }
 0x24c   : > { %2707 = vadd.xlane.f32.xlu0 %v2706_v27  ;;  %v2713_v31 = vadd.f32 %v2712_v57, %v2701_v12  ;;  %v4431_v27 = vld [vmem:[%s5260_s6 + $0xe0] sm:$0xff]   ;;  %v4435_v57 = vld [vmem:[%s5260_s6 + $0xd8] sm:$0xff]  }
 0x250   : > { %2714 = vadd.xlane.f32.xlu0 %v2713_v31  ;;  %v4434_v31 = vld [vmem:[%s5260_s6 + $0x18] sm:$0xff]  }
 0x2d5   : > { %v2708_v34 = vpop.xlane.xlu0 %2707 }
 0x2d6   : > { %v2717_v35 = vmul.f32 0.0013020834, %v2708_v34  ;;  %v4438_v34 = vld [vmem:[%s5260_s6 + $0x10] sm:$0xff]  }
 0x2d8   : > { %v4992_v36 = vsub.f32 %v2690_v55, %v2717_v35  ;;  %v4994_v37 = vsub.f32 %v2691_v56, %v2717_v35  ;;  %v4996_v38 = vsub.f32 %v2692_v58, %v2717_v35  ;;  %v4998_v40 = vsub.f32 %v2693_v0, %v2717_v35 }
 0x2d9   : > { %v2715_v39 = vpop.xlane.xlu0 %2714  ;;  %v5004_v45 = vsub.f32 %v2694_v4, %v2717_v35  ;;  %v5014_v51 = vsub.f32 %v2695_v15, %v2717_v35  ;;  %v4422_v15 = vld [vmem:[%s5260_s6 + $0x30] sm:$0xff]  }
 0x2da   : > { %v2718_v42 = vmul.f32 0.0013020834, %v2715_v39  ;;  %v2731_v43 = vmul.f32 %v4992_v36, %v4992_v36  ;;  %v2732_v44 = vmul.f32 %v4994_v37, %v4994_v37  ;;  %v2733_v46 = vmul.f32 %v4996_v38, %v4996_v38  ;;  %v4440_v35 = vld [vmem:[%s5260_s6 + $0x90] sm:$0xff]   ;;  %v4441_v39 = vld [vmem:[%s5260_s6 + $0x48] sm:$0xff]  }
 0x2db   : > { %v2734_v52 = vmul.f32 %v4998_v40, %v4998_v40  ;;  %v2735_v58 = vmul.f32 %v5004_v45, %v5004_v45  ;;  %v2736_v63 = vmul.f32 %v5014_v51, %v5014_v51 }
 0x2dc   : > { %v2743_v47 = vadd.f32 %v2732_v44, %v2731_v43  ;;  %v5008_v48 = vsub.f32 %v2696_v7, %v2718_v42  ;;  %v5010_v49 = vsub.f32 %v2697_v10, %v2718_v42  ;;  %v5012_v50 = vsub.f32 %v2698_v14, %v2718_v42  ;;  %v4420_v10 = vld [vmem:[%s5260_s6 + $0xb8] sm:$0xff]   ;;  %v4421_v14 = vld [vmem:[%s5260_s6 + $0x70] sm:$0xff]   ;;  %v4442_v43 = vld [vmem:[%s5260_s6 + $0x8] sm:$0xff]  }
 0x2dd   : > { %v5018_v54 = vsub.f32 %v2699_v20, %v2718_v42  ;;  %v5026_v60 = vsub.f32 %v2700_v22, %v2718_v42  ;;  %v5032_v1 = vsub.f32 %v2701_v12, %v2718_v42  ;;  %3885 = vmatpush3.bf16.msra.mxu1 %v4420_v10  ;;  %3864 = vmatprep.subr.bf16.mxu0 %v4421_v14  ;;  %v4426_v20 = vld [vmem:[%s5260_s6 + $0x28] sm:$0xff]   ;;  %v4429_v22 = vld [vmem:[%s5260_s6 + $0x60] sm:$0xff]  }
 0x2de   : > { %v2744_v53 = vadd.f32 %v2743_v47, %v2733_v46  ;;  %v2737_v55 = vmul.f32 %v5008_v48, %v5008_v48  ;;  %v2738_v56 = vmul.f32 %v5010_v49, %v5010_v49  ;;  %v2739_v61 = vmul.f32 %v5012_v50, %v5012_v50  ;;  %3865 = vmatpush3.bf16.msra.mxu0 %v4422_v15  ;;  %v4432_v12 = vld [vmem:[%s5260_s6 + $0xa0] sm:$0xff]   ;;  %v4443_v42 = vld [vmem:[%s5260_s6 + $0xc8] sm:$0xff]  }
 0x2df   : > { %v2740_v2 = vmul.f32 %v5018_v54, %v5018_v54  ;;  %v2741_v5 = vmul.f32 %v5026_v60, %v5026_v60  ;;  %v2742_v7 = vmul.f32 %v5032_v1, %v5032_v1  ;;  %3886 = vmatprep.subr.bf16.mxu1 %v4423_v16  ;;  %3866 = vmatprep.subr.bf16.mxu0 %v4425_v19  ;;  %v4444_v44 = vld [vmem:[%s5260_s6 + $0x88] sm:$0xff]   ;;  %v4445_v46 = vld [vmem:[%s5260_s6 + $0x40] sm:$0xff]  }
 0x2e0   : > { %v2745_v59 = vadd.f32 %v2744_v53, %v2734_v52  ;;  %v2750_v62 = vadd.f32 %v2738_v56, %v2737_v55  ;;  %v4447_v47 = vld [vmem:[%s5260_s6 + $0xc0] sm:$0xff]   ;;  %v4449_v55 = vld [vmem:[%s5260_s6 + $0x178] sm:$0xff]  }
 0x2e1   : > { %3887 = vmatpush3.bf16.msra.mxu1 %v4424_v18  ;;  %v4446_v52 = vld [vmem:[%s5260_s6] sm:$0xff]  }
 0x2e2   : > { %v2746_v0 = vadd.f32 %v2745_v59, %v2735_v58  ;;  %v2751_v3 = vadd.f32 %v2750_v62, %v2739_v61  ;;  %3867 = vmatpush3.bf16.msra.mxu0 %v4426_v20  ;;  %3888 = vmatprep.subr.bf16.mxu1 %v4427_v17  ;;  %v4448_v53 = vld [vmem:[%s5260_s6 + $0x80] sm:$0xff]  }
 0x2e3   : > { %3868 = vmatprep.subr.bf16.mxu0 %v4429_v22 }
 0x2e4   : > { %v2747_v4 = vadd.f32 %v2746_v0, %v2736_v63  ;;  %v2752_v6 = vadd.f32 %v2751_v3, %v2740_v2  ;;  %v5133_v0 = vld [vmem:[%s5258_s4] sm:$0x3f] }
 0x2e5   : > { %3889 = vmatpush3.bf16.msra.mxu1 %v4428_v21  ;;  %v5140_v3 = vld [vmem:[%s5259_s5] sm:$0x3f]  ;;  %v2787_v14 = vrot.slane %v5133_v0, %v4960_v26  ;;  %v2799_v15 = vrot.slane %v5133_v0, %v4966_v29 }
 0x2e6   : > { %2748 = vadd.xlane.f32.xlu1 %v2747_v4  ;;  %v2753_v8 = vadd.f32 %v2752_v6, %v2741_v5  ;;  %3890 = vmatprep.subr.bf16.mxu1 %v4431_v27  ;;  %v2783_v4 = vrot.slane %v5133_v0, %v4958_v25  ;;  %v2834_v18 = vrot.slane %v5140_v3, %v4962_v11 }
 0x2e7   : > { %3869 = vmatpush3.bf16.msra.mxu0 %v4430_v23  ;;  %v2830_v19 = vrot.slane %v5140_v3, %v4960_v26 }
 0x2e8   : > { %v2754_v9 = vadd.f32 %v2753_v8, %v2742_v7  ;;  %3870 = vmatprep.subr.bf16.mxu0 %v4433_v30  ;;  %v2791_v7 = vrot.slane %v5133_v0, %v4962_v11 }
 0x2e9   : > { %3891 = vmatpush3.bf16.msra.mxu1 %v4432_v12 }
 0x2ea   : > { %2755 = vadd.xlane.f32.xlu1 %v2754_v9  ;;  %3892 = vmatprep.subr.bf16.mxu1 %v4435_v57  ;;  %v2779_v9 = vrot.slane %v5133_v0, %v4956_v24 }
 0x2eb   : > { %3871 = vmatpush3.bf16.msra.mxu0 %v4434_v31 }
 0x2ec   : > { %3872 = vmatprep.subr.bf16.mxu0 %v4437_v32 }
 0x2ed   : > { %3893 = vmatpush3.bf16.msra.mxu1 %v4436_v41 }
 0x2ee   : > { %3894 = vmatprep.subr.bf16.mxu1 %v4439_v33 }
 0x2ef   : > { %3873 = vmatpush3.bf16.msra.mxu0 %v4438_v34 }
 0x2f0   : > { %3874 = vmatprep.subr.bf16.mxu0 %v4441_v39 }
 0x2f1   : > { %3895 = vmatpush3.bf16.msra.mxu1 %v4440_v35 }
 0x2f2   : > { %3896 = vmatprep.subr.bf16.mxu1 %v4443_v42 }
 0x2f3   : > { %3875 = vmatpush3.bf16.msra.mxu0 %v4442_v43 }
 0x2f4   : > { %3876 = vmatprep.subr.bf16.mxu0 %v4445_v46  ;;  %v4451_v46 = vld [vmem:[%s5260_s6 + $0x170] sm:$0xff]  }
 0x2f5   : > { %3897 = vmatpush3.bf16.msra.mxu1 %v4444_v44 }
 0x2f6   : > { %3898 = vmatprep.subr.bf16.mxu1 %v4447_v47 }
 0x2f7   : > { %3877 = vmatpush3.bf16.msra.mxu0 %v4446_v52  ;;  %v4452_v52 = vld [vmem:[%s5260_s6 + $0x130] sm:$0xff]  }
 0x2f8   : > { %3906 = vmatprep.subr.bf16.mxu0 %v4449_v55  ;;  %v4454_v55 = vld [vmem:[%s5260_s6 + $0x128] sm:$0xff]  }
 0x2f9   : > { %3899 = vmatpush3.bf16.msra.mxu1 %v4448_v53  ;;  %v4453_v53 = vld [vmem:[%s5260_s6 + $0x168] sm:$0xff]  }
 0x36f   : > { %v2749_v56 = vpop.xlane.xlu1 %2748 }
 0x370   : > { %v2757_v58 = vmul.f32 0.0013020834, %v2749_v56  ;;  %v4455_v56 = vld [vmem:[%s5260_s6 + $0x160] sm:$0xff]  }
 0x372   : > { %v2759_v59 = vadd.f32 1e-12, %v2757_v58  ;;  %v4456_v58 = vld [vmem:[%s5260_s6 + $0x120] sm:$0xff]  }
 0x373   : > { %v2756_v61 = vpop.xlane.xlu1 %2755 }
 0x374   : > { %4465 = vrsqrt.f32 %v2759_v59  ;;  %v2758_v62 = vmul.f32 0.0013020834, %v2756_v61  ;;  %v4457_v59 = vld [vmem:[%s5260_s6 + $0x158] sm:$0xff]  }
 0x375   : > { %v4458_v61 = vld [vmem:[%s5260_s6 + $0x118] sm:$0xff]  }
 0x376   : > { %v2760_v63 = vadd.f32 1e-12, %v2758_v62  ;;  %v4459_v62 = vld [vmem:[%s5260_s6 + $0x150] sm:$0xff]  }
 0x378   : > { %4467 = vrsqrt.f32 %v2760_v63  ;;  %v4460_v63 = vld [vmem:[%s5260_s6 + $0x110] sm:$0xff]  }
 0x381   : > { %v5135_v2 = vpop.eup %4465 }
 0x382   : > { %v2764_v5 = vmul.f32 %v5135_v2, %v4994_v37  ;;  %v2766_v6 = vmul.f32 %v5135_v2, %v4998_v40  ;;  %v2763_v8 = vmul.f32 %v5135_v2, %v4992_v36  ;;  %v2765_v10 = vmul.f32 %v5135_v2, %v4996_v38 }
 0x383   : > { %v2826_v37 = vrot.slane %v5140_v3, %v4958_v25  ;;  %v2768_v40 = vmul.f32 %v5135_v2, %v5014_v51  ;;  %v2822_v38 = vrot.slane %v5140_v3, %v4956_v24  ;;  %v2842_v51 = vrot.slane %v5140_v3, %v4966_v29 }
 0x384   : > { %v2807_v36 = vmul.f32 %v2783_v4, %v2764_v5  ;;  %v2809_v17 = vmul.f32 %v2791_v7, %v2766_v6  ;;  %v2806_v22 = vmul.f32 %v2779_v9, %v2763_v8  ;;  %v2808_v11 = vmul.f32 %v2787_v14, %v2765_v10  ;;  %v4462_v8 = vld [vmem:[%s5260_s6 + $0x108] sm:$0xff]  }
 0x385   : > { %v4468_v16 = vpop.eup %4467  ;;  %v2811_v30 = vmul.f32 %v2799_v15, %v2768_v40  ;;  %v2767_v6 = vmul.f32 %v5135_v2, %v5004_v45  ;;  %v4464_v45 = vld [vmem:[%s5260_s6 + $0x100] sm:$0xff]  }
 0x386   : > { %v2770_v20 = vmul.f32 %v4468_v16, %v5010_v49  ;;  %v2772_v25 = vmul.f32 %v4468_v16, %v5018_v54  ;;  %v2769_v21 = vmul.f32 %v4468_v16, %v5008_v48  ;;  %v2771_v23 = vmul.f32 %v4468_v16, %v5012_v50  ;;  %v4450_v50 = vld [vmem:[%s5260_s6 + $0x138] sm:$0xff]  }
 0x387   : > { %v2774_v24 = vmul.f32 %v4468_v16, %v5032_v1  ;;  %v2850_v26 = vadd.f32 %v2826_v37, %v2807_v36  ;;  %v2852_v54 = vadd.f32 %v2834_v18, %v2809_v17  ;;  %v2849_v33 = vadd.f32 %v2822_v38, %v2806_v22 }
 0x388   : > { %v2813_v27 = vmul.f32 %v2783_v4, %v2770_v20  ;;  %v2815_v12 = vmul.f32 %v2791_v7, %v2772_v25  ;;  %v2812_v57 = vmul.f32 %v2779_v9, %v2769_v21  ;;  %v2814_v49 = vmul.f32 %v2787_v14, %v2771_v23  ;;  %v4461_v4 = vld [vmem:[%s5260_s6 + $0x148] sm:$0xff]   ;;  %v4463_v9 = vld [vmem:[%s5260_s6 + $0x140] sm:$0xff]  }
 0x389   : > { %v2817_v32 = vmul.f32 %v2799_v15, %v2774_v24  ;;  %v2851_v34 = vadd.f32 %v2830_v19, %v2808_v11  ;;  %v2854_v42 = vadd.f32 %v2842_v51, %v2811_v30  ;;  %v2773_v5 = vmul.f32 %v4468_v16, %v5026_v60 }
 0x38a   : > { %v2856_v31 = vadd.f32 %v2826_v37, %v2813_v27  ;;  %v2858_v41 = vadd.f32 %v2834_v18, %v2815_v12  ;;  %v2855_v29 = vadd.f32 %v2822_v38, %v2812_v57  ;;  %v2857_v48 = vadd.f32 %v2830_v19, %v2814_v49 }
 0x38b   : > { %v2860_v1 = vadd.f32 %v2842_v51, %v2817_v32  ;;  %v2795_v7 = vrot.slane %v5133_v0, %v4964_v28  ;;  %v2838_v60 = vrot.slane %v5140_v3, %v4964_v28  ;;  %v3806_v28 = vld [vmem:[%s5261_s7] ss:$0 sm:$0xff] }
 0x38c   : > { %v2862_v35 = vpack.c.bf16 %v2856_v31, %v2850_v26  ;;  %v2864_v39 = vpack.c.bf16 %v2858_v41, %v2852_v54  ;;  %v2861_v43 = vpack.c.bf16 %v2855_v29, %v2849_v33  ;;  %v2863_v44 = vpack.c.bf16 %v2857_v48, %v2851_v34 }
 0x38d   : > { %v2866_v47 = vpack.c.bf16 %v2860_v1, %v2854_v42  ;;  %v2816_v10 = vmul.f32 %v2795_v7, %v2773_v5  ;;  %v2810_v14 = vmul.f32 %v2795_v7, %v2767_v6  ;;  %v3382_v48 = vand.u32 127, %v2636_v13 }
 0x38e   : > { %3290 = vmatprep.mubr.bf16.mxu0 %v2862_v35  ;;  %3331 = vmatprep.mubr.bf16.mxu1 %v2864_v39 }
 0x38f   : > { %3291 = vmatmul.mubr.bf16.vlgmr.msra.gmra.mxu0 %v2861_v43  ;;  %3332 = vmatmul.mubr.bf16.vlgmr.msra.gmra.mxu1 %v2863_v44  ;;  %v2859_v0 = vadd.f32 %v2838_v60, %v2816_v10  ;;  %v2853_v2 = vadd.f32 %v2838_v60, %v2810_v14  ;;  %vm3396_vm0 = vcmp.eq.s32.totalorder %v3382_v48, 1  ;;  %vm3383_vm1 = vcmp.eq.s32.totalorder %v3382_v48, 0 }
 0x390   : > { %3907 = vmatpush3.bf16.msra.mxu0 %v4450_v50  ;;  %3372 = vmatprep.mubr.bf16.mxu0 %v2866_v47 }
 0x391   : > { %3908 = vmatprep.subr.bf16.mxu0 %v4451_v46  ;;  %v2865_v37 = vpack.c.bf16 %v2859_v0, %v2853_v2 }
 0x394   : > { %3909 = vmatpush3.bf16.msra.mxu0 %v4452_v52 }
 0x395   : > { %3910 = vmatprep.subr.bf16.mxu0 %v4453_v53 }
 0x398   : > { %3911 = vmatpush3.bf16.msra.mxu0 %v4454_v55 }
 0x399   : > { %3912 = vmatprep.subr.bf16.mxu0 %v4455_v56 }
 0x39c   : > { %3913 = vmatpush3.bf16.msra.mxu0 %v4456_v58 }
 0x39d   : > { %3914 = vmatprep.subr.bf16.mxu0 %v4457_v59 }
 0x3a0   : > { %3915 = vmatpush3.bf16.msra.mxu0 %v4458_v61 }
 0x3a1   : > { %3916 = vmatprep.subr.bf16.mxu0 %v4459_v62 }
 0x3a4   : > { %3917 = vmatpush3.bf16.msra.mxu0 %v4460_v63 }
 0x3a5   : > { %3918 = vmatprep.subr.bf16.mxu0 %v4461_v4 }
 0x3a8   : > { %3919 = vmatpush3.bf16.msra.mxu0 %v4462_v8 }
 0x3a9   : > { %3920 = vmatprep.subr.bf16.mxu0 %v4463_v9 }
 0x3ac   : > { %3921 = vmatpush3.bf16.msra.mxu0 %v4464_v45 }
 0x3af   : > { %3373 = vmatmul.mubr.bf16.vlgmr.msra.gmra.mxu0 %v2865_v37 }
 0x44f   : > { %v3878_v40 = vpop.f32.mrf.mxu0  ;;  %v3900_v16 = vpop.f32.mrf.mxu1 }
 0x451   : > { %v3879_v15 = vpop.f32.mrf.mxu0  ;;  %v3901_v18 = vpop.f32.mrf.mxu1 }
 0x452   : > { %v3880_v38 = vadd.f32 %v3879_v15, %v3878_v40  ;;  %v3902_v51 = vadd.f32 %v3901_v18, %v3900_v16 }
 0x453   : > { %v3881_v36 = vpop.f32.mrf.mxu0  ;;  %v3903_v19 = vpop.f32.mrf.mxu1 }
 0x454   : > { %v3293_v20 = vadd.f32 %v3880_v38, %v3806_v28 }
 0x455   : > { %v3882_v3 = vpop.f32.mrf.mxu0  ;;  %v3904_v21 = vpop.f32.mrf.mxu1 }
 0x456   : > { %v3883_v25 = vadd.f32 %v3882_v3, %v3881_v36  ;;  %v3334_v23 = vadd.f32 %v3902_v51, %v3293_v20  ;;  %v3905_v24 = vadd.f32 %v3904_v21, %v3903_v19 }
 0x458   : > { %v3296_v11 = vadd.f32 %v3883_v25, %v3806_v28 }
 0x45a   : > { %v3337_v57 = vadd.f32 %v3905_v24, %v3296_v11 }
 0x46f   : > { %v3922_v17 = vpop.f32.mrf.mxu0 }
 0x471   : > { %v3923_v22 = vpop.f32.mrf.mxu0 }
 0x472   : > { %v3924_v27 = vadd.f32 %v3923_v22, %v3922_v17 }
 0x473   : > { %v3925_v12 = vpop.f32.mrf.mxu0 }
 0x474   : > { %v3375_v30 = vadd.f32 %v3924_v27, %v3334_v23 }
 0x475   : > { %v3926_v26 = vpop.f32.mrf.mxu0 }
 0x476   : > { %v3855_v49 = vmul.f32 -1.442695, %v3375_v30  ;;  %v3927_v31 = vadd.f32 %v3926_v26, %v3925_v12 }
 0x478   : > { %4469 = vpow2.f32 %v3855_v49  ;;  %v3378_v54 = vadd.f32 %v3927_v31, %v3337_v57 }
 0x47a   : > { %v3856_v41 = vmul.f32 -1.442695, %v3378_v54 }
 0x47c   : > { %4471 = vpow2.f32 %v3856_v41 }
 0x47d   : > { %4473 = vtanh.f32 %v3375_v30 }
 0x485   : > { %v4470_v32 = vpop.eup %4469 }
 0x486   : > { %v3390_v33 = vadd.f32 1.0, %v4470_v32 }
 0x488   : > { %4475 = vrcp.f32 %v3390_v33 }
 0x489   : > { %v4472_v29 = vpop.eup %4471  ;;  %4477 = vtanh.f32 %v3378_v54 }
 0x48a   : > { %v3391_v34 = vadd.f32 1.0, %v4472_v29  ;;  %v4474_v35 = vpop.eup %4473 }
 0x48b   : > { %v3399_v50 = vsel %vm3396_vm0, %v4474_v35, 0.0 }
 0x48c   : > { %4479 = vrcp.f32 %v3391_v34 }
 0x495   : > { %v4476_v39 = vpop.eup %4475 }
 0x496   : > { %v4478_v42 = vpop.eup %4477  ;;  %v3401_v1 = vsel %vm3383_vm1, %v4476_v39, %v3399_v50 }
 0x497   : > { %3403 = vst [vmem:[%s5262_s8] sm:$0xff] %v3401_v1  ;;  %v3400_v44 = vsel %vm3396_vm0, %v4478_v42, 0.0 }
 0x499   : > { %v4480_v43 = vpop.eup %4479 }
 0x49a   : > { %v3402_v46 = vsel %vm3383_vm1, %v4480_v43, %v3400_v44 }
 0x49b   : > { %3404 = vst [vmem:[%s5262_s8 + $0x8] sm:$0xff] %v3402_v46 }
 0x49c PF: > { %s18_s9 = sadd.s32 1, %s4519_s9   ;;  %s5263_s27 = smov %s4507_s28 }
 0x49d   : > { %p15_p12 = scmp.ge.s32.totalorder %s18_s9, 6   ;;  %s5264_s28 = smov %s4602_s13 }
 0x49e   : > { %s5265_s29 = smov %s4515_s30  ;;  %s5266_s30 = smov %s5268_s10 }
 0x49f   :  { %17 = sbr.rel (!%p15_p12) target bundleno = 3 (0x3), region = 124 }

</bundles_post_ra>
